<compile_context>
chip_gen: v6e
topology: v6e:2x2x1
jax: 0.10.0
libtpu: 0.0.40
codegen_flags: <defaults>
</compile_context>

<pallas_src>
import functools

import jax
import jax.numpy as jnp
from jax.experimental import pallas as pl
from jax.experimental.pallas import tpu as pltpu

# ----------------------------- hyper-parameters (small, synthetic) -----------------------------
NUM_CHARS = 20
EMBED_DIMS = 16
ENCODER_DIMS = 16                  # CBHG channels of the text encoder
DECODER_DIMS = 32                  # == 2 * ENCODER_DIMS (bi-GRU output of encoder CBHG)
N_MELS = 8
FFT_BINS = 16
POSTNET_DIMS = 16
ENCODER_K = 3
LSTM_DIMS = 32
POSTNET_K = 3
NUM_HIGHWAYS = 2
SPEAKER_LATENT = 8
SPEAKER_ENC_DIMS = 16
N_SPEAKERS = 4
NOISE_LATENT = 8
NOISE_ENC_DIMS = 16
R = 2                              # reduction factor (set_r)
MAX_R = 2
PRENET_FC1 = 32
PRENET_FC2 = ENCODER_DIMS          # encoder prenet out == CBHG in_channels (residual add)
DEC_PRENET_FC1 = 32
DEC_PRENET_FC2 = DECODER_DIMS // 2
LSA_KERNEL = 7
LSA_FILTERS = 8
CNN_KW = 3                         # conv kernel width of the speaker/noise CNN encoders


def _round_up(x, m):
    return (x + m - 1) // m * m


def _tile_rows(M, tm_max=256):
    tm = min(tm_max, _round_up(M, 8))
    return tm, _round_up(M, tm)


def _vmem():
    return pl.BlockSpec(memory_space=pltpu.MemorySpace.VMEM)


def _cspec(shape):
    """Full-array block whose index does not move with the grid (stays VMEM-resident)."""
    n = len(shape)
    return pl.BlockSpec(tuple(shape), lambda *_: (0,) * n)


# ----------------------------------- tiled fused matmul (+bias / activation) -----------------------------------
def _mm_kernel(has_bias, act, x_ref, w_ref, *rest):
    o_ref = rest[-1]
    y = jnp.dot(x_ref[...], w_ref[...], preferred_element_type=jnp.float32)
    if has_bias:
        y = y + rest[0][...]
    if act == "relu":
        y = jnp.maximum(y, 0.0)
    elif act == "sigmoid":
        y = jax.nn.sigmoid(y)
    elif act == "tanh":
        y = jnp.tanh(y)
    o_ref[...] = y


def fused_matmul(x, w, bias=None, act=None, compute_dtype=jnp.float32, tm_max=256):
    """x: (M, K) @ w: (K, N), grid-tiled over M (weights resident), optional bias/activation."""
    M, K = x.shape
    N = w.shape[1]
    tm, Mp = _tile_rows(M, tm_max)
    xp = x.astype(compute_dtype)
    if Mp != M:
        xp = jnp.pad(xp, ((0, Mp - M), (0, 0)))
    args = [xp, w.astype(compute_dtype)]
    in_specs = [pl.BlockSpec((tm, K), lambda i: (i, 0)), _cspec((K, N))]
    if bias is not None:
        args.append(bias.reshape(1, N).astype(jnp.float32))
        in_specs.append(_cspec((1, N)))
    y = pl.pallas_call(
        functools.partial(_mm_kernel, bias is not None, act),
        out_shape=jax.ShapeDtypeStruct((Mp, N), jnp.float32),
        grid=(Mp // tm,),
        in_specs=in_specs,
        out_specs=pl.BlockSpec((tm, N), lambda i: (i, 0)),
        compiler_params=pltpu.CompilerParams(dimension_semantics=("parallel",)),
    )(*args)
    return y[:M] if Mp != M else y


# ----------------------------------- tiled matmul + global BatchNorm (two-pass) -----------------------------------
def _mm_stats_kernel(M_real, tm, x_ref, w_ref, y_ref, stats_ref):
    i = pl.program_id(0)
    y = jnp.dot(x_ref[...], w_ref[...], preferred_element_type=jnp.float32)
    y_ref[...] = y
    rows = jax.lax.broadcasted_iota(jnp.int32, (tm, 1), 0) + i * tm
    valid = (rows < M_real).astype(jnp.float32)      # padded rows excluded from BN statistics
    ym = y * valid
    cur = jnp.concatenate([jnp.sum(ym, axis=0, keepdims=True),
                           jnp.sum(ym * y, axis=0, keepdims=True)], axis=0)

    @pl.when(i == 0)
    def _():
        stats_ref[...] = cur

    @pl.when(i > 0)
    def _():
        stats_ref[...] = stats_ref[...] + cur


def _bn_act_kernel(inv_m, act, y_ref, stats_ref, g_ref, b_ref, o_ref):
    mean = stats_ref[0:1, :] * inv_m
    var = stats_ref[1:2, :] * inv_m - mean * mean
    y = (y_ref[...] - mean) * jax.lax.rsqrt(var + 1e-5) * g_ref[...] + b_ref[...]
    if act == "relu":
        y = jnp.maximum(y, 0.0)
    o_ref[...] = y


def matmul_bn(x, w, gamma, beta, act=None, compute_dtype=jnp.bfloat16, tm_max=256):
    """Tiled matmul with training-mode BatchNorm (global stats over real rows) and activation."""
    M, K = x.shape
    N = w.shape[1]
    tm, Mp = _tile_rows(M, tm_max)
    xp = x.astype(compute_dtype)
    if Mp != M:
        xp = jnp.pad(xp, ((0, Mp - M), (0, 0)))
    y, stats = pl.pallas_call(
        functools.partial(_mm_stats_kernel, M, tm),
        out_shape=(jax.ShapeDtypeStruct((Mp, N), jnp.float32),
                   jax.ShapeDtypeStruct((2, N), jnp.float32)),
        grid=(Mp // tm,),
        in_specs=[pl.BlockSpec((tm, K), lambda i: (i, 0)), _cspec((K, N))],
        out_specs=(pl.BlockSpec((tm, N), lambda i: (i, 0)), _cspec((2, N))),
        compiler_params=pltpu.CompilerParams(dimension_semantics=("arbitrary",)),
    )(xp, w.astype(compute_dtype))
    out = pl.pallas_call(
        functools.partial(_bn_act_kernel, 1.0 / float(M), act),
        out_shape=jax.ShapeDtypeStruct((Mp, N), jnp.float32),
        grid=(Mp // tm,),
        in_specs=[pl.BlockSpec((tm, N), lambda i: (i, 0)), _cspec((2, N)),
                  _cspec((1, N)), _cspec((1, N))],
        out_specs=pl.BlockSpec((tm, N), lambda i: (i, 0)),
        compiler_params=pltpu.CompilerParams(dimension_semantics=("parallel",)),
    )(y, stats, gamma.reshape(1, N).astype(jnp.float32), beta.reshape(1, N).astype(jnp.float32))
    return out[:M] if Mp != M else out


# ----------------------------------- conv1d as one im2col matmul -----------------------------------
def _im2col(x, kw, dtype=jnp.bfloat16):
    """(B, T, Cin) -> (B*T, kw*Cin) with PyTorch 'same' padding (pad=kw//2, truncated to T)."""
    # TODO(synk): im2col still materializes the kw-inflated activation in HBM; an in-kernel
    #             halo-window tap build (per time tile) would cut HBM reads by ~kw x.
    B, T, Cin = x.shape
    pad_l = kw // 2
    pad_r = kw - 1 - pad_l
    xp = jnp.pad(x.astype(dtype), ((0, 0), (pad_l, pad_r), (0, 0)))
    cols = jnp.concatenate([xp[:, k:k + T, :] for k in range(kw)], axis=-1)
    return cols.reshape(B * T, kw * Cin)


def conv1d(x, w, bias=None, gamma=None, beta=None, act=None, compute_dtype=jnp.bfloat16):
    """'Same'-length conv over time.  x: (B,T,Cin), w: (Kw,Cin,Cout) -> (B,T,Cout)."""
    B, T, Cin = x.shape
    Kw, _, Cout = w.shape
    cols = _im2col(x, Kw, dtype=compute_dtype)
    w2d = w.reshape(Kw * Cin, Cout)
    if gamma is not None:
        y = matmul_bn(cols, w2d, gamma, beta, act=act, compute_dtype=compute_dtype)
    else:
        y = fused_matmul(cols, w2d, bias=bias, act=act, compute_dtype=compute_dtype)
    return y.reshape(B, T, Cout)


# ----------------------------------- fused highway stack (tiled over rows) -----------------------------------
def _highway_kernel(num_hwy, x_ref, w1_ref, b1_ref, w2_ref, b2_ref, o_ref):
    x = x_ref[...]
    for i in range(num_hwy):
        w1 = w1_ref[i]
        w2 = w2_ref[i]
        xc = x.astype(w1.dtype)
        h = jnp.maximum(jnp.dot(xc, w1, preferred_element_type=jnp.float32) + b1_ref[i], 0.0)
        g = jax.nn.sigmoid(jnp.dot(xc, w2, preferred_element_type=jnp.float32) + b2_ref[i])
        x = g * h + (1.0 - g) * x
    o_ref[...] = x


def highway_stack(x, w1, b1, w2, b2, tm_max=256):
    M, C = x.shape
    num_hwy = w1.shape[0]
    tm, Mp = _tile_rows(M, tm_max)
    xp = jnp.pad(x, ((0, Mp - M), (0, 0))) if Mp != M else x
    out = pl.pallas_call(
        functools.partial(_highway_kernel, num_hwy),
        out_shape=jax.ShapeDtypeStruct((Mp, C), jnp.float32),
        grid=(Mp // tm,),
        in_specs=[pl.BlockSpec((tm, C), lambda i: (i, 0)),
                  _cspec(w1.shape), _cspec(b1.shape),
                  _cspec(w2.shape), _cspec(b2.shape)],
        out_specs=pl.BlockSpec((tm, C), lambda i: (i, 0)),
        compiler_params=pltpu.CompilerParams(dimension_semantics=("parallel",)),
    )(xp, w1, b1, w2, b2)
    return out[:M] if Mp != M else out


# ----------------------------------- encoder prenet (2 fused linears, tiled) -----------------------------------
def _mlp2_kernel(x_ref, w1_ref, b1_ref, w2_ref, b2_ref, o_ref):
    w2 = w2_ref[...]
    h = jnp.maximum(jnp.dot(x_ref[...], w1_ref[...], preferred_element_type=jnp.float32)
                    + b1_ref[...], 0.0)
    o_ref[...] = jnp.maximum(jnp.dot(h.astype(w2.dtype), w2, preferred_element_type=jnp.float32)
                             + b2_ref[...], 0.0)


def mlp2_relu(x, w1, b1, w2, b2, compute_dtype=jnp.bfloat16, tm_max=256):
    M, _ = x.shape
    N = w2.shape[1]
    H1 = w1.shape[1]
    tm, Mp = _tile_rows(M, tm_max)
    xp = x.astype(compute_dtype)
    if Mp != M:
        xp = jnp.pad(xp, ((0, Mp - M), (0, 0)))
    out = pl.pallas_call(
        _mlp2_kernel,
        out_shape=jax.ShapeDtypeStruct((Mp, N), jnp.float32),
        grid=(Mp // tm,),
        in_specs=[pl.BlockSpec((tm, x.shape[1]), lambda i: (i, 0)),
                  _cspec(w1.shape), _cspec((1, H1)),
                  _cspec(w2.shape), _cspec((1, N))],
        out_specs=pl.BlockSpec((tm, N), lambda i: (i, 0)),
        compiler_params=pltpu.CompilerParams(dimension_semantics=("parallel",)),
    )(xp, w1.astype(compute_dtype), b1.reshape(1, -1).astype(jnp.float32),
      w2.astype(compute_dtype), b2.reshape(1, -1).astype(jnp.float32))
    return out[:M] if Mp != M else out


# ----------------------------------- bidirectional GRU (direction on a parallel grid axis) -----------------------------------
def _bigru_kernel(H, gi_ref, whh_ref, bhh_ref, y_ref, h_sc):
    @pl.when(pl.program_id(1) == 0)
    def _():
        h_sc[...] = jnp.zeros_like(h_sc)

    gi = gi_ref[0, 0]                  # (BP, 3H) f32
    whh = whh_ref[0]                   # (H, 3H) bf16
    bhh = bhh_ref[0]                   # (1, 3H) f32
    h = h_sc[...]
    gh = jnp.dot(h.astype(whh.dtype), whh, preferred_element_type=jnp.float32) + bhh
    r = jax.nn.sigmoid(gi[:, 0:H] + gh[:, 0:H])
    z = jax.nn.sigmoid(gi[:, H:2 * H] + gh[:, H:2 * H])
    n = jnp.tanh(gi[:, 2 * H:3 * H] + r * gh[:, 2 * H:3 * H])
    h = (1.0 - z) * n + z * h
    h_sc[...] = h
    y_ref[0, 0] = h


def bigru(x, q):
    """(B, T, C) -> (B, T, 2H).  Input projection is one big matmul (transpose done BEFORE it,
    on the narrow C-wide input); the recurrence runs on a (2, T) grid where the direction axis
    is 'parallel' (megacore split on v7x) and the hidden state lives in VMEM scratch."""
    B, T, C = x.shape
    H = q['whh'].shape[1]
    xT = jnp.swapaxes(x, 0, 1).reshape(T * B, C)
    gi = fused_matmul(xT, q['wih'], bias=q['bih'], compute_dtype=jnp.bfloat16)   # (T*B, 6H)
    gi = gi.reshape(T, B, 6 * H)
    BP = max(8, _round_up(B, 8))
    if BP != B:
        gi = jnp.pad(gi, ((0, 0), (0, BP - B), (0, 0)))
    gi = jnp.stack([gi[..., :3 * H], gi[..., 3 * H:]], axis=0)                   # (2, T, BP, 3H)

    def time_map(d, t):
        # forward direction reads/writes t, backward reads/writes T-1-t
        return (d, t + d * (T - 1 - 2 * t), 0, 0)

    y = pl.pallas_call(
        functools.partial(_bigru_kernel, H),
        out_shape=jax.ShapeDtypeStruct((2, T, BP, H), jnp.float32),
        grid=(2, T),
        in_specs=[pl.BlockSpec((1, 1, BP, 3 * H), time_map),
                  pl.BlockSpec((1, H, 3 * H), lambda d, t: (d, 0, 0)),
                  pl.BlockSpec((1, 1, 3 * H), lambda d, t: (d, 0, 0))],
        out_specs=pl.BlockSpec((1, 1, BP, H), time_map),
        scratch_shapes=[pltpu.VMEM((BP, H), jnp.float32)],
        compiler_params=pltpu.CompilerParams(dimension_semantics=("parallel", "arbitrary")),
    )(gi, q['whh'], q['bhh'])
    out = jnp.concatenate([y[0], y[1]], axis=-1)[:, :B, :]                        # (T, B, 2H)
    return jnp.swapaxes(out, 0, 1)


# ----------------------------------- CBHG -----------------------------------
def _pack_bank_weights(p, K, in_ch, channels):
    """Zero-pad each bank kernel to K taps and concat along Cout so the whole bank is one matmul."""
    pad = K // 2
    blocks = []
    for k in range(1, K + 1):
        wk = p[f'bank{k}_w']                                       # (k, in_ch, channels)
        full = jnp.zeros((K, in_ch, channels), jnp.float32)
        start = pad - k // 2
        full = full.at[start:start + k].set(wk)
        blocks.append(full)
    return jnp.concatenate(blocks, axis=-1)                        # (K, in_ch, K*channels)


def pack_cbhg(p, K, in_ch, channels, num_hwy):
    """One-time weight packing for a CBHG (run in prepare_params, not in the jitted forward)."""
    q = {}
    q['bank_w'] = _pack_bank_weights(p, K, in_ch, channels).astype(jnp.bfloat16)
    q['bank_gamma'] = jnp.concatenate([p[f'bank{k}_gamma'] for k in range(1, K + 1)])
    q['bank_beta'] = jnp.concatenate([p[f'bank{k}_beta'] for k in range(1, K + 1)])
    q['proj1_w'] = p['proj1_w'].astype(jnp.bfloat16)
    q['proj1_gamma'] = p['proj1_gamma']; q['proj1_beta'] = p['proj1_beta']
    q['proj2_w'] = p['proj2_w'].astype(jnp.bfloat16)
    q['proj2_gamma'] = p['proj2_gamma']; q['proj2_beta'] = p['proj2_beta']
    q['hwy_w1'] = jnp.stack([p[f'hwy{i}_w1'] for i in range(num_hwy)]).astype(jnp.bfloat16)
    q['hwy_b1'] = jnp.stack([p[f'hwy{i}_b1'].reshape(1, -1) for i in range(num_hwy)])
    q['hwy_w2'] = jnp.stack([p[f'hwy{i}_w2'] for i in range(num_hwy)]).astype(jnp.bfloat16)
    q['hwy_b2'] = jnp.stack([p[f'hwy{i}_b2'].reshape(1, -1) for i in range(num_hwy)])
    q['wih'] = jnp.concatenate([p['gru_fwd_wih'], p['gru_bwd_wih']], axis=1).astype(jnp.bfloat16)
    q['bih'] = jnp.concatenate([p['gru_fwd_bih'], p['gru_bwd_bih']]).reshape(1, -1)
    q['whh'] = jnp.stack([p['gru_fwd_whh'], p['gru_bwd_whh']]).astype(jnp.bfloat16)
    q['bhh'] = jnp.stack([p['gru_fwd_bhh'].reshape(1, -1), p['gru_bwd_bhh'].reshape(1, -1)])
    return q


def cbhg_forward(q, x, K):
    """CBHG: fused conv bank (+BN+ReLU) -> maxpool(2,1) -> 2 projections (+BN) -> residual
       -> fused highways -> bi-GRU.  x: (B, T, C_in) channels-last."""
    B, T, Cin = x.shape
    channels = q['hwy_w1'].shape[1]
    residual = x
    cb = conv1d(x, q['bank_w'], gamma=q['bank_gamma'], beta=q['bank_beta'], act='relu')
    # MaxPool1d(kernel=2, stride=1, padding=1) truncated to T -> max(x[t-1], x[t])  [glue]
    prev = jnp.concatenate(
        [jnp.full((B, 1, cb.shape[-1]), -1e30, jnp.float32), cb[:, :-1, :]], axis=1)
    xm = jnp.maximum(prev, cb)
    x1 = conv1d(xm, q['proj1_w'], gamma=q['proj1_gamma'], beta=q['proj1_beta'], act='relu')
    x2 = conv1d(x1, q['proj2_w'], gamma=q['proj2_gamma'], beta=q['proj2_beta'])
    x = x2 + residual
    xf = highway_stack(x.reshape(B * T, channels), q['hwy_w1'], q['hwy_b1'],
                       q['hwy_w2'], q['hwy_b2'])
    x = xf.reshape(B, T, channels)
    return bigru(x, q)


def encoder_fwd(prep, phone):
    B, T = phone.shape
    # TODO(synk): embedding gather stays in JAX (tiny gather; no clean Pallas path at this size).
    x = jnp.take(prep['embedding'], phone, axis=0)                    # (B, T, E)
    # TODO(synk): prenet dropout omitted for determinism.
    xf = mlp2_relu(x.reshape(B * T, EMBED_DIMS),
                   prep['enc_pre_fc1_w'], prep['enc_pre_fc1_b'],
                   prep['enc_pre_fc2_w'], prep['enc_pre_fc2_b'])
    return cbhg_forward(prep['enc_cbhg'], xf.reshape(B, T, PRENET_FC2), ENCODER_K)


# ----------------------------------- speaker + noise CNN encoders (fused) -----------------------------------
def pack_dual_cnn(spk, noi):
    # TODO(synk): CNNEncoder submodule source unavailable; conv->relu x2, masked mean-pool,
    #             then loc / log_scale heads.  Speaker and noise encoders are packed
    #             block-diagonally so both share the same kernels.
    C = SPEAKER_ENC_DIMS + NOISE_ENC_DIMS
    kw = CNN_KW
    q = {}
    q['conv1_w'] = jnp.concatenate([spk['conv1_w'], noi['conv1_w']], axis=2).astype(jnp.bfloat16)
    q['conv1_b'] = jnp.concatenate([spk['conv1_b'], noi['conv1_b']])
    w2 = jnp.zeros((kw, C, C), jnp.float32)
    w2 = w2.at[:, :SPEAKER_ENC_DIMS, :SPEAKER_ENC_DIMS].set(spk['conv2_w'])
    w2 = w2.at[:, SPEAKER_ENC_DIMS:, SPEAKER_ENC_DIMS:].set(noi['conv2_w'])
    q['conv2_w'] = w2.reshape(kw * C, C).astype(jnp.bfloat16)
    q['conv2_b'] = jnp.concatenate([spk['conv2_b'], noi['conv2_b']]).reshape(1, -1)
    sl, nl = SPEAKER_LATENT, NOISE_LATENT
    hw = jnp.zeros((C, 2 * sl + 2 * nl), jnp.float32)
    hw = hw.at[:SPEAKER_ENC_DIMS, :2 * sl].set(jnp.concatenate([spk['loc_w'], spk['ls_w']], axis=1))
    hw = hw.at[SPEAKER_ENC_DIMS:, 2 * sl:].set(jnp.concatenate([noi['loc_w'], noi['ls_w']], axis=1))
    q['head_w'] = hw
    q['head_b'] = jnp.concatenate([spk['loc_b'], spk['ls_b'], noi['loc_b'], noi['ls_b']]).reshape(1, -1)
    return q


def _cnn_tail_kernel(B, T, cols_ref, w2_ref, b2_ref, pool_ref, hw_ref, hb_ref, o_ref):
    h2 = jnp.maximum(jnp.dot(cols_ref[...], w2_ref[...], preferred_element_type=jnp.float32)
                     + b2_ref[...], 0.0)                           # (B*T, C)
    C = h2.shape[-1]
    # masked mean-pool over T on the VPU/XLU (no block-diagonal pool matrix)
    pooled = jnp.sum(h2.reshape(B, T, C) * pool_ref[...][:, :, None], axis=1)   # (B, C)
    o_ref[...] = jnp.dot(pooled, hw_ref[...], preferred_element_type=jnp.float32) + hb_ref[...]


def dual_cnn_encoder(q, mel_btc, frame_len):
    B, T, _ = mel_btc.shape
    h1 = conv1d(mel_btc, q['conv1_w'], bias=q['conv1_b'], act='relu')             # (B, T, C)
    BP = max(8, _round_up(B, 8))
    pb = BP - B
    h1p = jnp.pad(h1, ((0, pb), (0, 0), (0, 0)))
    cols2 = _im2col(h1p, CNN_KW, dtype=jnp.bfloat16)                              # (BP*T, kw*C)
    mask = (jnp.arange(T)[None, :] < frame_len[:, None]).astype(jnp.float32)
    inv_len = 1.0 / jnp.maximum(frame_len.astype(jnp.float32), 1.0)
    pool = jnp.pad(mask * inv_len[:, None], ((0, pb), (0, 0)))                    # (BP, T)
    out = pl.pallas_call(
        functools.partial(_cnn_tail_kernel, BP, T),
        out_shape=jax.ShapeDtypeStruct((BP, 2 * (SPEAKER_LATENT + NOISE_LATENT)), jnp.float32),
        in_specs=[_vmem()] * 6,
        out_specs=_vmem(),
    )(cols2, q['conv2_w'], q['conv2_b'], pool, q['head_w'], q['head_b'])
    out = out[:B]
    sl, nl = SPEAKER_LATENT, NOISE_LATENT
    return out[:, :sl], out[:, sl:2 * sl], out[:, 2 * sl:2 * sl + nl], out[:, 2 * sl + nl:]


# ----------------------------------- decoder weight slab (one resident input) -----------------------------------
DEC_SLAB_WIDTH = 128


def _dec_slab_layout():
    entries = [
        ('pre1_w', N_MELS, DEC_PRENET_FC1), ('pre1_b', 1, DEC_PRENET_FC1),
        ('pre2_w', DEC_PRENET_FC1, DEC_PRENET_FC2), ('pre2_b', 1, DEC_PRENET_FC2),
        ('attn_wih', DECODER_DIMS + DEC_PRENET_FC2, 3 * DECODER_DIMS),
        ('attn_whh', DECODER_DIMS, 3 * DECODER_DIMS),
        ('attn_bih', 1, 3 * DECODER_DIMS), ('attn_bhh', 1, 3 * DECODER_DIMS),
        ('wtap', 2 * LSA_KERNEL, DECODER_DIMS),
        ('lsa_W_w', DECODER_DIMS, DECODER_DIMS), ('lsa_qb', 1, DECODER_DIMS),
        ('lsa_v', DECODER_DIMS, 1),
        ('rnn_in_w', 2 * DECODER_DIMS + SPEAKER_LATENT + NOISE_LATENT, LSTM_DIMS),
        ('rnn_in_b', 1, LSTM_DIMS),
        ('rnn1_wih', LSTM_DIMS, 4 * LSTM_DIMS), ('rnn1_whh', LSTM_DIMS, 4 * LSTM_DIMS),
        ('rnn1_b', 1, 4 * LSTM_DIMS),
        ('rnn2_wih', LSTM_DIMS, 4 * LSTM_DIMS), ('rnn2_whh', LSTM_DIMS, 4 * LSTM_DIMS),
        ('rnn2_b', 1, 4 * LSTM_DIMS),
        ('mel_w', LSTM_DIMS, N_MELS * MAX_R),
    ]
    layout, off = {}, 0
    for name, r, c in entries:
        layout[name] = (off, r, c)
        off += _round_up(r, 8)
    return layout, off


DEC_SLAB_LAYOUT, DEC_SLAB_ROWS = _dec_slab_layout()


def build_decoder_slab(d):
    """Fold LSA conv+projection into per-tap weights and pack all decoder weights into one slab."""
    wlc = jnp.einsum('kf,fd->kd', d['lsa_conv_w'][:, 0, :], d['lsa_L_w'])
    wla = jnp.einsum('kf,fd->kd', d['lsa_conv_w'][:, 1, :], d['lsa_L_w'])
    vals = {
        'pre1_w': d['pre_fc1_w'], 'pre1_b': d['pre_fc1_b'],
        'pre2_w': d['pre_fc2_w'], 'pre2_b': d['pre_fc2_b'],
        'attn_wih': d['attn_wih'], 'attn_whh': d['attn_whh'],
        'attn_bih': d['attn_bih'], 'attn_bhh': d['attn_bhh'],
        'wtap': jnp.concatenate([wlc, wla], axis=0),
        'lsa_W_w': d['lsa_W_w'], 'lsa_qb': d['lsa_W_b'] + d['lsa_L_b'],
        'lsa_v': d['lsa_v'],
        'rnn_in_w': d['rnn_in_w'], 'rnn_in_b': d['rnn_in_b'],
        'rnn1_wih': d['rnn1_wih'], 'rnn1_whh': d['rnn1_whh'], 'rnn1_b': d['rnn1_b'],
        'rnn2_wih': d['rnn2_wih'], 'rnn2_whh': d['rnn2_whh'], 'rnn2_b': d['rnn2_b'],
        'mel_w': d['mel_proj_w'],
    }
    slab = jnp.zeros((DEC_SLAB_ROWS, DEC_SLAB_WIDTH), jnp.float32)
    for name, (off, r, c) in DEC_SLAB_LAYOUT.items():
        slab = slab.at[off:off + r, :c].set(jnp.asarray(vals[name], jnp.float32).reshape(r, c))
    return slab


# ----------------------------------- fused decoder loop -----------------------------------
def _decoder_kernel(layout, BP, Tt,
                    frames_ref, enc_ref, encp_ref, mask_ref, spk_ref, noi_ref, slab_ref,
                    mel_out_ref, attn_out_ref,
                    attn_h_sc, r1h_sc, r1c_sc, r2h_sc, r2c_sc, ctx_sc, cum_sc, att_sc):
    # TODO(synk): Decoder submodule source unavailable; speaker/noise embeddings are injected
    #             at the rnn_input projection (standard placement for this Tacotron variant).
    D = DECODER_DIMS
    HL = LSTM_DIMS
    SL = SPEAKER_LATENT
    t = pl.program_id(0)

    def W(name):
        o, r, c = layout[name]
        return slab_ref[o:o + r, 0:c]

    @pl.when(t == 0)
    def _():
        for s in (attn_h_sc, r1h_sc, r1c_sc, r2h_sc, r2c_sc, ctx_sc, cum_sc, att_sc):
            s[...] = jnp.zeros_like(s)

    # ---- decoder PreNet (dropout omitted for determinism) ----
    x = jnp.maximum(jnp.dot(frames_ref[t], W('pre1_w'), preferred_element_type=jnp.float32)
                    + W('pre1_b'), 0.0)
    x = jnp.maximum(jnp.dot(x, W('pre2_w'), preferred_element_type=jnp.float32)
                    + W('pre2_b'), 0.0)                                        # (BP, DEC/2)

    # ---- attention GRU (input = [context, prenet], weight split instead of concat) ----
    ctx = ctx_sc[...]
    h_att = attn_h_sc[...]
    wih = W('attn_wih')
    gi = (jnp.dot(ctx, wih[0:D, :], preferred_element_type=jnp.float32)
          + jnp.dot(x, wih[D:, :], preferred_element_type=jnp.float32)
          + W('attn_bih'))
    gh = jnp.dot(h_att, W('attn_whh'), preferred_element_type=jnp.float32) + W('attn_bhh')
    r = jax.nn.sigmoid(gi[:, 0:D] + gh[:, 0:D])
    z = jax.nn.sigmoid(gi[:, D:2 * D] + gh[:, D:2 * D])
    n = jnp.tanh(gi[:, 2 * D:3 * D] + r * gh[:, 2 * D:3 * D])
    h_att = (1.0 - z) * n + z * h_att
    attn_h_sc[...] = h_att

    # ---- location-sensitive attention: pltpu.roll taps + ONE folded (2K, D) matmul ----
    q = jnp.dot(h_att, W('lsa_W_w'), preferred_element_type=jnp.float32) + W('lsa_qb')
    cum = cum_sc[...]                                              # (BP, Tt)
    att = att_sc[...]
    t_idx = jax.lax.broadcasted_iota(jnp.int32, (1, Tt), 1)

    def taps(v):
        outs = []
        for k in range(LSA_KERNEL):
            d_off = k - LSA_KERNEL // 2
            rolled = v if d_off == 0 else pltpu.roll(v, shift=(-d_off) % Tt, axis=1)
            valid = jnp.logical_and(t_idx + d_off >= 0, t_idx + d_off < Tt)
            outs.append(jnp.where(valid, rolled, 0.0))             # zero-padded 'same' conv taps
        return outs

    feats = jnp.stack(taps(cum) + taps(att), axis=-1)              # (BP, Tt, 2K)
    loc = jnp.dot(feats.reshape(BP * Tt, 2 * LSA_KERNEL), W('wtap'),
                  preferred_element_type=jnp.float32).reshape(BP, Tt, D)
    e = jnp.tanh(q[:, None, :] + encp_ref[...] + loc)              # (BP, Tt, D)
    # energies via MXU (matvec) instead of a cross-lane reduce
    u = jnp.dot(e.reshape(BP * Tt, D), W('lsa_v'),
                preferred_element_type=jnp.float32).reshape(BP, Tt)
    u = jnp.where(mask_ref[...] > 0.5, u, -1e30)                   # mask padded phones
    m = jnp.max(u, axis=-1, keepdims=True)
    pexp = jnp.exp(u - m)
    scores = pexp / jnp.sum(pexp, axis=-1, keepdims=True)          # exact softmax (feedback path)
    ctx = jnp.sum(scores[:, :, None] * enc_ref[...], axis=1)       # context (BP, DEC)
    att_sc[...] = scores
    cum_sc[...] = cum + scores
    ctx_sc[...] = ctx

    # ---- residual LSTM stack (speaker / noise embeddings injected at rnn_input) ----
    w_in = W('rnn_in_w')
    xr = (jnp.dot(ctx, w_in[0:D, :], preferred_element_type=jnp.float32)
          + jnp.dot(h_att, w_in[D:2 * D, :], preferred_element_type=jnp.float32)
          + jnp.dot(spk_ref[...], w_in[2 * D:2 * D + SL, :], preferred_element_type=jnp.float32)
          + jnp.dot(noi_ref[...], w_in[2 * D + SL:, :], preferred_element_type=jnp.float32)
          + W('rnn_in_b'))

    def lstm(xx, h, c, wih_n, whh_n, b_n):
        g = (jnp.dot(xx, W(wih_n), preferred_element_type=jnp.float32)
             + jnp.dot(h, W(whh_n), preferred_element_type=jnp.float32) + W(b_n))
        i = jax.nn.sigmoid(g[:, 0:HL])
        f = jax.nn.sigmoid(g[:, HL:2 * HL])
        gg = jnp.tanh(g[:, 2 * HL:3 * HL])
        o = jax.nn.sigmoid(g[:, 3 * HL:4 * HL])
        c2 = f * c + i * gg
        return o * jnp.tanh(c2), c2

    h1, c1 = lstm(xr, r1h_sc[...], r1c_sc[...], 'rnn1_wih', 'rnn1_whh', 'rnn1_b')
    r1h_sc[...] = h1
    r1c_sc[...] = c1
    xr = xr + h1
    h2, c2 = lstm(xr, r2h_sc[...], r2c_sc[...], 'rnn2_wih', 'rnn2_whh', 'rnn2_b')
    r2h_sc[...] = h2
    r2c_sc[...] = c2
    xr = xr + h2

    # write into the VMEM-resident output slabs; HBM writeback happens once at grid end
    mel_out_ref[t] = jnp.dot(xr, W('mel_w'), preferred_element_type=jnp.float32)
    attn_out_ref[t] = scores


def run_decoder(slab, enc_seq, enc_proj, frames, mask, spk_emb, noise_emb):
    n_chunks, BP, _ = frames.shape
    Tt = enc_seq.shape[1]
    D = DECODER_DIMS
    kernel = functools.partial(_decoder_kernel, DEC_SLAB_LAYOUT, BP, Tt)
    mel_all, attn_all = pl.pallas_call(
        kernel,
        out_shape=(jax.ShapeDtypeStruct((n_chunks, BP, N_MELS * MAX_R), jnp.float32),
                   jax.ShapeDtypeStruct((n_chunks, BP, Tt), jnp.float32)),
        grid=(n_chunks,),
        in_specs=[_cspec(frames.shape), _cspec(enc_seq.shape), _cspec(enc_proj.shape),
                  _cspec(mask.shape), _cspec(spk_emb.shape), _cspec(noise_emb.shape),
                  _cspec(slab.shape)],
        out_specs=(_cspec((n_chunks, BP, N_MELS * MAX_R)),
                   _cspec((n_chunks, BP, Tt))),
        scratch_shapes=[
            pltpu.VMEM((BP, D), jnp.float32),          # attention GRU hidden
            pltpu.VMEM((BP, LSTM_DIMS), jnp.float32),  # rnn1 h
            pltpu.VMEM((BP, LSTM_DIMS), jnp.float32),  # rnn1 c
            pltpu.VMEM((BP, LSTM_DIMS), jnp.float32),  # rnn2 h
            pltpu.VMEM((BP, LSTM_DIMS), jnp.float32),  # rnn2 c
            pltpu.VMEM((BP, D), jnp.float32),          # context
            pltpu.VMEM((BP, Tt), jnp.float32),         # cumulative attention
            pltpu.VMEM((BP, Tt), jnp.float32),         # previous attention
        ],
        compiler_params=pltpu.CompilerParams(dimension_semantics=("arbitrary",)),
    )(frames, enc_seq, enc_proj, mask, spk_emb, noise_emb, slab)
    return mel_all, attn_all


# ----------------------------------- plain-JAX glue -----------------------------------
def kl_to_std_normal(loc, log_scale):
    # KL( N(loc, exp(log_scale)) || N(0, 1) ), summed over latent dims (dist.Independent(..., 1))
    return jnp.sum(0.5 * (jnp.exp(2.0 * log_scale) + loc ** 2 - 1.0) - log_scale, axis=-1)


def pack_classifiers(p):
    zsn = jnp.zeros((SPEAKER_LATENT, N_SPEAKERS + 2), jnp.float32)
    zns = jnp.zeros((NOISE_LATENT, N_SPEAKERS + 2), jnp.float32)
    w = jnp.concatenate([
        jnp.concatenate([p['spk_spk_w'], p['spk_noise_w'], zsn], axis=1),
        jnp.concatenate([zns, p['noise_spk_w'], p['noise_noise_w']], axis=1),
    ], axis=0)
    b = jnp.concatenate([p['spk_spk_b'], p['spk_noise_b'],
                         p['noise_spk_b'], p['noise_noise_b']])
    return w, b


def prepare_params(p):
    """One-time packing / folding of weights (kept OUT of the per-step jitted forward)."""
    prep = {
        'embedding': p['embedding'],
        'enc_pre_fc1_w': p['enc_pre_fc1_w'], 'enc_pre_fc1_b': p['enc_pre_fc1_b'],
        'enc_pre_fc2_w': p['enc_pre_fc2_w'], 'enc_pre_fc2_b': p['enc_pre_fc2_b'],
        'encoder_proj_w': p['encoder_proj_w'],
        'post_proj_w': p['post_proj_w'],
        'enc_cbhg': pack_cbhg(p['enc_cbhg'], ENCODER_K, PRENET_FC2, ENCODER_DIMS, NUM_HIGHWAYS),
        'postnet': pack_cbhg(p['postnet'], POSTNET_K, N_MELS + NOISE_LATENT, POSTNET_DIMS,
                             NUM_HIGHWAYS),
        'dec_slab': build_decoder_slab(p['dec']),
        'dualcnn': pack_dual_cnn(p['spk_enc'], p['noise_enc']),
    }
    prep['cls_w'], prep['cls_b'] = pack_classifiers(p)
    return prep


# ----------------------------------- full forward -----------------------------------
def tacotron_forward(prep, phone, mel, phone_len, frame_len, sample_key):
    B = mel.shape[0]
    steps = mel.shape[2]
    Ttext = phone.shape[1]
    mel_btc = jnp.swapaxes(mel, 1, 2).astype(jnp.float32)               # (B, T, n_mels)

    encoder_seq = encoder_fwd(prep, phone)                              # (B, Ttext, DEC)
    encoder_seq_proj = fused_matmul(encoder_seq.reshape(B * Ttext, DECODER_DIMS),
                                    prep['encoder_proj_w']).reshape(B, Ttext, DECODER_DIMS)

    spk_loc, spk_ls, noise_loc, noise_ls = dual_cnn_encoder(prep['dualcnn'], mel_btc, frame_len)

    # reparameterised sampling (dist.Normal(...).rsample())
    k_spk, k_noise = jax.random.split(sample_key)
    spk_emb = spk_loc + jnp.exp(spk_ls) * jax.random.normal(k_spk, spk_loc.shape, jnp.float32)
    noise_emb = noise_loc + jnp.exp(noise_ls) * jax.random.normal(k_noise, noise_loc.shape,
                                                                  jnp.float32)

    # four classifier heads batched into one block-diagonal matmul
    noise_det = jax.lax.stop_gradient(noise_emb)                        # .detach()
    cls = fused_matmul(jnp.concatenate([spk_emb, noise_det], axis=1),
                       prep['cls_w'], bias=prep['cls_b'])
    spk_spk = cls[:, :N_SPEAKERS]                                       # grad_reverse == id in fwd
    spk_noise = cls[:, N_SPEAKERS:N_SPEAKERS + 2]
    noise_spk = cls[:, N_SPEAKERS + 2:2 * N_SPEAKERS + 2]
    noise_noise = cls[:, 2 * N_SPEAKERS + 2:]

    kl_loss = kl_to_std_normal(spk_loc, spk_ls) + kl_to_std_normal(noise_loc, noise_ls)

    # ---- teacher-forced autoregressive decoder: one fused kernel over all chunks ----
    BP = max(8, _round_up(B, 8))                                        # pad batch to 8 sublanes
    pb = BP - B
    mask = (jnp.arange(Ttext)[None, :] < phone_len[:, None]).astype(jnp.float32)
    n_chunks = (steps + R - 1) // R
    idx = jnp.clip(jnp.arange(n_chunks) * R - 1, 0, steps - 1)
    frames = jnp.swapaxes(mel_btc[:, idx, :], 0, 1)                     # (n_chunks, B, n_mels)
    frames = frames.at[0].set(0.0)                                      # <go> frame at t == 0

    frames_p = jnp.pad(frames, ((0, 0), (0, pb), (0, 0)))
    mask_p = jnp.pad(mask, ((0, pb), (0, 0)), constant_values=1.0)
    enc_p = jnp.pad(encoder_seq, ((0, pb), (0, 0), (0, 0)))
    encproj_p = jnp.pad(encoder_seq_proj, ((0, pb), (0, 0), (0, 0)))
    spk_p = jnp.pad(spk_emb, ((0, pb), (0, 0)))
    noi_p = jnp.pad(noise_emb, ((0, pb), (0, 0)))

    mel_chunks, score_chunks = run_decoder(prep['dec_slab'], enc_p, encproj_p,
                                           frames_p, mask_p, spk_p, noi_p)
    mel_chunks = mel_chunks[:, :B]
    score_chunks = score_chunks[:, :B]
    mel_chunks = mel_chunks.reshape(n_chunks, B, N_MELS, MAX_R)[..., :R]
    mel_outputs = jnp.transpose(mel_chunks, (1, 2, 0, 3)).reshape(B, N_MELS, n_chunks * R)
    attn_scores = jnp.transpose(score_chunks, (1, 0, 2))                # (B, steps//r, Ttext)

    # ---- postnet CBHG + linear projection ----
    steps_out = mel_outputs.shape[2]
    post_noise = jnp.repeat(noise_emb[:, :, None], steps_out, axis=2)
    postnet_in = jnp.concatenate([mel_outputs, post_noise], axis=1)     # (B, n_mels+noise, T)
    postnet_out = cbhg_forward(prep['postnet'], jnp.swapaxes(postnet_in, 1, 2), POSTNET_K)
    lin = fused_matmul(postnet_out.reshape(B * steps_out, 2 * POSTNET_DIMS), prep['post_proj_w'])
    linear_outputs = jnp.swapaxes(lin.reshape(B, steps_out, FFT_BINS), 1, 2)

    return (mel_outputs, linear_outputs, spk_spk, spk_noise,
            noise_spk, noise_noise, kl_loss, attn_scores)


# ----------------------------------- parameter init -----------------------------------
class PInit:
    def __init__(self, key):
        self.key = key

    def _next(self):
        self.key, k = jax.random.split(self.key)
        return k

    def mat(self, shape):
        fan_in = 1
        for s in shape[:-1]:
            fan_in *= int(s)
        fan_out = int(shape[-1])
        lim = (6.0 / (fan_in + fan_out)) ** 0.5
        return jax.random.uniform(self._next(), shape, jnp.float32, -lim, lim)

    def zeros(self, shape):
        return jnp.zeros(shape, jnp.float32)

    def ones(self, shape):
        return jnp.ones(shape, jnp.float32)


def init_cbhg(pm, K, in_ch, channels, proj, num_hwy):
    p = {}
    for k in range(1, K + 1):
        p[f'bank{k}_w'] = pm.mat((k, in_ch, channels))
        p[f'bank{k}_gamma'] = pm.ones((channels,))
        p[f'bank{k}_beta'] = pm.zeros((channels,))
    p['proj1_w'] = pm.mat((3, K * channels, proj[0]))
    p['proj1_gamma'] = pm.ones((proj[0],))
    p['proj1_beta'] = pm.zeros((proj[0],))
    p['proj2_w'] = pm.mat((3, proj[0], proj[1]))
    p['proj2_gamma'] = pm.ones((proj[1],))
    p['proj2_beta'] = pm.zeros((proj[1],))
    for i in range(num_hwy):
        p[f'hwy{i}_w1'] = pm.mat((channels, channels))
        p[f'hwy{i}_b1'] = pm.zeros((channels,))
        p[f'hwy{i}_w2'] = pm.mat((channels, channels))
        p[f'hwy{i}_b2'] = pm.zeros((channels,))
    for d in ('fwd', 'bwd'):
        p[f'gru_{d}_wih'] = pm.mat((channels, 3 * channels))
        p[f'gru_{d}_whh'] = pm.mat((channels, 3 * channels))
        p[f'gru_{d}_bih'] = pm.zeros((3 * channels,))
        p[f'gru_{d}_bhh'] = pm.zeros((3 * channels,))
    return p


def init_cnn_encoder(pm, latent, enc_dims):
    return {
        'conv1_w': pm.mat((3, N_MELS, enc_dims)), 'conv1_b': pm.zeros((enc_dims,)),
        'conv2_w': pm.mat((3, enc_dims, enc_dims)), 'conv2_b': pm.zeros((enc_dims,)),
        'loc_w': pm.mat((enc_dims, latent)), 'loc_b': pm.zeros((latent,)),
        'ls_w': pm.mat((enc_dims, latent)), 'ls_b': pm.zeros((latent,)),
    }


def init_params(key):
    pm = PInit(key)
    p = {}
    p['embedding'] = pm.mat((NUM_CHARS, EMBED_DIMS))
    p['enc_pre_fc1_w'] = pm.mat((EMBED_DIMS, PRENET_FC1)); p['enc_pre_fc1_b'] = pm.zeros((PRENET_FC1,))
    p['enc_pre_fc2_w'] = pm.mat((PRENET_FC1, PRENET_FC2)); p['enc_pre_fc2_b'] = pm.zeros((PRENET_FC2,))
    p['enc_cbhg'] = init_cbhg(pm, ENCODER_K, PRENET_FC2, ENCODER_DIMS,
                              [ENCODER_DIMS, ENCODER_DIMS], NUM_HIGHWAYS)
    p['encoder_proj_w'] = pm.mat((DECODER_DIMS, DECODER_DIMS))
    d = {}
    d['pre_fc1_w'] = pm.mat((N_MELS, DEC_PRENET_FC1)); d['pre_fc1_b'] = pm.zeros((DEC_PRENET_FC1,))
    d['pre_fc2_w'] = pm.mat((DEC_PRENET_FC1, DEC_PRENET_FC2)); d['pre_fc2_b'] = pm.zeros((DEC_PRENET_FC2,))
    d['attn_wih'] = pm.mat((DECODER_DIMS + DEC_PRENET_FC2, 3 * DECODER_DIMS))
    d['attn_whh'] = pm.mat((DECODER_DIMS, 3 * DECODER_DIMS))
    d['attn_bih'] = pm.zeros((3 * DECODER_DIMS,)); d['attn_bhh'] = pm.zeros((3 * DECODER_DIMS,))
    d['lsa_conv_w'] = pm.mat((LSA_KERNEL, 2, LSA_FILTERS))
    d['lsa_L_w'] = pm.mat((LSA_FILTERS, DECODER_DIMS)); d['lsa_L_b'] = pm.zeros((DECODER_DIMS,))
    d['lsa_W_w'] = pm.mat((DECODER_DIMS, DECODER_DIMS)); d['lsa_W_b'] = pm.zeros((DECODER_DIMS,))
    d['lsa_v'] = pm.mat((DECODER_DIMS, 1))
    d['rnn_in_w'] = pm.mat((2 * DECODER_DIMS + SPEAKER_LATENT + NOISE_LATENT, LSTM_DIMS))
    d['rnn_in_b'] = pm.zeros((LSTM_DIMS,))
    d['rnn1_wih'] = pm.mat((LSTM_DIMS, 4 * LSTM_DIMS)); d['rnn1_whh'] = pm.mat((LSTM_DIMS, 4 * LSTM_DIMS))
    d['rnn1_b'] = pm.zeros((4 * LSTM_DIMS,))
    d['rnn2_wih'] = pm.mat((LSTM_DIMS, 4 * LSTM_DIMS)); d['rnn2_whh'] = pm.mat((LSTM_DIMS, 4 * LSTM_DIMS))
    d['rnn2_b'] = pm.zeros((4 * LSTM_DIMS,))
    d['mel_proj_w'] = pm.mat((LSTM_DIMS, N_MELS * MAX_R))
    p['dec'] = d
    p['postnet'] = init_cbhg(pm, POSTNET_K, N_MELS + NOISE_LATENT, POSTNET_DIMS,
                             [256, N_MELS + NOISE_LATENT], NUM_HIGHWAYS)
    p['post_proj_w'] = pm.mat((2 * POSTNET_DIMS, FFT_BINS))
    p['spk_enc'] = init_cnn_encoder(pm, SPEAKER_LATENT, SPEAKER_ENC_DIMS)
    p['noise_enc'] = init_cnn_encoder(pm, NOISE_LATENT, NOISE_ENC_DIMS)
    p['spk_spk_w'] = pm.mat((SPEAKER_LATENT, N_SPEAKERS)); p['spk_spk_b'] = pm.zeros((N_SPEAKERS,))
    p['spk_noise_w'] = pm.mat((SPEAKER_LATENT, 2)); p['spk_noise_b'] = pm.zeros((2,))
    p['noise_spk_w'] = pm.mat((NOISE_LATENT, N_SPEAKERS)); p['noise_spk_b'] = pm.zeros((N_SPEAKERS,))
    p['noise_noise_w'] = pm.mat((NOISE_LATENT, 2)); p['noise_noise_b'] = pm.zeros((2,))
    return p


# ----------------------------------- driver -----------------------------------
if __name__ == "__main__":
    root = jax.random.PRNGKey(0)
    k_params, k_phone, k_mel, k_sample = jax.random.split(root, 4)
    params = init_params(k_params)
    prep = prepare_params(params)           # one-time weight packing, outside the jitted forward

    B, TTEXT, STEPS = 2, 8, 8
    phone = jax.random.randint(k_phone, (B, TTEXT), 0, NUM_CHARS, dtype=jnp.int32)
    mel = jax.random.normal(k_mel, (B, N_MELS, STEPS), jnp.float32)       # PyTorch NCT layout
    phone_len = jnp.array([TTEXT, TTEXT - 2], dtype=jnp.int32)
    frame_len = jnp.array([STEPS, STEPS - 1], dtype=jnp.int32)

    fwd = jax.jit(tacotron_forward)
    outs = jax.block_until_ready(fwd(prep, phone, mel, phone_len, frame_len, k_sample))
    (mel_out, lin_out, ss_cls, sn_cls, ns_cls, nn_cls, kl, attn) = outs

    assert mel_out.shape == (B, N_MELS, (STEPS + R - 1) // R * R)
    assert lin_out.shape == (B, FFT_BINS, (STEPS + R - 1) // R * R)
    assert ss_cls.shape == (B, N_SPEAKERS) and sn_cls.shape == (B, 2)
    assert ns_cls.shape == (B, N_SPEAKERS) and nn_cls.shape == (B, 2)
    assert kl.shape == (B,)
    assert attn.shape == (B, (STEPS + R - 1) // R, TTEXT)
    assert bool(jnp.all(jnp.isfinite(mel_out))) and bool(jnp.all(jnp.isfinite(lin_out)))
    assert bool(jnp.all(jnp.isfinite(attn))) and bool(jnp.all(jnp.isfinite(kl)))

    print("KERNEL_OK")
</pallas_src>

<mosaic_0001>
module attributes {stable_mosaic.version = 11 : i64} {
  func.func @_mlp2_kernel(%arg0: i32, %arg1: memref<16x16xbf16, #tpu.memory_space<vmem>>, %arg2: memref<16x32xbf16, #tpu.memory_space<vmem>>, %arg3: memref<1x32xf32, #tpu.memory_space<vmem>>, %arg4: memref<32x16xbf16, #tpu.memory_space<vmem>>, %arg5: memref<1x16xf32, #tpu.memory_space<vmem>>, %arg6: memref<16x16xf32, #tpu.memory_space<vmem>>) attributes {dimension_semantics = [#tpu.dimension_semantics<parallel>], iteration_bounds = array<i64: 1>, scalar_prefetch = 0 : i64, scratch_operands = 0 : i64, tpu.core_type = #tpu.core_type<tc>, window_params = [{transform_indices = @transform_0, window_bounds = array<i64: 16, 16>}, {pipeline_mode = #tpu.pipeline_mode<synchronous>, transform_indices = @transform_1, window_bounds = array<i64: 16, 32>}, {pipeline_mode = #tpu.pipeline_mode<synchronous>, transform_indices = @transform_2, window_bounds = array<i64: 1, 32>}, {pipeline_mode = #tpu.pipeline_mode<synchronous>, transform_indices = @transform_3, window_bounds = array<i64: 32, 16>}, {pipeline_mode = #tpu.pipeline_mode<synchronous>, transform_indices = @transform_4, window_bounds = array<i64: 1, 16>}, {transform_indices = @transform_5, window_bounds = array<i64: 16, 16>}]} {
    %c0 = arith.constant 0 : index
    %c0_0 = arith.constant 0 : index
    %0 = vector.load %arg4[%c0, %c0_0] : memref<32x16xbf16, #tpu.memory_space<vmem>>, vector<32x16xbf16>
    %c0_1 = arith.constant 0 : index
    %c0_2 = arith.constant 0 : index
    %1 = vector.load %arg1[%c0_1, %c0_2] : memref<16x16xbf16, #tpu.memory_space<vmem>>, vector<16x16xbf16>
    %c0_3 = arith.constant 0 : index
    %c0_4 = arith.constant 0 : index
    %2 = vector.load %arg2[%c0_3, %c0_4] : memref<16x32xbf16, #tpu.memory_space<vmem>>, vector<16x32xbf16>
    %cst = arith.constant dense<0.000000e+00> : vector<16x32xf32>
    %3 = tpu.matmul %1, %2, %cst {dimension_numbers = #tpu.dot_dimension_numbers<[1], [0], [0], [1], [0, 0, 1, 1], [], []>} : vector<16x16xbf16>, vector<16x32xbf16>, vector<16x32xf32> -> vector<16x32xf32>
    %c0_5 = arith.constant 0 : index
    %c0_6 = arith.constant 0 : index
    %4 = vector.load %arg3[%c0_5, %c0_6] : memref<1x32xf32, #tpu.memory_space<vmem>>, vector<1x32xf32>
    %5 = vector.broadcast %4 : vector<1x32xf32> to vector<16x32xf32>
    %6 = arith.addf %3, %5 : vector<16x32xf32>
    %cst_7 = arith.constant 0.000000e+00 : f32
    %7 = vector.broadcast %cst_7 : f32 to vector<16x32xf32>
    %8 = arith.maximumf %6, %7 : vector<16x32xf32>
    %9 = arith.truncf %8 : vector<16x32xf32> to vector<16x32xbf16>
    %cst_8 = arith.constant dense<0.000000e+00> : vector<16x16xf32>
    %10 = tpu.matmul %9, %0, %cst_8 {dimension_numbers = #tpu.dot_dimension_numbers<[1], [0], [0], [1], [0, 0, 1, 1], [], []>} : vector<16x32xbf16>, vector<32x16xbf16>, vector<16x16xf32> -> vector<16x16xf32>
    %c0_9 = arith.constant 0 : index
    %c0_10 = arith.constant 0 : index
    %11 = vector.load %arg5[%c0_9, %c0_10] : memref<1x16xf32, #tpu.memory_space<vmem>>, vector<1x16xf32>
    %12 = vector.broadcast %11 : vector<1x16xf32> to vector<16x16xf32>
    %13 = arith.addf %10, %12 : vector<16x16xf32>
    %cst_11 = arith.constant 0.000000e+00 : f32
    %14 = vector.broadcast %cst_11 : f32 to vector<16x16xf32>
    %15 = arith.maximumf %13, %14 : vector<16x16xf32>
    %c0_12 = arith.constant 0 : index
    %c0_13 = arith.constant 0 : index
    %16 = vector.load %arg6[%c0_12, %c0_13] : memref<16x16xf32, #tpu.memory_space<vmem>>, vector<16x16xf32>
    tpu.vector_store %arg6[%c0_12, %c0_13], %15 {strides = array<i32>} : memref<16x16xf32, #tpu.memory_space<vmem>>, vector<16x16xf32>,
    return
  }
  func.func @transform_0(%arg0: i32) -> (i32, i32) {
    %c0_i32 = arith.constant 0 : i32
    %c0_i32_0 = arith.constant 0 : i32
    return %arg0, %c0_i32 : i32, i32
  }
  func.func @transform_1(%arg0: i32) -> (i32, i32) {
    %c0_i32 = arith.constant 0 : i32
    %c0_i32_0 = arith.constant 0 : i32
    %c0_i32_1 = arith.constant 0 : i32
    return %c0_i32, %c0_i32_0 : i32, i32
  }
  func.func @transform_2(%arg0: i32) -> (i32, i32) {
    %c0_i32 = arith.constant 0 : i32
    %c0_i32_0 = arith.constant 0 : i32
    %c0_i32_1 = arith.constant 0 : i32
    return %c0_i32, %c0_i32_0 : i32, i32
  }
  func.func @transform_3(%arg0: i32) -> (i32, i32) {
    %c0_i32 = arith.constant 0 : i32
    %c0_i32_0 = arith.constant 0 : i32
    %c0_i32_1 = arith.constant 0 : i32
    return %c0_i32, %c0_i32_0 : i32, i32
  }
  func.func @transform_4(%arg0: i32) -> (i32, i32) {
    %c0_i32 = arith.constant 0 : i32
    %c0_i32_0 = arith.constant 0 : i32
    %c0_i32_1 = arith.constant 0 : i32
    return %c0_i32, %c0_i32_0 : i32, i32
  }
  func.func @transform_5(%arg0: i32) -> (i32, i32) {
    %c0_i32 = arith.constant 0 : i32
    %c0_i32_0 = arith.constant 0 : i32
    return %arg0, %c0_i32 : i32, i32
  }
}

module attributes {stable_mosaic.version = 11 : i64} {
  func.func @_mm_stats_kernel(%arg0: i32, %arg1: memref<16x48xbf16, #tpu.memory_space<vmem>>, %arg2: memref<48x48xbf16, #tpu.memory_space<vmem>>, %arg3: memref<16x48xf32, #tpu.memory_space<vmem>>, %arg4: memref<2x48xf32, #tpu.memory_space<vmem>>) attributes {dimension_semantics = [#tpu.dimension_semantics<arbitrary>], iteration_bounds = array<i64: 1>, scalar_prefetch = 0 : i64, scratch_operands = 0 : i64, tpu.core_type = #tpu.core_type<tc>, window_params = [{transform_indices = @transform_0, window_bounds = array<i64: 16, 48>}, {pipeline_mode = #tpu.pipeline_mode<synchronous>, transform_indices = @transform_1, window_bounds = array<i64: 48, 48>}, {transform_indices = @transform_2, window_bounds = array<i64: 16, 48>}, {pipeline_mode = #tpu.pipeline_mode<synchronous>, transform_indices = @transform_3, window_bounds = array<i64: 2, 48>}]} {
    %c0 = arith.constant 0 : index
    %c0_0 = arith.constant 0 : index
    %0 = vector.load %arg1[%c0, %c0_0] : memref<16x48xbf16, #tpu.memory_space<vmem>>, vector<16x48xbf16>
    %c0_1 = arith.constant 0 : index
    %c0_2 = arith.constant 0 : index
    %1 = vector.load %arg2[%c0_1, %c0_2] : memref<48x48xbf16, #tpu.memory_space<vmem>>, vector<48x48xbf16>
    %cst = arith.constant dense<0.000000e+00> : vector<16x48xf32>
    %2 = tpu.matmul %0, %1, %cst {dimension_numbers = #tpu.dot_dimension_numbers<[1], [0], [0], [1], [0, 0, 1, 1], [], []>} : vector<16x48xbf16>, vector<48x48xbf16>, vector<16x48xf32> -> vector<16x48xf32>
    %c0_3 = arith.constant 0 : index
    %c0_4 = arith.constant 0 : index
    %3 = vector.load %arg3[%c0_3, %c0_4] : memref<16x48xf32, #tpu.memory_space<vmem>>, vector<16x48xf32>
    tpu.vector_store %arg3[%c0_3, %c0_4], %2 {strides = array<i32>} : memref<16x48xf32, #tpu.memory_space<vmem>>, vector<16x48xf32>,
    %4 = tpu.iota {dimensions = array<i32: 0>} : vector<16x1xi32>
    %c16_i32 = arith.constant 16 : i32
    %5 = arith.muli %arg0, %c16_i32 : i32
    %6 = vector.broadcast %5 : i32 to vector<16x1xi32>
    %7 = arith.addi %4, %6 : vector<16x1xi32>
    %c16_i32_5 = arith.constant 16 : i32
    %8 = vector.broadcast %c16_i32_5 : i32 to vector<16x1xi32>
    %9 = arith.cmpi slt, %7, %8 : vector<16x1xi32>
    %10 = arith.extui %9 : vector<16x1xi1> to vector<16x1xi32>
    %11 = arith.sitofp %10 : vector<16x1xi32> to vector<16x1xf32>
    %12 = vector.broadcast %11 : vector<16x1xf32> to vector<16x48xf32>
    %13 = arith.mulf %2, %12 : vector<16x48xf32>
    %cst_6 = arith.constant dense<0.000000e+00> : vector<48xf32>
    %14 = vector.multi_reduction <add>, %13, %cst_6 [0] : vector<16x48xf32> to vector<48xf32>
    %15 = vector.shape_cast %14 : vector<48xf32> to vector<1x48xf32>
    %16 = arith.mulf %13, %2 : vector<16x48xf32>
    %cst_7 = arith.constant dense<0.000000e+00> : vector<48xf32>
    %17 = vector.multi_reduction <add>, %16, %cst_7 [0] : vector<16x48xf32> to vector<48xf32>
    %18 = vector.shape_cast %17 : vector<48xf32> to vector<1x48xf32>
    %19 = tpu.concatenate %15, %18 in 0 : vector<1x48xf32>, vector<1x48xf32> -> vector<2x48xf32>
    %c0_i32 = arith.constant 0 : i32
    %20 = arith.cmpi eq, %arg0, %c0_i32 : i32
    %21 = arith.extui %20 : i1 to i32
    %c0_i32_8 = arith.constant 0 : i32
    %22 = arith.cmpi ne, %21, %c0_i32_8 : i32
    scf.if %22 {
      %c0_11 = arith.constant 0 : index
      %c0_12 = arith.constant 0 : index
      %26 = vector.load %arg4[%c0_11, %c0_12] : memref<2x48xf32, #tpu.memory_space<vmem>>, vector<2x48xf32>
      tpu.vector_store %arg4[%c0_11, %c0_12], %19 {strides = array<i32>} : memref<2x48xf32, #tpu.memory_space<vmem>>, vector<2x48xf32>,
    } else {
    }
    %c0_i32_9 = arith.constant 0 : i32
    %23 = arith.cmpi sgt, %arg0, %c0_i32_9 : i32
    %24 = arith.extui %23 : i1 to i32
    %c0_i32_10 = arith.constant 0 : i32
    %25 = arith.cmpi ne, %24, %c0_i32_10 : i32
    scf.if %25 {
      %c0_11 = arith.constant 0 : index
      %c0_12 = arith.constant 0 : index
      %26 = vector.load %arg4[%c0_11, %c0_12] : memref<2x48xf32, #tpu.memory_space<vmem>>, vector<2x48xf32>
      %27 = arith.addf %26, %19 : vector<2x48xf32>
      %c0_13 = arith.constant 0 : index
      %c0_14 = arith.constant 0 : index
      %28 = vector.load %arg4[%c0_13, %c0_14] : memref<2x48xf32, #tpu.memory_space<vmem>>, vector<2x48xf32>
      tpu.vector_store %arg4[%c0_13, %c0_14], %27 {strides = array<i32>} : memref<2x48xf32, #tpu.memory_space<vmem>>, vector<2x48xf32>,
    } else {
    }
    return
  }
  func.func @transform_0(%arg0: i32) -> (i32, i32) {
    %c0_i32 = arith.constant 0 : i32
    %c0_i32_0 = arith.constant 0 : i32
    return %arg0, %c0_i32 : i32, i32
  }
  func.func @transform_1(%arg0: i32) -> (i32, i32) {
    %c0_i32 = arith.constant 0 : i32
    %c0_i32_0 = arith.constant 0 : i32
    %c0_i32_1 = arith.constant 0 : i32
    return %c0_i32, %c0_i32_0 : i32, i32
  }
  func.func @transform_2(%arg0: i32) -> (i32, i32) {
    %c0_i32 = arith.constant 0 : i32
    %c0_i32_0 = arith.constant 0 : i32
    return %arg0, %c0_i32 : i32, i32
  }
  func.func @transform_3(%arg0: i32) -> (i32, i32) {
    %c0_i32 = arith.constant 0 : i32
    %c0_i32_0 = arith.constant 0 : i32
    %c0_i32_1 = arith.constant 0 : i32
    return %c0_i32, %c0_i32_0 : i32, i32
  }
}

module attributes {stable_mosaic.version = 11 : i64} {
  func.func @_bn_act_kernel(%arg0: i32, %arg1: memref<16x48xf32, #tpu.memory_space<vmem>>, %arg2: memref<2x48xf32, #tpu.memory_space<vmem>>, %arg3: memref<1x48xf32, #tpu.memory_space<vmem>>, %arg4: memref<1x48xf32, #tpu.memory_space<vmem>>, %arg5: memref<16x48xf32, #tpu.memory_space<vmem>>) attributes {dimension_semantics = [#tpu.dimension_semantics<parallel>], iteration_bounds = array<i64: 1>, scalar_prefetch = 0 : i64, scratch_operands = 0 : i64, tpu.core_type = #tpu.core_type<tc>, window_params = [{transform_indices = @transform_0, window_bounds = array<i64: 16, 48>}, {pipeline_mode = #tpu.pipeline_mode<synchronous>, transform_indices = @transform_1, window_bounds = array<i64: 2, 48>}, {pipeline_mode = #tpu.pipeline_mode<synchronous>, transform_indices = @transform_2, window_bounds = array<i64: 1, 48>}, {pipeline_mode = #tpu.pipeline_mode<synchronous>, transform_indices = @transform_3, window_bounds = array<i64: 1, 48>}, {transform_indices = @transform_4, window_bounds = array<i64: 16, 48>}]} {
    %c0 = arith.constant 0 : index
    %c0_0 = arith.constant 0 : index
    %0 = vector.load %arg2[%c0, %c0_0] : memref<2x48xf32, #tpu.memory_space<vmem>>, vector<1x48xf32>
    %cst = arith.constant 6.250000e-02 : f32
    %1 = vector.broadcast %cst : f32 to vector<1x48xf32>
    %2 = arith.mulf %0, %1 : vector<1x48xf32>
    %c1 = arith.constant 1 : index
    %c0_1 = arith.constant 0 : index
    %3 = vector.load %arg2[%c1, %c0_1] : memref<2x48xf32, #tpu.memory_space<vmem>>, vector<1x48xf32>
    %cst_2 = arith.constant 6.250000e-02 : f32
    %4 = vector.broadcast %cst_2 : f32 to vector<1x48xf32>
    %5 = arith.mulf %3, %4 : vector<1x48xf32>
    %6 = arith.mulf %2, %2 : vector<1x48xf32>
    %7 = arith.subf %5, %6 : vector<1x48xf32>
    %c0_3 = arith.constant 0 : index
    %c0_4 = arith.constant 0 : index
    %8 = vector.load %arg1[%c0_3, %c0_4] : memref<16x48xf32, #tpu.memory_space<vmem>>, vector<16x48xf32>
    %9 = vector.broadcast %2 : vector<1x48xf32> to vector<16x48xf32>
    %10 = arith.subf %8, %9 : vector<16x48xf32>
    %cst_5 = arith.constant 9.99999974E-6 : f32
    %11 = vector.broadcast %cst_5 : f32 to vector<1x48xf32>
    %12 = arith.addf %7, %11 : vector<1x48xf32>
    %13 = math.rsqrt %12 : vector<1x48xf32>
    %14 = vector.broadcast %13 : vector<1x48xf32> to vector<16x48xf32>
    %15 = arith.mulf %10, %14 : vector<16x48xf32>
    %c0_6 = arith.constant 0 : index
    %c0_7 = arith.constant 0 : index
    %16 = vector.load %arg3[%c0_6, %c0_7] : memref<1x48xf32, #tpu.memory_space<vmem>>, vector<1x48xf32>
    %17 = vector.broadcast %16 : vector<1x48xf32> to vector<16x48xf32>
    %18 = arith.mulf %15, %17 : vector<16x48xf32>
    %c0_8 = arith.constant 0 : index
    %c0_9 = arith.constant 0 : index
    %19 = vector.load %arg4[%c0_8, %c0_9] : memref<1x48xf32, #tpu.memory_space<vmem>>, vector<1x48xf32>
    %20 = vector.broadcast %19 : vector<1x48xf32> to vector<16x48xf32>
    %21 = arith.addf %18, %20 : vector<16x48xf32>
    %cst_10 = arith.constant 0.000000e+00 : f32
    %22 = vector.broadcast %cst_10 : f32 to vector<16x48xf32>
    %23 = arith.maximumf %21, %22 : vector<16x48xf32>
    %c0_11 = arith.constant 0 : index
    %c0_12 = arith.constant 0 : index
    %24 = vector.load %arg5[%c0_11, %c0_12] : memref<16x48xf32, #tpu.memory_space<vmem>>, vector<16x48xf32>
    tpu.vector_store %arg5[%c0_11, %c0_12], %23 {strides = array<i32>} : memref<16x48xf32, #tpu.memory_space<vmem>>, vector<16x48xf32>,
    return
  }
  func.func @transform_0(%arg0: i32) -> (i32, i32) {
    %c0_i32 = arith.constant 0 : i32
    %c0_i32_0 = arith.constant 0 : i32
    return %arg0, %c0_i32 : i32, i32
  }
  func.func @transform_1(%arg0: i32) -> (i32, i32) {
    %c0_i32 = arith.constant 0 : i32
    %c0_i32_0 = arith.constant 0 : i32
    %c0_i32_1 = arith.constant 0 : i32
    return %c0_i32, %c0_i32_0 : i32, i32
  }
  func.func @transform_2(%arg0: i32) -> (i32, i32) {
    %c0_i32 = arith.constant 0 : i32
    %c0_i32_0 = arith.constant 0 : i32
    %c0_i32_1 = arith.constant 0 : i32
    return %c0_i32, %c0_i32_0 : i32, i32
  }
  func.func @transform_3(%arg0: i32) -> (i32, i32) {
    %c0_i32 = arith.constant 0 : i32
    %c0_i32_0 = arith.constant 0 : i32
    %c0_i32_1 = arith.constant 0 : i32
    return %c0_i32, %c0_i32_0 : i32, i32
  }
  func.func @transform_4(%arg0: i32) -> (i32, i32) {
    %c0_i32 = arith.constant 0 : i32
    %c0_i32_0 = arith.constant 0 : i32
    return %arg0, %c0_i32 : i32, i32
  }
}

module attributes {stable_mosaic.version = 11 : i64} {
  func.func @_mm_stats_kernel(%arg0: i32, %arg1: memref<16x144xbf16, #tpu.memory_space<vmem>>, %arg2: memref<144x16xbf16, #tpu.memory_space<vmem>>, %arg3: memref<16x16xf32, #tpu.memory_space<vmem>>, %arg4: memref<2x16xf32, #tpu.memory_space<vmem>>) attributes {dimension_semantics = [#tpu.dimension_semantics<arbitrary>], iteration_bounds = array<i64: 1>, scalar_prefetch = 0 : i64, scratch_operands = 0 : i64, tpu.core_type = #tpu.core_type<tc>, window_params = [{transform_indices = @transform_0, window_bounds = array<i64: 16, 144>}, {pipeline_mode = #tpu.pipeline_mode<synchronous>, transform_indices = @transform_1, window_bounds = array<i64: 144, 16>}, {transform_indices = @transform_2, window_bounds = array<i64: 16, 16>}, {pipeline_mode = #tpu.pipeline_mode<synchronous>, transform_indices = @transform_3, window_bounds = array<i64: 2, 16>}]} {
    %c0 = arith.constant 0 : index
    %c0_0 = arith.constant 0 : index
    %0 = vector.load %arg1[%c0, %c0_0] : memref<16x144xbf16, #tpu.memory_space<vmem>>, vector<16x144xbf16>
    %c0_1 = arith.constant 0 : index
    %c0_2 = arith.constant 0 : index
    %1 = vector.load %arg2[%c0_1, %c0_2] : memref<144x16xbf16, #tpu.memory_space<vmem>>, vector<144x16xbf16>
    %cst = arith.constant dense<0.000000e+00> : vector<16x16xf32>
    %2 = tpu.matmul %0, %1, %cst {dimension_numbers = #tpu.dot_dimension_numbers<[1], [0], [0], [1], [0, 0, 1, 1], [], []>} : vector<16x144xbf16>, vector<144x16xbf16>, vector<16x16xf32> -> vector<16x16xf32>
    %c0_3 = arith.constant 0 : index
    %c0_4 = arith.constant 0 : index
    %3 = vector.load %arg3[%c0_3, %c0_4] : memref<16x16xf32, #tpu.memory_space<vmem>>, vector<16x16xf32>
    tpu.vector_store %arg3[%c0_3, %c0_4], %2 {strides = array<i32>} : memref<16x16xf32, #tpu.memory_space<vmem>>, vector<16x16xf32>,
    %4 = tpu.iota {dimensions = array<i32: 0>} : vector<16x1xi32>
    %c16_i32 = arith.constant 16 : i32
    %5 = arith.muli %arg0, %c16_i32 : i32
    %6 = vector.broadcast %5 : i32 to vector<16x1xi32>
    %7 = arith.addi %4, %6 : vector<16x1xi32>
    %c16_i32_5 = arith.constant 16 : i32
    %8 = vector.broadcast %c16_i32_5 : i32 to vector<16x1xi32>
    %9 = arith.cmpi slt, %7, %8 : vector<16x1xi32>
    %10 = arith.extui %9 : vector<16x1xi1> to vector<16x1xi32>
    %11 = arith.sitofp %10 : vector<16x1xi32> to vector<16x1xf32>
    %12 = vector.broadcast %11 : vector<16x1xf32> to vector<16x16xf32>
    %13 = arith.mulf %2, %12 : vector<16x16xf32>
    %cst_6 = arith.constant dense<0.000000e+00> : vector<16xf32>
    %14 = vector.multi_reduction <add>, %13, %cst_6 [0] : vector<16x16xf32> to vector<16xf32>
    %15 = vector.shape_cast %14 : vector<16xf32> to vector<1x16xf32>
    %16 = arith.mulf %13, %2 : vector<16x16xf32>
    %cst_7 = arith.constant dense<0.000000e+00> : vector<16xf32>
    %17 = vector.multi_reduction <add>, %16, %cst_7 [0] : vector<16x16xf32> to vector<16xf32>
    %18 = vector.shape_cast %17 : vector<16xf32> to vector<1x16xf32>
    %19 = tpu.concatenate %15, %18 in 0 : vector<1x16xf32>, vector<1x16xf32> -> vector<2x16xf32>
    %c0_i32 = arith.constant 0 : i32
    %20 = arith.cmpi eq, %arg0, %c0_i32 : i32
    %21 = arith.extui %20 : i1 to i32
    %c0_i32_8 = arith.constant 0 : i32
    %22 = arith.cmpi ne, %21, %c0_i32_8 : i32
    scf.if %22 {
      %c0_11 = arith.constant 0 : index
      %c0_12 = arith.constant 0 : index
      %26 = vector.load %arg4[%c0_11, %c0_12] : memref<2x16xf32, #tpu.memory_space<vmem>>, vector<2x16xf32>
      tpu.vector_store %arg4[%c0_11, %c0_12], %19 {strides = array<i32>} : memref<2x16xf32, #tpu.memory_space<vmem>>, vector<2x16xf32>,
    } else {
    }
    %c0_i32_9 = arith.constant 0 : i32
    %23 = arith.cmpi sgt, %arg0, %c0_i32_9 : i32
    %24 = arith.extui %23 : i1 to i32
    %c0_i32_10 = arith.constant 0 : i32
    %25 = arith.cmpi ne, %24, %c0_i32_10 : i32
    scf.if %25 {
      %c0_11 = arith.constant 0 : index
      %c0_12 = arith.constant 0 : index
      %26 = vector.load %arg4[%c0_11, %c0_12] : memref<2x16xf32, #tpu.memory_space<vmem>>, vector<2x16xf32>
      %27 = arith.addf %26, %19 : vector<2x16xf32>
      %c0_13 = arith.constant 0 : index
      %c0_14 = arith.constant 0 : index
      %28 = vector.load %arg4[%c0_13, %c0_14] : memref<2x16xf32, #tpu.memory_space<vmem>>, vector<2x16xf32>
      tpu.vector_store %arg4[%c0_13, %c0_14], %27 {strides = array<i32>} : memref<2x16xf32, #tpu.memory_space<vmem>>, vector<2x16xf32>,
    } else {
    }
    return
  }
  func.func @transform_0(%arg0: i32) -> (i32, i32) {
    %c0_i32 = arith.constant 0 : i32
    %c0_i32_0 = arith.constant 0 : i32
    return %arg0, %c0_i32 : i32, i32
  }
  func.func @transform_1(%arg0: i32) -> (i32, i32) {
    %c0_i32 = arith.constant 0 : i32
    %c0_i32_0 = arith.constant 0 : i32
    %c0_i32_1 = arith.constant 0 : i32
    return %c0_i32, %c0_i32_0 : i32, i32
  }
  func.func @transform_2(%arg0: i32) -> (i32, i32) {
    %c0_i32 = arith.constant 0 : i32
    %c0_i32_0 = arith.constant 0 : i32
    return %arg0, %c0_i32 : i32, i32
  }
  func.func @transform_3(%arg0: i32) -> (i32, i32) {
    %c0_i32 = arith.constant 0 : i32
    %c0_i32_0 = arith.constant 0 : i32
    %c0_i32_1 = arith.constant 0 : i32
    return %c0_i32, %c0_i32_0 : i32, i32
  }
}

module attributes {stable_mosaic.version = 11 : i64} {
  func.func @_bn_act_kernel(%arg0: i32, %arg1: memref<16x16xf32, #tpu.memory_space<vmem>>, %arg2: memref<2x16xf32, #tpu.memory_space<vmem>>, %arg3: memref<1x16xf32, #tpu.memory_space<vmem>>, %arg4: memref<1x16xf32, #tpu.memory_space<vmem>>, %arg5: memref<16x16xf32, #tpu.memory_space<vmem>>) attributes {dimension_semantics = [#tpu.dimension_semantics<parallel>], iteration_bounds = array<i64: 1>, scalar_prefetch = 0 : i64, scratch_operands = 0 : i64, tpu.core_type = #tpu.core_type<tc>, window_params = [{transform_indices = @transform_0, window_bounds = array<i64: 16, 16>}, {pipeline_mode = #tpu.pipeline_mode<synchronous>, transform_indices = @transform_1, window_bounds = array<i64: 2, 16>}, {pipeline_mode = #tpu.pipeline_mode<synchronous>, transform_indices = @transform_2, window_bounds = array<i64: 1, 16>}, {pipeline_mode = #tpu.pipeline_mode<synchronous>, transform_indices = @transform_3, window_bounds = array<i64: 1, 16>}, {transform_indices = @transform_4, window_bounds = array<i64: 16, 16>}]} {
    %c0 = arith.constant 0 : index
    %c0_0 = arith.constant 0 : index
    %0 = vector.load %arg2[%c0, %c0_0] : memref<2x16xf32, #tpu.memory_space<vmem>>, vector<1x16xf32>
    %cst = arith.constant 6.250000e-02 : f32
    %1 = vector.broadcast %cst : f32 to vector<1x16xf32>
    %2 = arith.mulf %0, %1 : vector<1x16xf32>
    %c1 = arith.constant 1 : index
    %c0_1 = arith.constant 0 : index
    %3 = vector.load %arg2[%c1, %c0_1] : memref<2x16xf32, #tpu.memory_space<vmem>>, vector<1x16xf32>
    %cst_2 = arith.constant 6.250000e-02 : f32
    %4 = vector.broadcast %cst_2 : f32 to vector<1x16xf32>
    %5 = arith.mulf %3, %4 : vector<1x16xf32>
    %6 = arith.mulf %2, %2 : vector<1x16xf32>
    %7 = arith.subf %5, %6 : vector<1x16xf32>
    %c0_3 = arith.constant 0 : index
    %c0_4 = arith.constant 0 : index
    %8 = vector.load %arg1[%c0_3, %c0_4] : memref<16x16xf32, #tpu.memory_space<vmem>>, vector<16x16xf32>
    %9 = vector.broadcast %2 : vector<1x16xf32> to vector<16x16xf32>
    %10 = arith.subf %8, %9 : vector<16x16xf32>
    %cst_5 = arith.constant 9.99999974E-6 : f32
    %11 = vector.broadcast %cst_5 : f32 to vector<1x16xf32>
    %12 = arith.addf %7, %11 : vector<1x16xf32>
    %13 = math.rsqrt %12 : vector<1x16xf32>
    %14 = vector.broadcast %13 : vector<1x16xf32> to vector<16x16xf32>
    %15 = arith.mulf %10, %14 : vector<16x16xf32>
    %c0_6 = arith.constant 0 : index
    %c0_7 = arith.constant 0 : index
    %16 = vector.load %arg3[%c0_6, %c0_7] : memref<1x16xf32, #tpu.memory_space<vmem>>, vector<1x16xf32>
    %17 = vector.broadcast %16 : vector<1x16xf32> to vector<16x16xf32>
    %18 = arith.mulf %15, %17 : vector<16x16xf32>
    %c0_8 = arith.constant 0 : index
    %c0_9 = arith.constant 0 : index
    %19 = vector.load %arg4[%c0_8, %c0_9] : memref<1x16xf32, #tpu.memory_space<vmem>>, vector<1x16xf32>
    %20 = vector.broadcast %19 : vector<1x16xf32> to vector<16x16xf32>
    %21 = arith.addf %18, %20 : vector<16x16xf32>
    %cst_10 = arith.constant 0.000000e+00 : f32
    %22 = vector.broadcast %cst_10 : f32 to vector<16x16xf32>
    %23 = arith.maximumf %21, %22 : vector<16x16xf32>
    %c0_11 = arith.constant 0 : index
    %c0_12 = arith.constant 0 : index
    %24 = vector.load %arg5[%c0_11, %c0_12] : memref<16x16xf32, #tpu.memory_space<vmem>>, vector<16x16xf32>
    tpu.vector_store %arg5[%c0_11, %c0_12], %23 {strides = array<i32>} : memref<16x16xf32, #tpu.memory_space<vmem>>, vector<16x16xf32>,
    return
  }
  func.func @transform_0(%arg0: i32) -> (i32, i32) {
    %c0_i32 = arith.constant 0 : i32
    %c0_i32_0 = arith.constant 0 : i32
    return %arg0, %c0_i32 : i32, i32
  }
  func.func @transform_1(%arg0: i32) -> (i32, i32) {
    %c0_i32 = arith.constant 0 : i32
    %c0_i32_0 = arith.constant 0 : i32
    %c0_i32_1 = arith.constant 0 : i32
    return %c0_i32, %c0_i32_0 : i32, i32
  }
  func.func @transform_2(%arg0: i32) -> (i32, i32) {
    %c0_i32 = arith.constant 0 : i32
    %c0_i32_0 = arith.constant 0 : i32
    %c0_i32_1 = arith.constant 0 : i32
    return %c0_i32, %c0_i32_0 : i32, i32
  }
  func.func @transform_3(%arg0: i32) -> (i32, i32) {
    %c0_i32 = arith.constant 0 : i32
    %c0_i32_0 = arith.constant 0 : i32
    %c0_i32_1 = arith.constant 0 : i32
    return %c0_i32, %c0_i32_0 : i32, i32
  }
  func.func @transform_4(%arg0: i32) -> (i32, i32) {
    %c0_i32 = arith.constant 0 : i32
    %c0_i32_0 = arith.constant 0 : i32
    return %arg0, %c0_i32 : i32, i32
  }
}

module attributes {stable_mosaic.version = 11 : i64} {
  func.func @_bn_act_kernel(%arg0: i32, %arg1: memref<16x16xf32, #tpu.memory_space<vmem>>, %arg2: memref<2x16xf32, #tpu.memory_space<vmem>>, %arg3: memref<1x16xf32, #tpu.memory_space<vmem>>, %arg4: memref<1x16xf32, #tpu.memory_space<vmem>>, %arg5: memref<16x16xf32, #tpu.memory_space<vmem>>) attributes {dimension_semantics = [#tpu.dimension_semantics<parallel>], iteration_bounds = array<i64: 1>, scalar_prefetch = 0 : i64, scratch_operands = 0 : i64, tpu.core_type = #tpu.core_type<tc>, window_params = [{transform_indices = @transform_0, window_bounds = array<i64: 16, 16>}, {pipeline_mode = #tpu.pipeline_mode<synchronous>, transform_indices = @transform_1, window_bounds = array<i64: 2, 16>}, {pipeline_mode = #tpu.pipeline_mode<synchronous>, transform_indices = @transform_2, window_bounds = array<i64: 1, 16>}, {pipeline_mode = #tpu.pipeline_mode<synchronous>, transform_indices = @transform_3, window_bounds = array<i64: 1, 16>}, {transform_indices = @transform_4, window_bounds = array<i64: 16, 16>}]} {
    %c0 = arith.constant 0 : index
    %c0_0 = arith.constant 0 : index
    %0 = vector.load %arg2[%c0, %c0_0] : memref<2x16xf32, #tpu.memory_space<vmem>>, vector<1x16xf32>
    %cst = arith.constant 6.250000e-02 : f32
    %1 = vector.broadcast %cst : f32 to vector<1x16xf32>
    %2 = arith.mulf %0, %1 : vector<1x16xf32>
    %c1 = arith.constant 1 : index
    %c0_1 = arith.constant 0 : index
    %3 = vector.load %arg2[%c1, %c0_1] : memref<2x16xf32, #tpu.memory_space<vmem>>, vector<1x16xf32>
    %cst_2 = arith.constant 6.250000e-02 : f32
    %4 = vector.broadcast %cst_2 : f32 to vector<1x16xf32>
    %5 = arith.mulf %3, %4 : vector<1x16xf32>
    %6 = arith.mulf %2, %2 : vector<1x16xf32>
    %7 = arith.subf %5, %6 : vector<1x16xf32>
    %c0_3 = arith.constant 0 : index
    %c0_4 = arith.constant 0 : index
    %8 = vector.load %arg1[%c0_3, %c0_4] : memref<16x16xf32, #tpu.memory_space<vmem>>, vector<16x16xf32>
    %9 = vector.broadcast %2 : vector<1x16xf32> to vector<16x16xf32>
    %10 = arith.subf %8, %9 : vector<16x16xf32>
    %cst_5 = arith.constant 9.99999974E-6 : f32
    %11 = vector.broadcast %cst_5 : f32 to vector<1x16xf32>
    %12 = arith.addf %7, %11 : vector<1x16xf32>
    %13 = math.rsqrt %12 : vector<1x16xf32>
    %14 = vector.broadcast %13 : vector<1x16xf32> to vector<16x16xf32>
    %15 = arith.mulf %10, %14 : vector<16x16xf32>
    %c0_6 = arith.constant 0 : index
    %c0_7 = arith.constant 0 : index
    %16 = vector.load %arg3[%c0_6, %c0_7] : memref<1x16xf32, #tpu.memory_space<vmem>>, vector<1x16xf32>
    %17 = vector.broadcast %16 : vector<1x16xf32> to vector<16x16xf32>
    %18 = arith.mulf %15, %17 : vector<16x16xf32>
    %c0_8 = arith.constant 0 : index
    %c0_9 = arith.constant 0 : index
    %19 = vector.load %arg4[%c0_8, %c0_9] : memref<1x16xf32, #tpu.memory_space<vmem>>, vector<1x16xf32>
    %20 = vector.broadcast %19 : vector<1x16xf32> to vector<16x16xf32>
    %21 = arith.addf %18, %20 : vector<16x16xf32>
    %c0_10 = arith.constant 0 : index
    %c0_11 = arith.constant 0 : index
    %22 = vector.load %arg5[%c0_10, %c0_11] : memref<16x16xf32, #tpu.memory_space<vmem>>, vector<16x16xf32>
    tpu.vector_store %arg5[%c0_10, %c0_11], %21 {strides = array<i32>} : memref<16x16xf32, #tpu.memory_space<vmem>>, vector<16x16xf32>,
    return
  }
  func.func @transform_0(%arg0: i32) -> (i32, i32) {
    %c0_i32 = arith.constant 0 : i32
    %c0_i32_0 = arith.constant 0 : i32
    return %arg0, %c0_i32 : i32, i32
  }
  func.func @transform_1(%arg0: i32) -> (i32, i32) {
    %c0_i32 = arith.constant 0 : i32
    %c0_i32_0 = arith.constant 0 : i32
    %c0_i32_1 = arith.constant 0 : i32
    return %c0_i32, %c0_i32_0 : i32, i32
  }
  func.func @transform_2(%arg0: i32) -> (i32, i32) {
    %c0_i32 = arith.constant 0 : i32
    %c0_i32_0 = arith.constant 0 : i32
    %c0_i32_1 = arith.constant 0 : i32
    return %c0_i32, %c0_i32_0 : i32, i32
  }
  func.func @transform_3(%arg0: i32) -> (i32, i32) {
    %c0_i32 = arith.constant 0 : i32
    %c0_i32_0 = arith.constant 0 : i32
    %c0_i32_1 = arith.constant 0 : i32
    return %c0_i32, %c0_i32_0 : i32, i32
  }
  func.func @transform_4(%arg0: i32) -> (i32, i32) {
    %c0_i32 = arith.constant 0 : i32
    %c0_i32_0 = arith.constant 0 : i32
    return %arg0, %c0_i32 : i32, i32
  }
}

module attributes {stable_mosaic.version = 11 : i64} {
  func.func @_mm_stats_kernel(%arg0: i32, %arg1: memref<16x48xbf16, #tpu.memory_space<vmem>>, %arg2: memref<48x16xbf16, #tpu.memory_space<vmem>>, %arg3: memref<16x16xf32, #tpu.memory_space<vmem>>, %arg4: memref<2x16xf32, #tpu.memory_space<vmem>>) attributes {dimension_semantics = [#tpu.dimension_semantics<arbitrary>], iteration_bounds = array<i64: 1>, scalar_prefetch = 0 : i64, scratch_operands = 0 : i64, tpu.core_type = #tpu.core_type<tc>, window_params = [{transform_indices = @transform_0, window_bounds = array<i64: 16, 48>}, {pipeline_mode = #tpu.pipeline_mode<synchronous>, transform_indices = @transform_1, window_bounds = array<i64: 48, 16>}, {transform_indices = @transform_2, window_bounds = array<i64: 16, 16>}, {pipeline_mode = #tpu.pipeline_mode<synchronous>, transform_indices = @transform_3, window_bounds = array<i64: 2, 16>}]} {
    %c0 = arith.constant 0 : index
    %c0_0 = arith.constant 0 : index
    %0 = vector.load %arg1[%c0, %c0_0] : memref<16x48xbf16, #tpu.memory_space<vmem>>, vector<16x48xbf16>
    %c0_1 = arith.constant 0 : index
    %c0_2 = arith.constant 0 : index
    %1 = vector.load %arg2[%c0_1, %c0_2] : memref<48x16xbf16, #tpu.memory_space<vmem>>, vector<48x16xbf16>
    %cst = arith.constant dense<0.000000e+00> : vector<16x16xf32>
    %2 = tpu.matmul %0, %1, %cst {dimension_numbers = #tpu.dot_dimension_numbers<[1], [0], [0], [1], [0, 0, 1, 1], [], []>} : vector<16x48xbf16>, vector<48x16xbf16>, vector<16x16xf32> -> vector<16x16xf32>
    %c0_3 = arith.constant 0 : index
    %c0_4 = arith.constant 0 : index
    %3 = vector.load %arg3[%c0_3, %c0_4] : memref<16x16xf32, #tpu.memory_space<vmem>>, vector<16x16xf32>
    tpu.vector_store %arg3[%c0_3, %c0_4], %2 {strides = array<i32>} : memref<16x16xf32, #tpu.memory_space<vmem>>, vector<16x16xf32>,
    %4 = tpu.iota {dimensions = array<i32: 0>} : vector<16x1xi32>
    %c16_i32 = arith.constant 16 : i32
    %5 = arith.muli %arg0, %c16_i32 : i32
    %6 = vector.broadcast %5 : i32 to vector<16x1xi32>
    %7 = arith.addi %4, %6 : vector<16x1xi32>
    %c16_i32_5 = arith.constant 16 : i32
    %8 = vector.broadcast %c16_i32_5 : i32 to vector<16x1xi32>
    %9 = arith.cmpi slt, %7, %8 : vector<16x1xi32>
    %10 = arith.extui %9 : vector<16x1xi1> to vector<16x1xi32>
    %11 = arith.sitofp %10 : vector<16x1xi32> to vector<16x1xf32>
    %12 = vector.broadcast %11 : vector<16x1xf32> to vector<16x16xf32>
    %13 = arith.mulf %2, %12 : vector<16x16xf32>
    %cst_6 = arith.constant dense<0.000000e+00> : vector<16xf32>
    %14 = vector.multi_reduction <add>, %13, %cst_6 [0] : vector<16x16xf32> to vector<16xf32>
    %15 = vector.shape_cast %14 : vector<16xf32> to vector<1x16xf32>
    %16 = arith.mulf %13, %2 : vector<16x16xf32>
    %cst_7 = arith.constant dense<0.000000e+00> : vector<16xf32>
    %17 = vector.multi_reduction <add>, %16, %cst_7 [0] : vector<16x16xf32> to vector<16xf32>
    %18 = vector.shape_cast %17 : vector<16xf32> to vector<1x16xf32>
    %19 = tpu.concatenate %15, %18 in 0 : vector<1x16xf32>, vector<1x16xf32> -> vector<2x16xf32>
    %c0_i32 = arith.constant 0 : i32
    %20 = arith.cmpi eq, %arg0, %c0_i32 : i32
    %21 = arith.extui %20 : i1 to i32
    %c0_i32_8 = arith.constant 0 : i32
    %22 = arith.cmpi ne, %21, %c0_i32_8 : i32
    scf.if %22 {
      %c0_11 = arith.constant 0 : index
      %c0_12 = arith.constant 0 : index
      %26 = vector.load %arg4[%c0_11, %c0_12] : memref<2x16xf32, #tpu.memory_space<vmem>>, vector<2x16xf32>
      tpu.vector_store %arg4[%c0_11, %c0_12], %19 {strides = array<i32>} : memref<2x16xf32, #tpu.memory_space<vmem>>, vector<2x16xf32>,
    } else {
    }
    %c0_i32_9 = arith.constant 0 : i32
    %23 = arith.cmpi sgt, %arg0, %c0_i32_9 : i32
    %24 = arith.extui %23 : i1 to i32
    %c0_i32_10 = arith.constant 0 : i32
    %25 = arith.cmpi ne, %24, %c0_i32_10 : i32
    scf.if %25 {
      %c0_11 = arith.constant 0 : index
      %c0_12 = arith.constant 0 : index
      %26 = vector.load %arg4[%c0_11, %c0_12] : memref<2x16xf32, #tpu.memory_space<vmem>>, vector<2x16xf32>
      %27 = arith.addf %26, %19 : vector<2x16xf32>
      %c0_13 = arith.constant 0 : index
      %c0_14 = arith.constant 0 : index
      %28 = vector.load %arg4[%c0_13, %c0_14] : memref<2x16xf32, #tpu.memory_space<vmem>>, vector<2x16xf32>
      tpu.vector_store %arg4[%c0_13, %c0_14], %27 {strides = array<i32>} : memref<2x16xf32, #tpu.memory_space<vmem>>, vector<2x16xf32>,
    } else {
    }
    return
  }
  func.func @transform_0(%arg0: i32) -> (i32, i32) {
    %c0_i32 = arith.constant 0 : i32
    %c0_i32_0 = arith.constant 0 : i32
    return %arg0, %c0_i32 : i32, i32
  }
  func.func @transform_1(%arg0: i32) -> (i32, i32) {
    %c0_i32 = arith.constant 0 : i32
    %c0_i32_0 = arith.constant 0 : i32
    %c0_i32_1 = arith.constant 0 : i32
    return %c0_i32, %c0_i32_0 : i32, i32
  }
  func.func @transform_2(%arg0: i32) -> (i32, i32) {
    %c0_i32 = arith.constant 0 : i32
    %c0_i32_0 = arith.constant 0 : i32
    return %arg0, %c0_i32 : i32, i32
  }
  func.func @transform_3(%arg0: i32) -> (i32, i32) {
    %c0_i32 = arith.constant 0 : i32
    %c0_i32_0 = arith.constant 0 : i32
    %c0_i32_1 = arith.constant 0 : i32
    return %c0_i32, %c0_i32_0 : i32, i32
  }
}

module attributes {stable_mosaic.version = 11 : i64} {
  func.func @_highway_kernel(%arg0: i32, %arg1: memref<16x16xf32, #tpu.memory_space<vmem>>, %arg2: memref<2x16x16xbf16, #tpu.memory_space<vmem>>, %arg3: memref<2x1x16xf32, #tpu.memory_space<vmem>>, %arg4: memref<2x16x16xbf16, #tpu.memory_space<vmem>>, %arg5: memref<2x1x16xf32, #tpu.memory_space<vmem>>, %arg6: memref<16x16xf32, #tpu.memory_space<vmem>>) attributes {dimension_semantics = [#tpu.dimension_semantics<parallel>], iteration_bounds = array<i64: 1>, scalar_prefetch = 0 : i64, scratch_operands = 0 : i64, tpu.core_type = #tpu.core_type<tc>, window_params = [{transform_indices = @transform_0, window_bounds = array<i64: 16, 16>}, {pipeline_mode = #tpu.pipeline_mode<synchronous>, transform_indices = @transform_1, window_bounds = array<i64: 2, 16, 16>}, {pipeline_mode = #tpu.pipeline_mode<synchronous>, transform_indices = @transform_2, window_bounds = array<i64: 2, 1, 16>}, {pipeline_mode = #tpu.pipeline_mode<synchronous>, transform_indices = @transform_3, window_bounds = array<i64: 2, 16, 16>}, {pipeline_mode = #tpu.pipeline_mode<synchronous>, transform_indices = @transform_4, window_bounds = array<i64: 2, 1, 16>}, {transform_indices = @transform_5, window_bounds = array<i64: 16, 16>}]} {
    %c0 = arith.constant 0 : index
    %c0_0 = arith.constant 0 : index
    %0 = vector.load %arg1[%c0, %c0_0] : memref<16x16xf32, #tpu.memory_space<vmem>>, vector<16x16xf32>
    %c0_1 = arith.constant 0 : index
    %c0_2 = arith.constant 0 : index
    %c0_3 = arith.constant 0 : index
    %1 = vector.load %arg2[%c0_1, %c0_2, %c0_3] : memref<2x16x16xbf16, #tpu.memory_space<vmem>>, vector<1x16x16xbf16>
    %2 = vector.shape_cast %1 : vector<1x16x16xbf16> to vector<16x16xbf16>
    %c0_4 = arith.constant 0 : index
    %c0_5 = arith.constant 0 : index
    %c0_6 = arith.constant 0 : index
    %3 = vector.load %arg4[%c0_4, %c0_5, %c0_6] : memref<2x16x16xbf16, #tpu.memory_space<vmem>>, vector<1x16x16xbf16>
    %4 = vector.shape_cast %3 : vector<1x16x16xbf16> to vector<16x16xbf16>
    %5 = arith.truncf %0 : vector<16x16xf32> to vector<16x16xbf16>
    %cst = arith.constant dense<0.000000e+00> : vector<16x16xf32>
    %6 = tpu.matmul %5, %2, %cst {dimension_numbers = #tpu.dot_dimension_numbers<[1], [0], [0], [1], [0, 0, 1, 1], [], []>} : vector<16x16xbf16>, vector<16x16xbf16>, vector<16x16xf32> -> vector<16x16xf32>
    %c0_7 = arith.constant 0 : index
    %c0_8 = arith.constant 0 : index
    %c0_9 = arith.constant 0 : index
    %7 = vector.load %arg3[%c0_7, %c0_8, %c0_9] : memref<2x1x16xf32, #tpu.memory_space<vmem>>, vector<1x1x16xf32>
    %8 = vector.shape_cast %7 : vector<1x1x16xf32> to vector<1x16xf32>
    %9 = vector.broadcast %8 : vector<1x16xf32> to vector<16x16xf32>
    %10 = arith.addf %6, %9 : vector<16x16xf32>
    %cst_10 = arith.constant 0.000000e+00 : f32
    %11 = vector.broadcast %cst_10 : f32 to vector<16x16xf32>
    %12 = arith.maximumf %10, %11 : vector<16x16xf32>
    %cst_11 = arith.constant dense<0.000000e+00> : vector<16x16xf32>
    %13 = tpu.matmul %5, %4, %cst_11 {dimension_numbers = #tpu.dot_dimension_numbers<[1], [0], [0], [1], [0, 0, 1, 1], [], []>} : vector<16x16xbf16>, vector<16x16xbf16>, vector<16x16xf32> -> vector<16x16xf32>
    %c0_12 = arith.constant 0 : index
    %c0_13 = arith.constant 0 : index
    %c0_14 = arith.constant 0 : index
    %14 = vector.load %arg5[%c0_12, %c0_13, %c0_14] : memref<2x1x16xf32, #tpu.memory_space<vmem>>, vector<1x1x16xf32>
    %15 = vector.shape_cast %14 : vector<1x1x16xf32> to vector<1x16xf32>
    %16 = vector.broadcast %15 : vector<1x16xf32> to vector<16x16xf32>
    %17 = arith.addf %13, %16 : vector<16x16xf32>
    %18 = arith.negf %17 : vector<16x16xf32>
    %19 = math.exp %18 : vector<16x16xf32>
    %cst_15 = arith.constant 1.000000e+00 : f32
    %20 = vector.broadcast %cst_15 : f32 to vector<16x16xf32>
    %21 = arith.addf %20, %19 : vector<16x16xf32>
    %22 = arith.divf %20, %21 : vector<16x16xf32>
    %23 = arith.mulf %22, %12 : vector<16x16xf32>
    %cst_16 = arith.constant 1.000000e+00 : f32
    %24 = vector.broadcast %cst_16 : f32 to vector<16x16xf32>
    %25 = arith.subf %24, %22 : vector<16x16xf32>
    %26 = arith.mulf %25, %0 : vector<16x16xf32>
    %27 = arith.addf %23, %26 : vector<16x16xf32>
    %c1 = arith.constant 1 : index
    %c0_17 = arith.constant 0 : index
    %c0_18 = arith.constant 0 : index
    %28 = vector.load %arg2[%c1, %c0_17, %c0_18] : memref<2x16x16xbf16, #tpu.memory_space<vmem>>, vector<1x16x16xbf16>
    %29 = vector.shape_cast %28 : vector<1x16x16xbf16> to vector<16x16xbf16>
    %c1_19 = arith.constant 1 : index
    %c0_20 = arith.constant 0 : index
    %c0_21 = arith.constant 0 : index
    %30 = vector.load %arg4[%c1_19, %c0_20, %c0_21] : memref<2x16x16xbf16, #tpu.memory_space<vmem>>, vector<1x16x16xbf16>
    %31 = vector.shape_cast %30 : vector<1x16x16xbf16> to vector<16x16xbf16>
    %32 = arith.truncf %27 : vector<16x16xf32> to vector<16x16xbf16>
    %cst_22 = arith.constant dense<0.000000e+00> : vector<16x16xf32>
    %33 = tpu.matmul %32, %29, %cst_22 {dimension_numbers = #tpu.dot_dimension_numbers<[1], [0], [0], [1], [0, 0, 1, 1], [], []>} : vector<16x16xbf16>, vector<16x16xbf16>, vector<16x16xf32> -> vector<16x16xf32>
    %c1_23 = arith.constant 1 : index
    %c0_24 = arith.constant 0 : index
    %c0_25 = arith.constant 0 : index
    %34 = vector.load %arg3[%c1_23, %c0_24, %c0_25] : memref<2x1x16xf32, #tpu.memory_space<vmem>>, vector<1x1x16xf32>
    %35 = vector.shape_cast %34 : vector<1x1x16xf32> to vector<1x16xf32>
    %36 = vector.broadcast %35 : vector<1x16xf32> to vector<16x16xf32>
    %37 = arith.addf %33, %36 : vector<16x16xf32>
    %cst_26 = arith.constant 0.000000e+00 : f32
    %38 = vector.broadcast %cst_26 : f32 to vector<16x16xf32>
    %39 = arith.maximumf %37, %38 : vector<16x16xf32>
    %cst_27 = arith.constant dense<0.000000e+00> : vector<16x16xf32>
    %40 = tpu.matmul %32, %31, %cst_27 {dimension_numbers = #tpu.dot_dimension_numbers<[1], [0], [0], [1], [0, 0, 1, 1], [], []>} : vector<16x16xbf16>, vector<16x16xbf16>, vector<16x16xf32> -> vector<16x16xf32>
    %c1_28 = arith.constant 1 : index
    %c0_29 = arith.constant 0 : index
    %c0_30 = arith.constant 0 : index
    %41 = vector.load %arg5[%c1_28, %c0_29, %c0_30] : memref<2x1x16xf32, #tpu.memory_space<vmem>>, vector<1x1x16xf32>
    %42 = vector.shape_cast %41 : vector<1x1x16xf32> to vector<1x16xf32>
    %43 = vector.broadcast %42 : vector<1x16xf32> to vector<16x16xf32>
    %44 = arith.addf %40, %43 : vector<16x16xf32>
    %45 = arith.negf %44 : vector<16x16xf32>
    %46 = math.exp %45 : vector<16x16xf32>
    %cst_31 = arith.constant 1.000000e+00 : f32
    %47 = vector.broadcast %cst_31 : f32 to vector<16x16xf32>
    %48 = arith.addf %47, %46 : vector<16x16xf32>
    %49 = arith.divf %47, %48 : vector<16x16xf32>
    %50 = arith.mulf %49, %39 : vector<16x16xf32>
    %cst_32 = arith.constant 1.000000e+00 : f32
    %51 = vector.broadcast %cst_32 : f32 to vector<16x16xf32>
    %52 = arith.subf %51, %49 : vector<16x16xf32>
    %53 = arith.mulf %52, %27 : vector<16x16xf32>
    %54 = arith.addf %50, %53 : vector<16x16xf32>
    %c0_33 = arith.constant 0 : index
    %c0_34 = arith.constant 0 : index
    %55 = vector.load %arg6[%c0_33, %c0_34] : memref<16x16xf32, #tpu.memory_space<vmem>>, vector<16x16xf32>
    tpu.vector_store %arg6[%c0_33, %c0_34], %54 {strides = array<i32>} : memref<16x16xf32, #tpu.memory_space<vmem>>, vector<16x16xf32>,
    return
  }
  func.func @transform_0(%arg0: i32) -> (i32, i32) {
    %c0_i32 = arith.constant 0 : i32
    %c0_i32_0 = arith.constant 0 : i32
    return %arg0, %c0_i32 : i32, i32
  }
  func.func @transform_1(%arg0: i32) -> (i32, i32, i32) {
    %c0_i32 = arith.constant 0 : i32
    %c0_i32_0 = arith.constant 0 : i32
    %c0_i32_1 = arith.constant 0 : i32
    %c0_i32_2 = arith.constant 0 : i32
    return %c0_i32, %c0_i32_0, %c0_i32_1 : i32, i32, i32
  }
  func.func @transform_2(%arg0: i32) -> (i32, i32, i32) {
    %c0_i32 = arith.constant 0 : i32
    %c0_i32_0 = arith.constant 0 : i32
    %c0_i32_1 = arith.constant 0 : i32
    %c0_i32_2 = arith.constant 0 : i32
    return %c0_i32, %c0_i32_0, %c0_i32_1 : i32, i32, i32
  }
  func.func @transform_3(%arg0: i32) -> (i32, i32, i32) {
    %c0_i32 = arith.constant 0 : i32
    %c0_i32_0 = arith.constant 0 : i32
    %c0_i32_1 = arith.constant 0 : i32
    %c0_i32_2 = arith.constant 0 : i32
    return %c0_i32, %c0_i32_0, %c0_i32_1 : i32, i32, i32
  }
  func.func @transform_4(%arg0: i32) -> (i32, i32, i32) {
    %c0_i32 = arith.constant 0 : i32
    %c0_i32_0 = arith.constant 0 : i32
    %c0_i32_1 = arith.constant 0 : i32
    %c0_i32_2 = arith.constant 0 : i32
    return %c0_i32, %c0_i32_0, %c0_i32_1 : i32, i32, i32
  }
  func.func @transform_5(%arg0: i32) -> (i32, i32) {
    %c0_i32 = arith.constant 0 : i32
    %c0_i32_0 = arith.constant 0 : i32
    return %arg0, %c0_i32 : i32, i32
  }
}

module attributes {stable_mosaic.version = 11 : i64} {
  func.func @_mm_kernel(%arg0: i32, %arg1: memref<16x16xbf16, #tpu.memory_space<vmem>>, %arg2: memref<16x96xbf16, #tpu.memory_space<vmem>>, %arg3: memref<1x96xf32, #tpu.memory_space<vmem>>, %arg4: memref<16x96xf32, #tpu.memory_space<vmem>>) attributes {dimension_semantics = [#tpu.dimension_semantics<parallel>], iteration_bounds = array<i64: 1>, scalar_prefetch = 0 : i64, scratch_operands = 0 : i64, tpu.core_type = #tpu.core_type<tc>, window_params = [{transform_indices = @transform_0, window_bounds = array<i64: 16, 16>}, {pipeline_mode = #tpu.pipeline_mode<synchronous>, transform_indices = @transform_1, window_bounds = array<i64: 16, 96>}, {pipeline_mode = #tpu.pipeline_mode<synchronous>, transform_indices = @transform_2, window_bounds = array<i64: 1, 96>}, {transform_indices = @transform_3, window_bounds = array<i64: 16, 96>}]} {
    %c0 = arith.constant 0 : index
    %c0_0 = arith.constant 0 : index
    %0 = vector.load %arg1[%c0, %c0_0] : memref<16x16xbf16, #tpu.memory_space<vmem>>, vector<16x16xbf16>
    %c0_1 = arith.constant 0 : index
    %c0_2 = arith.constant 0 : index
    %1 = vector.load %arg2[%c0_1, %c0_2] : memref<16x96xbf16, #tpu.memory_space<vmem>>, vector<16x96xbf16>
    %cst = arith.constant dense<0.000000e+00> : vector<16x96xf32>
    %2 = tpu.matmul %0, %1, %cst {dimension_numbers = #tpu.dot_dimension_numbers<[1], [0], [0], [1], [0, 0, 1, 1], [], []>} : vector<16x16xbf16>, vector<16x96xbf16>, vector<16x96xf32> -> vector<16x96xf32>
    %c0_3 = arith.constant 0 : index
    %c0_4 = arith.constant 0 : index
    %3 = vector.load %arg3[%c0_3, %c0_4] : memref<1x96xf32, #tpu.memory_space<vmem>>, vector<1x96xf32>
    %4 = vector.broadcast %3 : vector<1x96xf32> to vector<16x96xf32>
    %5 = arith.addf %2, %4 : vector<16x96xf32>
    %c0_5 = arith.constant 0 : index
    %c0_6 = arith.constant 0 : index
    %6 = vector.load %arg4[%c0_5, %c0_6] : memref<16x96xf32, #tpu.memory_space<vmem>>, vector<16x96xf32>
    tpu.vector_store %arg4[%c0_5, %c0_6], %5 {strides = array<i32>} : memref<16x96xf32, #tpu.memory_space<vmem>>, vector<16x96xf32>,
    return
  }
  func.func @transform_0(%arg0: i32) -> (i32, i32) {
    %c0_i32 = arith.constant 0 : i32
    %c0_i32_0 = arith.constant 0 : i32
    return %arg0, %c0_i32 : i32, i32
  }
  func.func @transform_1(%arg0: i32) -> (i32, i32) {
    %c0_i32 = arith.constant 0 : i32
    %c0_i32_0 = arith.constant 0 : i32
    %c0_i32_1 = arith.constant 0 : i32
    return %c0_i32, %c0_i32_0 : i32, i32
  }
  func.func @transform_2(%arg0: i32) -> (i32, i32) {
    %c0_i32 = arith.constant 0 : i32
    %c0_i32_0 = arith.constant 0 : i32
    %c0_i32_1 = arith.constant 0 : i32
    return %c0_i32, %c0_i32_0 : i32, i32
  }
  func.func @transform_3(%arg0: i32) -> (i32, i32) {
    %c0_i32 = arith.constant 0 : i32
    %c0_i32_0 = arith.constant 0 : i32
    return %arg0, %c0_i32 : i32, i32
  }
}

module attributes {stable_mosaic.version = 11 : i64} {
  func.func @_bigru_kernel(%arg0: i32, %arg1: i32, %arg2: memref<1x1x8x48xf32, #tpu.memory_space<vmem>>, %arg3: memref<1x16x48xbf16, #tpu.memory_space<vmem>>, %arg4: memref<1x1x48xf32, #tpu.memory_space<vmem>>, %arg5: memref<1x1x8x16xf32, #tpu.memory_space<vmem>>, %arg6: memref<8x16xf32, #tpu.memory_space<vmem>>) attributes {dimension_semantics = [#tpu.dimension_semantics<parallel>, #tpu.dimension_semantics<arbitrary>], iteration_bounds = array<i64: 2, 8>, scalar_prefetch = 0 : i64, scratch_operands = 1 : i64, tpu.core_type = #tpu.core_type<tc>, window_params = [{transform_indices = @transform_0, window_bounds = array<i64: 1, 1, 8, 48>}, {transform_indices = @transform_1, window_bounds = array<i64: 1, 16, 48>}, {transform_indices = @transform_2, window_bounds = array<i64: 1, 1, 48>}, {transform_indices = @transform_3, window_bounds = array<i64: 1, 1, 8, 16>}]} {
    %c0_i32 = arith.constant 0 : i32
    %0 = arith.cmpi eq, %arg1, %c0_i32 : i32
    %1 = arith.extui %0 : i1 to i32
    %c0_i32_0 = arith.constant 0 : i32
    %2 = arith.cmpi ne, %1, %c0_i32_0 : i32
    scf.if %2 {
      %cst_21 = arith.constant 0.000000e+00 : f32
      %44 = vector.broadcast %cst_21 : f32 to vector<8x16xf32>
      %c0_22 = arith.constant 0 : index
      %c0_23 = arith.constant 0 : index
      %45 = vector.load %arg6[%c0_22, %c0_23] : memref<8x16xf32, #tpu.memory_space<vmem>>, vector<8x16xf32>
      tpu.vector_store %arg6[%c0_22, %c0_23], %44 {strides = array<i32>} : memref<8x16xf32, #tpu.memory_space<vmem>>, vector<8x16xf32>,
    } else {
    }
    %c0 = arith.constant 0 : index
    %c0_1 = arith.constant 0 : index
    %c0_2 = arith.constant 0 : index
    %c0_3 = arith.constant 0 : index
    %3 = vector.load %arg2[%c0, %c0_1, %c0_2, %c0_3] : memref<1x1x8x48xf32, #tpu.memory_space<vmem>>, vector<1x1x8x48xf32>
    %4 = vector.shape_cast %3 : vector<1x1x8x48xf32> to vector<8x48xf32>
    %c0_4 = arith.constant 0 : index
    %c0_5 = arith.constant 0 : index
    %c0_6 = arith.constant 0 : index
    %5 = vector.load %arg3[%c0_4, %c0_5, %c0_6] : memref<1x16x48xbf16, #tpu.memory_space<vmem>>, vector<1x16x48xbf16>
    %6 = vector.shape_cast %5 : vector<1x16x48xbf16> to vector<16x48xbf16>
    %c0_7 = arith.constant 0 : index
    %c0_8 = arith.constant 0 : index
    %c0_9 = arith.constant 0 : index
    %7 = vector.load %arg4[%c0_7, %c0_8, %c0_9] : memref<1x1x48xf32, #tpu.memory_space<vmem>>, vector<1x1x48xf32>
    %8 = vector.shape_cast %7 : vector<1x1x48xf32> to vector<1x48xf32>
    %c0_10 = arith.constant 0 : index
    %c0_11 = arith.constant 0 : index
    %9 = vector.load %arg6[%c0_10, %c0_11] : memref<8x16xf32, #tpu.memory_space<vmem>>, vector<8x16xf32>
    %10 = arith.truncf %9 : vector<8x16xf32> to vector<8x16xbf16>
    %cst = arith.constant dense<0.000000e+00> : vector<8x48xf32>
    %11 = tpu.matmul %10, %6, %cst {dimension_numbers = #tpu.dot_dimension_numbers<[1], [0], [0], [1], [0, 0, 1, 1], [], []>} : vector<8x16xbf16>, vector<16x48xbf16>, vector<8x48xf32> -> vector<8x48xf32>
    %12 = vector.broadcast %8 : vector<1x48xf32> to vector<8x48xf32>
    %13 = arith.addf %11, %12 : vector<8x48xf32>
    %14 = vector.extract_strided_slice %4 {offsets = [0, 0], sizes = [8, 16], strides = [1, 1]} : vector<8x48xf32> to vector<8x16xf32>
    %15 = vector.extract_strided_slice %13 {offsets = [0, 0], sizes = [8, 16], strides = [1, 1]} : vector<8x48xf32> to vector<8x16xf32>
    %16 = arith.addf %14, %15 : vector<8x16xf32>
    %17 = arith.negf %16 : vector<8x16xf32>
    %18 = math.exp %17 : vector<8x16xf32>
    %cst_12 = arith.constant 1.000000e+00 : f32
    %19 = vector.broadcast %cst_12 : f32 to vector<8x16xf32>
    %20 = arith.addf %19, %18 : vector<8x16xf32>
    %21 = arith.divf %19, %20 : vector<8x16xf32>
    %22 = vector.extract_strided_slice %4 {offsets = [0, 16], sizes = [8, 16], strides = [1, 1]} : vector<8x48xf32> to vector<8x16xf32>
    %23 = vector.extract_strided_slice %13 {offsets = [0, 16], sizes = [8, 16], strides = [1, 1]} : vector<8x48xf32> to vector<8x16xf32>
    %24 = arith.addf %22, %23 : vector<8x16xf32>
    %25 = arith.negf %24 : vector<8x16xf32>
    %26 = math.exp %25 : vector<8x16xf32>
    %cst_13 = arith.constant 1.000000e+00 : f32
    %27 = vector.broadcast %cst_13 : f32 to vector<8x16xf32>
    %28 = arith.addf %27, %26 : vector<8x16xf32>
    %29 = arith.divf %27, %28 : vector<8x16xf32>
    %30 = vector.extract_strided_slice %4 {offsets = [0, 32], sizes = [8, 16], strides = [1, 1]} : vector<8x48xf32> to vector<8x16xf32>
    %31 = vector.extract_strided_slice %13 {offsets = [0, 32], sizes = [8, 16], strides = [1, 1]} : vector<8x48xf32> to vector<8x16xf32>
    %32 = arith.mulf %21, %31 : vector<8x16xf32>
    %33 = arith.addf %30, %32 : vector<8x16xf32>
    %34 = math.tanh %33 : vector<8x16xf32>
    %cst_14 = arith.constant 1.000000e+00 : f32
    %35 = vector.broadcast %cst_14 : f32 to vector<8x16xf32>
    %36 = arith.subf %35, %29 : vector<8x16xf32>
    %37 = arith.mulf %36, %34 : vector<8x16xf32>
    %38 = arith.mulf %29, %9 : vector<8x16xf32>
    %39 = arith.addf %37, %38 : vector<8x16xf32>
    %c0_15 = arith.constant 0 : index
    %c0_16 = arith.constant 0 : index
    %40 = vector.load %arg6[%c0_15, %c0_16] : memref<8x16xf32, #tpu.memory_space<vmem>>, vector<8x16xf32>
    tpu.vector_store %arg6[%c0_15, %c0_16], %39 {strides = array<i32>} : memref<8x16xf32, #tpu.memory_space<vmem>>, vector<8x16xf32>,
    %c0_17 = arith.constant 0 : index
    %c0_18 = arith.constant 0 : index
    %c0_19 = arith.constant 0 : index
    %c0_20 = arith.constant 0 : index
    %41 = vector.load %arg5[%c0_17, %c0_18, %c0_19, %c0_20] : memref<1x1x8x16xf32, #tpu.memory_space<vmem>>, vector<1x1x8x16xf32>
    %42 = vector.shape_cast %41 : vector<1x1x8x16xf32> to vector<8x16xf32>
    %43 = vector.shape_cast %39 : vector<8x16xf32> to vector<1x1x8x16xf32>
    tpu.vector_store %arg5[%c0_17, %c0_18, %c0_19, %c0_20], %43 {strides = array<i32>} : memref<1x1x8x16xf32, #tpu.memory_space<vmem>>, vector<1x1x8x16xf32>,
    return
  }
  func.func @transform_0(%arg0: i32, %arg1: i32) -> (i32, i32, i32, i32) {
    %c2_i32 = arith.constant 2 : i32
    %0 = arith.muli %c2_i32, %arg1 : i32
    %c7_i32 = arith.constant 7 : i32
    %1 = arith.subi %c7_i32, %0 : i32
    %2 = arith.muli %arg0, %1 : i32
    %3 = arith.addi %arg1, %2 : i32
    %c0_i32 = arith.constant 0 : i32
    %c0_i32_0 = arith.constant 0 : i32
    %c0_i32_1 = arith.constant 0 : i32
    return %arg0, %3, %c0_i32, %c0_i32_0 : i32, i32, i32, i32
  }
  func.func @transform_1(%arg0: i32, %arg1: i32) -> (i32, i32, i32) {
    %c0_i32 = arith.constant 0 : i32
    %c0_i32_0 = arith.constant 0 : i32
    %c0_i32_1 = arith.constant 0 : i32
    return %arg0, %c0_i32, %c0_i32_0 : i32, i32, i32
  }
  func.func @transform_2(%arg0: i32, %arg1: i32) -> (i32, i32, i32) {
    %c0_i32 = arith.constant 0 : i32
    %c0_i32_0 = arith.constant 0 : i32
    %c0_i32_1 = arith.constant 0 : i32
    return %arg0, %c0_i32, %c0_i32_0 : i32, i32, i32
  }
  func.func @transform_3(%arg0: i32, %arg1: i32) -> (i32, i32, i32, i32) {
    %c2_i32 = arith.constant 2 : i32
    %0 = arith.muli %c2_i32, %arg1 : i32
    %c7_i32 = arith.constant 7 : i32
    %1 = arith.subi %c7_i32, %0 : i32
    %2 = arith.muli %arg0, %1 : i32
    %3 = arith.addi %arg1, %2 : i32
    %c0_i32 = arith.constant 0 : i32
    %c0_i32_0 = arith.constant 0 : i32
    %c0_i32_1 = arith.constant 0 : i32
    return %arg0, %3, %c0_i32, %c0_i32_0 : i32, i32, i32, i32
  }
}

module attributes {stable_mosaic.version = 11 : i64} {
  func.func @_mm_kernel(%arg0: i32, %arg1: memref<16x32xf32, #tpu.memory_space<vmem>>, %arg2: memref<32x32xf32, #tpu.memory_space<vmem>>, %arg3: memref<16x32xf32, #tpu.memory_space<vmem>>) attributes {dimension_semantics = [#tpu.dimension_semantics<parallel>], iteration_bounds = array<i64: 1>, scalar_prefetch = 0 : i64, scratch_operands = 0 : i64, tpu.core_type = #tpu.core_type<tc>, window_params = [{transform_indices = @transform_0, window_bounds = array<i64: 16, 32>}, {pipeline_mode = #tpu.pipeline_mode<synchronous>, transform_indices = @transform_1, window_bounds = array<i64: 32, 32>}, {transform_indices = @transform_2, window_bounds = array<i64: 16, 32>}]} {
    %c0 = arith.constant 0 : index
    %c0_0 = arith.constant 0 : index
    %0 = vector.load %arg1[%c0, %c0_0] : memref<16x32xf32, #tpu.memory_space<vmem>>, vector<16x32xf32>
    %c0_1 = arith.constant 0 : index
    %c0_2 = arith.constant 0 : index
    %1 = vector.load %arg2[%c0_1, %c0_2] : memref<32x32xf32, #tpu.memory_space<vmem>>, vector<32x32xf32>
    %cst = arith.constant dense<0.000000e+00> : vector<16x32xf32>
    %2 = tpu.matmul %0, %1, %cst {dimension_numbers = #tpu.dot_dimension_numbers<[1], [0], [0], [1], [0, 0, 1, 1], [], []>} : vector<16x32xf32>, vector<32x32xf32>, vector<16x32xf32> -> vector<16x32xf32>
    %c0_3 = arith.constant 0 : index
    %c0_4 = arith.constant 0 : index
    %3 = vector.load %arg3[%c0_3, %c0_4] : memref<16x32xf32, #tpu.memory_space<vmem>>, vector<16x32xf32>
    tpu.vector_store %arg3[%c0_3, %c0_4], %2 {strides = array<i32>} : memref<16x32xf32, #tpu.memory_space<vmem>>, vector<16x32xf32>,
    return
  }
  func.func @transform_0(%arg0: i32) -> (i32, i32) {
    %c0_i32 = arith.constant 0 : i32
    %c0_i32_0 = arith.constant 0 : i32
    return %arg0, %c0_i32 : i32, i32
  }
  func.func @transform_1(%arg0: i32) -> (i32, i32) {
    %c0_i32 = arith.constant 0 : i32
    %c0_i32_0 = arith.constant 0 : i32
    %c0_i32_1 = arith.constant 0 : i32
    return %c0_i32, %c0_i32_0 : i32, i32
  }
  func.func @transform_2(%arg0: i32) -> (i32, i32) {
    %c0_i32 = arith.constant 0 : i32
    %c0_i32_0 = arith.constant 0 : i32
    return %arg0, %c0_i32 : i32, i32
  }
}

module attributes {stable_mosaic.version = 11 : i64} {
  func.func @_mm_kernel(%arg0: i32, %arg1: memref<16x24xbf16, #tpu.memory_space<vmem>>, %arg2: memref<24x32xbf16, #tpu.memory_space<vmem>>, %arg3: memref<1x32xf32, #tpu.memory_space<vmem>>, %arg4: memref<16x32xf32, #tpu.memory_space<vmem>>) attributes {dimension_semantics = [#tpu.dimension_semantics<parallel>], iteration_bounds = array<i64: 1>, scalar_prefetch = 0 : i64, scratch_operands = 0 : i64, tpu.core_type = #tpu.core_type<tc>, window_params = [{transform_indices = @transform_0, window_bounds = array<i64: 16, 24>}, {pipeline_mode = #tpu.pipeline_mode<synchronous>, transform_indices = @transform_1, window_bounds = array<i64: 24, 32>}, {pipeline_mode = #tpu.pipeline_mode<synchronous>, transform_indices = @transform_2, window_bounds = array<i64: 1, 32>}, {transform_indices = @transform_3, window_bounds = array<i64: 16, 32>}]} {
    %c0 = arith.constant 0 : index
    %c0_0 = arith.constant 0 : index
    %0 = vector.load %arg1[%c0, %c0_0] : memref<16x24xbf16, #tpu.memory_space<vmem>>, vector<16x24xbf16>
    %c0_1 = arith.constant 0 : index
    %c0_2 = arith.constant 0 : index
    %1 = vector.load %arg2[%c0_1, %c0_2] : memref<24x32xbf16, #tpu.memory_space<vmem>>, vector<24x32xbf16>
    %cst = arith.constant dense<0.000000e+00> : vector<16x32xf32>
    %2 = tpu.matmul %0, %1, %cst {dimension_numbers = #tpu.dot_dimension_numbers<[1], [0], [0], [1], [0, 0, 1, 1], [], []>} : vector<16x24xbf16>, vector<24x32xbf16>, vector<16x32xf32> -> vector<16x32xf32>
    %c0_3 = arith.constant 0 : index
    %c0_4 = arith.constant 0 : index
    %3 = vector.load %arg3[%c0_3, %c0_4] : memref<1x32xf32, #tpu.memory_space<vmem>>, vector<1x32xf32>
    %4 = vector.broadcast %3 : vector<1x32xf32> to vector<16x32xf32>
    %5 = arith.addf %2, %4 : vector<16x32xf32>
    %cst_5 = arith.constant 0.000000e+00 : f32
    %6 = vector.broadcast %cst_5 : f32 to vector<16x32xf32>
    %7 = arith.maximumf %5, %6 : vector<16x32xf32>
    %c0_6 = arith.constant 0 : index
    %c0_7 = arith.constant 0 : index
    %8 = vector.load %arg4[%c0_6, %c0_7] : memref<16x32xf32, #tpu.memory_space<vmem>>, vector<16x32xf32>
    tpu.vector_store %arg4[%c0_6, %c0_7], %7 {strides = array<i32>} : memref<16x32xf32, #tpu.memory_space<vmem>>, vector<16x32xf32>,
    return
  }
  func.func @transform_0(%arg0: i32) -> (i32, i32) {
    %c0_i32 = arith.constant 0 : i32
    %c0_i32_0 = arith.constant 0 : i32
    return %arg0, %c0_i32 : i32, i32
  }
  func.func @transform_1(%arg0: i32) -> (i32, i32) {
    %c0_i32 = arith.constant 0 : i32
    %c0_i32_0 = arith.constant 0 : i32
    %c0_i32_1 = arith.constant 0 : i32
    return %c0_i32, %c0_i32_0 : i32, i32
  }
  func.func @transform_2(%arg0: i32) -> (i32, i32) {
    %c0_i32 = arith.constant 0 : i32
    %c0_i32_0 = arith.constant 0 : i32
    %c0_i32_1 = arith.constant 0 : i32
    return %c0_i32, %c0_i32_0 : i32, i32
  }
  func.func @transform_3(%arg0: i32) -> (i32, i32) {
    %c0_i32 = arith.constant 0 : i32
    %c0_i32_0 = arith.constant 0 : i32
    return %arg0, %c0_i32 : i32, i32
  }
}

module attributes {stable_mosaic.version = 11 : i64} {
  func.func @_cnn_tail_kernel(%arg0: memref<64x96xbf16, #tpu.memory_space<vmem>>, %arg1: memref<96x32xbf16, #tpu.memory_space<vmem>>, %arg2: memref<1x32xf32, #tpu.memory_space<vmem>>, %arg3: memref<8x8xf32, #tpu.memory_space<vmem>>, %arg4: memref<32x32xf32, #tpu.memory_space<vmem>>, %arg5: memref<1x32xf32, #tpu.memory_space<vmem>>, %arg6: memref<8x32xf32, #tpu.memory_space<vmem>>) attributes {dimension_semantics = [], scalar_prefetch = 0 : i64, scratch_operands = 0 : i64, tpu.core_type = #tpu.core_type<tc>} {
    %c0 = arith.constant 0 : index
    %c0_0 = arith.constant 0 : index
    %0 = vector.load %arg0[%c0, %c0_0] : memref<64x96xbf16, #tpu.memory_space<vmem>>, vector<64x96xbf16>
    %c0_1 = arith.constant 0 : index
    %c0_2 = arith.constant 0 : index
    %1 = vector.load %arg1[%c0_1, %c0_2] : memref<96x32xbf16, #tpu.memory_space<vmem>>, vector<96x32xbf16>
    %cst = arith.constant dense<0.000000e+00> : vector<64x32xf32>
    %2 = tpu.matmul %0, %1, %cst {dimension_numbers = #tpu.dot_dimension_numbers<[1], [0], [0], [1], [0, 0, 1, 1], [], []>} : vector<64x96xbf16>, vector<96x32xbf16>, vector<64x32xf32> -> vector<64x32xf32>
    %c0_3 = arith.constant 0 : index
    %c0_4 = arith.constant 0 : index
    %3 = vector.load %arg2[%c0_3, %c0_4] : memref<1x32xf32, #tpu.memory_space<vmem>>, vector<1x32xf32>
    %4 = vector.broadcast %3 : vector<1x32xf32> to vector<64x32xf32>
    %5 = arith.addf %2, %4 : vector<64x32xf32>
    %cst_5 = arith.constant 0.000000e+00 : f32
    %6 = vector.broadcast %cst_5 : f32 to vector<64x32xf32>
    %7 = arith.maximumf %5, %6 : vector<64x32xf32>
    %8 = vector.shape_cast %7 : vector<64x32xf32> to vector<8x8x32xf32>
    %c0_6 = arith.constant 0 : index
    %c0_7 = arith.constant 0 : index
    %9 = vector.load %arg3[%c0_6, %c0_7] : memref<8x8xf32, #tpu.memory_space<vmem>>, vector<8x8xf32>
    %10 = vector.shape_cast %9 : vector<8x8xf32> to vector<8x8x1xf32>
    %11 = vector.broadcast %10 : vector<8x8x1xf32> to vector<8x8x32xf32>
    %12 = arith.mulf %8, %11 : vector<8x8x32xf32>
    %cst_8 = arith.constant dense<0.000000e+00> : vector<8x32xf32>
    %13 = vector.multi_reduction <add>, %12, %cst_8 [1] : vector<8x8x32xf32> to vector<8x32xf32>
    %c0_9 = arith.constant 0 : index
    %c0_10 = arith.constant 0 : index
    %14 = vector.load %arg4[%c0_9, %c0_10] : memref<32x32xf32, #tpu.memory_space<vmem>>, vector<32x32xf32>
    %cst_11 = arith.constant dense<0.000000e+00> : vector<8x32xf32>
    %15 = tpu.matmul %13, %14, %cst_11 {dimension_numbers = #tpu.dot_dimension_numbers<[1], [0], [0], [1], [0, 0, 1, 1], [], []>} : vector<8x32xf32>, vector<32x32xf32>, vector<8x32xf32> -> vector<8x32xf32>
    %c0_12 = arith.constant 0 : index
    %c0_13 = arith.constant 0 : index
    %16 = vector.load %arg5[%c0_12, %c0_13] : memref<1x32xf32, #tpu.memory_space<vmem>>, vector<1x32xf32>
    %17 = vector.broadcast %16 : vector<1x32xf32> to vector<8x32xf32>
    %18 = arith.addf %15, %17 : vector<8x32xf32>
    %c0_14 = arith.constant 0 : index
    %c0_15 = arith.constant 0 : index
    %19 = vector.load %arg6[%c0_14, %c0_15] : memref<8x32xf32, #tpu.memory_space<vmem>>, vector<8x32xf32>
    tpu.vector_store %arg6[%c0_14, %c0_15], %18 {strides = array<i32>} : memref<8x32xf32, #tpu.memory_space<vmem>>, vector<8x32xf32>,
    return
  }
}

module attributes {stable_mosaic.version = 11 : i64} {
  func.func @_mm_stats_kernel(%arg0: i32, %arg1: memref<16x144xbf16, #tpu.memory_space<vmem>>, %arg2: memref<144x256xbf16, #tpu.memory_space<vmem>>, %arg3: memref<16x256xf32, #tpu.memory_space<vmem>>, %arg4: memref<2x256xf32, #tpu.memory_space<vmem>>) attributes {dimension_semantics = [#tpu.dimension_semantics<arbitrary>], iteration_bounds = array<i64: 1>, scalar_prefetch = 0 : i64, scratch_operands = 0 : i64, tpu.core_type = #tpu.core_type<tc>, window_params = [{transform_indices = @transform_0, window_bounds = array<i64: 16, 144>}, {pipeline_mode = #tpu.pipeline_mode<synchronous>, transform_indices = @transform_1, window_bounds = array<i64: 144, 256>}, {transform_indices = @transform_2, window_bounds = array<i64: 16, 256>}, {pipeline_mode = #tpu.pipeline_mode<synchronous>, transform_indices = @transform_3, window_bounds = array<i64: 2, 256>}]} {
    %c0 = arith.constant 0 : index
    %c0_0 = arith.constant 0 : index
    %0 = vector.load %arg1[%c0, %c0_0] : memref<16x144xbf16, #tpu.memory_space<vmem>>, vector<16x144xbf16>
    %c0_1 = arith.constant 0 : index
    %c0_2 = arith.constant 0 : index
    %1 = vector.load %arg2[%c0_1, %c0_2] : memref<144x256xbf16, #tpu.memory_space<vmem>>, vector<144x256xbf16>
    %cst = arith.constant dense<0.000000e+00> : vector<16x256xf32>
    %2 = tpu.matmul %0, %1, %cst {dimension_numbers = #tpu.dot_dimension_numbers<[1], [0], [0], [1], [0, 0, 1, 1], [], []>} : vector<16x144xbf16>, vector<144x256xbf16>, vector<16x256xf32> -> vector<16x256xf32>
    %c0_3 = arith.constant 0 : index
    %c0_4 = arith.constant 0 : index
    %3 = vector.load %arg3[%c0_3, %c0_4] : memref<16x256xf32, #tpu.memory_space<vmem>>, vector<16x256xf32>
    tpu.vector_store %arg3[%c0_3, %c0_4], %2 {strides = array<i32>} : memref<16x256xf32, #tpu.memory_space<vmem>>, vector<16x256xf32>,
    %4 = tpu.iota {dimensions = array<i32: 0>} : vector<16x1xi32>
    %c16_i32 = arith.constant 16 : i32
    %5 = arith.muli %arg0, %c16_i32 : i32
    %6 = vector.broadcast %5 : i32 to vector<16x1xi32>
    %7 = arith.addi %4, %6 : vector<16x1xi32>
    %c16_i32_5 = arith.constant 16 : i32
    %8 = vector.broadcast %c16_i32_5 : i32 to vector<16x1xi32>
    %9 = arith.cmpi slt, %7, %8 : vector<16x1xi32>
    %10 = arith.extui %9 : vector<16x1xi1> to vector<16x1xi32>
    %11 = arith.sitofp %10 : vector<16x1xi32> to vector<16x1xf32>
    %12 = vector.broadcast %11 : vector<16x1xf32> to vector<16x256xf32>
    %13 = arith.mulf %2, %12 : vector<16x256xf32>
    %cst_6 = arith.constant dense<0.000000e+00> : vector<256xf32>
    %14 = vector.multi_reduction <add>, %13, %cst_6 [0] : vector<16x256xf32> to vector<256xf32>
    %15 = vector.shape_cast %14 : vector<256xf32> to vector<1x256xf32>
    %16 = arith.mulf %13, %2 : vector<16x256xf32>
    %cst_7 = arith.constant dense<0.000000e+00> : vector<256xf32>
    %17 = vector.multi_reduction <add>, %16, %cst_7 [0] : vector<16x256xf32> to vector<256xf32>
    %18 = vector.shape_cast %17 : vector<256xf32> to vector<1x256xf32>
    %19 = tpu.concatenate %15, %18 in 0 : vector<1x256xf32>, vector<1x256xf32> -> vector<2x256xf32>
    %c0_i32 = arith.constant 0 : i32
    %20 = arith.cmpi eq, %arg0, %c0_i32 : i32
    %21 = arith.extui %20 : i1 to i32
    %c0_i32_8 = arith.constant 0 : i32
    %22 = arith.cmpi ne, %21, %c0_i32_8 : i32
    scf.if %22 {
      %c0_11 = arith.constant 0 : index
      %c0_12 = arith.constant 0 : index
      %26 = vector.load %arg4[%c0_11, %c0_12] : memref<2x256xf32, #tpu.memory_space<vmem>>, vector<2x256xf32>
      tpu.vector_store %arg4[%c0_11, %c0_12], %19 {strides = array<i32>} : memref<2x256xf32, #tpu.memory_space<vmem>>, vector<2x256xf32>,
    } else {
    }
    %c0_i32_9 = arith.constant 0 : i32
    %23 = arith.cmpi sgt, %arg0, %c0_i32_9 : i32
    %24 = arith.extui %23 : i1 to i32
    %c0_i32_10 = arith.constant 0 : i32
    %25 = arith.cmpi ne, %24, %c0_i32_10 : i32
    scf.if %25 {
      %c0_11 = arith.constant 0 : index
      %c0_12 = arith.constant 0 : index
      %26 = vector.load %arg4[%c0_11, %c0_12] : memref<2x256xf32, #tpu.memory_space<vmem>>, vector<2x256xf32>
      %27 = arith.addf %26, %19 : vector<2x256xf32>
      %c0_13 = arith.constant 0 : index
      %c0_14 = arith.constant 0 : index
      %28 = vector.load %arg4[%c0_13, %c0_14] : memref<2x256xf32, #tpu.memory_space<vmem>>, vector<2x256xf32>
      tpu.vector_store %arg4[%c0_13, %c0_14], %27 {strides = array<i32>} : memref<2x256xf32, #tpu.memory_space<vmem>>, vector<2x256xf32>,
    } else {
    }
    return
  }
  func.func @transform_0(%arg0: i32) -> (i32, i32) {
    %c0_i32 = arith.constant 0 : i32
    %c0_i32_0 = arith.constant 0 : i32
    return %arg0, %c0_i32 : i32, i32
  }
  func.func @transform_1(%arg0: i32) -> (i32, i32) {
    %c0_i32 = arith.constant 0 : i32
    %c0_i32_0 = arith.constant 0 : i32
    %c0_i32_1 = arith.constant 0 : i32
    return %c0_i32, %c0_i32_0 : i32, i32
  }
  func.func @transform_2(%arg0: i32) -> (i32, i32) {
    %c0_i32 = arith.constant 0 : i32
    %c0_i32_0 = arith.constant 0 : i32
    return %arg0, %c0_i32 : i32, i32
  }
  func.func @transform_3(%arg0: i32) -> (i32, i32) {
    %c0_i32 = arith.constant 0 : i32
    %c0_i32_0 = arith.constant 0 : i32
    %c0_i32_1 = arith.constant 0 : i32
    return %c0_i32, %c0_i32_0 : i32, i32
  }
}

module attributes {stable_mosaic.version = 11 : i64} {
  func.func @_bn_act_kernel(%arg0: i32, %arg1: memref<16x256xf32, #tpu.memory_space<vmem>>, %arg2: memref<2x256xf32, #tpu.memory_space<vmem>>, %arg3: memref<1x256xf32, #tpu.memory_space<vmem>>, %arg4: memref<1x256xf32, #tpu.memory_space<vmem>>, %arg5: memref<16x256xf32, #tpu.memory_space<vmem>>) attributes {dimension_semantics = [#tpu.dimension_semantics<parallel>], iteration_bounds = array<i64: 1>, scalar_prefetch = 0 : i64, scratch_operands = 0 : i64, tpu.core_type = #tpu.core_type<tc>, window_params = [{transform_indices = @transform_0, window_bounds = array<i64: 16, 256>}, {pipeline_mode = #tpu.pipeline_mode<synchronous>, transform_indices = @transform_1, window_bounds = array<i64: 2, 256>}, {pipeline_mode = #tpu.pipeline_mode<synchronous>, transform_indices = @transform_2, window_bounds = array<i64: 1, 256>}, {pipeline_mode = #tpu.pipeline_mode<synchronous>, transform_indices = @transform_3, window_bounds = array<i64: 1, 256>}, {transform_indices = @transform_4, window_bounds = array<i64: 16, 256>}]} {
    %c0 = arith.constant 0 : index
    %c0_0 = arith.constant 0 : index
    %0 = vector.load %arg2[%c0, %c0_0] : memref<2x256xf32, #tpu.memory_space<vmem>>, vector<1x256xf32>
    %cst = arith.constant 6.250000e-02 : f32
    %1 = vector.broadcast %cst : f32 to vector<1x256xf32>
    %2 = arith.mulf %0, %1 : vector<1x256xf32>
    %c1 = arith.constant 1 : index
    %c0_1 = arith.constant 0 : index
    %3 = vector.load %arg2[%c1, %c0_1] : memref<2x256xf32, #tpu.memory_space<vmem>>, vector<1x256xf32>
    %cst_2 = arith.constant 6.250000e-02 : f32
    %4 = vector.broadcast %cst_2 : f32 to vector<1x256xf32>
    %5 = arith.mulf %3, %4 : vector<1x256xf32>
    %6 = arith.mulf %2, %2 : vector<1x256xf32>
    %7 = arith.subf %5, %6 : vector<1x256xf32>
    %c0_3 = arith.constant 0 : index
    %c0_4 = arith.constant 0 : index
    %8 = vector.load %arg1[%c0_3, %c0_4] : memref<16x256xf32, #tpu.memory_space<vmem>>, vector<16x256xf32>
    %9 = vector.broadcast %2 : vector<1x256xf32> to vector<16x256xf32>
    %10 = arith.subf %8, %9 : vector<16x256xf32>
    %cst_5 = arith.constant 9.99999974E-6 : f32
    %11 = vector.broadcast %cst_5 : f32 to vector<1x256xf32>
    %12 = arith.addf %7, %11 : vector<1x256xf32>
    %13 = math.rsqrt %12 : vector<1x256xf32>
    %14 = vector.broadcast %13 : vector<1x256xf32> to vector<16x256xf32>
    %15 = arith.mulf %10, %14 : vector<16x256xf32>
    %c0_6 = arith.constant 0 : index
    %c0_7 = arith.constant 0 : index
    %16 = vector.load %arg3[%c0_6, %c0_7] : memref<1x256xf32, #tpu.memory_space<vmem>>, vector<1x256xf32>
    %17 = vector.broadcast %16 : vector<1x256xf32> to vector<16x256xf32>
    %18 = arith.mulf %15, %17 : vector<16x256xf32>
    %c0_8 = arith.constant 0 : index
    %c0_9 = arith.constant 0 : index
    %19 = vector.load %arg4[%c0_8, %c0_9] : memref<1x256xf32, #tpu.memory_space<vmem>>, vector<1x256xf32>
    %20 = vector.broadcast %19 : vector<1x256xf32> to vector<16x256xf32>
    %21 = arith.addf %18, %20 : vector<16x256xf32>
    %cst_10 = arith.constant 0.000000e+00 : f32
    %22 = vector.broadcast %cst_10 : f32 to vector<16x256xf32>
    %23 = arith.maximumf %21, %22 : vector<16x256xf32>
    %c0_11 = arith.constant 0 : index
    %c0_12 = arith.constant 0 : index
    %24 = vector.load %arg5[%c0_11, %c0_12] : memref<16x256xf32, #tpu.memory_space<vmem>>, vector<16x256xf32>
    tpu.vector_store %arg5[%c0_11, %c0_12], %23 {strides = array<i32>} : memref<16x256xf32, #tpu.memory_space<vmem>>, vector<16x256xf32>,
    return
  }
  func.func @transform_0(%arg0: i32) -> (i32, i32) {
    %c0_i32 = arith.constant 0 : i32
    %c0_i32_0 = arith.constant 0 : i32
    return %arg0, %c0_i32 : i32, i32
  }
  func.func @transform_1(%arg0: i32) -> (i32, i32) {
    %c0_i32 = arith.constant 0 : i32
    %c0_i32_0 = arith.constant 0 : i32
    %c0_i32_1 = arith.constant 0 : i32
    return %c0_i32, %c0_i32_0 : i32, i32
  }
  func.func @transform_2(%arg0: i32) -> (i32, i32) {
    %c0_i32 = arith.constant 0 : i32
    %c0_i32_0 = arith.constant 0 : i32
    %c0_i32_1 = arith.constant 0 : i32
    return %c0_i32, %c0_i32_0 : i32, i32
  }
  func.func @transform_3(%arg0: i32) -> (i32, i32) {
    %c0_i32 = arith.constant 0 : i32
    %c0_i32_0 = arith.constant 0 : i32
    %c0_i32_1 = arith.constant 0 : i32
    return %c0_i32, %c0_i32_0 : i32, i32
  }
  func.func @transform_4(%arg0: i32) -> (i32, i32) {
    %c0_i32 = arith.constant 0 : i32
    %c0_i32_0 = arith.constant 0 : i32
    return %arg0, %c0_i32 : i32, i32
  }
}

module attributes {stable_mosaic.version = 11 : i64} {
  func.func @_decoder_kernel(%arg0: i32, %arg1: memref<4x8x8xf32, #tpu.memory_space<vmem>>, %arg2: memref<8x8x32xf32, #tpu.memory_space<vmem>>, %arg3: memref<8x8x32xf32, #tpu.memory_space<vmem>>, %arg4: memref<8x8xf32, #tpu.memory_space<vmem>>, %arg5: memref<8x8xf32, #tpu.memory_space<vmem>>, %arg6: memref<8x8xf32, #tpu.memory_space<vmem>>, %arg7: memref<504x128xf32, #tpu.memory_space<vmem>>, %arg8: memref<4x8x16xf32, #tpu.memory_space<vmem>>, %arg9: memref<4x8x8xf32, #tpu.memory_space<vmem>>, %arg10: memref<8x32xf32, #tpu.memory_space<vmem>>, %arg11: memref<8x32xf32, #tpu.memory_space<vmem>>, %arg12: memref<8x32xf32, #tpu.memory_space<vmem>>, %arg13: memref<8x32xf32, #tpu.memory_space<vmem>>, %arg14: memref<8x32xf32, #tpu.memory_space<vmem>>, %arg15: memref<8x32xf32, #tpu.memory_space<vmem>>, %arg16: memref<8x8xf32, #tpu.memory_space<vmem>>, %arg17: memref<8x8xf32, #tpu.memory_space<vmem>>) attributes {dimension_semantics = [#tpu.dimension_semantics<arbitrary>], iteration_bounds = array<i64: 4>, scalar_prefetch = 0 : i64, scratch_operands = 8 : i64, tpu.core_type = #tpu.core_type<tc>, window_params = [{pipeline_mode = #tpu.pipeline_mode<synchronous>, transform_indices = @transform_0, window_bounds = array<i64: 4, 8, 8>}, {pipeline_mode = #tpu.pipeline_mode<synchronous>, transform_indices = @transform_1, window_bounds = array<i64: 8, 8, 32>}, {pipeline_mode = #tpu.pipeline_mode<synchronous>, transform_indices = @transform_2, window_bounds = array<i64: 8, 8, 32>}, {pipeline_mode = #tpu.pipeline_mode<synchronous>, transform_indices = @transform_3, window_bounds = array<i64: 8, 8>}, {pipeline_mode = #tpu.pipeline_mode<synchronous>, transform_indices = @transform_4, window_bounds = array<i64: 8, 8>}, {pipeline_mode = #tpu.pipeline_mode<synchronous>, transform_indices = @transform_5, window_bounds = array<i64: 8, 8>}, {pipeline_mode = #tpu.pipeline_mode<synchronous>, transform_indices = @transform_6, window_bounds = array<i64: 504, 128>}, {pipeline_mode = #tpu.pipeline_mode<synchronous>, transform_indices = @transform_7, window_bounds = array<i64: 4, 8, 16>}, {pipeline_mode = #tpu.pipeline_mode<synchronous>, transform_indices = @transform_8, window_bounds = array<i64: 4, 8, 8>}]} {
    %c0_i32 = arith.constant 0 : i32
    %0 = arith.cmpi eq, %arg0, %c0_i32 : i32
    %1 = arith.extui %0 : i1 to i32
    %c0_i32_0 = arith.constant 0 : i32
    %2 = arith.cmpi ne, %1, %c0_i32_0 : i32
    scf.if %2 {
      %cst_176 = arith.constant 0.000000e+00 : f32
      %420 = vector.broadcast %cst_176 : f32 to vector<8x32xf32>
      %c0_177 = arith.constant 0 : index
      %c0_178 = arith.constant 0 : index
      %421 = vector.load %arg10[%c0_177, %c0_178] : memref<8x32xf32, #tpu.memory_space<vmem>>, vector<8x32xf32>
      tpu.vector_store %arg10[%c0_177, %c0_178], %420 {strides = array<i32>} : memref<8x32xf32, #tpu.memory_space<vmem>>, vector<8x32xf32>,
      %cst_179 = arith.constant 0.000000e+00 : f32
      %422 = vector.broadcast %cst_179 : f32 to vector<8x32xf32>
      %c0_180 = arith.constant 0 : index
      %c0_181 = arith.constant 0 : index
      %423 = vector.load %arg11[%c0_180, %c0_181] : memref<8x32xf32, #tpu.memory_space<vmem>>, vector<8x32xf32>
      tpu.vector_store %arg11[%c0_180, %c0_181], %422 {strides = array<i32>} : memref<8x32xf32, #tpu.memory_space<vmem>>, vector<8x32xf32>,
      %cst_182 = arith.constant 0.000000e+00 : f32
      %424 = vector.broadcast %cst_182 : f32 to vector<8x32xf32>
      %c0_183 = arith.constant 0 : index
      %c0_184 = arith.constant 0 : index
      %425 = vector.load %arg12[%c0_183, %c0_184] : memref<8x32xf32, #tpu.memory_space<vmem>>, vector<8x32xf32>
      tpu.vector_store %arg12[%c0_183, %c0_184], %424 {strides = array<i32>} : memref<8x32xf32, #tpu.memory_space<vmem>>, vector<8x32xf32>,
      %cst_185 = arith.constant 0.000000e+00 : f32
      %426 = vector.broadcast %cst_185 : f32 to vector<8x32xf32>
      %c0_186 = arith.constant 0 : index
      %c0_187 = arith.constant 0 : index
      %427 = vector.load %arg13[%c0_186, %c0_187] : memref<8x32xf32, #tpu.memory_space<vmem>>, vector<8x32xf32>
      tpu.vector_store %arg13[%c0_186, %c0_187], %426 {strides = array<i32>} : memref<8x32xf32, #tpu.memory_space<vmem>>, vector<8x32xf32>,
      %cst_188 = arith.constant 0.000000e+00 : f32
      %428 = vector.broadcast %cst_188 : f32 to vector<8x32xf32>
      %c0_189 = arith.constant 0 : index
      %c0_190 = arith.constant 0 : index
      %429 = vector.load %arg14[%c0_189, %c0_190] : memref<8x32xf32, #tpu.memory_space<vmem>>, vector<8x32xf32>
      tpu.vector_store %arg14[%c0_189, %c0_190], %428 {strides = array<i32>} : memref<8x32xf32, #tpu.memory_space<vmem>>, vector<8x32xf32>,
      %cst_191 = arith.constant 0.000000e+00 : f32
      %430 = vector.broadcast %cst_191 : f32 to vector<8x32xf32>
      %c0_192 = arith.constant 0 : index
      %c0_193 = arith.constant 0 : index
      %431 = vector.load %arg15[%c0_192, %c0_193] : memref<8x32xf32, #tpu.memory_space<vmem>>, vector<8x32xf32>
      tpu.vector_store %arg15[%c0_192, %c0_193], %430 {strides = array<i32>} : memref<8x32xf32, #tpu.memory_space<vmem>>, vector<8x32xf32>,
      %cst_194 = arith.constant 0.000000e+00 : f32
      %432 = vector.broadcast %cst_194 : f32 to vector<8x8xf32>
      %c0_195 = arith.constant 0 : index
      %c0_196 = arith.constant 0 : index
      %433 = vector.load %arg16[%c0_195, %c0_196] : memref<8x8xf32, #tpu.memory_space<vmem>>, vector<8x8xf32>
      tpu.vector_store %arg16[%c0_195, %c0_196], %432 {strides = array<i32>} : memref<8x8xf32, #tpu.memory_space<vmem>>, vector<8x8xf32>,
      %cst_197 = arith.constant 0.000000e+00 : f32
      %434 = vector.broadcast %cst_197 : f32 to vector<8x8xf32>
      %c0_198 = arith.constant 0 : index
      %c0_199 = arith.constant 0 : index
      %435 = vector.load %arg17[%c0_198, %c0_199] : memref<8x8xf32, #tpu.memory_space<vmem>>, vector<8x8xf32>
      tpu.vector_store %arg17[%c0_198, %c0_199], %434 {strides = array<i32>} : memref<8x8xf32, #tpu.memory_space<vmem>>, vector<8x8xf32>,
    } else {
    }
    %3 = arith.index_cast %arg0 : i32 to index
    %c0 = arith.constant 0 : index
    %c0_1 = arith.constant 0 : index
    %4 = vector.load %arg1[%3, %c0, %c0_1] : memref<4x8x8xf32, #tpu.memory_space<vmem>>, vector<1x8x8xf32>
    %5 = vector.shape_cast %4 : vector<1x8x8xf32> to vector<8x8xf32>
    %c0_2 = arith.constant 0 : index
    %c0_3 = arith.constant 0 : index
    %6 = vector.load %arg7[%c0_2, %c0_3] : memref<504x128xf32, #tpu.memory_space<vmem>>, vector<8x32xf32>
    %cst = arith.constant dense<0.000000e+00> : vector<8x32xf32>
    %7 = tpu.matmul %5, %6, %cst {dimension_numbers = #tpu.dot_dimension_numbers<[1], [0], [0], [1], [0, 0, 1, 1], [], []>} : vector<8x8xf32>, vector<8x32xf32>, vector<8x32xf32> -> vector<8x32xf32>
    %c8 = arith.constant 8 : index
    %c0_4 = arith.constant 0 : index
    %8 = vector.load %arg7[%c8, %c0_4] : memref<504x128xf32, #tpu.memory_space<vmem>>, vector<1x32xf32>
    %9 = vector.broadcast %8 : vector<1x32xf32> to vector<8x32xf32>
    %10 = arith.addf %7, %9 : vector<8x32xf32>
    %cst_5 = arith.constant 0.000000e+00 : f32
    %11 = vector.broadcast %cst_5 : f32 to vector<8x32xf32>
    %12 = arith.maximumf %10, %11 : vector<8x32xf32>
    %c16 = arith.constant 16 : index
    %c0_6 = arith.constant 0 : index
    %13 = vector.load %arg7[%c16, %c0_6] : memref<504x128xf32, #tpu.memory_space<vmem>>, vector<32x16xf32>
    %cst_7 = arith.constant dense<0.000000e+00> : vector<8x16xf32>
    %14 = tpu.matmul %12, %13, %cst_7 {dimension_numbers = #tpu.dot_dimension_numbers<[1], [0], [0], [1], [0, 0, 1, 1], [], []>} : vector<8x32xf32>, vector<32x16xf32>, vector<8x16xf32> -> vector<8x16xf32>
    %c48 = arith.constant 48 : index
    %c0_8 = arith.constant 0 : index
    %15 = vector.load %arg7[%c48, %c0_8] : memref<504x128xf32, #tpu.memory_space<vmem>>, vector<1x16xf32>
    %16 = vector.broadcast %15 : vector<1x16xf32> to vector<8x16xf32>
    %17 = arith.addf %14, %16 : vector<8x16xf32>
    %cst_9 = arith.constant 0.000000e+00 : f32
    %18 = vector.broadcast %cst_9 : f32 to vector<8x16xf32>
    %19 = arith.maximumf %17, %18 : vector<8x16xf32>
    %c0_10 = arith.constant 0 : index
    %c0_11 = arith.constant 0 : index
    %20 = vector.load %arg15[%c0_10, %c0_11] : memref<8x32xf32, #tpu.memory_space<vmem>>, vector<8x32xf32>
    %c0_12 = arith.constant 0 : index
    %c0_13 = arith.constant 0 : index
    %21 = vector.load %arg10[%c0_12, %c0_13] : memref<8x32xf32, #tpu.memory_space<vmem>>, vector<8x32xf32>
    %c56 = arith.constant 56 : index
    %c0_14 = arith.constant 0 : index
    %22 = vector.load %arg7[%c56, %c0_14] : memref<504x128xf32, #tpu.memory_space<vmem>>, vector<48x96xf32>
    %23 = vector.extract_strided_slice %22 {offsets = [0, 0], sizes = [32, 96], strides = [1, 1]} : vector<48x96xf32> to vector<32x96xf32>
    %cst_15 = arith.constant dense<0.000000e+00> : vector<8x96xf32>
    %24 = tpu.matmul %20, %23, %cst_15 {dimension_numbers = #tpu.dot_dimension_numbers<[1], [0], [0], [1], [0, 0, 1, 1], [], []>} : vector<8x32xf32>, vector<32x96xf32>, vector<8x96xf32> -> vector<8x96xf32>
    %25 = vector.extract_strided_slice %22 {offsets = [32, 0], sizes = [16, 96], strides = [1, 1]} : vector<48x96xf32> to vector<16x96xf32>
    %cst_16 = arith.constant dense<0.000000e+00> : vector<8x96xf32>
    %26 = tpu.matmul %19, %25, %cst_16 {dimension_numbers = #tpu.dot_dimension_numbers<[1], [0], [0], [1], [0, 0, 1, 1], [], []>} : vector<8x16xf32>, vector<16x96xf32>, vector<8x96xf32> -> vector<8x96xf32>
    %27 = arith.addf %24, %26 : vector<8x96xf32>
    %c136 = arith.constant 136 : index
    %c0_17 = arith.constant 0 : index
    %28 = vector.load %arg7[%c136, %c0_17] : memref<504x128xf32, #tpu.memory_space<vmem>>, vector<1x96xf32>
    %29 = vector.broadcast %28 : vector<1x96xf32> to vector<8x96xf32>
    %30 = arith.addf %27, %29 : vector<8x96xf32>
    %c104 = arith.constant 104 : index
    %c0_18 = arith.constant 0 : index
    %31 = vector.load %arg7[%c104, %c0_18] : memref<504x128xf32, #tpu.memory_space<vmem>>, vector<32x96xf32>
    %cst_19 = arith.constant dense<0.000000e+00> : vector<8x96xf32>
    %32 = tpu.matmul %21, %31, %cst_19 {dimension_numbers = #tpu.dot_dimension_numbers<[1], [0], [0], [1], [0, 0, 1, 1], [], []>} : vector<8x32xf32>, vector<32x96xf32>, vector<8x96xf32> -> vector<8x96xf32>
    %c144 = arith.constant 144 : index
    %c0_20 = arith.constant 0 : index
    %33 = vector.load %arg7[%c144, %c0_20] : memref<504x128xf32, #tpu.memory_space<vmem>>, vector<1x96xf32>
    %34 = vector.broadcast %33 : vector<1x96xf32> to vector<8x96xf32>
    %35 = arith.addf %32, %34 : vector<8x96xf32>
    %36 = vector.extract_strided_slice %30 {offsets = [0, 0], sizes = [8, 32], strides = [1, 1]} : vector<8x96xf32> to vector<8x32xf32>
    %37 = vector.extract_strided_slice %35 {offsets = [0, 0], sizes = [8, 32], strides = [1, 1]} : vector<8x96xf32> to vector<8x32xf32>
    %38 = arith.addf %36, %37 : vector<8x32xf32>
    %39 = arith.negf %38 : vector<8x32xf32>
    %40 = math.exp %39 : vector<8x32xf32>
    %cst_21 = arith.constant 1.000000e+00 : f32
    %41 = vector.broadcast %cst_21 : f32 to vector<8x32xf32>
    %42 = arith.addf %41, %40 : vector<8x32xf32>
    %43 = arith.divf %41, %42 : vector<8x32xf32>
    %44 = vector.extract_strided_slice %30 {offsets = [0, 32], sizes = [8, 32], strides = [1, 1]} : vector<8x96xf32> to vector<8x32xf32>
    %45 = vector.extract_strided_slice %35 {offsets = [0, 32], sizes = [8, 32], strides = [1, 1]} : vector<8x96xf32> to vector<8x32xf32>
    %46 = arith.addf %44, %45 : vector<8x32xf32>
    %47 = arith.negf %46 : vector<8x32xf32>
    %48 = math.exp %47 : vector<8x32xf32>
    %cst_22 = arith.constant 1.000000e+00 : f32
    %49 = vector.broadcast %cst_22 : f32 to vector<8x32xf32>
    %50 = arith.addf %49, %48 : vector<8x32xf32>
    %51 = arith.divf %49, %50 : vector<8x32xf32>
    %52 = vector.extract_strided_slice %30 {offsets = [0, 64], sizes = [8, 32], strides = [1, 1]} : vector<8x96xf32> to vector<8x32xf32>
    %53 = vector.extract_strided_slice %35 {offsets = [0, 64], sizes = [8, 32], strides = [1, 1]} : vector<8x96xf32> to vector<8x32xf32>
    %54 = arith.mulf %43, %53 : vector<8x32xf32>
    %55 = arith.addf %52, %54 : vector<8x32xf32>
    %56 = math.tanh %55 : vector<8x32xf32>
    %cst_23 = arith.constant 1.000000e+00 : f32
    %57 = vector.broadcast %cst_23 : f32 to vector<8x32xf32>
    %58 = arith.subf %57, %51 : vector<8x32xf32>
    %59 = arith.mulf %58, %56 : vector<8x32xf32>
    %60 = arith.mulf %51, %21 : vector<8x32xf32>
    %61 = arith.addf %59, %60 : vector<8x32xf32>
    %c0_24 = arith.constant 0 : index
    %c0_25 = arith.constant 0 : index
    %62 = vector.load %arg10[%c0_24, %c0_25] : memref<8x32xf32, #tpu.memory_space<vmem>>, vector<8x32xf32>
    tpu.vector_store %arg10[%c0_24, %c0_25], %61 {strides = array<i32>} : memref<8x32xf32, #tpu.memory_space<vmem>>, vector<8x32xf32>,
    %c168 = arith.constant 168 : index
    %c0_26 = arith.constant 0 : index
    %63 = vector.load %arg7[%c168, %c0_26] : memref<504x128xf32, #tpu.memory_space<vmem>>, vector<32x32xf32>
    %cst_27 = arith.constant dense<0.000000e+00> : vector<8x32xf32>
    %64 = tpu.matmul %61, %63, %cst_27 {dimension_numbers = #tpu.dot_dimension_numbers<[1], [0], [0], [1], [0, 0, 1, 1], [], []>} : vector<8x32xf32>, vector<32x32xf32>, vector<8x32xf32> -> vector<8x32xf32>
    %c200 = arith.constant 200 : index
    %c0_28 = arith.constant 0 : index
    %65 = vector.load %arg7[%c200, %c0_28] : memref<504x128xf32, #tpu.memory_space<vmem>>, vector<1x32xf32>
    %66 = vector.broadcast %65 : vector<1x32xf32> to vector<8x32xf32>
    %67 = arith.addf %64, %66 : vector<8x32xf32>
    %c0_29 = arith.constant 0 : index
    %c0_30 = arith.constant 0 : index
    %68 = vector.load %arg16[%c0_29, %c0_30] : memref<8x8xf32, #tpu.memory_space<vmem>>, vector<8x8xf32>
    %c0_31 = arith.constant 0 : index
    %c0_32 = arith.constant 0 : index
    %69 = vector.load %arg17[%c0_31, %c0_32] : memref<8x8xf32, #tpu.memory_space<vmem>>, vector<8x8xf32>
    %70 = tpu.iota {dimensions = array<i32: 1>} : vector<1x8xi32>
    %c3_i32 = arith.constant 3 : i32
    %71 = tpu.dynamic_rotate %68 by %c3_i32 dim 1 : vector<8x8xf32>, i32 -> vector<8x8xf32>
    %c-3_i32 = arith.constant -3 : i32
    %72 = vector.broadcast %c-3_i32 : i32 to vector<1x8xi32>
    %73 = arith.addi %70, %72 : vector<1x8xi32>
    %c0_i32_33 = arith.constant 0 : i32
    %74 = vector.broadcast %c0_i32_33 : i32 to vector<1x8xi32>
    %75 = arith.cmpi sge, %73, %74 : vector<1x8xi32>
    %c-3_i32_34 = arith.constant -3 : i32
    %76 = vector.broadcast %c-3_i32_34 : i32 to vector<1x8xi32>
    %77 = arith.addi %70, %76 : vector<1x8xi32>
    %c8_i32 = arith.constant 8 : i32
    %78 = vector.broadcast %c8_i32 : i32 to vector<1x8xi32>
    %79 = arith.cmpi slt, %77, %78 : vector<1x8xi32>
    %80 = arith.andi %75, %79 : vector<1x8xi1>
    %cst_35 = arith.constant 0.000000e+00 : f32
    %81 = vector.shape_cast %80 : vector<1x8xi1> to vector<1x8xi1>
    %82 = vector.broadcast %81 : vector<1x8xi1> to vector<8x8xi1>
    %83 = vector.broadcast %cst_35 : f32 to vector<8x8xf32>
    %84 = arith.select %82, %71, %83 : vector<8x8xi1>, vector<8x8xf32>
    %c2_i32 = arith.constant 2 : i32
    %85 = tpu.dynamic_rotate %68 by %c2_i32 dim 1 : vector<8x8xf32>, i32 -> vector<8x8xf32>
    %c-2_i32 = arith.constant -2 : i32
    %86 = vector.broadcast %c-2_i32 : i32 to vector<1x8xi32>
    %87 = arith.addi %70, %86 : vector<1x8xi32>
    %c0_i32_36 = arith.constant 0 : i32
    %88 = vector.broadcast %c0_i32_36 : i32 to vector<1x8xi32>
    %89 = arith.cmpi sge, %87, %88 : vector<1x8xi32>
    %c-2_i32_37 = arith.constant -2 : i32
    %90 = vector.broadcast %c-2_i32_37 : i32 to vector<1x8xi32>
    %91 = arith.addi %70, %90 : vector<1x8xi32>
    %c8_i32_38 = arith.constant 8 : i32
    %92 = vector.broadcast %c8_i32_38 : i32 to vector<1x8xi32>
    %93 = arith.cmpi slt, %91, %92 : vector<1x8xi32>
    %94 = arith.andi %89, %93 : vector<1x8xi1>
    %cst_39 = arith.constant 0.000000e+00 : f32
    %95 = vector.shape_cast %94 : vector<1x8xi1> to vector<1x8xi1>
    %96 = vector.broadcast %95 : vector<1x8xi1> to vector<8x8xi1>
    %97 = vector.broadcast %cst_39 : f32 to vector<8x8xf32>
    %98 = arith.select %96, %85, %97 : vector<8x8xi1>, vector<8x8xf32>
    %c1_i32 = arith.constant 1 : i32
    %99 = tpu.dynamic_rotate %68 by %c1_i32 dim 1 : vector<8x8xf32>, i32 -> vector<8x8xf32>
    %c-1_i32 = arith.constant -1 : i32
    %100 = vector.broadcast %c-1_i32 : i32 to vector<1x8xi32>
    %101 = arith.addi %70, %100 : vector<1x8xi32>
    %c0_i32_40 = arith.constant 0 : i32
    %102 = vector.broadcast %c0_i32_40 : i32 to vector<1x8xi32>
    %103 = arith.cmpi sge, %101, %102 : vector<1x8xi32>
    %c-1_i32_41 = arith.constant -1 : i32
    %104 = vector.broadcast %c-1_i32_41 : i32 to vector<1x8xi32>
    %105 = arith.addi %70, %104 : vector<1x8xi32>
    %c8_i32_42 = arith.constant 8 : i32
    %106 = vector.broadcast %c8_i32_42 : i32 to vector<1x8xi32>
    %107 = arith.cmpi slt, %105, %106 : vector<1x8xi32>
    %108 = arith.andi %103, %107 : vector<1x8xi1>
    %cst_43 = arith.constant 0.000000e+00 : f32
    %109 = vector.shape_cast %108 : vector<1x8xi1> to vector<1x8xi1>
    %110 = vector.broadcast %109 : vector<1x8xi1> to vector<8x8xi1>
    %111 = vector.broadcast %cst_43 : f32 to vector<8x8xf32>
    %112 = arith.select %110, %99, %111 : vector<8x8xi1>, vector<8x8xf32>
    %c0_i32_44 = arith.constant 0 : i32
    %113 = vector.broadcast %c0_i32_44 : i32 to vector<1x8xi32>
    %114 = arith.addi %70, %113 : vector<1x8xi32>
    %c0_i32_45 = arith.constant 0 : i32
    %115 = vector.broadcast %c0_i32_45 : i32 to vector<1x8xi32>
    %116 = arith.cmpi sge, %114, %115 : vector<1x8xi32>
    %c0_i32_46 = arith.constant 0 : i32
    %117 = vector.broadcast %c0_i32_46 : i32 to vector<1x8xi32>
    %118 = arith.addi %70, %117 : vector<1x8xi32>
    %c8_i32_47 = arith.constant 8 : i32
    %119 = vector.broadcast %c8_i32_47 : i32 to vector<1x8xi32>
    %120 = arith.cmpi slt, %118, %119 : vector<1x8xi32>
    %121 = arith.andi %116, %120 : vector<1x8xi1>
    %cst_48 = arith.constant 0.000000e+00 : f32
    %122 = vector.shape_cast %121 : vector<1x8xi1> to vector<1x8xi1>
    %123 = vector.broadcast %122 : vector<1x8xi1> to vector<8x8xi1>
    %124 = vector.broadcast %cst_48 : f32 to vector<8x8xf32>
    %125 = arith.select %123, %68, %124 : vector<8x8xi1>, vector<8x8xf32>
    %c7_i32 = arith.constant 7 : i32
    %126 = tpu.dynamic_rotate %68 by %c7_i32 dim 1 : vector<8x8xf32>, i32 -> vector<8x8xf32>
    %c1_i32_49 = arith.constant 1 : i32
    %127 = vector.broadcast %c1_i32_49 : i32 to vector<1x8xi32>
    %128 = arith.addi %70, %127 : vector<1x8xi32>
    %c0_i32_50 = arith.constant 0 : i32
    %129 = vector.broadcast %c0_i32_50 : i32 to vector<1x8xi32>
    %130 = arith.cmpi sge, %128, %129 : vector<1x8xi32>
    %c1_i32_51 = arith.constant 1 : i32
    %131 = vector.broadcast %c1_i32_51 : i32 to vector<1x8xi32>
    %132 = arith.addi %70, %131 : vector<1x8xi32>
    %c8_i32_52 = arith.constant 8 : i32
    %133 = vector.broadcast %c8_i32_52 : i32 to vector<1x8xi32>
    %134 = arith.cmpi slt, %132, %133 : vector<1x8xi32>
    %135 = arith.andi %130, %134 : vector<1x8xi1>
    %cst_53 = arith.constant 0.000000e+00 : f32
    %136 = vector.shape_cast %135 : vector<1x8xi1> to vector<1x8xi1>
    %137 = vector.broadcast %136 : vector<1x8xi1> to vector<8x8xi1>
    %138 = vector.broadcast %cst_53 : f32 to vector<8x8xf32>
    %139 = arith.select %137, %126, %138 : vector<8x8xi1>, vector<8x8xf32>
    %c6_i32 = arith.constant 6 : i32
    %140 = tpu.dynamic_rotate %68 by %c6_i32 dim 1 : vector<8x8xf32>, i32 -> vector<8x8xf32>
    %c2_i32_54 = arith.constant 2 : i32
    %141 = vector.broadcast %c2_i32_54 : i32 to vector<1x8xi32>
    %142 = arith.addi %70, %141 : vector<1x8xi32>
    %c0_i32_55 = arith.constant 0 : i32
    %143 = vector.broadcast %c0_i32_55 : i32 to vector<1x8xi32>
    %144 = arith.cmpi sge, %142, %143 : vector<1x8xi32>
    %c2_i32_56 = arith.constant 2 : i32
    %145 = vector.broadcast %c2_i32_56 : i32 to vector<1x8xi32>
    %146 = arith.addi %70, %145 : vector<1x8xi32>
    %c8_i32_57 = arith.constant 8 : i32
    %147 = vector.broadcast %c8_i32_57 : i32 to vector<1x8xi32>
    %148 = arith.cmpi slt, %146, %147 : vector<1x8xi32>
    %149 = arith.andi %144, %148 : vector<1x8xi1>
    %cst_58 = arith.constant 0.000000e+00 : f32
    %150 = vector.shape_cast %149 : vector<1x8xi1> to vector<1x8xi1>
    %151 = vector.broadcast %150 : vector<1x8xi1> to vector<8x8xi1>
    %152 = vector.broadcast %cst_58 : f32 to vector<8x8xf32>
    %153 = arith.select %151, %140, %152 : vector<8x8xi1>, vector<8x8xf32>
    %c5_i32 = arith.constant 5 : i32
    %154 = tpu.dynamic_rotate %68 by %c5_i32 dim 1 : vector<8x8xf32>, i32 -> vector<8x8xf32>
    %c3_i32_59 = arith.constant 3 : i32
    %155 = vector.broadcast %c3_i32_59 : i32 to vector<1x8xi32>
    %156 = arith.addi %70, %155 : vector<1x8xi32>
    %c0_i32_60 = arith.constant 0 : i32
    %157 = vector.broadcast %c0_i32_60 : i32 to vector<1x8xi32>
    %158 = arith.cmpi sge, %156, %157 : vector<1x8xi32>
    %c3_i32_61 = arith.constant 3 : i32
    %159 = vector.broadcast %c3_i32_61 : i32 to vector<1x8xi32>
    %160 = arith.addi %70, %159 : vector<1x8xi32>
    %c8_i32_62 = arith.constant 8 : i32
    %161 = vector.broadcast %c8_i32_62 : i32 to vector<1x8xi32>
    %162 = arith.cmpi slt, %160, %161 : vector<1x8xi32>
    %163 = arith.andi %158, %162 : vector<1x8xi1>
    %cst_63 = arith.constant 0.000000e+00 : f32
    %164 = vector.shape_cast %163 : vector<1x8xi1> to vector<1x8xi1>
    %165 = vector.broadcast %164 : vector<1x8xi1> to vector<8x8xi1>
    %166 = vector.broadcast %cst_63 : f32 to vector<8x8xf32>
    %167 = arith.select %165, %154, %166 : vector<8x8xi1>, vector<8x8xf32>
    %c3_i32_64 = arith.constant 3 : i32
    %168 = tpu.dynamic_rotate %69 by %c3_i32_64 dim 1 : vector<8x8xf32>, i32 -> vector<8x8xf32>
    %c-3_i32_65 = arith.constant -3 : i32
    %169 = vector.broadcast %c-3_i32_65 : i32 to vector<1x8xi32>
    %170 = arith.addi %70, %169 : vector<1x8xi32>
    %c0_i32_66 = arith.constant 0 : i32
    %171 = vector.broadcast %c0_i32_66 : i32 to vector<1x8xi32>
    %172 = arith.cmpi sge, %170, %171 : vector<1x8xi32>
    %c-3_i32_67 = arith.constant -3 : i32
    %173 = vector.broadcast %c-3_i32_67 : i32 to vector<1x8xi32>
    %174 = arith.addi %70, %173 : vector<1x8xi32>
    %c8_i32_68 = arith.constant 8 : i32
    %175 = vector.broadcast %c8_i32_68 : i32 to vector<1x8xi32>
    %176 = arith.cmpi slt, %174, %175 : vector<1x8xi32>
    %177 = arith.andi %172, %176 : vector<1x8xi1>
    %cst_69 = arith.constant 0.000000e+00 : f32
    %178 = vector.shape_cast %177 : vector<1x8xi1> to vector<1x8xi1>
    %179 = vector.broadcast %178 : vector<1x8xi1> to vector<8x8xi1>
    %180 = vector.broadcast %cst_69 : f32 to vector<8x8xf32>
    %181 = arith.select %179, %168, %180 : vector<8x8xi1>, vector<8x8xf32>
    %c2_i32_70 = arith.constant 2 : i32
    %182 = tpu.dynamic_rotate %69 by %c2_i32_70 dim 1 : vector<8x8xf32>, i32 -> vector<8x8xf32>
    %c-2_i32_71 = arith.constant -2 : i32
    %183 = vector.broadcast %c-2_i32_71 : i32 to vector<1x8xi32>
    %184 = arith.addi %70, %183 : vector<1x8xi32>
    %c0_i32_72 = arith.constant 0 : i32
    %185 = vector.broadcast %c0_i32_72 : i32 to vector<1x8xi32>
    %186 = arith.cmpi sge, %184, %185 : vector<1x8xi32>
    %c-2_i32_73 = arith.constant -2 : i32
    %187 = vector.broadcast %c-2_i32_73 : i32 to vector<1x8xi32>
    %188 = arith.addi %70, %187 : vector<1x8xi32>
    %c8_i32_74 = arith.constant 8 : i32
    %189 = vector.broadcast %c8_i32_74 : i32 to vector<1x8xi32>
    %190 = arith.cmpi slt, %188, %189 : vector<1x8xi32>
    %191 = arith.andi %186, %190 : vector<1x8xi1>
    %cst_75 = arith.constant 0.000000e+00 : f32
    %192 = vector.shape_cast %191 : vector<1x8xi1> to vector<1x8xi1>
    %193 = vector.broadcast %192 : vector<1x8xi1> to vector<8x8xi1>
    %194 = vector.broadcast %cst_75 : f32 to vector<8x8xf32>
    %195 = arith.select %193, %182, %194 : vector<8x8xi1>, vector<8x8xf32>
    %c1_i32_76 = arith.constant 1 : i32
    %196 = tpu.dynamic_rotate %69 by %c1_i32_76 dim 1 : vector<8x8xf32>, i32 -> vector<8x8xf32>
    %c-1_i32_77 = arith.constant -1 : i32
    %197 = vector.broadcast %c-1_i32_77 : i32 to vector<1x8xi32>
    %198 = arith.addi %70, %197 : vector<1x8xi32>
    %c0_i32_78 = arith.constant 0 : i32
    %199 = vector.broadcast %c0_i32_78 : i32 to vector<1x8xi32>
    %200 = arith.cmpi sge, %198, %199 : vector<1x8xi32>
    %c-1_i32_79 = arith.constant -1 : i32
    %201 = vector.broadcast %c-1_i32_79 : i32 to vector<1x8xi32>
    %202 = arith.addi %70, %201 : vector<1x8xi32>
    %c8_i32_80 = arith.constant 8 : i32
    %203 = vector.broadcast %c8_i32_80 : i32 to vector<1x8xi32>
    %204 = arith.cmpi slt, %202, %203 : vector<1x8xi32>
    %205 = arith.andi %200, %204 : vector<1x8xi1>
    %cst_81 = arith.constant 0.000000e+00 : f32
    %206 = vector.shape_cast %205 : vector<1x8xi1> to vector<1x8xi1>
    %207 = vector.broadcast %206 : vector<1x8xi1> to vector<8x8xi1>
    %208 = vector.broadcast %cst_81 : f32 to vector<8x8xf32>
    %209 = arith.select %207, %196, %208 : vector<8x8xi1>, vector<8x8xf32>
    %c0_i32_82 = arith.constant 0 : i32
    %210 = vector.broadcast %c0_i32_82 : i32 to vector<1x8xi32>
    %211 = arith.addi %70, %210 : vector<1x8xi32>
    %c0_i32_83 = arith.constant 0 : i32
    %212 = vector.broadcast %c0_i32_83 : i32 to vector<1x8xi32>
    %213 = arith.cmpi sge, %211, %212 : vector<1x8xi32>
    %c0_i32_84 = arith.constant 0 : i32
    %214 = vector.broadcast %c0_i32_84 : i32 to vector<1x8xi32>
    %215 = arith.addi %70, %214 : vector<1x8xi32>
    %c8_i32_85 = arith.constant 8 : i32
    %216 = vector.broadcast %c8_i32_85 : i32 to vector<1x8xi32>
    %217 = arith.cmpi slt, %215, %216 : vector<1x8xi32>
    %218 = arith.andi %213, %217 : vector<1x8xi1>
    %cst_86 = arith.constant 0.000000e+00 : f32
    %219 = vector.shape_cast %218 : vector<1x8xi1> to vector<1x8xi1>
    %220 = vector.broadcast %219 : vector<1x8xi1> to vector<8x8xi1>
    %221 = vector.broadcast %cst_86 : f32 to vector<8x8xf32>
    %222 = arith.select %220, %69, %221 : vector<8x8xi1>, vector<8x8xf32>
    %c7_i32_87 = arith.constant 7 : i32
    %223 = tpu.dynamic_rotate %69 by %c7_i32_87 dim 1 : vector<8x8xf32>, i32 -> vector<8x8xf32>
    %c1_i32_88 = arith.constant 1 : i32
    %224 = vector.broadcast %c1_i32_88 : i32 to vector<1x8xi32>
    %225 = arith.addi %70, %224 : vector<1x8xi32>
    %c0_i32_89 = arith.constant 0 : i32
    %226 = vector.broadcast %c0_i32_89 : i32 to vector<1x8xi32>
    %227 = arith.cmpi sge, %225, %226 : vector<1x8xi32>
    %c1_i32_90 = arith.constant 1 : i32
    %228 = vector.broadcast %c1_i32_90 : i32 to vector<1x8xi32>
    %229 = arith.addi %70, %228 : vector<1x8xi32>
    %c8_i32_91 = arith.constant 8 : i32
    %230 = vector.broadcast %c8_i32_91 : i32 to vector<1x8xi32>
    %231 = arith.cmpi slt, %229, %230 : vector<1x8xi32>
    %232 = arith.andi %227, %231 : vector<1x8xi1>
    %cst_92 = arith.constant 0.000000e+00 : f32
    %233 = vector.shape_cast %232 : vector<1x8xi1> to vector<1x8xi1>
    %234 = vector.broadcast %233 : vector<1x8xi1> to vector<8x8xi1>
    %235 = vector.broadcast %cst_92 : f32 to vector<8x8xf32>
    %236 = arith.select %234, %223, %235 : vector<8x8xi1>, vector<8x8xf32>
    %c6_i32_93 = arith.constant 6 : i32
    %237 = tpu.dynamic_rotate %69 by %c6_i32_93 dim 1 : vector<8x8xf32>, i32 -> vector<8x8xf32>
    %c2_i32_94 = arith.constant 2 : i32
    %238 = vector.broadcast %c2_i32_94 : i32 to vector<1x8xi32>
    %239 = arith.addi %70, %238 : vector<1x8xi32>
    %c0_i32_95 = arith.constant 0 : i32
    %240 = vector.broadcast %c0_i32_95 : i32 to vector<1x8xi32>
    %241 = arith.cmpi sge, %239, %240 : vector<1x8xi32>
    %c2_i32_96 = arith.constant 2 : i32
    %242 = vector.broadcast %c2_i32_96 : i32 to vector<1x8xi32>
    %243 = arith.addi %70, %242 : vector<1x8xi32>
    %c8_i32_97 = arith.constant 8 : i32
    %244 = vector.broadcast %c8_i32_97 : i32 to vector<1x8xi32>
    %245 = arith.cmpi slt, %243, %244 : vector<1x8xi32>
    %246 = arith.andi %241, %245 : vector<1x8xi1>
    %cst_98 = arith.constant 0.000000e+00 : f32
    %247 = vector.shape_cast %246 : vector<1x8xi1> to vector<1x8xi1>
    %248 = vector.broadcast %247 : vector<1x8xi1> to vector<8x8xi1>
    %249 = vector.broadcast %cst_98 : f32 to vector<8x8xf32>
    %250 = arith.select %248, %237, %249 : vector<8x8xi1>, vector<8x8xf32>
    %c5_i32_99 = arith.constant 5 : i32
    %251 = tpu.dynamic_rotate %69 by %c5_i32_99 dim 1 : vector<8x8xf32>, i32 -> vector<8x8xf32>
    %c3_i32_100 = arith.constant 3 : i32
    %252 = vector.broadcast %c3_i32_100 : i32 to vector<1x8xi32>
    %253 = arith.addi %70, %252 : vector<1x8xi32>
    %c0_i32_101 = arith.constant 0 : i32
    %254 = vector.broadcast %c0_i32_101 : i32 to vector<1x8xi32>
    %255 = arith.cmpi sge, %253, %254 : vector<1x8xi32>
    %c3_i32_102 = arith.constant 3 : i32
    %256 = vector.broadcast %c3_i32_102 : i32 to vector<1x8xi32>
    %257 = arith.addi %70, %256 : vector<1x8xi32>
    %c8_i32_103 = arith.constant 8 : i32
    %258 = vector.broadcast %c8_i32_103 : i32 to vector<1x8xi32>
    %259 = arith.cmpi slt, %257, %258 : vector<1x8xi32>
    %260 = arith.andi %255, %259 : vector<1x8xi1>
    %cst_104 = arith.constant 0.000000e+00 : f32
    %261 = vector.shape_cast %260 : vector<1x8xi1> to vector<1x8xi1>
    %262 = vector.broadcast %261 : vector<1x8xi1> to vector<8x8xi1>
    %263 = vector.broadcast %cst_104 : f32 to vector<8x8xf32>
    %264 = arith.select %262, %251, %263 : vector<8x8xi1>, vector<8x8xf32>
    %265 = vector.shape_cast %84 : vector<8x8xf32> to vector<8x8x1xf32>
    %266 = vector.shape_cast %98 : vector<8x8xf32> to vector<8x8x1xf32>
    %267 = vector.shape_cast %112 : vector<8x8xf32> to vector<8x8x1xf32>
    %268 = vector.shape_cast %125 : vector<8x8xf32> to vector<8x8x1xf32>
    %269 = vector.shape_cast %139 : vector<8x8xf32> to vector<8x8x1xf32>
    %270 = vector.shape_cast %153 : vector<8x8xf32> to vector<8x8x1xf32>
    %271 = vector.shape_cast %167 : vector<8x8xf32> to vector<8x8x1xf32>
    %272 = vector.shape_cast %181 : vector<8x8xf32> to vector<8x8x1xf32>
    %273 = vector.shape_cast %195 : vector<8x8xf32> to vector<8x8x1xf32>
    %274 = vector.shape_cast %209 : vector<8x8xf32> to vector<8x8x1xf32>
    %275 = vector.shape_cast %222 : vector<8x8xf32> to vector<8x8x1xf32>
    %276 = vector.shape_cast %236 : vector<8x8xf32> to vector<8x8x1xf32>
    %277 = vector.shape_cast %250 : vector<8x8xf32> to vector<8x8x1xf32>
    %278 = vector.shape_cast %264 : vector<8x8xf32> to vector<8x8x1xf32>
    %279 = tpu.concatenate %265, %266, %267, %268, %269, %270, %271, %272, %273, %274, %275, %276, %277, %278 in 2 : vector<8x8x1xf32>, vector<8x8x1xf32>, vector<8x8x1xf32>, vector<8x8x1xf32>, vector<8x8x1xf32>, vector<8x8x1xf32>, vector<8x8x1xf32>, vector<8x8x1xf32>, vector<8x8x1xf32>, vector<8x8x1xf32>, vector<8x8x1xf32>, vector<8x8x1xf32>, vector<8x8x1xf32>, vector<8x8x1xf32> -> vector<8x8x14xf32>
    %280 = vector.shape_cast %279 : vector<8x8x14xf32> to vector<64x14xf32>
    %c152 = arith.constant 152 : index
    %c0_105 = arith.constant 0 : index
    %281 = vector.load %arg7[%c152, %c0_105] : memref<504x128xf32, #tpu.memory_space<vmem>>, vector<14x32xf32>
    %cst_106 = arith.constant dense<0.000000e+00> : vector<64x32xf32>
    %282 = tpu.matmul %280, %281, %cst_106 {dimension_numbers = #tpu.dot_dimension_numbers<[1], [0], [0], [1], [0, 0, 1, 1], [], []>} : vector<64x14xf32>, vector<14x32xf32>, vector<64x32xf32> -> vector<64x32xf32>
    %283 = vector.shape_cast %282 : vector<64x32xf32> to vector<8x8x32xf32>
    %284 = vector.shape_cast %67 : vector<8x32xf32> to vector<8x1x32xf32>
    %c0_107 = arith.constant 0 : index
    %c0_108 = arith.constant 0 : index
    %c0_109 = arith.constant 0 : index
    %285 = vector.load %arg3[%c0_107, %c0_108, %c0_109] : memref<8x8x32xf32, #tpu.memory_space<vmem>>, vector<8x8x32xf32>
    %286 = vector.broadcast %284 : vector<8x1x32xf32> to vector<8x8x32xf32>
    %287 = arith.addf %286, %285 : vector<8x8x32xf32>
    %288 = arith.addf %287, %283 : vector<8x8x32xf32>
    %289 = math.tanh %288 : vector<8x8x32xf32>
    %290 = vector.shape_cast %289 : vector<8x8x32xf32> to vector<64x32xf32>
    %c208 = arith.constant 208 : index
    %c0_110 = arith.constant 0 : index
    %291 = vector.load %arg7[%c208, %c0_110] : memref<504x128xf32, #tpu.memory_space<vmem>>, vector<32x1xf32>
    %cst_111 = arith.constant dense<0.000000e+00> : vector<64x1xf32>
    %292 = tpu.matmul %290, %291, %cst_111 {dimension_numbers = #tpu.dot_dimension_numbers<[1], [0], [0], [1], [0, 0, 1, 1], [], []>} : vector<64x32xf32>, vector<32x1xf32>, vector<64x1xf32> -> vector<64x1xf32>
    %293 = vector.shape_cast %292 : vector<64x1xf32> to vector<8x8xf32>
    %c0_112 = arith.constant 0 : index
    %c0_113 = arith.constant 0 : index
    %294 = vector.load %arg4[%c0_112, %c0_113] : memref<8x8xf32, #tpu.memory_space<vmem>>, vector<8x8xf32>
    %cst_114 = arith.constant 5.000000e-01 : f32
    %295 = vector.broadcast %cst_114 : f32 to vector<8x8xf32>
    %296 = arith.cmpf ogt, %294, %295 : vector<8x8xf32>
    %cst_115 = arith.constant -1.000000e+30 : f32
    %297 = vector.broadcast %cst_115 : f32 to vector<8x8xf32>
    %298 = arith.select %296, %293, %297 : vector<8x8xi1>, vector<8x8xf32>
    %cst_116 = arith.constant dense<0xFF800000> : vector<8xf32>
    %299 = vector.multi_reduction <maximumf>, %298, %cst_116 [1] : vector<8x8xf32> to vector<8xf32>
    %300 = vector.shape_cast %299 : vector<8xf32> to vector<8x1xf32>
    %301 = vector.broadcast %300 : vector<8x1xf32> to vector<8x8xf32>
    %302 = arith.subf %298, %301 : vector<8x8xf32>
    %303 = math.exp %302 : vector<8x8xf32>
    %cst_117 = arith.constant dense<0.000000e+00> : vector<8xf32>
    %304 = vector.multi_reduction <add>, %303, %cst_117 [1] : vector<8x8xf32> to vector<8xf32>
    %305 = vector.shape_cast %304 : vector<8xf32> to vector<8x1xf32>
    %306 = vector.broadcast %305 : vector<8x1xf32> to vector<8x8xf32>
    %307 = arith.divf %303, %306 : vector<8x8xf32>
    %308 = vector.shape_cast %307 : vector<8x8xf32> to vector<8x8x1xf32>
    %c0_118 = arith.constant 0 : index
    %c0_119 = arith.constant 0 : index
    %c0_120 = arith.constant 0 : index
    %309 = vector.load %arg2[%c0_118, %c0_119, %c0_120] : memref<8x8x32xf32, #tpu.memory_space<vmem>>, vector<8x8x32xf32>
    %310 = vector.broadcast %308 : vector<8x8x1xf32> to vector<8x8x32xf32>
    %311 = arith.mulf %310, %309 : vector<8x8x32xf32>
    %cst_121 = arith.constant dense<0.000000e+00> : vector<8x32xf32>
    %312 = vector.multi_reduction <add>, %311, %cst_121 [1] : vector<8x8x32xf32> to vector<8x32xf32>
    %c0_122 = arith.constant 0 : index
    %c0_123 = arith.constant 0 : index
    %313 = vector.load %arg17[%c0_122, %c0_123] : memref<8x8xf32, #tpu.memory_space<vmem>>, vector<8x8xf32>
    tpu.vector_store %arg17[%c0_122, %c0_123], %307 {strides = array<i32>} : memref<8x8xf32, #tpu.memory_space<vmem>>, vector<8x8xf32>,
    %314 = arith.addf %68, %307 : vector<8x8xf32>
    %c0_124 = arith.constant 0 : index
    %c0_125 = arith.constant 0 : index
    %315 = vector.load %arg16[%c0_124, %c0_125] : memref<8x8xf32, #tpu.memory_space<vmem>>, vector<8x8xf32>
    tpu.vector_store %arg16[%c0_124, %c0_125], %314 {strides = array<i32>} : memref<8x8xf32, #tpu.memory_space<vmem>>, vector<8x8xf32>,
    %c0_126 = arith.constant 0 : index
    %c0_127 = arith.constant 0 : index
    %316 = vector.load %arg15[%c0_126, %c0_127] : memref<8x32xf32, #tpu.memory_space<vmem>>, vector<8x32xf32>
    tpu.vector_store %arg15[%c0_126, %c0_127], %312 {strides = array<i32>} : memref<8x32xf32, #tpu.memory_space<vmem>>, vector<8x32xf32>,
    %c240 = arith.constant 240 : index
    %c0_128 = arith.constant 0 : index
    %317 = vector.load %arg7[%c240, %c0_128] : memref<504x128xf32, #tpu.memory_space<vmem>>, vector<80x32xf32>
    %318 = vector.extract_strided_slice %317 {offsets = [0, 0], sizes = [32, 32], strides = [1, 1]} : vector<80x32xf32> to vector<32x32xf32>
    %cst_129 = arith.constant dense<0.000000e+00> : vector<8x32xf32>
    %319 = tpu.matmul %312, %318, %cst_129 {dimension_numbers = #tpu.dot_dimension_numbers<[1], [0], [0], [1], [0, 0, 1, 1], [], []>} : vector<8x32xf32>, vector<32x32xf32>, vector<8x32xf32> -> vector<8x32xf32>
    %320 = vector.extract_strided_slice %317 {offsets = [32, 0], sizes = [32, 32], strides = [1, 1]} : vector<80x32xf32> to vector<32x32xf32>
    %cst_130 = arith.constant dense<0.000000e+00> : vector<8x32xf32>
    %321 = tpu.matmul %61, %320, %cst_130 {dimension_numbers = #tpu.dot_dimension_numbers<[1], [0], [0], [1], [0, 0, 1, 1], [], []>} : vector<8x32xf32>, vector<32x32xf32>, vector<8x32xf32> -> vector<8x32xf32>
    %322 = arith.addf %319, %321 : vector<8x32xf32>
    %c0_131 = arith.constant 0 : index
    %c0_132 = arith.constant 0 : index
    %323 = vector.load %arg5[%c0_131, %c0_132] : memref<8x8xf32, #tpu.memory_space<vmem>>, vector<8x8xf32>
    %324 = vector.extract_strided_slice %317 {offsets = [64, 0], sizes = [8, 32], strides = [1, 1]} : vector<80x32xf32> to vector<8x32xf32>
    %cst_133 = arith.constant dense<0.000000e+00> : vector<8x32xf32>
    %325 = tpu.matmul %323, %324, %cst_133 {dimension_numbers = #tpu.dot_dimension_numbers<[1], [0], [0], [1], [0, 0, 1, 1], [], []>} : vector<8x8xf32>, vector<8x32xf32>, vector<8x32xf32> -> vector<8x32xf32>
    %326 = arith.addf %322, %325 : vector<8x32xf32>
    %c0_134 = arith.constant 0 : index
    %c0_135 = arith.constant 0 : index
    %327 = vector.load %arg6[%c0_134, %c0_135] : memref<8x8xf32, #tpu.memory_space<vmem>>, vector<8x8xf32>
    %328 = vector.extract_strided_slice %317 {offsets = [72, 0], sizes = [8, 32], strides = [1, 1]} : vector<80x32xf32> to vector<8x32xf32>
    %cst_136 = arith.constant dense<0.000000e+00> : vector<8x32xf32>
    %329 = tpu.matmul %327, %328, %cst_136 {dimension_numbers = #tpu.dot_dimension_numbers<[1], [0], [0], [1], [0, 0, 1, 1], [], []>} : vector<8x8xf32>, vector<8x32xf32>, vector<8x32xf32> -> vector<8x32xf32>
    %330 = arith.addf %326, %329 : vector<8x32xf32>
    %c320 = arith.constant 320 : index
    %c0_137 = arith.constant 0 : index
    %331 = vector.load %arg7[%c320, %c0_137] : memref<504x128xf32, #tpu.memory_space<vmem>>, vector<1x32xf32>
    %332 = vector.broadcast %331 : vector<1x32xf32> to vector<8x32xf32>
    %333 = arith.addf %330, %332 : vector<8x32xf32>
    %c0_138 = arith.constant 0 : index
    %c0_139 = arith.constant 0 : index
    %334 = vector.load %arg11[%c0_138, %c0_139] : memref<8x32xf32, #tpu.memory_space<vmem>>, vector<8x32xf32>
    %c0_140 = arith.constant 0 : index
    %c0_141 = arith.constant 0 : index
    %335 = vector.load %arg12[%c0_140, %c0_141] : memref<8x32xf32, #tpu.memory_space<vmem>>, vector<8x32xf32>
    %c328 = arith.constant 328 : index
    %c0_142 = arith.constant 0 : index
    %336 = vector.load %arg7[%c328, %c0_142] : memref<504x128xf32, #tpu.memory_space<vmem>>, vector<32x128xf32>
    %cst_143 = arith.constant dense<0.000000e+00> : vector<8x128xf32>
    %337 = tpu.matmul %333, %336, %cst_143 {dimension_numbers = #tpu.dot_dimension_numbers<[1], [0], [0], [1], [0, 0, 1, 1], [], []>} : vector<8x32xf32>, vector<32x128xf32>, vector<8x128xf32> -> vector<8x128xf32>
    %c360 = arith.constant 360 : index
    %c0_144 = arith.constant 0 : index
    %338 = vector.load %arg7[%c360, %c0_144] : memref<504x128xf32, #tpu.memory_space<vmem>>, vector<32x128xf32>
    %cst_145 = arith.constant dense<0.000000e+00> : vector<8x128xf32>
    %339 = tpu.matmul %334, %338, %cst_145 {dimension_numbers = #tpu.dot_dimension_numbers<[1], [0], [0], [1], [0, 0, 1, 1], [], []>} : vector<8x32xf32>, vector<32x128xf32>, vector<8x128xf32> -> vector<8x128xf32>
    %340 = arith.addf %337, %339 : vector<8x128xf32>
    %c392 = arith.constant 392 : index
    %c0_146 = arith.constant 0 : index
    %341 = vector.load %arg7[%c392, %c0_146] : memref<504x128xf32, #tpu.memory_space<vmem>>, vector<1x128xf32>
    %342 = vector.broadcast %341 : vector<1x128xf32> to vector<8x128xf32>
    %343 = arith.addf %340, %342 : vector<8x128xf32>
    %344 = vector.extract_strided_slice %343 {offsets = [0, 0], sizes = [8, 32], strides = [1, 1]} : vector<8x128xf32> to vector<8x32xf32>
    %345 = arith.negf %344 : vector<8x32xf32>
    %346 = math.exp %345 : vector<8x32xf32>
    %cst_147 = arith.constant 1.000000e+00 : f32
    %347 = vector.broadcast %cst_147 : f32 to vector<8x32xf32>
    %348 = arith.addf %347, %346 : vector<8x32xf32>
    %349 = arith.divf %347, %348 : vector<8x32xf32>
    %350 = vector.extract_strided_slice %343 {offsets = [0, 32], sizes = [8, 32], strides = [1, 1]} : vector<8x128xf32> to vector<8x32xf32>
    %351 = arith.negf %350 : vector<8x32xf32>
    %352 = math.exp %351 : vector<8x32xf32>
    %cst_148 = arith.constant 1.000000e+00 : f32
    %353 = vector.broadcast %cst_148 : f32 to vector<8x32xf32>
    %354 = arith.addf %353, %352 : vector<8x32xf32>
    %355 = arith.divf %353, %354 : vector<8x32xf32>
    %356 = vector.extract_strided_slice %343 {offsets = [0, 64], sizes = [8, 32], strides = [1, 1]} : vector<8x128xf32> to vector<8x32xf32>
    %357 = math.tanh %356 : vector<8x32xf32>
    %358 = vector.extract_strided_slice %343 {offsets = [0, 96], sizes = [8, 32], strides = [1, 1]} : vector<8x128xf32> to vector<8x32xf32>
    %359 = arith.negf %358 : vector<8x32xf32>
    %360 = math.exp %359 : vector<8x32xf32>
    %cst_149 = arith.constant 1.000000e+00 : f32
    %361 = vector.broadcast %cst_149 : f32 to vector<8x32xf32>
    %362 = arith.addf %361, %360 : vector<8x32xf32>
    %363 = arith.divf %361, %362 : vector<8x32xf32>
    %364 = arith.mulf %355, %335 : vector<8x32xf32>
    %365 = arith.mulf %349, %357 : vector<8x32xf32>
    %366 = arith.addf %364, %365 : vector<8x32xf32>
    %367 = math.tanh %366 : vector<8x32xf32>
    %368 = arith.mulf %363, %367 : vector<8x32xf32>
    %c0_150 = arith.constant 0 : index
    %c0_151 = arith.constant 0 : index
    %369 = vector.load %arg11[%c0_150, %c0_151] : memref<8x32xf32, #tpu.memory_space<vmem>>, vector<8x32xf32>
    tpu.vector_store %arg11[%c0_150, %c0_151], %368 {strides = array<i32>} : memref<8x32xf32, #tpu.memory_space<vmem>>, vector<8x32xf32>,
    %c0_152 = arith.constant 0 : index
    %c0_153 = arith.constant 0 : index
    %370 = vector.load %arg12[%c0_152, %c0_153] : memref<8x32xf32, #tpu.memory_space<vmem>>, vector<8x32xf32>
    tpu.vector_store %arg12[%c0_152, %c0_153], %366 {strides = array<i32>} : memref<8x32xf32, #tpu.memory_space<vmem>>, vector<8x32xf32>,
    %371 = arith.addf %333, %368 : vector<8x32xf32>
    %c0_154 = arith.constant 0 : index
    %c0_155 = arith.constant 0 : index
    %372 = vector.load %arg13[%c0_154, %c0_155] : memref<8x32xf32, #tpu.memory_space<vmem>>, vector<8x32xf32>
    %c0_156 = arith.constant 0 : index
    %c0_157 = arith.constant 0 : index
    %373 = vector.load %arg14[%c0_156, %c0_157] : memref<8x32xf32, #tpu.memory_space<vmem>>, vector<8x32xf32>
    %c400 = arith.constant 400 : index
    %c0_158 = arith.constant 0 : index
    %374 = vector.load %arg7[%c400, %c0_158] : memref<504x128xf32, #tpu.memory_space<vmem>>, vector<32x128xf32>
    %cst_159 = arith.constant dense<0.000000e+00> : vector<8x128xf32>
    %375 = tpu.matmul %371, %374, %cst_159 {dimension_numbers = #tpu.dot_dimension_numbers<[1], [0], [0], [1], [0, 0, 1, 1], [], []>} : vector<8x32xf32>, vector<32x128xf32>, vector<8x128xf32> -> vector<8x128xf32>
    %c432 = arith.constant 432 : index
    %c0_160 = arith.constant 0 : index
    %376 = vector.load %arg7[%c432, %c0_160] : memref<504x128xf32, #tpu.memory_space<vmem>>, vector<32x128xf32>
    %cst_161 = arith.constant dense<0.000000e+00> : vector<8x128xf32>
    %377 = tpu.matmul %372, %376, %cst_161 {dimension_numbers = #tpu.dot_dimension_numbers<[1], [0], [0], [1], [0, 0, 1, 1], [], []>} : vector<8x32xf32>, vector<32x128xf32>, vector<8x128xf32> -> vector<8x128xf32>
    %378 = arith.addf %375, %377 : vector<8x128xf32>
    %c464 = arith.constant 464 : index
    %c0_162 = arith.constant 0 : index
    %379 = vector.load %arg7[%c464, %c0_162] : memref<504x128xf32, #tpu.memory_space<vmem>>, vector<1x128xf32>
    %380 = vector.broadcast %379 : vector<1x128xf32> to vector<8x128xf32>
    %381 = arith.addf %378, %380 : vector<8x128xf32>
    %382 = vector.extract_strided_slice %381 {offsets = [0, 0], sizes = [8, 32], strides = [1, 1]} : vector<8x128xf32> to vector<8x32xf32>
    %383 = arith.negf %382 : vector<8x32xf32>
    %384 = math.exp %383 : vector<8x32xf32>
    %cst_163 = arith.constant 1.000000e+00 : f32
    %385 = vector.broadcast %cst_163 : f32 to vector<8x32xf32>
    %386 = arith.addf %385, %384 : vector<8x32xf32>
    %387 = arith.divf %385, %386 : vector<8x32xf32>
    %388 = vector.extract_strided_slice %381 {offsets = [0, 32], sizes = [8, 32], strides = [1, 1]} : vector<8x128xf32> to vector<8x32xf32>
    %389 = arith.negf %388 : vector<8x32xf32>
    %390 = math.exp %389 : vector<8x32xf32>
    %cst_164 = arith.constant 1.000000e+00 : f32
    %391 = vector.broadcast %cst_164 : f32 to vector<8x32xf32>
    %392 = arith.addf %391, %390 : vector<8x32xf32>
    %393 = arith.divf %391, %392 : vector<8x32xf32>
    %394 = vector.extract_strided_slice %381 {offsets = [0, 64], sizes = [8, 32], strides = [1, 1]} : vector<8x128xf32> to vector<8x32xf32>
    %395 = math.tanh %394 : vector<8x32xf32>
    %396 = vector.extract_strided_slice %381 {offsets = [0, 96], sizes = [8, 32], strides = [1, 1]} : vector<8x128xf32> to vector<8x32xf32>
    %397 = arith.negf %396 : vector<8x32xf32>
    %398 = math.exp %397 : vector<8x32xf32>
    %cst_165 = arith.constant 1.000000e+00 : f32
    %399 = vector.broadcast %cst_165 : f32 to vector<8x32xf32>
    %400 = arith.addf %399, %398 : vector<8x32xf32>
    %401 = arith.divf %399, %400 : vector<8x32xf32>
    %402 = arith.mulf %393, %373 : vector<8x32xf32>
    %403 = arith.mulf %387, %395 : vector<8x32xf32>
    %404 = arith.addf %402, %403 : vector<8x32xf32>
    %405 = math.tanh %404 : vector<8x32xf32>
    %406 = arith.mulf %401, %405 : vector<8x32xf32>
    %c0_166 = arith.constant 0 : index
    %c0_167 = arith.constant 0 : index
    %407 = vector.load %arg13[%c0_166, %c0_167] : memref<8x32xf32, #tpu.memory_space<vmem>>, vector<8x32xf32>
    tpu.vector_store %arg13[%c0_166, %c0_167], %406 {strides = array<i32>} : memref<8x32xf32, #tpu.memory_space<vmem>>, vector<8x32xf32>,
    %c0_168 = arith.constant 0 : index
    %c0_169 = arith.constant 0 : index
    %408 = vector.load %arg14[%c0_168, %c0_169] : memref<8x32xf32, #tpu.memory_space<vmem>>, vector<8x32xf32>
    tpu.vector_store %arg14[%c0_168, %c0_169], %404 {strides = array<i32>} : memref<8x32xf32, #tpu.memory_space<vmem>>, vector<8x32xf32>,
    %409 = arith.addf %371, %406 : vector<8x32xf32>
    %c472 = arith.constant 472 : index
    %c0_170 = arith.constant 0 : index
    %410 = vector.load %arg7[%c472, %c0_170] : memref<504x128xf32, #tpu.memory_space<vmem>>, vector<32x16xf32>
    %cst_171 = arith.constant dense<0.000000e+00> : vector<8x16xf32>
    %411 = tpu.matmul %409, %410, %cst_171 {dimension_numbers = #tpu.dot_dimension_numbers<[1], [0], [0], [1], [0, 0, 1, 1], [], []>} : vector<8x32xf32>, vector<32x16xf32>, vector<8x16xf32> -> vector<8x16xf32>
    %412 = arith.index_cast %arg0 : i32 to index
    %c0_172 = arith.constant 0 : index
    %c0_173 = arith.constant 0 : index
    %413 = vector.load %arg8[%412, %c0_172, %c0_173] : memref<4x8x16xf32, #tpu.memory_space<vmem>>, vector<1x8x16xf32>
    %414 = vector.shape_cast %413 : vector<1x8x16xf32> to vector<8x16xf32>
    %415 = vector.shape_cast %411 : vector<8x16xf32> to vector<1x8x16xf32>
    tpu.vector_store %arg8[%412, %c0_172, %c0_173], %415 {strides = array<i32>} : memref<4x8x16xf32, #tpu.memory_space<vmem>>, vector<1x8x16xf32>,
    %416 = arith.index_cast %arg0 : i32 to index
    %c0_174 = arith.constant 0 : index
    %c0_175 = arith.constant 0 : index
    %417 = vector.load %arg9[%416, %c0_174, %c0_175] : memref<4x8x8xf32, #tpu.memory_space<vmem>>, vector<1x8x8xf32>
    %418 = vector.shape_cast %417 : vector<1x8x8xf32> to vector<8x8xf32>
    %419 = vector.shape_cast %307 : vector<8x8xf32> to vector<1x8x8xf32>
    tpu.vector_store %arg9[%416, %c0_174, %c0_175], %419 {strides = array<i32>} : memref<4x8x8xf32, #tpu.memory_space<vmem>>, vector<1x8x8xf32>,
    return
  }
  func.func @transform_0(%arg0: i32) -> (i32, i32, i32) {
    %c0_i32 = arith.constant 0 : i32
    %c0_i32_0 = arith.constant 0 : i32
    %c0_i32_1 = arith.constant 0 : i32
    %c0_i32_2 = arith.constant 0 : i32
    return %c0_i32, %c0_i32_0, %c0_i32_1 : i32, i32, i32
  }
  func.func @transform_1(%arg0: i32) -> (i32, i32, i32) {
    %c0_i32 = arith.constant 0 : i32
    %c0_i32_0 = arith.constant 0 : i32
    %c0_i32_1 = arith.constant 0 : i32
    %c0_i32_2 = arith.constant 0 : i32
    return %c0_i32, %c0_i32_0, %c0_i32_1 : i32, i32, i32
  }
  func.func @transform_2(%arg0: i32) -> (i32, i32, i32) {
    %c0_i32 = arith.constant 0 : i32
    %c0_i32_0 = arith.constant 0 : i32
    %c0_i32_1 = arith.constant 0 : i32
    %c0_i32_2 = arith.constant 0 : i32
    return %c0_i32, %c0_i32_0, %c0_i32_1 : i32, i32, i32
  }
  func.func @transform_3(%arg0: i32) -> (i32, i32) {
    %c0_i32 = arith.constant 0 : i32
    %c0_i32_0 = arith.constant 0 : i32
    %c0_i32_1 = arith.constant 0 : i32
    return %c0_i32, %c0_i32_0 : i32, i32
  }
  func.func @transform_4(%arg0: i32) -> (i32, i32) {
    %c0_i32 = arith.constant 0 : i32
    %c0_i32_0 = arith.constant 0 : i32
    %c0_i32_1 = arith.constant 0 : i32
    return %c0_i32, %c0_i32_0 : i32, i32
  }
  func.func @transform_5(%arg0: i32) -> (i32, i32) {
    %c0_i32 = arith.constant 0 : i32
    %c0_i32_0 = arith.constant 0 : i32
    %c0_i32_1 = arith.constant 0 : i32
    return %c0_i32, %c0_i32_0 : i32, i32
  }
  func.func @transform_6(%arg0: i32) -> (i32, i32) {
    %c0_i32 = arith.constant 0 : i32
    %c0_i32_0 = arith.constant 0 : i32
    %c0_i32_1 = arith.constant 0 : i32
    return %c0_i32, %c0_i32_0 : i32, i32
  }
  func.func @transform_7(%arg0: i32) -> (i32, i32, i32) {
    %c0_i32 = arith.constant 0 : i32
    %c0_i32_0 = arith.constant 0 : i32
    %c0_i32_1 = arith.constant 0 : i32
    %c0_i32_2 = arith.constant 0 : i32
    return %c0_i32, %c0_i32_0, %c0_i32_1 : i32, i32, i32
  }
  func.func @transform_8(%arg0: i32) -> (i32, i32, i32) {
    %c0_i32 = arith.constant 0 : i32
    %c0_i32_0 = arith.constant 0 : i32
    %c0_i32_1 = arith.constant 0 : i32
    %c0_i32_2 = arith.constant 0 : i32
    return %c0_i32, %c0_i32_0, %c0_i32_1 : i32, i32, i32
  }
}

module attributes {stable_mosaic.version = 11 : i64} {
  func.func @_mm_stats_kernel(%arg0: i32, %arg1: memref<16x768xbf16, #tpu.memory_space<vmem>>, %arg2: memref<768x16xbf16, #tpu.memory_space<vmem>>, %arg3: memref<16x16xf32, #tpu.memory_space<vmem>>, %arg4: memref<2x16xf32, #tpu.memory_space<vmem>>) attributes {dimension_semantics = [#tpu.dimension_semantics<arbitrary>], iteration_bounds = array<i64: 1>, scalar_prefetch = 0 : i64, scratch_operands = 0 : i64, tpu.core_type = #tpu.core_type<tc>, window_params = [{transform_indices = @transform_0, window_bounds = array<i64: 16, 768>}, {pipeline_mode = #tpu.pipeline_mode<synchronous>, transform_indices = @transform_1, window_bounds = array<i64: 768, 16>}, {transform_indices = @transform_2, window_bounds = array<i64: 16, 16>}, {pipeline_mode = #tpu.pipeline_mode<synchronous>, transform_indices = @transform_3, window_bounds = array<i64: 2, 16>}]} {
    %c0 = arith.constant 0 : index
    %c0_0 = arith.constant 0 : index
    %0 = vector.load %arg1[%c0, %c0_0] : memref<16x768xbf16, #tpu.memory_space<vmem>>, vector<16x768xbf16>
    %c0_1 = arith.constant 0 : index
    %c0_2 = arith.constant 0 : index
    %1 = vector.load %arg2[%c0_1, %c0_2] : memref<768x16xbf16, #tpu.memory_space<vmem>>, vector<768x16xbf16>
    %cst = arith.constant dense<0.000000e+00> : vector<16x16xf32>
    %2 = tpu.matmul %0, %1, %cst {dimension_numbers = #tpu.dot_dimension_numbers<[1], [0], [0], [1], [0, 0, 1, 1], [], []>} : vector<16x768xbf16>, vector<768x16xbf16>, vector<16x16xf32> -> vector<16x16xf32>
    %c0_3 = arith.constant 0 : index
    %c0_4 = arith.constant 0 : index
    %3 = vector.load %arg3[%c0_3, %c0_4] : memref<16x16xf32, #tpu.memory_space<vmem>>, vector<16x16xf32>
    tpu.vector_store %arg3[%c0_3, %c0_4], %2 {strides = array<i32>} : memref<16x16xf32, #tpu.memory_space<vmem>>, vector<16x16xf32>,
    %4 = tpu.iota {dimensions = array<i32: 0>} : vector<16x1xi32>
    %c16_i32 = arith.constant 16 : i32
    %5 = arith.muli %arg0, %c16_i32 : i32
    %6 = vector.broadcast %5 : i32 to vector<16x1xi32>
    %7 = arith.addi %4, %6 : vector<16x1xi32>
    %c16_i32_5 = arith.constant 16 : i32
    %8 = vector.broadcast %c16_i32_5 : i32 to vector<16x1xi32>
    %9 = arith.cmpi slt, %7, %8 : vector<16x1xi32>
    %10 = arith.extui %9 : vector<16x1xi1> to vector<16x1xi32>
    %11 = arith.sitofp %10 : vector<16x1xi32> to vector<16x1xf32>
    %12 = vector.broadcast %11 : vector<16x1xf32> to vector<16x16xf32>
    %13 = arith.mulf %2, %12 : vector<16x16xf32>
    %cst_6 = arith.constant dense<0.000000e+00> : vector<16xf32>
    %14 = vector.multi_reduction <add>, %13, %cst_6 [0] : vector<16x16xf32> to vector<16xf32>
    %15 = vector.shape_cast %14 : vector<16xf32> to vector<1x16xf32>
    %16 = arith.mulf %13, %2 : vector<16x16xf32>
    %cst_7 = arith.constant dense<0.000000e+00> : vector<16xf32>
    %17 = vector.multi_reduction <add>, %16, %cst_7 [0] : vector<16x16xf32> to vector<16xf32>
    %18 = vector.shape_cast %17 : vector<16xf32> to vector<1x16xf32>
    %19 = tpu.concatenate %15, %18 in 0 : vector<1x16xf32>, vector<1x16xf32> -> vector<2x16xf32>
    %c0_i32 = arith.constant 0 : i32
    %20 = arith.cmpi eq, %arg0, %c0_i32 : i32
    %21 = arith.extui %20 : i1 to i32
    %c0_i32_8 = arith.constant 0 : i32
    %22 = arith.cmpi ne, %21, %c0_i32_8 : i32
    scf.if %22 {
      %c0_11 = arith.constant 0 : index
      %c0_12 = arith.constant 0 : index
      %26 = vector.load %arg4[%c0_11, %c0_12] : memref<2x16xf32, #tpu.memory_space<vmem>>, vector<2x16xf32>
      tpu.vector_store %arg4[%c0_11, %c0_12], %19 {strides = array<i32>} : memref<2x16xf32, #tpu.memory_space<vmem>>, vector<2x16xf32>,
    } else {
    }
    %c0_i32_9 = arith.constant 0 : i32
    %23 = arith.cmpi sgt, %arg0, %c0_i32_9 : i32
    %24 = arith.extui %23 : i1 to i32
    %c0_i32_10 = arith.constant 0 : i32
    %25 = arith.cmpi ne, %24, %c0_i32_10 : i32
    scf.if %25 {
      %c0_11 = arith.constant 0 : index
      %c0_12 = arith.constant 0 : index
      %26 = vector.load %arg4[%c0_11, %c0_12] : memref<2x16xf32, #tpu.memory_space<vmem>>, vector<2x16xf32>
      %27 = arith.addf %26, %19 : vector<2x16xf32>
      %c0_13 = arith.constant 0 : index
      %c0_14 = arith.constant 0 : index
      %28 = vector.load %arg4[%c0_13, %c0_14] : memref<2x16xf32, #tpu.memory_space<vmem>>, vector<2x16xf32>
      tpu.vector_store %arg4[%c0_13, %c0_14], %27 {strides = array<i32>} : memref<2x16xf32, #tpu.memory_space<vmem>>, vector<2x16xf32>,
    } else {
    }
    return
  }
  func.func @transform_0(%arg0: i32) -> (i32, i32) {
    %c0_i32 = arith.constant 0 : i32
    %c0_i32_0 = arith.constant 0 : i32
    return %arg0, %c0_i32 : i32, i32
  }
  func.func @transform_1(%arg0: i32) -> (i32, i32) {
    %c0_i32 = arith.constant 0 : i32
    %c0_i32_0 = arith.constant 0 : i32
    %c0_i32_1 = arith.constant 0 : i32
    return %c0_i32, %c0_i32_0 : i32, i32
  }
  func.func @transform_2(%arg0: i32) -> (i32, i32) {
    %c0_i32 = arith.constant 0 : i32
    %c0_i32_0 = arith.constant 0 : i32
    return %arg0, %c0_i32 : i32, i32
  }
  func.func @transform_3(%arg0: i32) -> (i32, i32) {
    %c0_i32 = arith.constant 0 : i32
    %c0_i32_0 = arith.constant 0 : i32
    %c0_i32_1 = arith.constant 0 : i32
    return %c0_i32, %c0_i32_0 : i32, i32
  }
}

module attributes {stable_mosaic.version = 11 : i64} {
  func.func @_mm_kernel(%arg0: i32, %arg1: memref<16x32xf32, #tpu.memory_space<vmem>>, %arg2: memref<32x16xf32, #tpu.memory_space<vmem>>, %arg3: memref<16x16xf32, #tpu.memory_space<vmem>>) attributes {dimension_semantics = [#tpu.dimension_semantics<parallel>], iteration_bounds = array<i64: 1>, scalar_prefetch = 0 : i64, scratch_operands = 0 : i64, tpu.core_type = #tpu.core_type<tc>, window_params = [{transform_indices = @transform_0, window_bounds = array<i64: 16, 32>}, {pipeline_mode = #tpu.pipeline_mode<synchronous>, transform_indices = @transform_1, window_bounds = array<i64: 32, 16>}, {transform_indices = @transform_2, window_bounds = array<i64: 16, 16>}]} {
    %c0 = arith.constant 0 : index
    %c0_0 = arith.constant 0 : index
    %0 = vector.load %arg1[%c0, %c0_0] : memref<16x32xf32, #tpu.memory_space<vmem>>, vector<16x32xf32>
    %c0_1 = arith.constant 0 : index
    %c0_2 = arith.constant 0 : index
    %1 = vector.load %arg2[%c0_1, %c0_2] : memref<32x16xf32, #tpu.memory_space<vmem>>, vector<32x16xf32>
    %cst = arith.constant dense<0.000000e+00> : vector<16x16xf32>
    %2 = tpu.matmul %0, %1, %cst {dimension_numbers = #tpu.dot_dimension_numbers<[1], [0], [0], [1], [0, 0, 1, 1], [], []>} : vector<16x32xf32>, vector<32x16xf32>, vector<16x16xf32> -> vector<16x16xf32>
    %c0_3 = arith.constant 0 : index
    %c0_4 = arith.constant 0 : index
    %3 = vector.load %arg3[%c0_3, %c0_4] : memref<16x16xf32, #tpu.memory_space<vmem>>, vector<16x16xf32>
    tpu.vector_store %arg3[%c0_3, %c0_4], %2 {strides = array<i32>} : memref<16x16xf32, #tpu.memory_space<vmem>>, vector<16x16xf32>,
    return
  }
  func.func @transform_0(%arg0: i32) -> (i32, i32) {
    %c0_i32 = arith.constant 0 : i32
    %c0_i32_0 = arith.constant 0 : i32
    return %arg0, %c0_i32 : i32, i32
  }
  func.func @transform_1(%arg0: i32) -> (i32, i32) {
    %c0_i32 = arith.constant 0 : i32
    %c0_i32_0 = arith.constant 0 : i32
    %c0_i32_1 = arith.constant 0 : i32
    return %c0_i32, %c0_i32_0 : i32, i32
  }
  func.func @transform_2(%arg0: i32) -> (i32, i32) {
    %c0_i32 = arith.constant 0 : i32
    %c0_i32_0 = arith.constant 0 : i32
    return %arg0, %c0_i32 : i32, i32
  }
}

module attributes {stable_mosaic.version = 11 : i64} {
  func.func @_mm_kernel(%arg0: i32, %arg1: memref<8x16xf32, #tpu.memory_space<vmem>>, %arg2: memref<16x12xf32, #tpu.memory_space<vmem>>, %arg3: memref<1x12xf32, #tpu.memory_space<vmem>>, %arg4: memref<8x12xf32, #tpu.memory_space<vmem>>) attributes {dimension_semantics = [#tpu.dimension_semantics<parallel>], iteration_bounds = array<i64: 1>, scalar_prefetch = 0 : i64, scratch_operands = 0 : i64, tpu.core_type = #tpu.core_type<tc>, window_params = [{transform_indices = @transform_0, window_bounds = array<i64: 8, 16>}, {pipeline_mode = #tpu.pipeline_mode<synchronous>, transform_indices = @transform_1, window_bounds = array<i64: 16, 12>}, {pipeline_mode = #tpu.pipeline_mode<synchronous>, transform_indices = @transform_2, window_bounds = array<i64: 1, 12>}, {transform_indices = @transform_3, window_bounds = array<i64: 8, 12>}]} {
    %c0 = arith.constant 0 : index
    %c0_0 = arith.constant 0 : index
    %0 = vector.load %arg1[%c0, %c0_0] : memref<8x16xf32, #tpu.memory_space<vmem>>, vector<8x16xf32>
    %c0_1 = arith.constant 0 : index
    %c0_2 = arith.constant 0 : index
    %1 = vector.load %arg2[%c0_1, %c0_2] : memref<16x12xf32, #tpu.memory_space<vmem>>, vector<16x12xf32>
    %cst = arith.constant dense<0.000000e+00> : vector<8x12xf32>
    %2 = tpu.matmul %0, %1, %cst {dimension_numbers = #tpu.dot_dimension_numbers<[1], [0], [0], [1], [0, 0, 1, 1], [], []>} : vector<8x16xf32>, vector<16x12xf32>, vector<8x12xf32> -> vector<8x12xf32>
    %c0_3 = arith.constant 0 : index
    %c0_4 = arith.constant 0 : index
    %3 = vector.load %arg3[%c0_3, %c0_4] : memref<1x12xf32, #tpu.memory_space<vmem>>, vector<1x12xf32>
    %4 = vector.broadcast %3 : vector<1x12xf32> to vector<8x12xf32>
    %5 = arith.addf %2, %4 : vector<8x12xf32>
    %c0_5 = arith.constant 0 : index
    %c0_6 = arith.constant 0 : index
    %6 = vector.load %arg4[%c0_5, %c0_6] : memref<8x12xf32, #tpu.memory_space<vmem>>, vector<8x12xf32>
    tpu.vector_store %arg4[%c0_5, %c0_6], %5 {strides = array<i32>} : memref<8x12xf32, #tpu.memory_space<vmem>>, vector<8x12xf32>,
    return
  }
  func.func @transform_0(%arg0: i32) -> (i32, i32) {
    %c0_i32 = arith.constant 0 : i32
    %c0_i32_0 = arith.constant 0 : i32
    return %arg0, %c0_i32 : i32, i32
  }
  func.func @transform_1(%arg0: i32) -> (i32, i32) {
    %c0_i32 = arith.constant 0 : i32
    %c0_i32_0 = arith.constant 0 : i32
    %c0_i32_1 = arith.constant 0 : i32
    return %c0_i32, %c0_i32_0 : i32, i32
  }
  func.func @transform_2(%arg0: i32) -> (i32, i32) {
    %c0_i32 = arith.constant 0 : i32
    %c0_i32_0 = arith.constant 0 : i32
    %c0_i32_1 = arith.constant 0 : i32
    return %c0_i32, %c0_i32_0 : i32, i32
  }
  func.func @transform_3(%arg0: i32) -> (i32, i32) {
    %c0_i32 = arith.constant 0 : i32
    %c0_i32_0 = arith.constant 0 : i32
    return %arg0, %c0_i32 : i32, i32
  }
}

</mosaic_0001>

<bundles_post_ra>
// kernel: tacotron_forward.27
= control target key start
LH: loop header
LB: loop body
LE: loop exit
PB: predicated region body
PF: predicated region fallthrough
CT: control target
= control target key end

     0   :  { %v25_v6 = vlaneseq  ;;  %vm59_vm0 = vcmask 392192   ;;  %s119_s1 = inlined_call_operand.vmem [shape: f32[2,48], index: 1, kind: input, shape index: {}]   ;;  %s120_s0 = inlined_call_operand.vmem [shape: f32[16,48], index: 0, kind: input, shape index: {}]   ;;  %s121_s2 = inlined_call_operand.vmem [shape: f32[1,48], index: 2, kind: input, shape index: {}]   ;;  %s122_s3 = inlined_call_operand.vmem [shape: f32[1,48], index: 3, kind: input, shape index: {}]   ;;  %s123_s4 = inlined_call_operand.vmem [shape: f32[16,48], index: 4, kind: output, shape index: {}]  }
   0x1   :  { %v17_v0 = vld [vmem:[%s119_s1] sm:$0x1]  ;;  %v19_v1 = vld [vmem:[%s119_s1 + $0x1] sm:$0x1]  ;;  %v24_v12 = vld [vmem:[%s120_s0 + $0x8] sm:$0xff] }
   0x2   :  { %v18_v2 = vmul.f32 0.0625, %v17_v0  ;;  %v20_v3 = vmul.f32 0.0625, %v19_v1  ;;  %v26_v8 = vshrl.u32 %v25_v6, 7  ;;  %v23_v11 = vld [vmem:[%s120_s0] sm:$0xff] }
   0x3   :  { %v66_v17 = vld [vmem:[%s121_s2] ss:$0 sm:$0xff] }
   0x4   :  { %v21_v4 = vmul.f32 %v18_v2, %v18_v2  ;;  %v27_v9 = vsub.s32 0, %v26_v8  ;;  %v67_v20 = vld [vmem:[%s122_s3] ss:$0 sm:$0xff] }
   0x6   :  { %v22_v5 = vsub.f32 %v20_v3, %v21_v4  ;;  %v28_v10 = vrot.slane %v18_v2, %v27_v9 }
   0x8   :  { %v31_v7 = vadd.f32 1e-05, %v22_v5  ;;  %v29_v13 = vsub.f32 %v23_v11, %v28_v10  ;;  %v30_v14 = vsub.f32 %v24_v12, %v28_v10 }
   0xa   :  { %68 = vrsqrt.f32 %v31_v7 }
  0x17   :  { %v69_v15 = vpop.eup %68 }
  0x18   :  { %v36_v16 = vrot.slane %v69_v15, %v27_v9 }
  0x1a   :  { %v37_v18 = vmul.f32 %v36_v16, %v29_v13  ;;  %v38_v19 = vmul.f32 %v36_v16, %v30_v14 }
  0x1c   :  { %v46_v21 = vmul.f32 %v66_v17, %v37_v18  ;;  %v47_v22 = vmul.f32 %v66_v17, %v38_v19 }
  0x1e   :  { %v55_v23 = vadd.f32 %v67_v20, %v46_v21  ;;  %v56_v24 = vadd.f32 %v67_v20, %v47_v22 }
  0x20   :  { %v57_v25 = vmax.f32 %v55_v23, 0.0  ;;  %v58_v26 = vmax.f32 %v56_v24, 0.0 }
  0x22   :  { %60 = vst.msk [vmem:[%s123_s4] sm:$0xff] %vm59_vm0, %v57_v25  ;;  %61 = vst.msk [vmem:[%s123_s4 + $0x8] sm:$0xff] %vm59_vm0, %v58_v26 }

// kernel: tacotron_forward.26
= control target key start
LH: loop header
LB: loop body
LE: loop exit
PB: predicated region body
PF: predicated region fallthrough
CT: control target
= control target key end

     0   :  { %v176_v0 = vmov 0.0   ;;  %vm177_vm0 = vmmov 0   ;;  %vm45_vm1 = vcmask 392192   ;;  %vm127_vm2 = vcmask 1040384   ;;  %s219_s1 = inlined_call_operand.vmem [shape: bf16[48,48], index: 1, kind: input, shape index: {}]   ;;  %s220_s0 = inlined_call_operand.vmem [shape: bf16[16,48], index: 0, kind: input, shape index: {}]   ;;  %s221_s2 = inlined_call_operand.vmem [shape: f32[16,48], index: 2, kind: output, shape index: {0}]   ;;  %s222_s3 = inlined_call_operand.vmem [shape: f32[2,48], index: 3, kind: output, shape index: {1}]  }
   0x1   :  { %160 = vmatprep.subr.bf16.mxu0 %v176_v0  ;;  %v172_v1 = vld [vmem:[%s219_s1 + $0x10] sm:$0xff]   ;;  %166 = vmatprep.mubr.msk.bf16.mxu0 %vm177_vm0, %v176_v0  ;;  %v173_v2 = vld [vmem:[%s219_s1 + $0x8] sm:$0xff]   ;;  %v174_v3 = vld [vmem:[%s219_s1] sm:$0xff]   ;;  %vm133_vm3 = vcmask 386048  }
   0x2   :  { %161 = vmatpush3.bf16.msra.mxu0 %v172_v1  ;;  %v175_v4 = vld [vmem:[%s220_s0] sm:$0xff]  }
   0x3   :  { %162 = vmatprep.subr.bf16.mxu0 %v176_v0 }
   0x6   :  { %163 = vmatpush3.bf16.msra.mxu0 %v173_v2 }
   0x7   :  { %164 = vmatprep.subr.bf16.mxu0 %v176_v0 }
   0xa   :  { %165 = vmatpush3.bf16.msra.mxu0 %v174_v3 }
   0xd   :  { %167 = vmatmul.mubr.msk.bf16.vlgmr.msra.gmra.mxu0 %vm45_vm1, %v175_v4 }
  0xcd   :  { %v83_v5 = vpop.f32.mrf.mxu0 }
  0xce   :  { %90 = vst.msk [vmem:[%s221_s2] sm:$0xff] %vm45_vm1, %v83_v5  ;;  %v116_v7 = vmul.f32 %v83_v5, %v83_v5  ;;  %v107_v9 = vsel %vm45_vm1, %v83_v5, 0.0 }
  0xcf   :  { %v168_v6 = vpop.f32.mrf.mxu0 }
  0xd0   :  { %v118_v14 = vsel %vm45_vm1, %v116_v7, 0.0 }
  0xd1   :  { %v86_v8 = vpop.f32.mrf.mxu0 }
  0xd2   :  { %91 = vst.msk [vmem:[%s221_s2 + $0x8] sm:$0xff] %vm45_vm1, %v86_v8  ;;  %v108_v10 = vsel %vm45_vm1, %v86_v8, 0.0  ;;  %v117_v11 = vmul.f32 %v86_v8, %v86_v8 }
  0xd3   :  { %v109_v12 = vadd.f32 %v108_v10, %v107_v9  ;;  %v169_v13 = vpop.f32.mrf.mxu0 }
  0xd4   :  { %v119_v15 = vsel %vm45_vm1, %v117_v11, 0.0 }
  0xd5   :  { %v110_v16 = vrot.slane %v109_v12, 4  ;;  %v120_v17 = vadd.f32 %v119_v15, %v118_v14 }
  0xd7   :  { %v111_v18 = vadd.f32 %v110_v16, %v109_v12  ;;  %v121_v19 = vrot.slane %v120_v17, 4 }
  0xd9   :  { %v112_v20 = vrot.slane %v111_v18, 2  ;;  %v122_v21 = vadd.f32 %v121_v19, %v120_v17 }
  0xdb   :  { %v113_v22 = vadd.f32 %v112_v20, %v111_v18  ;;  %v123_v23 = vrot.slane %v122_v21, 2 }
  0xdd   :  { %v114_v24 = vrot.slane %v113_v22, 1  ;;  %v124_v25 = vadd.f32 %v123_v23, %v122_v21 }
  0xdf   :  { %v125_v26 = vrot.slane %v124_v25, 1  ;;  %v115_v27 = vadd.f32 %v114_v24, %v113_v22 }
  0xe1   :  { %v126_v28 = vadd.f32 %v125_v26, %v124_v25 }
  0xe3   :  { %v128_v29 = vsel %vm127_vm2, %v115_v27, %v126_v28 }
  0xe4   :  { %134 = vst.msk [vmem:[%s222_s3] sm:$0x3] %vm133_vm3, %v128_v29 }

// kernel: tacotron_forward.25
= control target key start
LH: loop header
LB: loop body
LE: loop exit
PB: predicated region body
PF: predicated region fallthrough
CT: control target
= control target key end

     0   :  { %v200_v0 = vmov 0.0   ;;  %vm201_vm0 = vmmov 0   ;;  %vm47_vm1 = vcmask 130048   ;;  %vm114_vm2 = vcmask 261120   ;;  %s259_s1 = inlined_call_operand.vmem [shape: bf16[16,32], index: 1, kind: input, shape index: {}]   ;;  %s260_s0 = inlined_call_operand.vmem [shape: bf16[16,16], index: 0, kind: input, shape index: {}]   ;;  %s261_s3 = inlined_call_operand.vmem [shape: bf16[32,16], index: 3, kind: input, shape index: {}]   ;;  %s262_s2 = inlined_call_operand.vmem [shape: f32[1,32], index: 2, kind: input, shape index: {}]   ;;  %s263_s4 = inlined_call_operand.vmem [shape: f32[1,16], index: 4, kind: input, shape index: {}]   ;;  %s264_s5 = inlined_call_operand.vmem [shape: f32[16,16], index: 5, kind: output, shape index: {}]  }
   0x1   :  { %180 = vmatprep.subr.bf16.mxu0 %v200_v0  ;;  %v196_v1 = vld [vmem:[%s259_s1] sm:$0xff]   ;;  %182 = vmatprep.mubr.msk.bf16.mxu0 %vm201_vm0, %v200_v0  ;;  %v198_v3 = vld [vmem:[%s261_s3 + $0x8] sm:$0xff]  }
   0x2   :  { %v197_v2 = vld [vmem:[%s260_s0] sm:$0xff]   ;;  %186 = vmatprep.subr.bf16.mxu1 %v200_v0  ;;  %190 = vmatprep.mubr.msk.bf16.mxu1 %vm201_vm0, %v200_v0 }
   0x3   :  { %181 = vmatpush3.bf16.msra.mxu0 %v196_v1  ;;  %187 = vmatpush3.bf16.msra.mxu1 %v198_v3  ;;  %v199_v4 = vld [vmem:[%s261_s3] sm:$0xff]  }
   0x4   :  { %188 = vmatprep.subr.bf16.mxu1 %v200_v0  ;;  %v167_v5 = vld [vmem:[%s262_s2] ss:$0 sm:$0xff] }
   0x5   :  { %v171_v15 = vld [vmem:[%s263_s4] ss:$0 sm:$0xff] }
   0x6   :  { %183 = vmatmul.mubr.msk.bf16.vlgmr.msra.gmra.mxu0 %vm47_vm1, %v197_v2 }
   0x7   :  { %189 = vmatpush3.bf16.msra.mxu1 %v199_v4 }
  0xc6   :  { %v85_v6 = vpop.f32.mrf.mxu0 }
  0xc7   :  { %v86_v8 = vadd.f32 %v167_v5, %v85_v6 }
  0xc8   :  { %v184_v7 = vpop.f32.mrf.mxu0 }
  0xc9   :  { %v92_v12 = vmax.f32 %v86_v8, 0.0 }
  0xca   :  { %v88_v9 = vpop.f32.mrf.mxu0 }
  0xcb   :  { %v89_v10 = vadd.f32 %v167_v5, %v88_v9 }
  0xcc   :  { %v185_v11 = vpop.f32.mrf.mxu0 }
  0xcd   :  { %v93_v13 = vmax.f32 %v89_v10, 0.0 }
  0xcf   :  { %v94_v14 = vpack.c.bf16 %v93_v13, %v92_v12 }
  0xd1   :  { %191 = vmatmul.mubr.msk.bf16.vlgmr.msra.gmra.mxu1 %vm114_vm2, %v94_v14 }
 0x191   :  { %v152_v16 = vpop.f32.mrf.mxu1 }
 0x192   :  { %v153_v17 = vadd.f32 %v171_v15, %v152_v16 }
 0x193   :  { %v192_v18 = vpop.f32.mrf.mxu1 }
 0x194   :  { %v159_v19 = vmax.f32 %v153_v17, 0.0 }
 0x195   :  { %v155_v20 = vpop.f32.mrf.mxu1 }
 0x196   :  { %161 = vst.msk [vmem:[%s264_s5] sm:$0xff] %vm47_vm1, %v159_v19  ;;  %v156_v21 = vadd.f32 %v171_v15, %v155_v20 }
 0x197   :  { %v193_v22 = vpop.f32.mrf.mxu1 }
 0x198   :  { %v160_v23 = vmax.f32 %v156_v21, 0.0 }
 0x19a   :  { %162 = vst.msk [vmem:[%s264_s5 + $0x8] sm:$0xff] %vm47_vm1, %v160_v23 }

// kernel: tacotron_forward.28
= control target key start
LH: loop header
LB: loop body
LE: loop exit
PB: predicated region body
PF: predicated region fallthrough
CT: control target
= control target key end

     0   :  { %v228_v0 = vmov 0   ;;  %vm97_vm0 = vcmask 130048   ;;  %vm179_vm1 = vcmask 1040384   ;;  %vm185_vm2 = vcmask 123904   ;;  %s298_s1 = inlined_call_operand.vmem [shape: bf16[144,16], index: 1, kind: input, shape index: {}]   ;;  %s299_s0 = inlined_call_operand.vmem [shape: bf16[16,144], index: 0, kind: input, shape index: {}]   ;;  %s300_s2 = inlined_call_operand.vmem [shape: f32[16,16], index: 2, kind: output, shape index: {0}]   ;;  %s301_s3 = inlined_call_operand.vmem [shape: f32[2,16], index: 3, kind: output, shape index: {1}]  }
   0x1   :  { %101 = vmatprep.subr.bf16.mxu0 %v228_v0  ;;  %v216_v1 = vld [vmem:[%s298_s1 + $0x38] sm:$0xff]   ;;  %v217_v2 = vld [vmem:[%s298_s1 + $0x30] sm:$0xff]   ;;  %v218_v3 = vld [vmem:[%s298_s1 + $0x28] sm:$0xff]  }
   0x2   :  { %102 = vmatpush1.bf16.msra.mxu0 %v216_v1  ;;  %v219_v4 = vld [vmem:[%s298_s1 + $0x20] sm:$0xff]   ;;  %v220_v6 = vld [vmem:[%s298_s1 + $0x18] sm:$0xff]   ;;  %v221_v7 = vld [vmem:[%s298_s1 + $0x10] sm:$0xff]  }
   0x3   :  { %103 = vmatprep.subr.bf16.mxu0 %v228_v0  ;;  %v227_v5 = vld [vmem:[%s299_s0 + $0x4] ss:$8 sps:$4 sm:$0xff]   ;;  %v225_v11 = vld [vmem:[%s299_s0] ss:$8 sps:$4 sm:$0xff]  }
   0x4   :  { %214 = vmatprep.mubr.msk.bf16.mxu0 %vm97_vm0, %v227_v5  ;;  %v222_v8 = vld [vmem:[%s298_s1 + $0x8] sm:$0xff]   ;;  %v223_v9 = vld [vmem:[%s298_s1] sm:$0xff]  }
   0x5   :  { %v224_v10 = vld [vmem:[%s298_s1 + $0x40] sm:$0xff]  }
   0x6   :  { %104 = vmatpush1.bf16.msra.mxu0 %v217_v2 }
   0x7   :  { %105 = vmatprep.subr.bf16.mxu0 %v228_v0 }
   0xa   :  { %106 = vmatpush1.bf16.msra.mxu0 %v218_v3 }
   0xb   :  { %107 = vmatprep.subr.bf16.mxu0 %v228_v0 }
   0xe   :  { %108 = vmatpush1.bf16.msra.mxu0 %v219_v4 }
   0xf   :  { %109 = vmatprep.subr.bf16.mxu0 %v228_v0 }
  0x12   :  { %110 = vmatpush1.bf16.msra.mxu0 %v220_v6 }
  0x13   :  { %111 = vmatprep.subr.bf16.mxu0 %v228_v0 }
  0x16   :  { %112 = vmatpush1.bf16.msra.mxu0 %v221_v7 }
  0x17   :  { %113 = vmatprep.subr.bf16.mxu0 %v228_v0 }
  0x1a   :  { %114 = vmatpush1.bf16.msra.mxu0 %v222_v8 }
  0x1b   :  { %115 = vmatprep.subr.bf16.mxu0 %v228_v0 }
  0x1e   :  { %116 = vmatpush1.bf16.msra.mxu0 %v223_v9 }
  0x1f   :  { %131 = vmatprep.subr.bf16.mxu0 %v228_v0 }
  0x22   :  { %132 = vmatpush2.bf16.msra.mxu0 %v224_v10 }
  0x25   :  { %134 = vmatmul.mubr.bf16.vlgmr.msra.gmra.mxu0 %v225_v11 }
  0xe5   :  { %v135_v12 = vpop.f32.mrf.mxu0 }
  0xe6   :  { %142 = vst.msk [vmem:[%s300_s2] sm:$0xff] %vm97_vm0, %v135_v12  ;;  %v168_v14 = vmul.f32 %v135_v12, %v135_v12  ;;  %v159_v16 = vsel %vm97_vm0, %v135_v12, 0.0 }
  0xe7   :  { %v137_v13 = vpop.f32.mrf.mxu0 }
  0xe8   :  { %v170_v21 = vsel %vm97_vm0, %v168_v14, 0.0 }
  0xe9   :  { %v138_v15 = vpop.f32.mrf.mxu0 }
  0xea   :  { %143 = vst.msk [vmem:[%s300_s2 + $0x8] sm:$0xff] %vm97_vm0, %v138_v15  ;;  %v160_v17 = vsel %vm97_vm0, %v138_v15, 0.0  ;;  %v169_v18 = vmul.f32 %v138_v15, %v138_v15 }
  0xeb   :  { %v161_v19 = vadd.f32 %v160_v17, %v159_v16  ;;  %v140_v20 = vpop.f32.mrf.mxu0 }
  0xec   :  { %v171_v22 = vsel %vm97_vm0, %v169_v18, 0.0 }
  0xed   :  { %v162_v23 = vrot.slane %v161_v19, 4  ;;  %v172_v24 = vadd.f32 %v171_v22, %v170_v21 }
  0xef   :  { %v163_v25 = vadd.f32 %v162_v23, %v161_v19  ;;  %v173_v26 = vrot.slane %v172_v24, 4 }
  0xf1   :  { %v164_v27 = vrot.slane %v163_v25, 2  ;;  %v174_v28 = vadd.f32 %v173_v26, %v172_v24 }
  0xf3   :  { %v165_v29 = vadd.f32 %v164_v27, %v163_v25  ;;  %v175_v30 = vrot.slane %v174_v28, 2 }
  0xf5   :  { %v166_v31 = vrot.slane %v165_v29, 1  ;;  %v176_v32 = vadd.f32 %v175_v30, %v174_v28 }
  0xf7   :  { %v177_v33 = vrot.slane %v176_v32, 1  ;;  %v167_v34 = vadd.f32 %v166_v31, %v165_v29 }
  0xf9   :  { %v178_v35 = vadd.f32 %v177_v33, %v176_v32 }
  0xfb   :  { %v180_v36 = vsel %vm179_vm1, %v167_v34, %v178_v35 }
  0xfc   :  { %186 = vst.msk [vmem:[%s301_s3] sm:$0x3] %vm185_vm2, %v180_v36 }

// kernel: tacotron_forward.29
= control target key start
LH: loop header
LB: loop body
LE: loop exit
PB: predicated region body
PF: predicated region fallthrough
CT: control target
= control target key end

     0   :  { %v25_v6 = vlaneseq  ;;  %vm59_vm0 = vcmask 130048   ;;  %s119_s1 = inlined_call_operand.vmem [shape: f32[2,16], index: 1, kind: input, shape index: {}]   ;;  %s120_s0 = inlined_call_operand.vmem [shape: f32[16,16], index: 0, kind: input, shape index: {}]   ;;  %s121_s2 = inlined_call_operand.vmem [shape: f32[1,16], index: 2, kind: input, shape index: {}]   ;;  %s122_s3 = inlined_call_operand.vmem [shape: f32[1,16], index: 3, kind: input, shape index: {}]   ;;  %s123_s4 = inlined_call_operand.vmem [shape: f32[16,16], index: 4, kind: output, shape index: {}]  }
   0x1   :  { %v17_v0 = vld [vmem:[%s119_s1] sm:$0x1]  ;;  %v19_v1 = vld [vmem:[%s119_s1 + $0x1] sm:$0x1]  ;;  %v24_v12 = vld [vmem:[%s120_s0 + $0x8] sm:$0xff] }
   0x2   :  { %v18_v2 = vmul.f32 0.0625, %v17_v0  ;;  %v20_v3 = vmul.f32 0.0625, %v19_v1  ;;  %v26_v8 = vshrl.u32 %v25_v6, 7  ;;  %v23_v11 = vld [vmem:[%s120_s0] sm:$0xff] }
   0x3   :  { %v66_v17 = vld [vmem:[%s121_s2] ss:$0 sm:$0xff] }
   0x4   :  { %v21_v4 = vmul.f32 %v18_v2, %v18_v2  ;;  %v27_v9 = vsub.s32 0, %v26_v8  ;;  %v67_v20 = vld [vmem:[%s122_s3] ss:$0 sm:$0xff] }
   0x6   :  { %v22_v5 = vsub.f32 %v20_v3, %v21_v4  ;;  %v28_v10 = vrot.slane %v18_v2, %v27_v9 }
   0x8   :  { %v31_v7 = vadd.f32 1e-05, %v22_v5  ;;  %v29_v13 = vsub.f32 %v23_v11, %v28_v10  ;;  %v30_v14 = vsub.f32 %v24_v12, %v28_v10 }
   0xa   :  { %68 = vrsqrt.f32 %v31_v7 }
  0x17   :  { %v69_v15 = vpop.eup %68 }
  0x18   :  { %v36_v16 = vrot.slane %v69_v15, %v27_v9 }
  0x1a   :  { %v37_v18 = vmul.f32 %v36_v16, %v29_v13  ;;  %v38_v19 = vmul.f32 %v36_v16, %v30_v14 }
  0x1c   :  { %v46_v21 = vmul.f32 %v66_v17, %v37_v18  ;;  %v47_v22 = vmul.f32 %v66_v17, %v38_v19 }
  0x1e   :  { %v55_v23 = vadd.f32 %v67_v20, %v46_v21  ;;  %v56_v24 = vadd.f32 %v67_v20, %v47_v22 }
  0x20   :  { %v57_v25 = vmax.f32 %v55_v23, 0.0  ;;  %v58_v26 = vmax.f32 %v56_v24, 0.0 }
  0x22   :  { %60 = vst.msk [vmem:[%s123_s4] sm:$0xff] %vm59_vm0, %v57_v25  ;;  %61 = vst.msk [vmem:[%s123_s4 + $0x8] sm:$0xff] %vm59_vm0, %v58_v26 }

// kernel: tacotron_forward.31
= control target key start
LH: loop header
LB: loop body
LE: loop exit
PB: predicated region body
PF: predicated region fallthrough
CT: control target
= control target key end

     0   :  { %v25_v6 = vlaneseq  ;;  %vm57_vm0 = vcmask 130048   ;;  %s117_s1 = inlined_call_operand.vmem [shape: f32[2,16], index: 1, kind: input, shape index: {}]   ;;  %s118_s0 = inlined_call_operand.vmem [shape: f32[16,16], index: 0, kind: input, shape index: {}]   ;;  %s119_s2 = inlined_call_operand.vmem [shape: f32[1,16], index: 2, kind: input, shape index: {}]   ;;  %s120_s3 = inlined_call_operand.vmem [shape: f32[1,16], index: 3, kind: input, shape index: {}]   ;;  %s121_s4 = inlined_call_operand.vmem [shape: f32[16,16], index: 4, kind: output, shape index: {}]  }
   0x1   :  { %v17_v0 = vld [vmem:[%s117_s1] sm:$0x1]  ;;  %v19_v1 = vld [vmem:[%s117_s1 + $0x1] sm:$0x1]  ;;  %v24_v12 = vld [vmem:[%s118_s0 + $0x8] sm:$0xff] }
   0x2   :  { %v18_v2 = vmul.f32 0.0625, %v17_v0  ;;  %v20_v3 = vmul.f32 0.0625, %v19_v1  ;;  %v26_v8 = vshrl.u32 %v25_v6, 7  ;;  %v23_v11 = vld [vmem:[%s118_s0] sm:$0xff] }
   0x3   :  { %v64_v17 = vld [vmem:[%s119_s2] ss:$0 sm:$0xff] }
   0x4   :  { %v21_v4 = vmul.f32 %v18_v2, %v18_v2  ;;  %v27_v9 = vsub.s32 0, %v26_v8  ;;  %v65_v20 = vld [vmem:[%s120_s3] ss:$0 sm:$0xff] }
   0x6   :  { %v22_v5 = vsub.f32 %v20_v3, %v21_v4  ;;  %v28_v10 = vrot.slane %v18_v2, %v27_v9 }
   0x8   :  { %v31_v7 = vadd.f32 1e-05, %v22_v5  ;;  %v29_v13 = vsub.f32 %v23_v11, %v28_v10  ;;  %v30_v14 = vsub.f32 %v24_v12, %v28_v10 }
   0xa   :  { %66 = vrsqrt.f32 %v31_v7 }
  0x17   :  { %v67_v15 = vpop.eup %66 }
  0x18   :  { %v36_v16 = vrot.slane %v67_v15, %v27_v9 }
  0x1a   :  { %v37_v18 = vmul.f32 %v36_v16, %v29_v13  ;;  %v38_v19 = vmul.f32 %v36_v16, %v30_v14 }
  0x1c   :  { %v46_v21 = vmul.f32 %v64_v17, %v37_v18  ;;  %v47_v22 = vmul.f32 %v64_v17, %v38_v19 }
  0x1e   :  { %v55_v23 = vadd.f32 %v65_v20, %v46_v21  ;;  %v56_v24 = vadd.f32 %v65_v20, %v47_v22 }
  0x20   :  { %58 = vst.msk [vmem:[%s121_s4] sm:$0xff] %vm57_vm0, %v55_v23  ;;  %59 = vst.msk [vmem:[%s121_s4 + $0x8] sm:$0xff] %vm57_vm0, %v56_v24 }

// kernel: tacotron_forward.30
= control target key start
LH: loop header
LB: loop body
LE: loop exit
PB: predicated region body
PF: predicated region fallthrough
CT: control target
= control target key end

     0   :  { %v177_v0 = vmov 0.0   ;;  %vm178_vm0 = vmmov 0   ;;  %vm45_vm1 = vcmask 392192   ;;  %vm90_vm2 = vcmask 130048   ;;  %s220_s1 = inlined_call_operand.vmem [shape: bf16[48,16], index: 1, kind: input, shape index: {}]   ;;  %s221_s0 = inlined_call_operand.vmem [shape: bf16[16,48], index: 0, kind: input, shape index: {}]   ;;  %s222_s2 = inlined_call_operand.vmem [shape: f32[16,16], index: 2, kind: output, shape index: {0}]   ;;  %s223_s3 = inlined_call_operand.vmem [shape: f32[2,16], index: 3, kind: output, shape index: {1}]  }
   0x1   :  { %161 = vmatprep.subr.bf16.mxu0 %v177_v0  ;;  %v173_v1 = vld [vmem:[%s220_s1 + $0x10] sm:$0xff]   ;;  %167 = vmatprep.mubr.msk.bf16.mxu0 %vm178_vm0, %v177_v0  ;;  %v174_v2 = vld [vmem:[%s220_s1 + $0x8] sm:$0xff]   ;;  %v175_v3 = vld [vmem:[%s220_s1] sm:$0xff]   ;;  %vm128_vm3 = vcmask 1040384   ;;  %vm134_vm4 = vcmask 123904  }
   0x2   :  { %162 = vmatpush3.bf16.msra.mxu0 %v173_v1  ;;  %v176_v4 = vld [vmem:[%s221_s0] sm:$0xff]  }
   0x3   :  { %163 = vmatprep.subr.bf16.mxu0 %v177_v0 }
   0x6   :  { %164 = vmatpush3.bf16.msra.mxu0 %v174_v2 }
   0x7   :  { %165 = vmatprep.subr.bf16.mxu0 %v177_v0 }
   0xa   :  { %166 = vmatpush3.bf16.msra.mxu0 %v175_v3 }
   0xd   :  { %168 = vmatmul.mubr.msk.bf16.vlgmr.msra.gmra.mxu0 %vm45_vm1, %v176_v4 }
  0xcd   :  { %v83_v5 = vpop.f32.mrf.mxu0 }
  0xce   :  { %91 = vst.msk [vmem:[%s222_s2] sm:$0xff] %vm90_vm2, %v83_v5  ;;  %v117_v7 = vmul.f32 %v83_v5, %v83_v5  ;;  %v108_v9 = vsel %vm90_vm2, %v83_v5, 0.0 }
  0xcf   :  { %v169_v6 = vpop.f32.mrf.mxu0 }
  0xd0   :  { %v119_v14 = vsel %vm90_vm2, %v117_v7, 0.0 }
  0xd1   :  { %v86_v8 = vpop.f32.mrf.mxu0 }
  0xd2   :  { %92 = vst.msk [vmem:[%s222_s2 + $0x8] sm:$0xff] %vm90_vm2, %v86_v8  ;;  %v109_v10 = vsel %vm90_vm2, %v86_v8, 0.0  ;;  %v118_v11 = vmul.f32 %v86_v8, %v86_v8 }
  0xd3   :  { %v110_v12 = vadd.f32 %v109_v10, %v108_v9  ;;  %v170_v13 = vpop.f32.mrf.mxu0 }
  0xd4   :  { %v120_v15 = vsel %vm90_vm2, %v118_v11, 0.0 }
  0xd5   :  { %v111_v16 = vrot.slane %v110_v12, 4  ;;  %v121_v17 = vadd.f32 %v120_v15, %v119_v14 }
  0xd7   :  { %v112_v18 = vadd.f32 %v111_v16, %v110_v12  ;;  %v122_v19 = vrot.slane %v121_v17, 4 }
  0xd9   :  { %v113_v20 = vrot.slane %v112_v18, 2  ;;  %v123_v21 = vadd.f32 %v122_v19, %v121_v17 }
  0xdb   :  { %v114_v22 = vadd.f32 %v113_v20, %v112_v18  ;;  %v124_v23 = vrot.slane %v123_v21, 2 }
  0xdd   :  { %v115_v24 = vrot.slane %v114_v22, 1  ;;  %v125_v25 = vadd.f32 %v124_v23, %v123_v21 }
  0xdf   :  { %v126_v26 = vrot.slane %v125_v25, 1  ;;  %v116_v27 = vadd.f32 %v115_v24, %v114_v22 }
  0xe1   :  { %v127_v28 = vadd.f32 %v126_v26, %v125_v25 }
  0xe3   :  { %v129_v29 = vsel %vm128_vm3, %v116_v27, %v127_v28 }
  0xe4   :  { %135 = vst.msk [vmem:[%s223_s3] sm:$0x3] %vm134_vm4, %v129_v29 }

// kernel: tacotron_forward.32
= control target key start
LH: loop header
LB: loop body
LE: loop exit
PB: predicated region body
PF: predicated region fallthrough
CT: control target
= control target key end

     0   :  { %v386_v0 = vmov 0.0   ;;  %vm387_vm0 = vmmov 0   ;;  %vm41_vm1 = vcmask 130048   ;;  %s464_s3 = inlined_call_operand.vmem [shape: bf16[2,16,16], index: 3, kind: input, shape index: {}]   ;;  %s465_s0 = inlined_call_operand.vmem [shape: f32[16,16], index: 0, kind: input, shape index: {}]   ;;  %s466_s1 = inlined_call_operand.vmem [shape: bf16[2,16,16], index: 1, kind: input, shape index: {}]   ;;  %s467_s4 = inlined_call_operand.vmem [shape: f32[2,1,16], index: 4, kind: input, shape index: {}]   ;;  %s468_s2 = inlined_call_operand.vmem [shape: f32[2,1,16], index: 2, kind: input, shape index: {}]   ;;  %s469_s5 = inlined_call_operand.vmem [shape: f32[16,16], index: 5, kind: output, shape index: {}]  }
   0x1   :  { %346 = vmatprep.subr.bf16.mxu1 %v386_v0  ;;  %v366_v1 = vld [vmem:[%s464_s3] sm:$0xff]   ;;  %348 = vmatprep.mubr.msk.bf16.mxu1 %vm387_vm0, %v386_v0  ;;  %v22_v3 = vld [vmem:[%s465_s0 + $0x8] sm:$0xff] }
   0x2   :  { %v21_v2 = vld [vmem:[%s465_s0] sm:$0xff]  ;;  %340 = vmatprep.subr.bf16.mxu0 %v386_v0  ;;  %342 = vmatprep.mubr.msk.bf16.mxu0 %vm387_vm0, %v386_v0  ;;  %v368_v6 = vld [vmem:[%s464_s3 + $0x8] sm:$0xff]  }
   0x3   :  { %347 = vmatpush3.bf16.msra.mxu1 %v366_v1  ;;  %v27_v4 = vpack.c.bf16 %v22_v3, %v21_v2  ;;  %v367_v5 = vld [vmem:[%s466_s1] sm:$0xff]   ;;  %v369_v7 = vld [vmem:[%s466_s1 + $0x8] sm:$0xff]  }
   0x4   :  { %358 = vmatprep.subr.bf16.mxu1 %v386_v0  ;;  %341 = vmatpush3.bf16.msra.mxu0 %v367_v5  ;;  %v313_v8 = vld [vmem:[%s467_s4] ss:$0 sm:$0xff]  ;;  %v327_v41 = vld [vmem:[%s467_s4 + $0x1] ss:$0 sm:$0xff] }
   0x5   :  { %352 = vmatprep.subr.bf16.mxu0 %v386_v0  ;;  %v310_v25 = vld [vmem:[%s468_s2] ss:$0 sm:$0xff]  ;;  %v323_v58 = vld [vmem:[%s468_s2 + $0x1] ss:$0 sm:$0xff] }
   0x6   :  { %349 = vmatmul.mubr.msk.bf16.vlgmr.msra.gmra.mxu1 %vm41_vm1, %v27_v4 }
   0x7   :  { %360 = vmatprep.mubr.msk.bf16.mxu1 %vm387_vm0, %v386_v0  ;;  %343 = vmatmul.mubr.msk.bf16.vlgmr.msra.gmra.mxu0 %vm41_vm1, %v27_v4 }
   0x8   :  { %354 = vmatprep.mubr.msk.bf16.mxu0 %vm387_vm0, %v386_v0  ;;  %359 = vmatpush3.bf16.msra.mxu1 %v368_v6 }
   0x9   :  { %353 = vmatpush3.bf16.msra.mxu0 %v369_v7 }
  0xc6   :  { %v135_v9 = vpop.f32.mrf.mxu1 }
  0xc7   :  { %v136_v10 = vadd.f32 %v313_v8, %v135_v9  ;;  %v79_v12 = vpop.f32.mrf.mxu0 }
  0xc8   :  { %v350_v11 = vpop.f32.mrf.mxu1  ;;  %v80_v26 = vadd.f32 %v310_v25, %v79_v12 }
  0xc9   :  { %v316_v13 = vmul.f32 -1.442695, %v136_v10  ;;  %v344_v15 = vpop.f32.mrf.mxu0 }
  0xca   :  { %v138_v14 = vpop.f32.mrf.mxu1  ;;  %v86_v30 = vmax.f32 %v80_v26, 0.0 }
  0xcb   :  { %370 = vpow2.f32 %v316_v13  ;;  %v139_v16 = vadd.f32 %v313_v8, %v138_v14  ;;  %v82_v18 = vpop.f32.mrf.mxu0 }
  0xcc   :  { %v351_v17 = vpop.f32.mrf.mxu1  ;;  %v83_v29 = vadd.f32 %v310_v25, %v82_v18 }
  0xcd   :  { %v317_v19 = vmul.f32 -1.442695, %v139_v16  ;;  %v345_v20 = vpop.f32.mrf.mxu0 }
  0xce   :  { %v87_v33 = vmax.f32 %v83_v29, 0.0 }
  0xcf   :  { %372 = vpow2.f32 %v317_v19 }
  0xd8   :  { %v371_v21 = vpop.eup %370 }
  0xd9   :  { %v148_v22 = vadd.f32 1.0, %v371_v21 }
  0xdb   :  { %374 = vrcp.f32 %v148_v22 }
  0xdc   :  { %v373_v23 = vpop.eup %372 }
  0xdd   :  { %v149_v24 = vadd.f32 1.0, %v373_v23 }
  0xdf   :  { %376 = vrcp.f32 %v149_v24 }
  0xe8   :  { %v375_v27 = vpop.eup %374 }
  0xe9   :  { %v156_v28 = vsub.f32 1.0, %v375_v27  ;;  %v154_v35 = vmul.f32 %v375_v27, %v86_v30 }
  0xeb   :  { %v158_v32 = vmul.f32 %v156_v28, %v21_v2 }
  0xec   :  { %v377_v31 = vpop.eup %376 }
  0xed   :  { %v157_v34 = vsub.f32 1.0, %v377_v31  ;;  %v155_v36 = vmul.f32 %v377_v31, %v87_v33  ;;  %v160_v38 = vadd.f32 %v158_v32, %v154_v35 }
  0xef   :  { %v159_v37 = vmul.f32 %v157_v34, %v22_v3 }
  0xf1   :  { %v161_v39 = vadd.f32 %v159_v37, %v155_v36 }
  0xf3   :  { %v168_v40 = vpack.c.bf16 %v161_v39, %v160_v38 }
  0xf5   :  { %355 = vmatmul.mubr.msk.bf16.vlgmr.msra.gmra.mxu0 %vm41_vm1, %v168_v40  ;;  %361 = vmatmul.mubr.msk.bf16.vlgmr.msra.gmra.mxu1 %vm41_vm1, %v168_v40 }
 0x1b5   :  { %v220_v42 = vpop.f32.mrf.mxu0  ;;  %v277_v43 = vpop.f32.mrf.mxu1 }
 0x1b6   :  { %v278_v44 = vadd.f32 %v327_v41, %v277_v43  ;;  %v221_v59 = vadd.f32 %v323_v58, %v220_v42 }
 0x1b7   :  { %v356_v45 = vpop.f32.mrf.mxu0  ;;  %v362_v46 = vpop.f32.mrf.mxu1 }
 0x1b8   :  { %v330_v47 = vmul.f32 -1.442695, %v278_v44  ;;  %v227_v61 = vmax.f32 %v221_v59, 0.0 }
 0x1b9   :  { %v223_v48 = vpop.f32.mrf.mxu0  ;;  %v280_v49 = vpop.f32.mrf.mxu1 }
 0x1ba   :  { %378 = vpow2.f32 %v330_v47  ;;  %v281_v50 = vadd.f32 %v327_v41, %v280_v49  ;;  %v224_v63 = vadd.f32 %v323_v58, %v223_v48 }
 0x1bb   :  { %v357_v51 = vpop.f32.mrf.mxu0  ;;  %v363_v52 = vpop.f32.mrf.mxu1 }
 0x1bc   :  { %v331_v53 = vmul.f32 -1.442695, %v281_v50  ;;  %v228_v4 = vmax.f32 %v224_v63, 0.0 }
 0x1be   :  { %380 = vpow2.f32 %v331_v53 }
 0x1c7   :  { %v379_v54 = vpop.eup %378 }
 0x1c8   :  { %v290_v55 = vadd.f32 1.0, %v379_v54 }
 0x1ca   :  { %382 = vrcp.f32 %v290_v55 }
 0x1cb   :  { %v381_v56 = vpop.eup %380 }
 0x1cc   :  { %v291_v57 = vadd.f32 1.0, %v381_v56 }
 0x1ce   :  { %384 = vrcp.f32 %v291_v57 }
 0x1d7   :  { %v383_v60 = vpop.eup %382 }
 0x1d8   :  { %v298_v62 = vsub.f32 1.0, %v383_v60  ;;  %v296_v0 = vmul.f32 %v383_v60, %v227_v61 }
 0x1da   :  { %v300_v1 = vmul.f32 %v298_v62, %v160_v38 }
 0x1db   :  { %v385_v2 = vpop.eup %384 }
 0x1dc   :  { %v302_v3 = vadd.f32 %v300_v1, %v296_v0  ;;  %v299_v5 = vsub.f32 1.0, %v385_v2  ;;  %v297_v6 = vmul.f32 %v385_v2, %v228_v4 }
 0x1de   :  { %304 = vst.msk [vmem:[%s469_s5] sm:$0xff] %vm41_vm1, %v302_v3  ;;  %v301_v7 = vmul.f32 %v299_v5, %v161_v39 }
 0x1e0   :  { %v303_v8 = vadd.f32 %v301_v7, %v297_v6 }
 0x1e2   :  { %305 = vst.msk [vmem:[%s469_s5 + $0x8] sm:$0xff] %vm41_vm1, %v303_v8 }

// kernel: tacotron_forward.33
= control target key start
LH: loop header
LB: loop body
LE: loop exit
PB: predicated region body
PF: predicated region fallthrough
CT: control target
= control target key end

     0   :  { %v105_v0 = vmov 0.0   ;;  %vm106_vm0 = vmmov 0   ;;  %vm37_vm1 = vcmask 130048   ;;  %vm82_vm2 = vcmask 785408   ;;  %s142_s1 = inlined_call_operand.vmem [shape: bf16[16,96], index: 1, kind: input, shape index: {}]   ;;  %s143_s0 = inlined_call_operand.vmem [shape: bf16[16,16], index: 0, kind: input, shape index: {}]   ;;  %s144_s2 = inlined_call_operand.vmem [shape: f32[1,96], index: 2, kind: input, shape index: {}]   ;;  %s145_s3 = inlined_call_operand.vmem [shape: f32[16,96], index: 3, kind: output, shape index: {}]  }
   0x1   :  { %95 = vmatprep.subr.bf16.mxu0 %v105_v0  ;;  %v103_v1 = vld [vmem:[%s142_s1] sm:$0xff]   ;;  %97 = vmatprep.mubr.msk.bf16.mxu0 %vm106_vm0, %v105_v0 }
   0x2   :  { %v104_v2 = vld [vmem:[%s143_s0] sm:$0xff]   ;;  %96 = vmatpush3.bf16.msra.mxu0 %v103_v1 }
   0x3   :  { %v89_v3 = vld [vmem:[%s144_s2] ss:$0 sm:$0xff] }
   0x5   :  { %98 = vmatmul.mubr.msk.bf16.vlgmr.msra.gmra.mxu0 %vm37_vm1, %v104_v2 }
  0xc5   :  { %v75_v4 = vpop.f32.mrf.mxu0 }
  0xc6   :  { %v76_v5 = vadd.f32 %v89_v3, %v75_v4 }
  0xc7   :  { %v99_v6 = vpop.f32.mrf.mxu0 }
  0xc8   :  { %83 = vst.msk [vmem:[%s145_s3] sm:$0xff] %vm82_vm2, %v76_v5 }
  0xc9   :  { %v78_v7 = vpop.f32.mrf.mxu0 }
  0xca   :  { %v79_v8 = vadd.f32 %v89_v3, %v78_v7 }
  0xcb   :  { %v100_v9 = vpop.f32.mrf.mxu0 }
  0xcc   :  { %84 = vst.msk [vmem:[%s145_s3 + $0x8] sm:$0xff] %vm82_vm2, %v79_v8 }

// kernel: tacotron_forward.34
= control target key start
LH: loop header
LB: loop body
LE: loop exit
PB: predicated region body
PF: predicated region fallthrough
CT: control target
= control target key end

     0   :  { %s663_s12 = smov 0   ;;  %s665_s13 = smov 0   ;;  %s731_s0 = inlined_call_operand.vmem [shape: f32[2,8,8,48], index: 0, kind: input, shape index: {}]   ;;  %s732_s1 = inlined_call_operand.vmem [shape: bf16[2,16,48], index: 1, kind: input, shape index: {}]   ;;  %s733_s2 = inlined_call_operand.vmem [shape: f32[2,1,48], index: 2, kind: input, shape index: {}]   ;;  %s734_s3 = inlined_call_operand.vmem [shape: f32[2,8,8,16], index: 3, kind: output, shape index: {}]  }
   0x1   :  { %s667_s14 = smov 0   ;;  %s669_s15 = smov 0  }
   0x2   :  { %s671_s16 = smov 0  }
   0x3 LB: > { %s22_s17 = sadd.s32 1, %s626_s14  ;;  %s25_s18 = sadd.s32 1, %s630_s15  ;;  %s634_s16 = sphi %s671_s16, %s13_s16   ;;  %s630_s15 = sphi %s669_s15, %s738_s15   ;;  %s626_s14 = sphi %s667_s14, %s737_s14   ;;  %s622_s13 = sphi %s665_s13, %s736_s13   ;;  %s618_s12 = sphi %s663_s12, %s735_s12  }
   0x4   : > { %p23_p0 = scmp.ge.s32.totalorder %s22_s17, 8  ;;  %p517_p1 = scmp.ge.s32.totalorder %s634_s16, 1 }
   0x5   : > { %p198_p2 = scmp.lt.s32.totalorder %s634_s16, 17 }
   0x6   : > { %s740_s17 = smov (%p23_p0, %s22_s17), 0  ;;  %s742_s18 = smov (!%p23_p0, %s25_s18), %s630_s15 }
   0x7   : > { %p199_p3 = pnand %p517_p1, %p198_p2  ;;  %p27_p4 = scmp.ge.s32.totalorder %s742_s18, 2 }
   0x8   : > { %s518_s19 = sshll.u32 (!%p199_p3), %s618_s12, 1  ;;  %p248_p5 = scmp.lt.s32.totalorder (!%p199_p3), %s622_s13, 1 }
   0x9   : > { %s744_s18 = smov (%p27_p4, %s742_s18), 0  ;;  %202 = sbr.rel (%p199_p3) target bundleno = 715 (0x2cb), region = 32 }
   0xa   : > { %s245_s20 = ssub.s32 (!%p199_p3), 7, %s518_s19  ;;  %p526_p7 = scmp.ne.s32.totalorder (!%p199_p3), %s618_s12, 0 }
   0xb   : > { %s246_s21 = smul.u32 (!%p199_p3), %s622_s13, %s245_s20 }
   0xd   : > { %s247_s22 = sadd.s32 (!%p199_p3), %s618_s12, %s246_s21 }
   0xe   : > { %s746_s13 = smov (!%p248_p5, %s622_s13), 1  ;;  %p250_p6 = scmp.lt.s32.totalorder %s247_s22, 7 }
   0xf   : > { %s519_s23 = sshll.u32 %s746_s13, 3  ;;  %s267_s29 = scalar_lea.vmem %s733_s2, %s746_s13 }
  0x10   : > { %s264_s26 = scalar_lea.vmem %s732_s1, %s519_s23  ;;  %s748_s22 = smov (!%p250_p6, %s247_s22), 7 }
  0x11   : > { %s253_s30 = sadd.s32 %s519_s23, %s748_s22  ;;  %288 = sbr.rel (%p526_p7) target bundleno = 24 (0x18), region = 36 }
  0x12   : > { %s520_s4 = sshll.u32 %s253_s30, 3 }
  0x13   : > { %s255_s7 = scalar_lea.vmem %s731_s0, %s520_s4  ;;  %s709_s10 = scalar_lea.vmem %s734_s3, %s520_s4 }
  0x16   : > { %vm289_vm0 = vcmask 130048   ;;  %v636_v0 = vmov 0.0  }
  0x17   : > { %290 = vst.msk [vmem:[#allocation2] sm:$0xff] %vm289_vm0, %v636_v0 }
  0x18 PF: > { %v589_v1 = vld [vmem:[%s264_s26] sm:$0xff]   ;;  %v637_v2 = vmov 0.0   ;;  %vm638_vm1 = vmmov 0   ;;  %vm309_vm2 = vcmask 130048   ;;  %s639_s11 = smov 96   ;;  %s640_s12 = smov 32  }
  0x19   : > { %536 = vmatprep.subr.bf16.mxu0 %v637_v2  ;;  %538 = vmatprep.mubr.msk.bf16.mxu0 %vm638_vm1, %v637_v2  ;;  %v527_v5 = vld [vmem:[%s267_s29] ss:$0 sm:$0xff]  ;;  %s641_s13 = smov 112   ;;  %s642_s19 = smov 16  }
  0x1a   : > { %537 = vmatpush3.bf16.msra.mxu0 %v589_v1  ;;  %v291_v11 = vld [vmem:[%s255_s7] sm:$0xff] }
  0x1e   : > { %v295_v3 = vld [vmem:[#allocation2] sm:$0xff] }
  0x1f   : > { %v296_v4 = vpack.c.bf16 %v295_v3, %v295_v3 }
  0x21   : > { %539 = vmatmul.mubr.msk.bf16.vlgmr.msra.gmra.mxu0 %vm309_vm2, %v296_v4 }
  0xe1   : > { %v347_v6 = vpop.f32.mrf.mxu0 }
  0xe2   : > { %v348_v7 = vadd.f32 %v527_v5, %v347_v6 }
  0xe3   : > { %v540_v8 = vpop.f32.mrf.mxu0 }
  0xe4   : > { %361 = vrot.lane.b32.xlu0 %v348_v7, %s639_s11  ;;  %v353_v12 = vadd.f32 %v348_v7, %v291_v11 }
  0xe5   : > { %v350_v9 = vpop.f32.mrf.mxu0 }
  0xe6   : > { %v530_v13 = vmul.f32 -1.442695, %v353_v12 }
  0xe7   : > { %v541_v10 = vpop.f32.mrf.mxu0 }
  0xe8   : > { %590 = vpow2.f32 %v530_v13 }
  0xf5   : > { %v591_v14 = vpop.eup %590 }
  0xf6   : > { %v357_v15 = vadd.f32 1.0, %v591_v14 }
  0xf8   : > { %592 = vrcp.f32 %v357_v15 }
 0x105   : > { %v593_v16 = vpop.eup %592 }
 0x106   : > { %v371_v23 = vsub.f32 1.0, %v593_v16 }
 0x156   : > { %v362_v17 = vpop.permute.xlu0 %361 }
 0x157   : > { %v364_v18 = vmul.f32 %v593_v16, %v362_v17 }
 0x159   : > { %366 = vrot.lane.b32.xlu0 %v364_v18, %s640_s12 }
 0x1cb   : > { %v367_v19 = vpop.permute.xlu0 %366 }
 0x1cc   : > { %v369_v20 = vadd.f32 %v367_v19, %v291_v11 }
 0x1ce   : > { %594 = vtanh.f32 %v369_v20 }
 0x1db   : > { %v595_v21 = vpop.eup %594 }
 0x1dc   : > { %373 = vrot.lane.b32.xlu1 %v595_v21, %s641_s13 }
 0x1e0   : > { %378 = vrot.lane.b32.xlu1 %v295_v3, %s642_s19 }
 0x24e   : > { %v374_v22 = vpop.permute.xlu1 %373 }
 0x24f   : > { %v376_v25 = vmul.f32 %v374_v22, %v371_v23 }
 0x252   : > { %v379_v24 = vpop.permute.xlu1 %378 }
 0x253   : > { %v381_v26 = vmul.f32 %v593_v16, %v379_v24 }
 0x255   : > { %v382_v27 = vadd.f32 %v381_v26, %v376_v25 }
 0x257   : > { %384 = vrot.lane.b32.xlu0 %v382_v27, %s641_s13 }
 0x2c9   : > { %v385_v28 = vpop.permute.xlu0 %384 }
 0x2ca   : > { %387 = vst.msk [vmem:[#allocation2] sm:$0xff] %vm309_vm2, %v385_v28  ;;  %388 = vst.msk [vmem:[%s709_s10] sm:$0xff] %vm309_vm2, %v385_v28 }
 0x2cb PF: > { %s13_s16 = sadd.s32 1, %s634_s16   ;;  %s735_s12 = smov %s626_s14 }
 0x2cc   : > { %p10_p8 = scmp.ge.s32.totalorder %s13_s16, 18   ;;  %s736_s13 = smov %s630_s15 }
 0x2cd   : > { %s737_s14 = smov %s740_s17  ;;  %s738_s15 = smov %s744_s18 }
 0x2ce   :  { %12 = sbr.rel (!%p10_p8) target bundleno = 3 (0x3), region = 72 }

// kernel: tacotron_forward.35
= control target key start
LH: loop header
LB: loop body
LE: loop exit
PB: predicated region body
PF: predicated region fallthrough
CT: control target
= control target key end

     0   :  { %vm17_vm0 = vcmask 261120   ;;  %s167_s1 = inlined_call_operand.vmem [shape: f32[32,32], index: 1, kind: input, shape index: {}]   ;;  %s168_s0 = inlined_call_operand.vmem [shape: f32[16,32], index: 0, kind: input, shape index: {}]   ;;  %s169_s2 = inlined_call_operand.vmem [shape: f32[16,32], index: 2, kind: output, shape index: {}]  }
   0x1   :  { %v16_v0 = vld [vmem:[%s167_s1 + $0x18] sm:$0xff]  ;;  %v15_v1 = vld [vmem:[%s167_s1 + $0x10] sm:$0xff]  ;;  %v11_v2 = vld [vmem:[%s168_s0] sm:$0xff] }
   0x2   :  { %113 = vmatprep.subr.mxu0 %v16_v0  ;;  %v14_v3 = vld [vmem:[%s167_s1 + $0x8] sm:$0xff]  ;;  %121 = vmatprep.mubr.msk.f32.mxu0 %vm17_vm0, %v11_v2  ;;  %v13_v4 = vld [vmem:[%s167_s1] sm:$0xff] }
   0x3   :  { %114 = vmatpush3.msra.mxu0 %v16_v0  ;;  %v12_v5 = vld [vmem:[%s168_s0 + $0x8] sm:$0xff] }
   0x4   :  { %115 = vmatprep.subr.mxu0 %v15_v1 }
   0x5   :  { %116 = vmatpush3.msra.mxu0 %v15_v1 }
   0x6   :  { %117 = vmatprep.subr.mxu0 %v14_v3 }
   0x7   :  { %118 = vmatpush3.msra.mxu0 %v14_v3 }
   0x8   :  { %119 = vmatprep.subr.mxu0 %v13_v4 }
   0x9   :  { %120 = vmatpush3.msra.mxu0 %v13_v4 }
   0xa   :  { %122 = vmatmul.mubr.msk.f32.vlgmr.msra.gmra.mxu0 %vm17_vm0, %v12_v5 }
  0xca   :  { %v123_v6 = vpop.f32.mrf.mxu0 }
  0xcb   :  { %100 = vst.msk [vmem:[%s169_s2 + $0x8] sm:$0xff] %vm17_vm0, %v123_v6 }
  0xcc   :  { %v90_v7 = vpop.f32.mrf.mxu0 }
  0xcd   :  { %99 = vst.msk [vmem:[%s169_s2] sm:$0xff] %vm17_vm0, %v90_v7 }

// kernel: tacotron_forward.36
= control target key start
LH: loop header
LB: loop body
LE: loop exit
PB: predicated region body
PF: predicated region fallthrough
CT: control target
= control target key end

     0   :  { %vm45_vm0 = vcmask 1043456   ;;  %v120_v0 = vmov 0.0   ;;  %vm121_vm1 = vmmov 0   ;;  %vm41_vm2 = vcmask 195584   ;;  %s160_s1 = inlined_call_operand.vmem [shape: bf16[24,32], index: 1, kind: input, shape index: {}]   ;;  %s161_s0 = inlined_call_operand.vmem [shape: bf16[16,24], index: 0, kind: input, shape index: {}]   ;;  %s162_s2 = inlined_call_operand.vmem [shape: f32[1,32], index: 2, kind: input, shape index: {}]   ;;  %s163_s3 = inlined_call_operand.vmem [shape: f32[16,32], index: 3, kind: output, shape index: {}]  }
   0x1   :  { %107 = vmatprep.subr.bf16.mxu0 %v120_v0  ;;  %v117_v1 = vld [vmem:[%s160_s1 + $0x8] ss:$0 sps:$4 sm:$0xff]   ;;  %111 = vmatprep.mubr.msk.bf16.mxu0 %vm121_vm1, %v120_v0  ;;  %v118_v3 = vld [vmem:[%s160_s1] sm:$0xff]   ;;  %vm92_vm3 = vcmask 261120  }
   0x2   :  { %v47_v2 = vsel %vm45_vm0, %v117_v1, 0  ;;  %v119_v4 = vld [vmem:[%s161_s0] sm:$0xff]  }
   0x3   :  { %108 = vmatpush3.bf16.msra.mxu0 %v47_v2  ;;  %v99_v5 = vld [vmem:[%s162_s2] ss:$0 sm:$0xff] }
   0x4   :  { %109 = vmatprep.subr.bf16.mxu0 %v120_v0 }
   0x7   :  { %110 = vmatpush3.bf16.msra.mxu0 %v118_v3 }
   0xa   :  { %112 = vmatmul.mubr.msk.bf16.vlgmr.msra.gmra.mxu0 %vm41_vm2, %v119_v4 }
  0xca   :  { %v83_v6 = vpop.f32.mrf.mxu0 }
  0xcb   :  { %v84_v7 = vadd.f32 %v99_v5, %v83_v6 }
  0xcc   :  { %v113_v8 = vpop.f32.mrf.mxu0 }
  0xcd   :  { %v90_v9 = vmax.f32 %v84_v7, 0.0 }
  0xce   :  { %v86_v10 = vpop.f32.mrf.mxu0 }
  0xcf   :  { %93 = vst.msk [vmem:[%s163_s3] sm:$0xff] %vm92_vm3, %v90_v9  ;;  %v87_v11 = vadd.f32 %v99_v5, %v86_v10 }
  0xd0   :  { %v114_v12 = vpop.f32.mrf.mxu0 }
  0xd1   :  { %v91_v13 = vmax.f32 %v87_v11, 0.0 }
  0xd3   :  { %94 = vst.msk [vmem:[%s163_s3 + $0x8] sm:$0xff] %vm92_vm3, %v91_v13 }

// kernel: tacotron_forward.37
= control target key start
LH: loop header
LB: loop body
LE: loop exit
PB: predicated region body
PF: predicated region fallthrough
CT: control target
= control target key end

     0   :  { %v194_v0 = vlaneseq  ;;  %vm107_vm0 = vcmask 785408   ;;  %v512_v29 = vmov 0.0   ;;  %vm513_vm1 = vmmov 0   ;;  %s617_s1 = inlined_call_operand.vmem [shape: bf16[96,32], index: 1, kind: input, shape index: {}]   ;;  %s618_s0 = inlined_call_operand.vmem [shape: bf16[64,96], index: 0, kind: input, shape index: {}]   ;;  %s619_s3 = inlined_call_operand.vmem [shape: f32[8,8], index: 3, kind: input, shape index: {}]   ;;  %s620_s4 = inlined_call_operand.vmem [shape: f32[32,32], index: 4, kind: input, shape index: {}]   ;;  %s621_s2 = inlined_call_operand.vmem [shape: f32[1,32], index: 2, kind: input, shape index: {}]   ;;  %s622_s5 = inlined_call_operand.vmem [shape: f32[1,32], index: 5, kind: input, shape index: {}]   ;;  %s623_s6 = inlined_call_operand.vmem [shape: f32[8,32], index: 6, kind: output, shape index: {}]  }
   0x1   :  { %v502_v1 = vld [vmem:[%s617_s1 + $0x28] sm:$0xff]   ;;  %v503_v2 = vld [vmem:[%s617_s1 + $0x20] sm:$0xff]   ;;  %v504_v4 = vld [vmem:[%s617_s1 + $0x18] sm:$0xff]   ;;  %vm258_vm2 = vcmask 261120   ;;  %vm334_vm3 = vcmask 1041409   ;;  %vm336_vm4 = vcmask 1042434  }
   0x2   :  { %457 = vmatprep.subr.bf16.mxu0 %v502_v1  ;;  %488 = vmatprep.subr.bf16.mxu1 %v502_v1  ;;  %v195_v3 = vshrl.u32 %v194_v0, 7  ;;  %v508_v5 = vld [vmem:[%s618_s0] sm:$0xff]   ;;  %v509_v7 = vld [vmem:[%s618_s0 + $0x10] sm:$0xff]   ;;  %v506_v15 = vld [vmem:[%s617_s1 + $0x8] sm:$0xff]   ;;  %vm338_vm5 = vcmask 1043459   ;;  %vm340_vm6 = vcmask 1044484  }
   0x3   :  { %458 = vmatpush3.bf16.msra.mxu0 %v502_v1  ;;  %494 = vmatpush3.bf16.msra.mxu1 %v502_v1  ;;  %v505_v9 = vld [vmem:[%s617_s1 + $0x10] sm:$0xff]   ;;  %v193_v12 = vld [vmem:[%s619_s3] sm:$0xff]  ;;  %v510_v27 = vld [vmem:[%s618_s0 + $0x8] sm:$0xff]   ;;  %vm342_vm7 = vcmask 1045509   ;;  %vm344_vm8 = vcmask 1046534   ;;  %vm346_vm9 = vcmask 1047559  }
   0x4   :  { %459 = vmatprep.subr.bf16.mxu0 %v503_v2  ;;  %489 = vmatprep.subr.bf16.mxu1 %v503_v2  ;;  %v196_v6 = vsub.s32 0, %v195_v3  ;;  %v210_v8 = vsub.s32 2, %v195_v3  ;;  %v203_v10 = vsub.s32 1, %v195_v3  ;;  %v217_v11 = vsub.s32 3, %v195_v3  ;;  %v507_v20 = vld [vmem:[%s617_s1] sm:$0xff]   ;;  %v511_v28 = vld [vmem:[%s618_s0 + $0x18] sm:$0xff]  }
   0x5   :  { %469 = vmatprep.mubr.msk.bf16.mxu0 %vm107_vm0, %v508_v5  ;;  %473 = vmatprep.mubr.msk.bf16.mxu1 %vm107_vm0, %v509_v7  ;;  %v224_v18 = vsub.s32 4, %v195_v3  ;;  %v231_v19 = vsub.s32 5, %v195_v3  ;;  %v238_v23 = vsub.s32 6, %v195_v3  ;;  %v245_v24 = vsub.s32 7, %v195_v3  ;;  %v318_v30 = vld [vmem:[%s620_s4 + $0x18] sm:$0xff]  ;;  %v317_v31 = vld [vmem:[%s620_s4 + $0x10] sm:$0xff] }
   0x6   :  { %v197_v13 = vrot.slane %v193_v12, %v196_v6  ;;  %v211_v14 = vrot.slane %v193_v12, %v210_v8  ;;  %v204_v16 = vrot.slane %v193_v12, %v203_v10  ;;  %v218_v17 = vrot.slane %v193_v12, %v217_v11  ;;  %v316_v32 = vld [vmem:[%s620_s4 + $0x8] sm:$0xff]  ;;  %v315_v33 = vld [vmem:[%s620_s4] sm:$0xff] }
   0x7   :  { %460 = vmatpush3.bf16.msra.mxu0 %v503_v2  ;;  %495 = vmatpush3.bf16.msra.mxu1 %v503_v2  ;;  %v225_v21 = vrot.slane %v193_v12, %v224_v18  ;;  %v232_v22 = vrot.slane %v193_v12, %v231_v19  ;;  %v239_v25 = vrot.slane %v193_v12, %v238_v23  ;;  %v425_v39 = vld [vmem:[%s621_s2] ss:$0 sm:$0xff] }
   0x8   :  { %461 = vmatprep.subr.bf16.mxu0 %v504_v4  ;;  %490 = vmatprep.subr.bf16.mxu1 %v504_v4  ;;  %v246_v26 = vrot.slane %v193_v12, %v245_v24 }
   0x9   :  { %199 = vbcast.lane.b32.xlu0 %v197_v13, 256  ;;  %213 = vbcast.lane.b32.xlu1 %v211_v14, 256 }
   0xb   :  { %462 = vmatpush3.bf16.msra.mxu0 %v504_v4  ;;  %496 = vmatpush3.bf16.msra.mxu1 %v504_v4 }
   0xc   :  { %463 = vmatprep.subr.bf16.mxu0 %v505_v9  ;;  %491 = vmatprep.subr.bf16.mxu1 %v505_v9 }
   0xd   :  { %206 = vbcast.lane.b32.xlu0 %v204_v16, 256  ;;  %220 = vbcast.lane.b32.xlu1 %v218_v17, 256 }
   0xf   :  { %464 = vmatpush3.bf16.msra.mxu0 %v505_v9  ;;  %497 = vmatpush3.bf16.msra.mxu1 %v505_v9 }
  0x10   :  { %465 = vmatprep.subr.bf16.mxu0 %v506_v15  ;;  %492 = vmatprep.subr.bf16.mxu1 %v506_v15 }
  0x11   :  { %227 = vbcast.lane.b32.xlu0 %v225_v21, 256  ;;  %234 = vbcast.lane.b32.xlu1 %v232_v22, 256 }
  0x13   :  { %466 = vmatpush3.bf16.msra.mxu0 %v506_v15  ;;  %498 = vmatpush3.bf16.msra.mxu1 %v506_v15 }
  0x14   :  { %467 = vmatprep.subr.bf16.mxu0 %v507_v20  ;;  %493 = vmatprep.subr.bf16.mxu1 %v507_v20 }
  0x15   :  { %241 = vbcast.lane.b32.xlu0 %v239_v25, 256  ;;  %248 = vbcast.lane.b32.xlu1 %v246_v26, 256 }
  0x17   :  { %468 = vmatpush3.bf16.msra.mxu0 %v507_v20  ;;  %499 = vmatpush3.bf16.msra.mxu1 %v507_v20 }
  0x18   :  { %477 = vmatprep.subr.mxu1 %v512_v29 }
  0x1a   :  { %470 = vmatmul.mubr.msk.bf16.vlgmr.msra.gmra.mxu0 %vm107_vm0, %v510_v27  ;;  %474 = vmatmul.mubr.msk.bf16.vlgmr.msra.gmra.mxu1 %vm107_vm0, %v511_v28 }
  0x1b   :  { %478 = vmatpush3.msra.mxu1 %v318_v30  ;;  %485 = vmatprep.mubr.msk.f32.mxu1 %vm513_vm1, %v512_v29 }
  0x1c   :  { %479 = vmatprep.subr.mxu1 %v512_v29 }
  0x1d   :  { %480 = vmatpush3.msra.mxu1 %v317_v31 }
  0x1e   :  { %481 = vmatprep.subr.mxu1 %v512_v29 }
  0x1f   :  { %482 = vmatpush3.msra.mxu1 %v316_v32 }
  0x20   :  { %483 = vmatprep.subr.mxu1 %v512_v29 }
  0x21   :  { %484 = vmatpush3.msra.mxu1 %v315_v33 }
  0x7b   :  { %v200_v34 = vpop.permute.xlu0 %199  ;;  %v214_v35 = vpop.permute.xlu1 %213 }
  0x7f   :  { %v207_v36 = vpop.permute.xlu0 %206  ;;  %v221_v37 = vpop.permute.xlu1 %220 }
  0x83   :  { %v228_v38 = vpop.permute.xlu0 %227  ;;  %v235_v44 = vpop.permute.xlu1 %234 }
  0x87   :  { %v242_v45 = vpop.permute.xlu0 %241  ;;  %v249_v5 = vpop.permute.xlu1 %248 }
  0xda   :  { %v471_v40 = vpop.f32.mrf.mxu0  ;;  %v475_v41 = vpop.f32.mrf.mxu1 }
  0xdb   :  { %v163_v42 = vadd.f32 %v471_v40, %v425_v39  ;;  %v179_v43 = vadd.f32 %v475_v41, %v425_v39 }
  0xdc   :  { %v154_v46 = vpop.f32.mrf.mxu0  ;;  %v170_v47 = vpop.f32.mrf.mxu1 }
  0xdd   :  { %v187_v48 = vmax.f32 %v163_v42, 0.0  ;;  %v191_v49 = vmax.f32 %v179_v43, 0.0  ;;  %v155_v50 = vadd.f32 %v425_v39, %v154_v46  ;;  %v171_v51 = vadd.f32 %v425_v39, %v170_v47 }
  0xde   :  { %v472_v52 = vpop.f32.mrf.mxu0  ;;  %v476_v53 = vpop.f32.mrf.mxu1 }
  0xdf   :  { %v252_v54 = vmul.f32 %v214_v35, %v187_v48  ;;  %v185_v55 = vmax.f32 %v155_v50, 0.0  ;;  %v189_v56 = vmax.f32 %v171_v51, 0.0  ;;  %v256_v57 = vmul.f32 %v242_v45, %v191_v49 }
  0xe0   :  { %v166_v58 = vadd.f32 %v472_v52, %v425_v39  ;;  %v182_v59 = vadd.f32 %v476_v53, %v425_v39  ;;  %v157_v60 = vpop.f32.mrf.mxu0  ;;  %v173_v61 = vpop.f32.mrf.mxu1 }
  0xe1   :  { %v273_v62 = vsel %vm258_vm2, %v252_v54, 0.0  ;;  %v250_v63 = vmul.f32 %v200_v34, %v185_v55  ;;  %v254_v0 = vmul.f32 %v228_v38, %v189_v56  ;;  %v301_v2 = vsel %vm258_vm2, %v256_v57, 0.0 }
  0xe2   :  { %v274_v1 = vrot.slane %v273_v62, 4  ;;  %v188_v3 = vmax.f32 %v166_v58, 0.0  ;;  %v192_v4 = vmax.f32 %v182_v59, 0.0  ;;  %v158_v8 = vadd.f32 %v425_v39, %v157_v60 }
  0xe3   :  { %v259_v6 = vsel %vm258_vm2, %v250_v63, 0.0  ;;  %v287_v7 = vsel %vm258_vm2, %v254_v0, 0.0  ;;  %v174_v9 = vadd.f32 %v425_v39, %v173_v61  ;;  %v302_v18 = vrot.slane %v301_v2, 4 }
  0xe4   :  { %v260_v10 = vrot.slane %v259_v6, 4  ;;  %v288_v11 = vrot.slane %v287_v7, 4  ;;  %v253_v12 = vmul.f32 %v221_v37, %v188_v3  ;;  %v186_v13 = vmax.f32 %v158_v8, 0.0 }
  0xe5   :  { %v190_v14 = vmax.f32 %v174_v9, 0.0  ;;  %v257_v15 = vmul.f32 %v249_v5, %v192_v4  ;;  %v275_v16 = vadd.f32 %v274_v1, %v273_v62  ;;  %v303_v30 = vadd.f32 %v302_v18, %v301_v2 }
  0xe6   :  { %v261_v17 = vadd.f32 %v260_v10, %v259_v6  ;;  %v280_v19 = vsel %vm258_vm2, %v253_v12, 0.0  ;;  %v251_v20 = vmul.f32 %v207_v36, %v186_v13  ;;  %v289_v24 = vadd.f32 %v288_v11, %v287_v7  ;;  %v440_v10 = vld [vmem:[%s622_s5] ss:$0 sm:$0xff] }
  0xe7   :  { %v255_v21 = vmul.f32 %v235_v44, %v190_v14  ;;  %v308_v22 = vsel %vm258_vm2, %v257_v15, 0.0  ;;  %v281_v25 = vrot.slane %v280_v19, 4  ;;  %v276_v29 = vrot.slane %v275_v16, 2 }
  0xe8   :  { %v262_v23 = vrot.slane %v261_v17, 2  ;;  %v266_v26 = vsel %vm258_vm2, %v251_v20, 0.0  ;;  %v309_v28 = vrot.slane %v308_v22, 4  ;;  %v290_v35 = vrot.slane %v289_v24, 2 }
  0xe9   :  { %v294_v27 = vsel %vm258_vm2, %v255_v21, 0.0  ;;  %v282_v31 = vadd.f32 %v281_v25, %v280_v19  ;;  %v267_v32 = vrot.slane %v266_v26, 4  ;;  %v277_v40 = vadd.f32 %v276_v29, %v275_v16 }
  0xea   :  { %v295_v33 = vrot.slane %v294_v27, 4  ;;  %v310_v34 = vadd.f32 %v309_v28, %v308_v22  ;;  %v263_v37 = vadd.f32 %v262_v23, %v261_v17  ;;  %v304_v41 = vrot.slane %v303_v30, 2 }
  0xeb   :  { %v283_v36 = vrot.slane %v282_v31, 2  ;;  %v268_v38 = vadd.f32 %v267_v32, %v266_v26  ;;  %v291_v46 = vadd.f32 %v290_v35, %v289_v24  ;;  %v278_v50 = vrot.slane %v277_v40, 1 }
  0xec   :  { %v296_v39 = vadd.f32 %v295_v33, %v294_v27  ;;  %v311_v45 = vrot.slane %v310_v34, 2  ;;  %v264_v47 = vrot.slane %v263_v37, 1  ;;  %v305_v51 = vadd.f32 %v304_v41, %v303_v30 }
  0xed   :  { %v284_v42 = vadd.f32 %v283_v36, %v282_v31  ;;  %v269_v43 = vrot.slane %v268_v38, 2  ;;  %v292_v55 = vrot.slane %v291_v46, 1  ;;  %v279_v59 = vadd.f32 %v278_v50, %v277_v40 }
  0xee   :  { %v297_v44 = vrot.slane %v296_v39, 2  ;;  %v312_v54 = vadd.f32 %v311_v45, %v310_v34  ;;  %v265_v56 = vadd.f32 %v264_v47, %v263_v37  ;;  %v306_v60 = vrot.slane %v305_v51, 1 }
  0xef   :  { %v270_v48 = vadd.f32 %v269_v43, %v268_v38  ;;  %v285_v52 = vrot.slane %v284_v42, 1  ;;  %v293_v0 = vadd.f32 %v292_v55, %v291_v46 }
  0xf0   :  { %v298_v49 = vadd.f32 %v297_v44, %v296_v39  ;;  %v313_v63 = vrot.slane %v312_v54, 1  ;;  %v307_v4 = vadd.f32 %v306_v60, %v305_v51 }
  0xf1   :  { %v271_v53 = vrot.slane %v270_v48, 1  ;;  %v286_v61 = vadd.f32 %v285_v52, %v284_v42 }
  0xf2   :  { %v299_v58 = vrot.slane %v298_v49, 1  ;;  %v314_v6 = vadd.f32 %v313_v63, %v312_v54 }
  0xf3   :  { %v272_v57 = vadd.f32 %v271_v53, %v270_v48 }
  0xf4   :  { %v300_v2 = vadd.f32 %v299_v58, %v298_v49 }
  0xf5   :  { %v335_v62 = vsel %vm334_vm3, %v272_v57, %v265_v56 }
  0xf6   :  { %v337_v1 = vsel %vm336_vm4, %v279_v59, %v335_v62 }
  0xf7   :  { %v339_v3 = vsel %vm338_vm5, %v286_v61, %v337_v1 }
  0xf8   :  { %v341_v5 = vsel %vm340_vm6, %v293_v0, %v339_v3 }
  0xf9   :  { %v343_v7 = vsel %vm342_vm7, %v300_v2, %v341_v5 }
  0xfa   :  { %v345_v8 = vsel %vm344_vm8, %v307_v4, %v343_v7 }
  0xfb   :  { %v347_v9 = vsel %vm346_vm9, %v314_v6, %v345_v8 }
  0xfc   :  { %486 = vmatmul.mubr.msk.f32.vlgmr.msra.gmra.mxu1 %vm258_vm2, %v347_v9 }
 0x1bc   :  { %v416_v11 = vpop.f32.mrf.mxu1 }
 0x1bd   :  { %v417_v12 = vadd.f32 %v440_v10, %v416_v11 }
 0x1be   :  { %v487_v13 = vpop.f32.mrf.mxu1 }
 0x1bf   :  { %420 = vst.msk [vmem:[%s623_s6] sm:$0xff] %vm258_vm2, %v417_v12 }

// kernel: tacotron_forward.42
= control target key start
LH: loop header
LB: loop body
LE: loop exit
PB: predicated region body
PF: predicated region fallthrough
CT: control target
= control target key end

     0   :  { %v29_v6 = vlaneseq  ;;  %s168_s1 = inlined_call_operand.vmem [shape: f32[2,256], index: 1, kind: input, shape index: {}]   ;;  %s169_s0 = inlined_call_operand.vmem [shape: f32[16,256], index: 0, kind: input, shape index: {}]   ;;  %s170_s2 = inlined_call_operand.vmem [shape: f32[1,256], index: 2, kind: input, shape index: {}]   ;;  %s171_s3 = inlined_call_operand.vmem [shape: f32[1,256], index: 3, kind: input, shape index: {}]   ;;  %s172_s4 = inlined_call_operand.vmem [shape: f32[16,256], index: 4, kind: output, shape index: {}]  }
   0x1   :  { %v17_v0 = vld [vmem:[%s168_s1] ss:$2 sm:$0x3]  ;;  %v104_v1 = vld [vmem:[%s168_s1 + $0x1] ss:$2 sm:$0x3] }
   0x2   :  { %v18_v2 = vmul.f32 0.0625, %v17_v0  ;;  %v21_v3 = vmul.f32 0.0625, %v104_v1  ;;  %v30_v8 = vshrl.u32 %v29_v6, 7  ;;  %v24_v11 = vld [vmem:[%s169_s0] sm:$0xff]  ;;  %v25_v14 = vld [vmem:[%s169_s0 + $0x8] sm:$0xff]  ;;  %v26_v15 = vld [vmem:[%s169_s0 + $0x10] sm:$0xff] }
   0x3   :  { %v27_v16 = vld [vmem:[%s169_s0 + $0x18] sm:$0xff]  ;;  %v60_v17 = vld [vmem:[%s170_s2] sm:$0x3] }
   0x4   :  { %v22_v4 = vmul.f32 %v18_v2, %v18_v2  ;;  %v31_v9 = vsub.s32 0, %v30_v8  ;;  %v35_v10 = vsub.s32 1, %v30_v8  ;;  %v76_v19 = vld [vmem:[%s171_s3] sm:$0x3] }
   0x6   :  { %v23_v5 = vsub.f32 %v21_v3, %v22_v4  ;;  %v32_v12 = vrot.slane %v18_v2, %v31_v9  ;;  %v36_v13 = vrot.slane %v18_v2, %v35_v10  ;;  %v65_v25 = vrot.slane %v60_v17, %v31_v9 }
   0x7   :  { %v69_v27 = vrot.slane %v60_v17, %v35_v10  ;;  %v81_v28 = vrot.slane %v76_v19, %v31_v9  ;;  %v85_v29 = vrot.slane %v76_v19, %v35_v10 }
   0x8   :  { %v43_v7 = vadd.f32 1e-05, %v23_v5  ;;  %v39_v18 = vsub.f32 %v24_v11, %v32_v12  ;;  %v40_v20 = vsub.f32 %v25_v14, %v36_v13  ;;  %v41_v21 = vsub.f32 %v26_v15, %v32_v12 }
   0x9   :  { %v42_v22 = vsub.f32 %v27_v16, %v36_v13 }
   0xa   :  { %105 = vrsqrt.f32 %v43_v7 }
  0x17   :  { %v106_v23 = vpop.eup %105 }
  0x18   :  { %v49_v24 = vrot.slane %v106_v23, %v31_v9  ;;  %v53_v26 = vrot.slane %v106_v23, %v35_v10 }
  0x1a   :  { %v56_v30 = vmul.f32 %v49_v24, %v39_v18  ;;  %v57_v31 = vmul.f32 %v53_v26, %v40_v20  ;;  %v58_v32 = vmul.f32 %v49_v24, %v41_v21  ;;  %v59_v33 = vmul.f32 %v53_v26, %v42_v22 }
  0x1c   :  { %v72_v34 = vmul.f32 %v65_v25, %v56_v30  ;;  %v73_v35 = vmul.f32 %v69_v27, %v57_v31  ;;  %v74_v36 = vmul.f32 %v65_v25, %v58_v32  ;;  %v75_v37 = vmul.f32 %v69_v27, %v59_v33 }
  0x1e   :  { %v88_v38 = vadd.f32 %v81_v28, %v72_v34  ;;  %v89_v39 = vadd.f32 %v85_v29, %v73_v35  ;;  %v90_v40 = vadd.f32 %v81_v28, %v74_v36  ;;  %v91_v41 = vadd.f32 %v85_v29, %v75_v37 }
  0x20   :  { %v92_v42 = vmax.f32 %v88_v38, 0.0  ;;  %v93_v43 = vmax.f32 %v89_v39, 0.0  ;;  %v94_v44 = vmax.f32 %v90_v40, 0.0  ;;  %v95_v45 = vmax.f32 %v91_v41, 0.0 }
  0x22   :  { %96 = vst [vmem:[%s172_s4] sm:$0xff] %v92_v42  ;;  %97 = vst [vmem:[%s172_s4 + $0x8] sm:$0xff] %v93_v43 }
  0x23   :  { %98 = vst [vmem:[%s172_s4 + $0x10] sm:$0xff] %v94_v44  ;;  %99 = vst [vmem:[%s172_s4 + $0x18] sm:$0xff] %v95_v45 }

// kernel: tacotron_forward.41
= control target key start
LH: loop header
LB: loop body
LE: loop exit
PB: predicated region body
PF: predicated region fallthrough
CT: control target
= control target key end

     0   :  { %vm133_vm0 = vcmask 130048   ;;  %vm233_vm1 = vcmask 1040384   ;;  %s425_s1 = inlined_call_operand.vmem [shape: bf16[144,256], index: 1, kind: input, shape index: {}]   ;;  %s426_s0 = inlined_call_operand.vmem [shape: bf16[16,144], index: 0, kind: input, shape index: {}]   ;;  %s427_s2 = inlined_call_operand.vmem [shape: f32[16,256], index: 2, kind: output, shape index: {0}]   ;;  %s428_s3 = inlined_call_operand.vmem [shape: f32[2,256], index: 3, kind: output, shape index: {1}]  }
   0x1   :  { %v300_v0 = vld [vmem:[%s425_s1 + $0x74] ss:$8 sps:$4 sm:$0xff]   ;;  %v302_v1 = vld [vmem:[%s425_s1 + $0x70] ss:$8 sps:$4 sm:$0xff]   ;;  %v303_v2 = vld [vmem:[%s425_s1 + $0x64] ss:$8 sps:$4 sm:$0xff]  }
   0x2   :  { %137 = vmatprep.subr.bf16.mxu0 %v300_v0  ;;  %v305_v3 = vld [vmem:[%s425_s1 + $0x60] ss:$8 sps:$4 sm:$0xff]   ;;  %v306_v4 = vld [vmem:[%s425_s1 + $0x54] ss:$8 sps:$4 sm:$0xff]   ;;  %v308_v5 = vld [vmem:[%s425_s1 + $0x50] ss:$8 sps:$4 sm:$0xff]  }
   0x3   :  { %138 = vmatpush1.bf16.msra.mxu0 %v302_v1  ;;  %v309_v6 = vld [vmem:[%s425_s1 + $0x44] ss:$8 sps:$4 sm:$0xff]   ;;  %v311_v7 = vld [vmem:[%s425_s1 + $0x40] ss:$8 sps:$4 sm:$0xff]   ;;  %v312_v8 = vld [vmem:[%s425_s1 + $0x34] ss:$8 sps:$4 sm:$0xff]  }
   0x4   :  { %139 = vmatprep.subr.bf16.mxu0 %v303_v2  ;;  %v329_v9 = vld [vmem:[%s426_s0 + $0x4] ss:$8 sps:$4 sm:$0xff]   ;;  %v314_v10 = vld [vmem:[%s425_s1 + $0x30] ss:$8 sps:$4 sm:$0xff]   ;;  %v317_v12 = vld [vmem:[%s425_s1 + $0x20] ss:$8 sps:$4 sm:$0xff]  }
   0x5   :  { %298 = vmatprep.mubr.msk.bf16.mxu0 %vm133_vm0, %v329_v9  ;;  %v315_v11 = vld [vmem:[%s425_s1 + $0x24] ss:$8 sps:$4 sm:$0xff]   ;;  %v318_v13 = vld [vmem:[%s425_s1 + $0x14] ss:$8 sps:$4 sm:$0xff]   ;;  %v320_v14 = vld [vmem:[%s425_s1 + $0x10] ss:$8 sps:$4 sm:$0xff]  }
   0x6   :  { %v321_v15 = vld [vmem:[%s425_s1 + $0x4] ss:$8 sps:$4 sm:$0xff]   ;;  %v323_v16 = vld [vmem:[%s425_s1] ss:$8 sps:$4 sm:$0xff]  }
   0x7   :  { %140 = vmatpush1.bf16.msra.mxu0 %v305_v3  ;;  %v324_v17 = vld [vmem:[%s425_s1 + $0x84] ss:$8 sps:$4 sm:$0xff]   ;;  %v326_v18 = vld [vmem:[%s425_s1 + $0x80] ss:$8 sps:$4 sm:$0xff]  }
   0x8   :  { %141 = vmatprep.subr.bf16.mxu0 %v306_v4  ;;  %v327_v19 = vld [vmem:[%s426_s0] ss:$8 sps:$4 sm:$0xff]  }
   0xb   :  { %142 = vmatpush1.bf16.msra.mxu0 %v308_v5 }
   0xc   :  { %143 = vmatprep.subr.bf16.mxu0 %v309_v6 }
   0xf   :  { %144 = vmatpush1.bf16.msra.mxu0 %v311_v7 }
  0x10   :  { %145 = vmatprep.subr.bf16.mxu0 %v312_v8 }
  0x13   :  { %146 = vmatpush1.bf16.msra.mxu0 %v314_v10 }
  0x14   :  { %147 = vmatprep.subr.bf16.mxu0 %v315_v11 }
  0x17   :  { %148 = vmatpush1.bf16.msra.mxu0 %v317_v12 }
  0x18   :  { %149 = vmatprep.subr.bf16.mxu0 %v318_v13 }
  0x1b   :  { %150 = vmatpush1.bf16.msra.mxu0 %v320_v14 }
  0x1c   :  { %151 = vmatprep.subr.bf16.mxu0 %v321_v15 }
  0x1f   :  { %152 = vmatpush1.bf16.msra.mxu0 %v323_v16 }
  0x20   :  { %167 = vmatprep.subr.bf16.mxu0 %v324_v17 }
  0x23   :  { %168 = vmatpush2.bf16.msra.mxu0 %v326_v18 }
  0x26   :  { %170 = vmatmul.mubr.bf16.vlgmr.msra.gmra.mxu0 %v327_v19 }
  0xe6   :  { %v171_v20 = vpop.f32.mrf.mxu0 }
  0xe7   :  { %180 = vst [vmem:[%s427_s2] sm:$0xff] %v171_v20  ;;  %v215_v23 = vmul.f32 %v171_v20, %v171_v20 }
  0xe8   :  { %v173_v21 = vpop.f32.mrf.mxu0 }
  0xe9   :  { %181 = vst [vmem:[%s427_s2 + $0x8] sm:$0xff] %v173_v21  ;;  %v216_v26 = vmul.f32 %v173_v21, %v173_v21 }
  0xea   :  { %v175_v22 = vpop.f32.mrf.mxu0 }
  0xeb   :  { %182 = vst [vmem:[%s427_s2 + $0x10] sm:$0xff] %v175_v22  ;;  %v201_v24 = vadd.f32 %v175_v22, %v171_v20  ;;  %v217_v25 = vmul.f32 %v175_v22, %v175_v22 }
  0xec   :  { %v177_v27 = vpop.f32.mrf.mxu0 }
  0xed   :  { %v202_v28 = vrot.slane %v201_v24, 4  ;;  %v219_v29 = vadd.f32 %v217_v25, %v215_v23  ;;  %183 = vst [vmem:[%s427_s2 + $0x18] sm:$0xff] %v177_v27  ;;  %v208_v30 = vadd.f32 %v177_v27, %v173_v21  ;;  %v218_v31 = vmul.f32 %v177_v27, %v177_v27 }
  0xef   :  { %v203_v32 = vadd.f32 %v202_v28, %v201_v24  ;;  %v220_v33 = vrot.slane %v219_v29, 4  ;;  %v209_v34 = vrot.slane %v208_v30, 4  ;;  %v226_v35 = vadd.f32 %v218_v31, %v216_v26 }
  0xf1   :  { %v204_v36 = vrot.slane %v203_v32, 2  ;;  %v221_v37 = vadd.f32 %v220_v33, %v219_v29  ;;  %v210_v38 = vadd.f32 %v209_v34, %v208_v30  ;;  %v227_v39 = vrot.slane %v226_v35, 4 }
  0xf3   :  { %v205_v40 = vadd.f32 %v204_v36, %v203_v32  ;;  %v222_v41 = vrot.slane %v221_v37, 2  ;;  %v211_v42 = vrot.slane %v210_v38, 2  ;;  %v228_v43 = vadd.f32 %v227_v39, %v226_v35 }
  0xf5   :  { %v223_v44 = vadd.f32 %v222_v41, %v221_v37  ;;  %v212_v45 = vadd.f32 %v211_v42, %v210_v38  ;;  %v229_v46 = vrot.slane %v228_v43, 2  ;;  %v206_v47 = vrot.slane %v205_v40, 1 }
  0xf7   :  { %v224_v48 = vrot.slane %v223_v44, 1  ;;  %v213_v49 = vrot.slane %v212_v45, 1  ;;  %v230_v50 = vadd.f32 %v229_v46, %v228_v43  ;;  %v207_v53 = vadd.f32 %v206_v47, %v205_v40 }
  0xf9   :  { %v225_v51 = vadd.f32 %v224_v48, %v223_v44  ;;  %v231_v52 = vrot.slane %v230_v50, 1  ;;  %v214_v54 = vadd.f32 %v213_v49, %v212_v45 }
  0xfb   :  { %v232_v55 = vadd.f32 %v231_v52, %v230_v50  ;;  %v234_v56 = vsel %vm233_vm1, %v207_v53, %v225_v51 }
  0xfd   :  { %v235_v57 = vsel %vm233_vm1, %v214_v54, %v232_v55 }
  0xfe   :  { %v242_v58 = vcombine.low %v234_v56, %v235_v57 }
 0x100   :  { %299 = vst.sshfl [vmem:[%s428_s3] sm:$0x33 pattern:$0x76325410] %v242_v58 }

// kernel: tacotron_forward.48
= control target key start
LH: loop header
LB: loop body
LE: loop exit
PB: predicated region body
PF: predicated region fallthrough
CT: control target
= control target key end

     0   :  { %vm18_vm0 = vcmask 261120   ;;  %s202_s0 = inlined_call_operand.vmem [shape: f32[16,32], index: 0, kind: input, shape index: {}]   ;;  %s203_s1 = inlined_call_operand.vmem [shape: f32[32,16], index: 1, kind: input, shape index: {}]   ;;  %s204_s2 = inlined_call_operand.hbm [shape: f32[16,16], index: 2, kind: output, shape index: {}]  }
   0x1   :  { %v17_v0 = vld [vmem:[%s203_s1 + $0x18] sm:$0xff]  ;;  %v16_v1 = vld [vmem:[%s203_s1 + $0x10] sm:$0xff]  ;;  %v12_v2 = vld [vmem:[%s202_s0] sm:$0xff] }
   0x2   :  { %127 = vmatprep.subr.mxu0 %v17_v0  ;;  %v15_v3 = vld [vmem:[%s203_s1 + $0x8] sm:$0xff]  ;;  %135 = vmatprep.mubr.msk.f32.mxu0 %vm18_vm0, %v12_v2 }
   0x3   :  { %128 = vmatpush3.msra.mxu0 %v17_v0 }
   0x4   :  { %7 = vsyncpa [#allocation3], 0  ;;  %129 = vmatprep.subr.mxu0 %v16_v1  ;;  %v14_v4 = vld [vmem:[%s203_s1] sm:$0xff]  ;;  %v13_v5 = vld [vmem:[%s202_s0 + $0x8] sm:$0xff]  ;;  %s163_s21 = smov [#allocation2]   ;;  %vm100_vm1 = vcmask 130048  }
   0x5   :  { %130 = vmatpush3.msra.mxu0 %v16_v1  ;;  %s108_s22 = sshll.u32 %s163_s21, 4  ;;  %s109_s22 = int_to_ptr.vmem [resolvable:$true] %s108_s22 }
   0x6   :  { %131 = vmatprep.subr.mxu0 %v15_v3  ;;  %s141_s23 = scalar_lea.vmem %s109_s22, 256  ;;  %p146_p1 = scmp.lt.s32.totalorder %s109_s22, %s109_s22 }
   0x7   :  { %132 = vmatpush3.msra.mxu0 %v15_v3  ;;  %p142_p0 = scmp.ne.s32.totalorder %s109_s22, %s141_s23  ;;  %p147_p2 = scmp.lt.s32.totalorder %s141_s23, %s141_s23 }
   0x8   :  { %133 = vmatprep.subr.mxu0 %v14_v4 }
   0x9   :  { %134 = vmatpush3.msra.mxu0 %v14_v4  ;;  %p148_p3 = por %p147_p2, %p146_p1 }
   0xa   :  { %136 = vmatmul.mubr.msk.f32.vlgmr.msra.gmra.mxu0 %vm18_vm0, %v13_v5 }
   0xb   :  { %p149_p4 = pnand %p148_p3, %p142_p0 }
  0xca   :  { %v137_v6 = vpop.f32.mrf.mxu0 }
  0xcb   :  { %102 = vst.msk [vmem:[#allocation2 + $0x8] sm:$0xff] %vm100_vm1, %v137_v6 }
  0xcc   :  { %v91_v7 = vpop.f32.mrf.mxu0 }
  0xcd   :  { %101 = vst.msk [vmem:[#allocation2] sm:$0xff] %vm100_vm1, %v91_v7 }
  0xce   :  { %152 = shalt.err (!%p149_p4)
}
  0xcf   :  { %s164_s1 = smov 128   ;;  %s165_s0 = smov 8  }
  0xd0   :  { %114 = dma.vmem_to_hbm [thread:$0]  %s109_s22, 256, %s204_s2, [#allocation3], %s164_s1, %s164_s1, %s165_s0  }
  0xd1   :  { %161 = dma.done.wait [#allocation3], 256  }
  0xd2   :  { %162 = vsyncadd [#allocation3], 4294967040 }
  0xd3   :  { %118 = vsyncpa [#allocation3], 1 }

// kernel: tacotron_forward.49
= control target key start
LH: loop header
LB: loop body
LE: loop exit
PB: predicated region body
PF: predicated region fallthrough
CT: control target
= control target key end

     0   :  { %v118_v0 = vmov 0.0   ;;  %vm119_vm0 = vmmov 0   ;;  %vm24_vm1 = vcmask 130048   ;;  %vm98_vm2 = vcmask 97280   ;;  %s155_s1 = inlined_call_operand.vmem [shape: f32[16,12], index: 1, kind: input, shape index: {}]   ;;  %s156_s0 = inlined_call_operand.vmem [shape: f32[8,16], index: 0, kind: input, shape index: {}]   ;;  %s157_s2 = inlined_call_operand.vmem [shape: f32[1,12], index: 2, kind: input, shape index: {}]   ;;  %s158_s3 = inlined_call_operand.vmem [shape: f32[8,12], index: 3, kind: output, shape index: {}]  }
   0x1   :  { %109 = vmatprep.subr.mxu0 %v118_v0  ;;  %v16_v1 = vld [vmem:[%s155_s1 + $0x8] sm:$0xff]  ;;  %v15_v2 = vld [vmem:[%s155_s1] sm:$0xff]  ;;  %113 = vmatprep.mubr.msk.f32.mxu0 %vm119_vm0, %v118_v0 }
   0x2   :  { %110 = vmatpush3.msra.mxu0 %v16_v1  ;;  %v14_v3 = vld [vmem:[%s156_s0] sm:$0xff] }
   0x3   :  { %111 = vmatprep.subr.mxu0 %v118_v0  ;;  %v104_v4 = vld [vmem:[%s157_s2] ss:$0 sm:$0xff] }
   0x4   :  { %112 = vmatpush3.msra.mxu0 %v15_v2 }
   0x5   :  { %114 = vmatmul.mubr.msk.f32.vlgmr.msra.gmra.mxu0 %vm24_vm1, %v14_v3 }
  0xc5   :  { %v94_v5 = vpop.f32.mrf.mxu0 }
  0xc6   :  { %v95_v6 = vadd.f32 %v104_v4, %v94_v5 }
  0xc7   :  { %v115_v7 = vpop.f32.mrf.mxu0 }
  0xc8   :  { %99 = vst.msk [vmem:[%s158_s3] sm:$0xff] %vm98_vm2, %v95_v6 }

// kernel: tacotron_forward.43
= control target key start
LH: loop header
LB: loop body
LE: loop exit
PB: predicated region body
PF: predicated region fallthrough
CT: control target
= control target key end

     0   :  { %vm557_vm0 = vcmask 130048   ;;  %vm595_vm1 = vcmask 1040384   ;;  %vm601_vm2 = vcmask 123904   ;;  %s987_s1 = inlined_call_operand.vmem [shape: bf16[768,16], index: 1, kind: input, shape index: {}]   ;;  %s988_s0 = inlined_call_operand.vmem [shape: bf16[16,768], index: 0, kind: input, shape index: {}]   ;;  %s989_s2 = inlined_call_operand.vmem [shape: f32[16,16], index: 2, kind: output, shape index: {0}]   ;;  %s990_s3 = inlined_call_operand.vmem [shape: f32[2,16], index: 3, kind: output, shape index: {1}]  }
   0x1   :  { %v739_v0 = vld [vmem:[%s987_s1 + $0x78] sm:$0xff]   ;;  %v743_v4 = vld [vmem:[%s987_s1 + $0x70] sm:$0xff]   ;;  %v747_v8 = vld [vmem:[%s987_s1 + $0x68] sm:$0xff]  }
   0x2   :  { %v740_v1 = vld [vmem:[%s987_s1 + $0xf8] sm:$0xff]   ;;  %673 = vmatprep.subr.bf16.mxu0 %v739_v0  ;;  %v744_v5 = vld [vmem:[%s987_s1 + $0xf0] sm:$0xff]   ;;  %v748_v9 = vld [vmem:[%s987_s1 + $0xe8] sm:$0xff]  }
   0x3   :  { %v741_v2 = vld [vmem:[%s987_s1 + $0x38] sm:$0xff]   ;;  %695 = vmatprep.subr.bf16.mxu1 %v740_v1  ;;  %v745_v6 = vld [vmem:[%s987_s1 + $0x30] sm:$0xff]   ;;  %v749_v10 = vld [vmem:[%s987_s1 + $0x28] sm:$0xff]  }
   0x4   :  { %v742_v3 = vld [vmem:[%s987_s1 + $0xb8] sm:$0xff]   ;;  %674 = vmatpush3.bf16.msra.mxu0 %v741_v2  ;;  %v746_v7 = vld [vmem:[%s987_s1 + $0xb0] sm:$0xff]   ;;  %v750_v11 = vld [vmem:[%s987_s1 + $0xa8] sm:$0xff]  }
   0x5   :  { %696 = vmatpush3.bf16.msra.mxu1 %v742_v3  ;;  %675 = vmatprep.subr.bf16.mxu0 %v743_v4  ;;  %v751_v12 = vld [vmem:[%s987_s1 + $0x60] sm:$0xff]   ;;  %v755_v16 = vld [vmem:[%s987_s1 + $0x58] sm:$0xff]   ;;  %v759_v20 = vld [vmem:[%s987_s1 + $0x50] sm:$0xff]  }
   0x6   :  { %697 = vmatprep.subr.bf16.mxu1 %v744_v5  ;;  %v752_v13 = vld [vmem:[%s987_s1 + $0xe0] sm:$0xff]   ;;  %v756_v17 = vld [vmem:[%s987_s1 + $0xd8] sm:$0xff]   ;;  %v760_v21 = vld [vmem:[%s987_s1 + $0xd0] sm:$0xff]  }
   0x7   :  { %v753_v14 = vld [vmem:[%s987_s1 + $0x20] sm:$0xff]   ;;  %v757_v18 = vld [vmem:[%s987_s1 + $0x18] sm:$0xff]   ;;  %v761_v22 = vld [vmem:[%s987_s1 + $0x10] sm:$0xff]  }
   0x8   :  { %676 = vmatpush3.bf16.msra.mxu0 %v745_v6  ;;  %v754_v15 = vld [vmem:[%s987_s1 + $0xa0] sm:$0xff]   ;;  %v758_v19 = vld [vmem:[%s987_s1 + $0x98] sm:$0xff]   ;;  %v762_v23 = vld [vmem:[%s987_s1 + $0x90] sm:$0xff]  }
   0x9   :  { %698 = vmatpush3.bf16.msra.mxu1 %v746_v7  ;;  %677 = vmatprep.subr.bf16.mxu0 %v747_v8  ;;  %v763_v24 = vld [vmem:[%s987_s1 + $0x48] sm:$0xff]   ;;  %v767_v28 = vld [vmem:[%s987_s1 + $0x40] sm:$0xff]   ;;  %v777_v36 = vld [vmem:[%s987_s1 + $0x178] sm:$0xff]  }
   0xa   :  { %699 = vmatprep.subr.bf16.mxu1 %v748_v9  ;;  %v764_v25 = vld [vmem:[%s987_s1 + $0xc8] sm:$0xff]   ;;  %v768_v29 = vld [vmem:[%s987_s1 + $0xc0] sm:$0xff]   ;;  %v778_v37 = vld [vmem:[%s987_s1 + $0x138] sm:$0xff]  }
   0xb   :  { %v765_v26 = vld [vmem:[%s987_s1 + $0x8] sm:$0xff]   ;;  %v769_v30 = vld [vmem:[%s987_s1] sm:$0xff]   ;;  %v779_v38 = vld [vmem:[%s987_s1 + $0x170] sm:$0xff]  }
   0xc   :  { %678 = vmatpush3.bf16.msra.mxu0 %v749_v10  ;;  %v766_v27 = vld [vmem:[%s987_s1 + $0x88] sm:$0xff]   ;;  %v770_v31 = vld [vmem:[%s987_s1 + $0x80] sm:$0xff]   ;;  %v780_v39 = vld [vmem:[%s987_s1 + $0x130] sm:$0xff]  }
   0xd   :  { %700 = vmatpush3.bf16.msra.mxu1 %v750_v11  ;;  %679 = vmatprep.subr.bf16.mxu0 %v751_v12  ;;  %v771_v32 = vld [vmem:[%s988_s0] ss:$24 sps:$4 sm:$0xff]   ;;  %v773_v33 = vld [vmem:[%s988_s0 + $0x4] ss:$24 sps:$4 sm:$0xff]   ;;  %v781_v40 = vld [vmem:[%s987_s1 + $0x168] sm:$0xff]  }
   0xe   :  { %701 = vmatprep.subr.bf16.mxu1 %v752_v13  ;;  %v774_v34 = vld [vmem:[%s988_s0 + $0x8] ss:$24 sps:$4 sm:$0xff]   ;;  %v776_v35 = vld [vmem:[%s988_s0 + $0xc] ss:$24 sps:$4 sm:$0xff]   ;;  %466 = vmatprep.mubr.bf16.mxu0 %v773_v33  ;;  %v785_v44 = vld [vmem:[%s987_s1 + $0x158] sm:$0xff]  }
   0xf   :  { %507 = vmatprep.mubr.bf16.mxu1 %v776_v35  ;;  %v782_v41 = vld [vmem:[%s987_s1 + $0x128] sm:$0xff]   ;;  %v783_v42 = vld [vmem:[%s987_s1 + $0x160] sm:$0xff]   ;;  %v786_v45 = vld [vmem:[%s987_s1 + $0x118] sm:$0xff]  }
  0x10   :  { %680 = vmatpush3.bf16.msra.mxu0 %v753_v14  ;;  %v784_v43 = vld [vmem:[%s987_s1 + $0x120] sm:$0xff]   ;;  %v787_v46 = vld [vmem:[%s987_s1 + $0x150] sm:$0xff]   ;;  %v789_v49 = vld [vmem:[%s987_s1 + $0x148] sm:$0xff]  }
  0x11   :  { %702 = vmatpush3.bf16.msra.mxu1 %v754_v15  ;;  %681 = vmatprep.subr.bf16.mxu0 %v755_v16  ;;  %v795_v47 = vld [vmem:[%s988_s0 + $0x14] ss:$24 sps:$4 sm:$0xff]   ;;  %v791_v51 = vld [vmem:[%s987_s1 + $0x140] sm:$0xff]   ;;  %v793_v53 = vld [vmem:[%s988_s0 + $0x10] ss:$24 sps:$4 sm:$0xff]  }
  0x12   :  { %703 = vmatprep.subr.bf16.mxu1 %v756_v17  ;;  %v788_v48 = vld [vmem:[%s987_s1 + $0x110] sm:$0xff]   ;;  %v790_v50 = vld [vmem:[%s987_s1 + $0x108] sm:$0xff]   ;;  %v792_v52 = vld [vmem:[%s987_s1 + $0x100] sm:$0xff]  }
  0x14   :  { %682 = vmatpush3.bf16.msra.mxu0 %v757_v18 }
  0x15   :  { %704 = vmatpush3.bf16.msra.mxu1 %v758_v19  ;;  %683 = vmatprep.subr.bf16.mxu0 %v759_v20 }
  0x16   :  { %705 = vmatprep.subr.bf16.mxu1 %v760_v21 }
  0x18   :  { %684 = vmatpush3.bf16.msra.mxu0 %v761_v22 }
  0x19   :  { %706 = vmatpush3.bf16.msra.mxu1 %v762_v23  ;;  %685 = vmatprep.subr.bf16.mxu0 %v763_v24 }
  0x1a   :  { %707 = vmatprep.subr.bf16.mxu1 %v764_v25 }
  0x1c   :  { %686 = vmatpush3.bf16.msra.mxu0 %v765_v26 }
  0x1d   :  { %708 = vmatpush3.bf16.msra.mxu1 %v766_v27  ;;  %687 = vmatprep.subr.bf16.mxu0 %v767_v28 }
  0x1e   :  { %709 = vmatprep.subr.bf16.mxu1 %v768_v29 }
  0x20   :  { %688 = vmatpush3.bf16.msra.mxu0 %v769_v30 }
  0x21   :  { %710 = vmatpush3.bf16.msra.mxu1 %v770_v31  ;;  %717 = vmatprep.subr.bf16.mxu0 %v777_v36 }
  0x23   :  { %467 = vmatmul.mubr.bf16.vlgmr.msra.gmra.mxu0 %v771_v32 }
  0x24   :  { %508 = vmatmul.mubr.bf16.vlgmr.msra.gmra.mxu1 %v774_v34  ;;  %718 = vmatpush3.bf16.msra.mxu0 %v778_v37 }
  0x25   :  { %719 = vmatprep.subr.bf16.mxu0 %v779_v38  ;;  %548 = vmatprep.mubr.bf16.mxu0 %v795_v47 }
  0x28   :  { %720 = vmatpush3.bf16.msra.mxu0 %v780_v39 }
  0x29   :  { %721 = vmatprep.subr.bf16.mxu0 %v781_v40 }
  0x2c   :  { %722 = vmatpush3.bf16.msra.mxu0 %v782_v41 }
  0x2d   :  { %723 = vmatprep.subr.bf16.mxu0 %v783_v42 }
  0x30   :  { %724 = vmatpush3.bf16.msra.mxu0 %v784_v43 }
  0x31   :  { %725 = vmatprep.subr.bf16.mxu0 %v785_v44 }
  0x34   :  { %726 = vmatpush3.bf16.msra.mxu0 %v786_v45 }
  0x35   :  { %727 = vmatprep.subr.bf16.mxu0 %v787_v46 }
  0x38   :  { %728 = vmatpush3.bf16.msra.mxu0 %v788_v48 }
  0x39   :  { %729 = vmatprep.subr.bf16.mxu0 %v789_v49 }
  0x3c   :  { %730 = vmatpush3.bf16.msra.mxu0 %v790_v50 }
  0x3d   :  { %731 = vmatprep.subr.bf16.mxu0 %v791_v51 }
  0x40   :  { %732 = vmatpush3.bf16.msra.mxu0 %v792_v52 }
  0x43   :  { %549 = vmatmul.mubr.bf16.vlgmr.msra.gmra.mxu0 %v793_v53 }
  0xe3   :  { %v689_v54 = vpop.f32.mrf.mxu0 }
  0xe4   :  { %v711_v55 = vpop.f32.mrf.mxu1 }
  0xe5   :  { %v690_v56 = vpop.f32.mrf.mxu0 }
  0xe6   :  { %v712_v57 = vpop.f32.mrf.mxu1  ;;  %v691_v61 = vadd.f32 %v690_v56, %v689_v54 }
  0xe7   :  { %v692_v58 = vpop.f32.mrf.mxu0  ;;  %v713_v62 = vadd.f32 %v712_v57, %v711_v55 }
  0xe8   :  { %v714_v59 = vpop.f32.mrf.mxu1 }
  0xe9   :  { %v693_v60 = vpop.f32.mrf.mxu0  ;;  %v510_v2 = vadd.f32 %v713_v62, %v691_v61 }
  0xea   :  { %v715_v63 = vpop.f32.mrf.mxu1  ;;  %v694_v3 = vadd.f32 %v693_v60, %v692_v58 }
  0xeb   :  { %v716_v4 = vadd.f32 %v715_v63, %v714_v59 }
  0xed   :  { %v513_v9 = vadd.f32 %v716_v4, %v694_v3 }
 0x103   :  { %v733_v0 = vpop.f32.mrf.mxu0 }
 0x105   :  { %v734_v1 = vpop.f32.mrf.mxu0 }
 0x106   :  { %v735_v5 = vadd.f32 %v734_v1, %v733_v0 }
 0x107   :  { %v736_v6 = vpop.f32.mrf.mxu0 }
 0x108   :  { %v551_v7 = vadd.f32 %v735_v5, %v510_v2 }
 0x109   :  { %v737_v8 = vpop.f32.mrf.mxu0 }
 0x10a   :  { %558 = vst.msk [vmem:[%s989_s2] sm:$0xff] %vm557_vm0, %v551_v7  ;;  %v738_v10 = vadd.f32 %v737_v8, %v736_v6  ;;  %v584_v11 = vmul.f32 %v551_v7, %v551_v7  ;;  %v575_v13 = vsel %vm557_vm0, %v551_v7, 0.0 }
 0x10c   :  { %v554_v12 = vadd.f32 %v738_v10, %v513_v9  ;;  %v586_v17 = vsel %vm557_vm0, %v584_v11, 0.0 }
 0x10e   :  { %559 = vst.msk [vmem:[%s989_s2 + $0x8] sm:$0xff] %vm557_vm0, %v554_v12  ;;  %v576_v14 = vsel %vm557_vm0, %v554_v12, 0.0  ;;  %v585_v15 = vmul.f32 %v554_v12, %v554_v12 }
 0x10f   :  { %v577_v16 = vadd.f32 %v576_v14, %v575_v13 }
 0x110   :  { %v587_v18 = vsel %vm557_vm0, %v585_v15, 0.0 }
 0x111   :  { %v578_v19 = vrot.slane %v577_v16, 4  ;;  %v588_v20 = vadd.f32 %v587_v18, %v586_v17 }
 0x113   :  { %v579_v21 = vadd.f32 %v578_v19, %v577_v16  ;;  %v589_v22 = vrot.slane %v588_v20, 4 }
 0x115   :  { %v580_v23 = vrot.slane %v579_v21, 2  ;;  %v590_v24 = vadd.f32 %v589_v22, %v588_v20 }
 0x117   :  { %v581_v25 = vadd.f32 %v580_v23, %v579_v21  ;;  %v591_v26 = vrot.slane %v590_v24, 2 }
 0x119   :  { %v582_v27 = vrot.slane %v581_v25, 1  ;;  %v592_v28 = vadd.f32 %v591_v26, %v590_v24 }
 0x11b   :  { %v593_v29 = vrot.slane %v592_v28, 1  ;;  %v583_v30 = vadd.f32 %v582_v27, %v581_v25 }
 0x11d   :  { %v594_v31 = vadd.f32 %v593_v29, %v592_v28 }
 0x11f   :  { %v596_v32 = vsel %vm595_vm1, %v583_v30, %v594_v31 }
 0x120   :  { %602 = vst.msk [vmem:[%s990_s3] sm:$0x3] %vm601_vm2, %v596_v32 }

// kernel: tacotron_forward.38
= control target key start
LH: loop header
LB: loop body
LE: loop exit
PB: predicated region body
PF: predicated region fallthrough
CT: control target
= control target key end

     0   :  { %s3721_s27 = smov 0   ;;  %s4799_s0 = inlined_call_operand.vmem [shape: f32[4,8,8], index: 0, kind: input, shape index: {}]   ;;  %s4800_s1 = inlined_call_operand.vmem [shape: f32[8,8,32], index: 1, kind: input, shape index: {}]   ;;  %s4801_s2 = inlined_call_operand.vmem [shape: f32[8,8,32], index: 2, kind: input, shape index: {}]   ;;  %s4802_s3 = inlined_call_operand.vmem [shape: f32[8,8], index: 3, kind: input, shape index: {}]   ;;  %s4803_s4 = inlined_call_operand.vmem [shape: f32[8,8], index: 4, kind: input, shape index: {}]   ;;  %s4804_s5 = inlined_call_operand.vmem [shape: f32[8,8], index: 5, kind: input, shape index: {}]   ;;  %s4805_s6 = inlined_call_operand.vmem [shape: f32[504,128], index: 6, kind: input, shape index: {}]   ;;  %s4806_s7 = inlined_call_operand.vmem [shape: f32[4,8,16], index: 7, kind: output, shape index: {0}]   ;;  %s4807_s8 = inlined_call_operand.vmem [shape: f32[4,8,8], index: 8, kind: output, shape index: {1}]  }
   0x1 LB: > { %s3270_s28 = sadd.s32 4294967295, %s3659_s27   ;;  %p3272_p0 = scmp.ge.s32.totalorder %s3659_s27, 1  ;;  %s3659_s27 = sphi %s3721_s27, %s19_s27  }
   0x2   : > { %p245_p1 = scmp.lt.s32.totalorder %s3659_s27, 5 }
   0x4   : > { %p246_p2 = pnand %p3272_p0, %p245_p1 }
   0x6   : > { %249 = sbr.rel (%p246_p2) target bundleno = 3826 (0xef2), region = 48 }
   0xb   : > { %p3273_p3 = scmp.ne.s32.totalorder %s3270_s28, 0 }
   0xd   : > { %272 = sbr.rel (%p3273_p3) target bundleno = 23 (0x17), region = 52 }
  0x12   : > { %vm273_vm0 = vcmask 261120   ;;  %vm280_vm1 = vcmask 64512   ;;  %v3661_v0 = vmov 0.0  }
  0x13   : > { %274 = vst.msk [vmem:[#allocation2] sm:$0xff] %vm273_vm0, %v3661_v0  ;;  %275 = vst.msk [vmem:[#allocation3] sm:$0xff] %vm273_vm0, %v3661_v0 }
  0x14   : > { %276 = vst.msk [vmem:[#allocation4] sm:$0xff] %vm273_vm0, %v3661_v0  ;;  %277 = vst.msk [vmem:[#allocation5] sm:$0xff] %vm273_vm0, %v3661_v0 }
  0x15   : > { %278 = vst.msk [vmem:[#allocation6] sm:$0xff] %vm273_vm0, %v3661_v0  ;;  %279 = vst.msk [vmem:[#allocation7] sm:$0xff] %vm273_vm0, %v3661_v0 }
  0x16   : > { %281 = vst.msk [vmem:[#allocation8] sm:$0xff] %vm280_vm1, %v3661_v0  ;;  %282 = vst.msk [vmem:[#allocation9] sm:$0xff] %vm280_vm1, %v3661_v0 }
  0x17 PF: > { %v286_v2 = vld [vmem:[%s4805_s6] sm:$0xff]  ;;  %s3734_s9 = sshll.u32 %s3270_s28, 3  ;;  %v811_v3 = vlaneseq  ;;  %s3662_s10 = smov 8   ;;  %v4808_v4 = vmov 0.0   ;;  %vm292_vm2 = vcmask 64512   ;;  %vm3664_vm3 = vmmov 0  }
  0x18   : > { %3406 = vmatprep.subr.mxu1 %v4808_v4  ;;  %s284_s13 = scalar_lea.vmem %s4799_s0, %s3734_s9  ;;  %3408 = vmatprep.mubr.msk.f32.mxu1 %vm3664_vm3, %v4808_v4  ;;  %v370_v9 = vld [vmem:[%s4805_s6 + $0x28] sm:$0xff]  ;;  %v369_v13 = vld [vmem:[%s4805_s6 + $0x20] sm:$0xff]  ;;  %s3665_s18 = smov 32   ;;  %v368_v17 = vld [vmem:[%s4805_s6 + $0x18] sm:$0xff]  ;;  %vm813_vm5 = vcmask 1047616   ;;  %vm376_vm6 = vcmask 261120  }
  0x19   : > { %3407 = vmatpush3.msra.mxu1 %v286_v2  ;;  %v285_v6 = vld [vmem:[%s284_s13] sm:$0xff]  ;;  %v3747_v7 = vand.u32 127, %v811_v3  ;;  %v3749_v8 = vshrl.u32 %v811_v3, 7  ;;  %3422 = vmatprep.subr.mxu0 %v4808_v4  ;;  %v367_v18 = vld [vmem:[%s4805_s6 + $0x10] sm:$0xff]  ;;  %v3275_v23 = vld [vmem:[%s4805_s6 + $0x8] ss:$0 sm:$0xff]  ;;  %s3238_s12 = scalar_lea.vmem %s4806_s7, %s3734_s9 }
  0x1a   : > { %3409 = vmatmul.mubr.msk.f32.vlgmr.msra.gmra.mxu1 %vm292_vm2, %v285_v6  ;;  %v452_v12 = vld [vmem:[#allocation2] sm:$0xff]  ;;  %3411 = vmatprep.subr.mxu1 %v4808_v4  ;;  %v614_v29 = vld [vmem:[%s4805_s6 + $0x78] sm:$0xff]  ;;  %v613_v30 = vld [vmem:[%s4805_s6 + $0x70] sm:$0xff]  ;;  %s3666_s13 = smov 123   ;;  %s3667_s14 = smov 122  }
  0x1b   : > { %4814 = vst [vmem:[#allocation10_spill] sm:$0xff] %v3747_v7  ;;  %4815 = vst [vmem:[#allocation11_spill] sm:$0xff] %v3749_v8  ;;  %vm852_vm4 = vcmp.lt.s32.totalorder %v3747_v7, 8  ;;  %v3759_v10 = vsub.s32 0, %v3749_v8  ;;  %v3762_v11 = vsub.s32 1, %v3749_v8  ;;  %3419 = vmatprep.mubr.msk.f32.mxu1 %vm3664_vm3, %v4808_v4  ;;  %3412 = vmatpush3.msra.mxu1 %v370_v9  ;;  %v615_v28 = vld [vmem:[%s4805_s6 + $0x80] sm:$0xff] }
  0x1c   : > { %3413 = vmatprep.subr.mxu1 %v4808_v4  ;;  %3426 = vmatprep.mubr.msk.f32.mxu0 %vm3664_vm3, %v4808_v4  ;;  %v612_v31 = vld [vmem:[%s4805_s6 + $0x68] sm:$0xff]  ;;  %s3668_s15 = smov 121   ;;  %s3669_s16 = smov 127   ;;  %v458_v39 = vld [vmem:[%s4805_s6 + $0x60] sm:$0xff]  ;;  %v457_v40 = vld [vmem:[%s4805_s6 + $0x58] sm:$0xff]  ;;  %v820_v41 = vadd.s32 4294967293, %v3747_v7 }
  0x1d   : > { %v3729_v1 = vld [vmem:[#allocation8] sm:$0xff]  ;;  %v3743_v5 = vld [vmem:[#allocation9] sm:$0xff]  ;;  %3414 = vmatpush3.msra.mxu1 %v369_v13  ;;  %s3670_s17 = smov 126   ;;  %s3671_s19 = smov 125   ;;  %3423 = vmatpush3.msra.mxu0 %v458_v39  ;;  %v831_v42 = vadd.s32 4294967294, %v3747_v7  ;;  %v841_v43 = vadd.s32 4294967295, %v3747_v7 }
  0x1e   : > { %814 = vrot.lane.b32.xlu0 %v3729_v1, %s3662_s10  ;;  %887 = vrot.lane.b32.xlu1 %v3743_v5, %s3662_s10  ;;  %v3774_v14 = vsel %vm852_vm4, %v3729_v1, 0.0  ;;  %vm821_vm7 = vcmp.ge.s32.totalorder %v820_v41, 0  ;;  %vm822_vm8 = vcmp.lt.s32.totalorder %v820_v41, 8  ;;  %v3875_v57 = vadd.s32 1, %v3747_v7  ;;  %v454_v39 = vld [vmem:[%s4805_s6 + $0x40] sm:$0xff]  ;;  %v451_v45 = vld [vmem:[#allocation7] sm:$0xff] }
  0x1f   : > { %v1090_v15 = vrot.slane %v3774_v14, %v3759_v10  ;;  %v1097_v16 = vrot.slane %v3774_v14, %v3762_v11  ;;  %3415 = vmatprep.subr.mxu1 %v4808_v4  ;;  %3424 = vmatprep.subr.mxu0 %v4808_v4  ;;  %vm832_vm9 = vcmp.ge.s32.totalorder %v831_v42, 0  ;;  %vm833_vm10 = vcmp.lt.s32.totalorder %v831_v42, 8  ;;  %vm3842_vm11 = vmand %vm821_vm7, %vm822_vm8  ;;  %s3673_s24 = smov 96  }
  0x20   : > { %3416 = vmatpush3.msra.mxu1 %v368_v17  ;;  %3425 = vmatpush3.msra.mxu0 %v457_v40  ;;  %vm3846_vm12 = vmand %vm832_vm9, %vm833_vm10  ;;  %vm842_vm13 = vcmp.ge.s32.totalorder %v841_v43, 0  ;;  %vm843_vm14 = vcmp.lt.s32.totalorder %v841_v43, 8  ;;  %v3878_v58 = vsub.s32 2, %v3749_v8  ;;  %vm859_vm0 = vcmp.lt.s32.totalorder %v3875_v57, 8  ;;  %v453_v43 = vld [vmem:[%s4805_s6 + $0x38] sm:$0xff] }
  0x21   : > { %3417 = vmatprep.subr.mxu1 %v4808_v4  ;;  %3429 = vmatprep.subr.mxu0 %v4808_v4  ;;  %vm3862_vm15 = vmand %vm842_vm13, %vm843_vm14  ;;  %v3892_v0 = vadd.s32 2, %v3747_v7  ;;  %vm4813_vm7 = vcmask 130048   ;;  %v3967_v44 = vsub.s32 5, %v3749_v8  ;;  %vm1712_vm8 = vcmask 15360  }
  0x22   : > { %718 = vrot.lane.b32.xlu1 %v452_v12, %s3665_s18  ;;  %1092 = vbcast.lane.b32.xlu0 %v1090_v15, 256  ;;  %vm1721_vm9 = vcmask 23552   ;;  %vm1730_vm10 = vcmask 31744   ;;  %vm1757_vm13 = vcmask 56320   ;;  %vm1846_vm14 = vcmask 1045504  }
  0x23   : > { %3418 = vmatpush3.msra.mxu1 %v367_v18  ;;  %vm869_vm1 = vcmp.lt.s32.totalorder %v3892_v0, 8 }
  0x24   : > { %3440 = vmatprep.subr.mxu1 %v4808_v4 }
  0x26   : > { %1099 = vbcast.lane.b32.xlu1 %v1097_v16, 256 }
  0x90   : > { %v815_v19 = vpop.permute.xlu0 %814  ;;  %v888_v21 = vpop.permute.xlu1 %887 }
  0x91   : > { %v816_v20 = vsel %vm813_vm5, %v815_v19, %v3729_v1  ;;  %v889_v22 = vsel %vm813_vm5, %v888_v21, %v3743_v5 }
  0x92   : > { %817 = vrot.lane.b32.xlu0 %v816_v20, %s3662_s10  ;;  %890 = vrot.lane.b32.xlu1 %v889_v22, %s3662_s10  ;;  %v3927_v22 = vsub.s32 4, %v3749_v8 }
  0x94   : > { %v3821_v32 = vpop.permute.xlu0 %1092  ;;  %v3823_v33 = vpop.permute.xlu1 %718 }
  0x95   : > { %4816 = vst [vmem:[#allocation12_spill] sm:$0xff] %v3823_v33 }
  0x98   : > { %v3827_v36 = vpop.permute.xlu1 %1099 }
  0xda   : > { %v362_v24 = vpop.f32.mrf.mxu1 }
  0xdb   : > { %v363_v25 = vadd.f32 %v3275_v23, %v362_v24  ;;  %v3277_v24 = vld [vmem:[%s4805_s6 + $0x30] ss:$0 sm:$0xff] }
  0xdc   : > { %v3410_v26 = vpop.f32.mrf.mxu1 }
  0xdd   : > { %v366_v27 = vmax.f32 %v363_v25, 0.0 }
  0xdf   : > { %3420 = vmatmul.mubr.msk.f32.vlgmr.msra.gmra.mxu1 %vm376_vm6, %v366_v27 }
  0xe0   : > { %3441 = vmatpush3.msra.mxu1 %v615_v28  ;;  %3448 = vmatprep.mubr.msk.f32.mxu1 %vm3664_vm3, %v4808_v4 }
  0xe1   : > { %3442 = vmatprep.subr.mxu1 %v4808_v4 }
  0xe2   : > { %3443 = vmatpush3.msra.mxu1 %v614_v29 }
  0xe3   : > { %3444 = vmatprep.subr.mxu1 %v4808_v4 }
  0xe4   : > { %3445 = vmatpush3.msra.mxu1 %v613_v30 }
  0xe5   : > { %3446 = vmatprep.subr.mxu1 %v4808_v4 }
  0xe6   : > { %3447 = vmatpush3.msra.mxu1 %v612_v31  ;;  %v456_v31 = vld [vmem:[%s4805_s6 + $0x50] sm:$0xff] }
  0xe7   : > { %3449 = vmatmul.mubr.msk.f32.vlgmr.msra.gmra.mxu1 %vm376_vm6, %v452_v12  ;;  %v3907_v12 = vadd.s32 3, %v3747_v7 }
 0x104   : > { %v818_v34 = vpop.permute.xlu0 %817  ;;  %v891_v37 = vpop.permute.xlu1 %890 }
 0x105   : > { %v819_v35 = vsel %vm813_vm5, %v818_v34, %v3729_v1  ;;  %v892_v38 = vsel %vm813_vm5, %v891_v37, %v3743_v5  ;;  %v3895_v1 = vsub.s32 3, %v3749_v8  ;;  %vm879_vm5 = vcmp.lt.s32.totalorder %v3907_v12, 8  ;;  %v455_v37 = vld [vmem:[%s4805_s6 + $0x48] sm:$0xff] }
 0x106   : > { %827 = vrot.lane.b32.xlu0 %v819_v35, %s3666_s13  ;;  %837 = vrot.lane.b32.xlu1 %v819_v35, %s3667_s14 }
 0x107   : > { %v1111_v20 = vrot.slane %v3774_v14, %v3895_v1 }
 0x10a   : > { %847 = vrot.lane.b32.xlu0 %v819_v35, %s3668_s15  ;;  %863 = vrot.lane.b32.xlu1 %v819_v35, %s3669_s16 }
 0x10e   : > { %873 = vrot.lane.b32.xlu0 %v819_v35, %s3670_s17  ;;  %883 = vrot.lane.b32.xlu1 %v819_v35, %s3671_s19 }
 0x112   : > { %894 = vrot.lane.b32.xlu0 %v892_v38, %s3666_s13  ;;  %898 = vrot.lane.b32.xlu1 %v892_v38, %s3667_s14 }
 0x116   : > { %902 = vrot.lane.b32.xlu0 %v892_v38, %s3668_s15  ;;  %907 = vrot.lane.b32.xlu1 %v892_v38, %s3669_s16  ;;  %s3672_s16 = smov 64  }
 0x11a   : > { %915 = vrot.lane.b32.xlu1 %v892_v38, %s3671_s19  ;;  %911 = vrot.lane.b32.xlu0 %v892_v38, %s3670_s17  ;;  %v3282_v38 = vld [vmem:[%s4805_s6 + $0x90] ss:$0 sm:$0xff]  ;;  %s3240_s19 = scalar_lea.vmem %s4807_s8, %s3734_s9 }
 0x178   : > { %v828_v46 = vpop.permute.xlu0 %827  ;;  %v838_v47 = vpop.permute.xlu1 %837 }
 0x179   : > { %v3852_v48 = vsel %vm3842_vm11, %v828_v46, 0.0  ;;  %v3856_v49 = vsel %vm3846_vm12, %v838_v47, 0.0 }
 0x17a   : > { %v922_v50 = vrot.slane %v3852_v48, %v3759_v10  ;;  %v978_v51 = vrot.slane %v3856_v49, %v3759_v10  ;;  %v929_v54 = vrot.slane %v3852_v48, %v3762_v11  ;;  %v985_v55 = vrot.slane %v3856_v49, %v3762_v11 }
 0x17b   : > { %v936_v62 = vrot.slane %v3852_v48, %v3878_v58  ;;  %v999_v6 = vrot.slane %v3856_v49, %v3895_v1  ;;  %v950_v25 = vrot.slane %v3852_v48, %v3927_v22 }
 0x17c   : > { %924 = vbcast.lane.b32.xlu0 %v922_v50, 256  ;;  %980 = vbcast.lane.b32.xlu1 %v978_v51, 256  ;;  %v848_v53 = vpop.permute.xlu0 %847  ;;  %v864_v61 = vpop.permute.xlu1 %863  ;;  %v957_v50 = vrot.slane %v3852_v48, %v3967_v44  ;;  %v992_v51 = vrot.slane %v3856_v49, %v3878_v58 }
 0x17d   : > { %v3872_v56 = vsel %vm3862_vm15, %v848_v53, 0.0  ;;  %v3889_v63 = vsel %vm859_vm0, %v864_v61, 0.0  ;;  %v1104_v61 = vrot.slane %v3774_v14, %v3878_v58 }
 0x17e   : > { %v1034_v59 = vrot.slane %v3872_v56, %v3759_v10  ;;  %v1041_v60 = vrot.slane %v3872_v56, %v3762_v11  ;;  %v1153_v2 = vrot.slane %v3889_v63, %v3762_v11  ;;  %v1055_v16 = vrot.slane %v3872_v56, %v3895_v1 }
 0x17f   : > { %v1167_v34 = vrot.slane %v3889_v63, %v3895_v1  ;;  %v1146_v47 = vrot.slane %v3889_v63, %v3759_v10  ;;  %v1062_v53 = vrot.slane %v3872_v56, %v3927_v22  ;;  %v1069_v52 = vrot.slane %v3872_v56, %v3967_v44 }
 0x180   : > { %931 = vbcast.lane.b32.xlu0 %v929_v54, 256  ;;  %987 = vbcast.lane.b32.xlu1 %v985_v55, 256  ;;  %v874_v3 = vpop.permute.xlu0 %873  ;;  %v884_v15 = vpop.permute.xlu1 %883  ;;  %v943_v55 = vrot.slane %v3852_v48, %v3895_v1 }
 0x181   : > { %v3904_v9 = vsel %vm869_vm1, %v874_v3, 0.0  ;;  %v3916_v17 = vsel %vm879_vm5, %v884_v15, 0.0 }
 0x182   : > { %v1209_v13 = vrot.slane %v3904_v9, %v3762_v11  ;;  %v1265_v18 = vrot.slane %v3916_v17, %v3762_v11  ;;  %v1202_v54 = vrot.slane %v3904_v9, %v3759_v10  ;;  %v1216_v15 = vrot.slane %v3904_v9, %v3878_v58 }
 0x184   : > { %1036 = vbcast.lane.b32.xlu0 %v1034_v59, 256  ;;  %1043 = vbcast.lane.b32.xlu1 %v1041_v60, 256  ;;  %v895_v19 = vpop.permute.xlu0 %894  ;;  %v899_v29 = vpop.permute.xlu1 %898  ;;  %v1048_v59 = vrot.slane %v3872_v56, %v3878_v58  ;;  %v1258_v60 = vrot.slane %v3916_v17, %v3759_v10 }
 0x185   : > { %v3924_v21 = vsel %vm3842_vm11, %v895_v19, 0.0  ;;  %v3944_v35 = vsel %vm3846_vm12, %v899_v29, 0.0  ;;  %v1013_v19 = vrot.slane %v3856_v49, %v3967_v44  ;;  %vm1739_vm11 = vcmask 39936  }
 0x186   : > { %v1321_v23 = vrot.slane %v3924_v21, %v3762_v11  ;;  %v1377_v41 = vrot.slane %v3944_v35, %v3762_v11  ;;  %v1370_v3 = vrot.slane %v3944_v35, %v3759_v10  ;;  %v1335_v29 = vrot.slane %v3924_v21, %v3895_v1 }
 0x187   : > { %v1391_v57 = vrot.slane %v3944_v35, %v3895_v1  ;;  %vm1748_vm12 = vcmask 48128  }
 0x188   : > { %938 = vbcast.lane.b32.xlu1 %v936_v62, 256  ;;  %v1314_v62 = vrot.slane %v3924_v21, %v3759_v10 }
 0x18c   : > { %1155 = vbcast.lane.b32.xlu1 %v1153_v2, 256  ;;  %v1160_v2 = vrot.slane %v3889_v63, %v3878_v58 }
 0x190   : > { %1001 = vbcast.lane.b32.xlu1 %v999_v6, 256  ;;  %v1006_v6 = vrot.slane %v3856_v49, %v3927_v22 }
 0x194   : > { %1211 = vbcast.lane.b32.xlu1 %v1209_v13, 256  ;;  %v903_v13 = vpop.permute.xlu0 %902 }
 0x198   : > { %1057 = vbcast.lane.b32.xlu1 %v1055_v16, 256  ;;  %v4006_v16 = vsel %vm3862_vm15, %v903_v13, 0.0  ;;  %vm1774_vm15 = vcmask 72704  }
 0x19c   : > { %1267 = vbcast.lane.b32.xlu1 %v1265_v18, 256  ;;  %v1426_v18 = vrot.slane %v4006_v16, %v3759_v10 }
 0x19f   : > { %v446_v26 = vpop.f32.mrf.mxu1 }
 0x1a0   : > { %1113 = vbcast.lane.b32.xlu1 %v1111_v20, 256  ;;  %v447_v27 = vadd.f32 %v3277_v24, %v446_v26  ;;  %v1223_v20 = vrot.slane %v3904_v9, %v3895_v1  ;;  %v1279_v24 = vrot.slane %v3916_v17, %v3895_v1 }
 0x1a1   : > { %v3421_v28 = vpop.f32.mrf.mxu1 }
 0x1a2   : > { %v450_v30 = vmax.f32 %v447_v27, 0.0  ;;  %v1125_v27 = vrot.slane %v3774_v14, %v3967_v44  ;;  %v908_v28 = vpop.permute.xlu1 %907 }
 0x1a4   : > { %1323 = vbcast.lane.b32.xlu1 %v1321_v23, 256  ;;  %3427 = vmatmul.mubr.msk.f32.vlgmr.msra.gmra.mxu0 %vm4813_vm7, %v450_v30  ;;  %v1433_v23 = vrot.slane %v4006_v16, %v3762_v11  ;;  %v4033_v30 = vsel %vm859_vm0, %v908_v28, 0.0  ;;  %vm1783_vm0 = vcmask 80896   ;;  %vm1821_vm7 = vcmask 113664  }
 0x1a5   : > { %3430 = vmatpush3.msra.mxu0 %v456_v31  ;;  %3437 = vmatprep.mubr.msk.f32.mxu0 %vm3664_vm3, %v4808_v4  ;;  %v1545_v31 = vrot.slane %v4033_v30, %v3762_v11 }
 0x1a6   : > { %3431 = vmatprep.subr.mxu0 %v4808_v4 }
 0x1a7   : > { %3432 = vmatpush3.msra.mxu0 %v455_v37  ;;  %v690_v40 = vpop.f32.mrf.mxu1  ;;  %v912_v37 = vpop.permute.xlu0 %911 }
 0x1a8   : > { %952 = vbcast.lane.b32.xlu1 %v950_v25, 256  ;;  %v3960_v42 = vadd.f32 %v3282_v38, %v690_v40  ;;  %3433 = vmatprep.subr.mxu0 %v4808_v4  ;;  %v4023_v25 = vsel %vm852_vm4, %v3743_v5, 0.0  ;;  %v4036_v5 = vsub.s32 6, %v3749_v8  ;;  %v1181_v38 = vrot.slane %v3889_v63, %v3967_v44 }
 0x1a9   : > { %3434 = vmatpush3.msra.mxu0 %v454_v39  ;;  %v3450_v46 = vpop.f32.mrf.mxu1  ;;  %v1489_v26 = vrot.slane %v4023_v25, %v3762_v11  ;;  %v4048_v39 = vsel %vm869_vm1, %v912_v37, 0.0  ;;  %vm1703_vm4 = vcmask 7168   ;;  %vm1792_vm1 = vcmask 89088  }
 0x1aa   : > { %3435 = vmatprep.subr.mxu0 %v4808_v4  ;;  %702 = vrot.lane.b32.xlu0 %v3960_v42, %s3672_s16  ;;  %v1076_v0 = vrot.slane %v3872_v56, %v4036_v5 }
 0x1ab   : > { %3436 = vmatpush3.msra.mxu0 %v453_v43  ;;  %v4055_v43 = vsub.s32 7, %v3749_v8 }
 0x1ac   : > { %1169 = vbcast.lane.b32.xlu1 %v1167_v34, 256  ;;  %3438 = vmatmul.mubr.msk.f32.vlgmr.msra.gmra.mxu0 %vm376_vm6, %v451_v45  ;;  %v964_v34 = vrot.slane %v3852_v48, %v4036_v5 }
 0x1ad   : > { %3451 = vmatprep.subr.mxu0 %v4808_v4  ;;  %3459 = vmatprep.mubr.msk.f32.mxu0 %vm3664_vm3, %v4808_v4  ;;  %v971_v46 = vrot.slane %v3852_v48, %v4055_v43  ;;  %v1027_v12 = vrot.slane %v3856_v49, %v4055_v43 }
 0x1ae   : > { %1148 = vbcast.lane.b32.xlu0 %v1146_v47, 256 }
 0x1b0   : > { %1379 = vbcast.lane.b32.xlu1 %v1377_v41, 256  ;;  %v1601_v41 = vrot.slane %v4048_v39, %v3762_v11 }
 0x1b2   : > { %994 = vbcast.lane.b32.xlu0 %v992_v51, 256 }
 0x1b4   : > { %959 = vbcast.lane.b32.xlu1 %v957_v50, 256  ;;  %v4065_v50 = vpop.permute.xlu1 %915 }
 0x1b6   : > { %1204 = vbcast.lane.b32.xlu0 %v1202_v54, 256  ;;  %v1496_v54 = vrot.slane %v4023_v25, %v3878_v58 }
 0x1b8   : > { %1064 = vbcast.lane.b32.xlu1 %v1062_v53, 256  ;;  %v1286_v53 = vrot.slane %v3916_v17, %v3927_v22 }
 0x1ba   : > { %945 = vbcast.lane.b32.xlu0 %v943_v55, 256 }
 0x1be   : > { %1050 = vbcast.lane.b32.xlu0 %v1048_v59, 256 }
 0x1c2   : > { %1260 = vbcast.lane.b32.xlu0 %v1258_v60, 256  ;;  %v1083_v60 = vrot.slane %v3872_v56, %v4055_v43 }
 0x1c6   : > { %1106 = vbcast.lane.b32.xlu0 %v1104_v61, 256 }
 0x1ca   : > { %1316 = vbcast.lane.b32.xlu0 %v1314_v62, 256 }
 0x1ce   : > { %1162 = vbcast.lane.b32.xlu0 %v1160_v2, 256  ;;  %v1293_v2 = vrot.slane %v3916_v17, %v3967_v44 }
 0x1d2   : > { %1372 = vbcast.lane.b32.xlu0 %v1370_v3, 256 }
 0x1d6   : > { %1008 = vbcast.lane.b32.xlu0 %v1006_v6, 256 }
 0x1da   : > { %1218 = vbcast.lane.b32.xlu0 %v1216_v15, 256 }
 0x1de   : > { %1428 = vbcast.lane.b32.xlu0 %v1426_v18, 256 }
 0x1e2   : > { %1015 = vbcast.lane.b32.xlu0 %v1013_v19, 256 }
 0x1e6   : > { %1225 = vbcast.lane.b32.xlu0 %v1223_v20, 256 }
 0x1ea   : > { %1435 = vbcast.lane.b32.xlu0 %v1433_v23, 256 }
 0x1ee   : > { %1071 = vbcast.lane.b32.xlu0 %v1069_v52, 256  ;;  %v4050_v40 = vpop.permute.xlu0 %924  ;;  %v4073_v55 = vpop.permute.xlu1 %980 }
 0x1f2   : > { %1281 = vbcast.lane.b32.xlu0 %v1279_v24, 256  ;;  %v4057_v45 = vpop.permute.xlu0 %931  ;;  %v4081_v61 = vpop.permute.xlu1 %987 }
 0x1f6   : > { %1491 = vbcast.lane.b32.xlu0 %v1489_v26, 256  ;;  %v4061_v47 = vpop.permute.xlu0 %1036  ;;  %v4087_v3 = vpop.permute.xlu1 %1043 }
 0x1fa   : > { %1127 = vbcast.lane.b32.xlu0 %v1125_v27, 256  ;;  %v4091_v15 = vpop.permute.xlu1 %938 }
 0x1fb   : > { %4825 = vst [vmem:[#allocation15_spill] sm:$0xff] %v4091_v15 }
 0x1fe   : > { %1337 = vbcast.lane.b32.xlu0 %v1335_v29, 256  ;;  %v4095_v19 = vpop.permute.xlu1 %1155 }
 0x202   : > { %1547 = vbcast.lane.b32.xlu0 %v1545_v31, 256  ;;  %v1002_v23 = vpop.permute.xlu1 %1001 }
 0x206   : > { %966 = vbcast.lane.b32.xlu0 %v964_v34, 256  ;;  %v4103_v24 = vpop.permute.xlu1 %1211 }
 0x20a   : > { %1183 = vbcast.lane.b32.xlu0 %v1181_v38, 256  ;;  %v1058_v28 = vpop.permute.xlu1 %1057 }
 0x20e   : > { %1393 = vbcast.lane.b32.xlu0 %v1391_v57, 256  ;;  %v4111_v31 = vpop.permute.xlu1 %1267 }
 0x212   : > { %1603 = vbcast.lane.b32.xlu0 %v1601_v41, 256  ;;  %v1114_v38 = vpop.permute.xlu1 %1113 }
 0x216   : > { %973 = vbcast.lane.b32.xlu0 %v971_v46, 256  ;;  %v4115_v41 = vpop.permute.xlu1 %1323 }
 0x21a   : > { %1078 = vbcast.lane.b32.xlu0 %v1076_v0, 256 }
 0x21c   : > { %v4067_v51 = vpop.permute.xlu0 %702 }
 0x21e   : > { %1288 = vbcast.lane.b32.xlu0 %v1286_v53, 256  ;;  %v4119_v53 = vpop.permute.xlu1 %952 }
 0x21f   : > { %4831 = vst [vmem:[#allocation21_spill] sm:$0xff] %v4119_v53 }
 0x220   : > { %v4075_v48 = vpop.permute.xlu0 %1148 }
 0x222   : > { %1498 = vbcast.lane.b32.xlu0 %v1496_v54, 256  ;;  %v1170_v4 = vpop.permute.xlu1 %1169 }
 0x224   : > { %v4077_v59 = vpop.permute.xlu0 %994 }
 0x225   : > { %4823 = vst [vmem:[#allocation13_spill] sm:$0xff] %v4077_v59 }
 0x226   : > { %1085 = vbcast.lane.b32.xlu0 %v1083_v60, 256 }
 0x228   : > { %v4083_v62 = vpop.permute.xlu0 %1204 }
 0x22a   : > { %1295 = vbcast.lane.b32.xlu0 %v1293_v2, 256 }
 0x22c   : > { %v946_v6 = vpop.permute.xlu0 %945 }
 0x22d   : > { %v1707_v8 = vsel %vm1703_vm4, %v946_v6, %v1002_v23 }
 0x22e   : > { %v1716_v59 = vsel %vm1712_vm8, %v1707_v8, %v1058_v28 }
 0x230   : > { %v4089_v13 = vpop.permute.xlu0 %1050 }
 0x231   : > { %4824 = vst [vmem:[#allocation14_spill] sm:$0xff] %v4089_v13 }
 0x234   : > { %v4093_v18 = vpop.permute.xlu0 %1260 }
 0x238   : > { %v4097_v56 = vpop.permute.xlu0 %1106 }
 0x239   : > { %4826 = vst [vmem:[#allocation16_spill] sm:$0xff] %v4097_v56  ;;  %v4127_v56 = vpop.permute.xlu1 %1379 }
 0x23c   : > { %v4099_v20 = vpop.permute.xlu0 %1316 }
 0x23d   : > { %v960_v23 = vpop.permute.xlu1 %959 }
 0x240   : > { %v4101_v52 = vpop.permute.xlu0 %1162 }
 0x241   : > { %4827 = vst [vmem:[#allocation17_spill] sm:$0xff] %v4101_v52 }
 0x244   : > { %v4105_v26 = vpop.permute.xlu0 %1372 }
 0x248   : > { %v4107_v27 = vpop.permute.xlu0 %1008 }
 0x249   : > { %4828 = vst [vmem:[#allocation18_spill] sm:$0xff] %v4107_v27  ;;  %v1725_v27 = vsel %vm1721_vm9, %v1716_v59, %v1114_v38 }
 0x24c   : > { %v4109_v29 = vpop.permute.xlu0 %1218 }
 0x24d   : > { %4829 = vst [vmem:[#allocation19_spill] sm:$0xff] %v4109_v29  ;;  %v3281_v29 = vld [vmem:[%s4805_s6 + $0x88] ss:$0 sm:$0xff] }
 0x250   : > { %v4113_v34 = vpop.permute.xlu0 %1428 }
 0x254   : > { %v1016_v37 = vpop.permute.xlu0 %1015 }
 0x258   : > { %v1226_v57 = vpop.permute.xlu0 %1225 }
 0x25c   : > { %v4117_v46 = vpop.permute.xlu0 %1435 }
 0x25d   : > { %4830 = vst [vmem:[#allocation20_spill] sm:$0xff] %v4117_v46 }
 0x260   : > { %v1072_v0 = vpop.permute.xlu0 %1071 }
 0x264   : > { %v1282_v54 = vpop.permute.xlu0 %1281  ;;  %v529_v60 = vpop.f32.mrf.mxu0 }
 0x266   : > { %v3428_v2 = vpop.f32.mrf.mxu0 }
 0x268   : > { %v4121_v7 = vpop.permute.xlu0 %1491 }
 0x269   : > { %4832 = vst [vmem:[#allocation22_spill] sm:$0xff] %v4121_v7 }
 0x26c   : > { %v602_v33 = vpop.f32.mrf.mxu0  ;;  %v1128_v52 = vpop.permute.xlu0 %1127 }
 0x26d   : > { %v603_v13 = vadd.f32 %v602_v33, %v529_v60  ;;  %v1709_v33 = vsel %vm1703_vm4, %v960_v23, %v1016_v37  ;;  %v1118_v60 = vrot.slane %v3774_v14, %v3927_v22  ;;  %v1174_v23 = vrot.slane %v3889_v63, %v3927_v22 }
 0x26e   : > { %v3439_v15 = vpop.f32.mrf.mxu0  ;;  %v1718_v8 = vsel %vm1712_vm8, %v1709_v33, %v1072_v0  ;;  %v1384_v33 = vrot.slane %v3944_v35, %v3878_v58 }
 0x26f   : > { %v4130_v2 = vadd.f32 %v3281_v29, %v603_v13  ;;  %v1734_v15 = vsel %vm1730_vm10, %v1725_v27, %v1170_v4 }
 0x270   : > { %v1338_v53 = vpop.permute.xlu0 %1337  ;;  %v1743_v13 = vsel %vm1739_vm11, %v1734_v15, %v1226_v57  ;;  %v1594_v15 = vrot.slane %v4048_v39, %v3759_v10 }
 0x271   : > { %v694_v6 = vadd.f32 %v3960_v42, %v4130_v2  ;;  %v1727_v42 = vsel %vm1721_vm9, %v1718_v8, %v1128_v52  ;;  %v1752_v59 = vsel %vm1748_vm12, %v1743_v13, %v1282_v54  ;;  %v1272_v54 = vrot.slane %v3916_v17, %v3878_v58 }
 0x272   : > { %v1761_v4 = vsel %vm1757_vm13, %v1752_v59, %v1338_v53  ;;  %v1482_v53 = vrot.slane %v4023_v25, %v3759_v10  ;;  %v1020_v8 = vrot.slane %v3856_v49, %v4036_v5  ;;  %v1230_v13 = vrot.slane %v3904_v9, %v3927_v22 }
 0x273   : > { %v3284_v7 = vmul.f32 -1.442695, %v694_v6  ;;  %v1328_v6 = vrot.slane %v3924_v21, %v3878_v58  ;;  %v4182_v59 = vsel %vm879_vm5, %v4065_v50, 0.0  ;;  %v4833_v50 = vmov 0.0  }
 0x274   : > { %v4135_v46 = vpop.permute.xlu0 %1547  ;;  %v1132_v49 = vrot.slane %v3774_v14, %v4036_v5  ;;  %vm1810_vm5 = vcmask 105472  }
 0x275   : > { %3610 = vpow2.f32 %v3284_v7 }
 0x278   : > { %v4141_v28 = vpop.permute.xlu0 %966 }
 0x27c   : > { %v1184_v29 = vpop.permute.xlu0 %1183 }
 0x27d   : > { %v4146_v38 = vsel %vm1730_vm10, %v1727_v42, %v1184_v29  ;;  %v1440_v42 = vrot.slane %v4006_v16, %v3878_v58  ;;  %v1650_v29 = vrot.slane %v4182_v59, %v3759_v10 }
 0x280   : > { %v1394_v7 = vpop.permute.xlu0 %1393 }
 0x281   : > { %v4150_v27 = vsel %vm292_vm2, %v1761_v4, %v1394_v7  ;;  %v1820_v4 = vld [vmem:[%s4805_s6 + $0xa0] sm:$0x3f]  ;;  %v1819_v7 = vld [vmem:[%s4805_s6 + $0x98] sm:$0xff] }
 0x282   : > { %v3611_v37 = vpop.eup %3610  ;;  %3462 = vmatprep.subr.msk.mxu1 %vm1846_vm14, %v1820_v4 }
 0x283   : > { %v698_v57 = vadd.f32 1.0, %v3611_v37  ;;  %3463 = vmatpush3.msk.msra.mxu1 %vm1846_vm14, %v1820_v4  ;;  %v1237_v37 = vrot.slane %v3904_v9, %v3967_v44  ;;  %v1517_v4 = vrot.slane %v4023_v25, %v3967_v44  ;;  %vm1801_vm14 = vcmask 97280  }
 0x284   : > { %3464 = vmatprep.subr.mxu1 %v1819_v7 }
 0x285   : > { %3612 = vrcp.f32 %v698_v57  ;;  %3465 = vmatpush3.msra.mxu1 %v1819_v7  ;;  %v1447_v57 = vrot.slane %v4006_v16, %v3895_v1 }
 0x286   : > { %3498 = vmatprep.subr.mxu1 %v4833_v50 }
 0x292   : > { %v4152_v0 = vpop.eup %3612 }
 0x293   : > { %v705_v52 = vmul.f32 %v4152_v0, %v4067_v51  ;;  %v1538_v51 = vrot.slane %v4033_v30, %v3759_v10 }
 0x295   : > { %707 = vrot.lane.b32.xlu1 %v705_v52, %s3672_s16  ;;  %v1657_v52 = vrot.slane %v4182_v59, %v3762_v11 }
 0x299   : > { %1274 = vbcast.lane.b32.xlu1 %v1272_v54, 256  ;;  %v1342_v54 = vrot.slane %v3924_v21, %v3927_v22 }
 0x29d   : > { %1484 = vbcast.lane.b32.xlu1 %v1482_v53, 256  ;;  %v1552_v53 = vrot.slane %v4033_v30, %v3878_v58 }
 0x2a1   : > { %1120 = vbcast.lane.b32.xlu1 %v1118_v60, 256  ;;  %v1188_v60 = vrot.slane %v3889_v63, %v4036_v5 }
 0x2a5   : > { %1330 = vbcast.lane.b32.xlu1 %v1328_v6, 256  ;;  %v1398_v6 = vrot.slane %v3944_v35, %v3927_v22 }
 0x2a9   : > { %1540 = vbcast.lane.b32.xlu1 %v1538_v51, 256  ;;  %v1608_v51 = vrot.slane %v4048_v39, %v3878_v58 }
 0x2ad   : > { %1176 = vbcast.lane.b32.xlu1 %v1174_v23, 256  ;;  %v1244_v23 = vrot.slane %v3904_v9, %v4036_v5 }
 0x2b1   : > { %1386 = vbcast.lane.b32.xlu1 %v1384_v33, 256  ;;  %v1454_v33 = vrot.slane %v4006_v16, %v3927_v22 }
 0x2b5   : > { %1596 = vbcast.lane.b32.xlu1 %v1594_v15, 256  ;;  %v1664_v15 = vrot.slane %v4182_v59, %v3878_v58 }
 0x2b9   : > { %1022 = vbcast.lane.b32.xlu1 %v1020_v8, 256  ;;  %v1300_v8 = vrot.slane %v3916_v17, %v4036_v5 }
 0x2bd   : > { %1232 = vbcast.lane.b32.xlu1 %v1230_v13, 256  ;;  %v1510_v13 = vrot.slane %v4023_v25, %v3927_v22 }
 0x2c1   : > { %1442 = vbcast.lane.b32.xlu1 %v1440_v42, 256  ;;  %v4223_v42 = vpop.permute.xlu1 %1064 }
 0x2c5   : > { %1652 = vbcast.lane.b32.xlu1 %v1650_v29, 256  ;;  %v1307_v29 = vrot.slane %v3916_v17, %v4055_v43 }
 0x2c9   : > { %1029 = vbcast.lane.b32.xlu1 %v1027_v12, 256 }
 0x2cd   : > { %1239 = vbcast.lane.b32.xlu1 %v1237_v37, 256 }
 0x2d1   : > { %1449 = vbcast.lane.b32.xlu1 %v1447_v57, 256  ;;  %v1363_v57 = vrot.slane %v3924_v21, %v4055_v43 }
 0x2d5   : > { %1659 = vbcast.lane.b32.xlu1 %v1657_v52, 256 }
 0x2d9   : > { %1134 = vbcast.lane.b32.xlu1 %v1132_v49, 256  ;;  %v1573_v49 = vrot.slane %v4033_v30, %v3967_v44 }
 0x2dd   : > { %1344 = vbcast.lane.b32.xlu1 %v1342_v54, 256  ;;  %v1419_v54 = vrot.slane %v3944_v35, %v4055_v43 }
 0x2e1   : > { %1554 = vbcast.lane.b32.xlu1 %v1552_v53, 256 }
 0x2e5   : > { %1190 = vbcast.lane.b32.xlu1 %v1188_v60, 256  ;;  %v1629_v60 = vrot.slane %v4048_v39, %v3967_v44 }
 0x2e9   : > { %1400 = vbcast.lane.b32.xlu1 %v1398_v6, 256  ;;  %v1503_v6 = vrot.slane %v4023_v25, %v3895_v1 }
 0x2ed   : > { %1610 = vbcast.lane.b32.xlu1 %v1608_v51, 256 }
 0x2f1   : > { %1246 = vbcast.lane.b32.xlu1 %v1244_v23, 256  ;;  %v1139_v23 = vrot.slane %v3774_v14, %v4055_v43  ;;  %v1195_v14 = vrot.slane %v3889_v63, %v4055_v43 }
 0x2f5   : > { %1456 = vbcast.lane.b32.xlu1 %v1454_v33, 256 }
 0x2f9   : > { %1666 = vbcast.lane.b32.xlu1 %v1664_v15, 256  ;;  %v1349_v15 = vrot.slane %v3924_v21, %v3967_v44 }
 0x2fd   : > { %1302 = vbcast.lane.b32.xlu1 %v1300_v8, 256 }
 0x301   : > { %1512 = vbcast.lane.b32.xlu1 %v1510_v13, 256  ;;  %v1559_v13 = vrot.slane %v4033_v30, %v3895_v1 }
 0x305   : > { %1309 = vbcast.lane.b32.xlu1 %v1307_v29, 256 }
 0x307   : > { %v708_v7 = vpop.permute.xlu1 %707 }
 0x308   : > { %v710_v12 = vadd.f32 %v708_v7, %v4130_v2 }
 0x309   : > { %1519 = vbcast.lane.b32.xlu1 %v1517_v4, 256  ;;  %v1704_v4 = vsel %vm1703_vm4, %v4050_v40, %v4073_v55 }
 0x30a   : > { %3614 = vtanh.f32 %v710_v12  ;;  %v1713_v7 = vsel %vm1712_vm8, %v1704_v4, %v4061_v47 }
 0x30b   : > { %v4230_v37 = vpop.permute.xlu1 %1274 }
 0x30d   : > { %1365 = vbcast.lane.b32.xlu1 %v1363_v57, 256  ;;  %v1722_v57 = vsel %vm1721_vm9, %v1713_v7, %v3821_v32  ;;  %v1615_v32 = vrot.slane %v4048_v39, %v3895_v1 }
 0x30f   : > { %v1485_v52 = vpop.permute.xlu1 %1484 }
 0x311   : > { %1575 = vbcast.lane.b32.xlu1 %v1573_v49, 256  ;;  %v1405_v49 = vrot.slane %v3944_v35, %v3967_v44 }
 0x313   : > { %v4236_v17 = vpop.permute.xlu1 %1120 }
 0x315   : > { %1421 = vbcast.lane.b32.xlu1 %v1419_v54, 256  ;;  %v1731_v54 = vsel %vm1730_vm10, %v1722_v57, %v4075_v48 }
 0x316   : > { %v1740_v40 = vsel %vm1739_vm11, %v1731_v54, %v4083_v62  ;;  %v1705_v62 = vsel %vm1703_vm4, %v4057_v45, %v4081_v61 }
 0x317   : > { %v3615_v2 = vpop.eup %3614  ;;  %v4240_v53 = vpop.permute.xlu1 %1330  ;;  %v1749_v63 = vsel %vm1748_vm12, %v1740_v40, %v4093_v18  ;;  %v4836_v40 = vld [vmem:[#allocation18_spill] sm:$0xff] }
 0x318   : > { %714 = vrot.lane.b32.xlu0 %v3615_v2, %s3673_s24  ;;  %v1758_v47 = vsel %vm1757_vm13, %v1749_v63, %v4099_v20  ;;  %v4837_v63 = vld [vmem:[#allocation21_spill] sm:$0xff] }
 0x319   : > { %1631 = vbcast.lane.b32.xlu1 %v1629_v60, 256  ;;  %v1766_v55 = vsel %vm292_vm2, %v1758_v47, %v4105_v26  ;;  %v1251_v26 = vrot.slane %v3904_v9, %v4055_v43  ;;  %v1604_v9 = vpop.permute.xlu0 %1603  ;;  %v1708_v47 = vsel %vm1703_vm4, %v4837_v63, %v4836_v40  ;;  %v4842_v40 = vld [vmem:[#allocation17_spill] sm:$0xff] }
 0x31a   : > { %v1775_v60 = vsel %vm1774_vm15, %v1766_v55, %v4113_v34 }
 0x31b   : > { %v1541_v51 = vpop.permute.xlu1 %1540  ;;  %v1784_v18 = vsel %vm1783_vm0, %v1775_v60, %v1485_v52 }
 0x31c   : > { %1505 = vbcast.lane.b32.xlu0 %v1503_v6, 256  ;;  %v1793_v20 = vsel %vm1792_vm1, %v1784_v18, %v1541_v51  ;;  %v1714_v6 = vsel %vm1712_vm8, %v1705_v62, %v4087_v3  ;;  %v1461_v51 = vrot.slane %v4006_v16, %v3967_v44  ;;  %v1717_v18 = vsel %vm1712_vm8, %v1708_v47, %v4223_v42 }
 0x31d   : > { %v1723_v52 = vsel %vm1721_vm9, %v1714_v6, %v3827_v36  ;;  %v4318_v7 = vpop.permute.xlu0 %973 }
 0x31e   : > { %v1732_v3 = vsel %vm1730_vm10, %v1723_v52, %v4095_v19  ;;  %v1356_v19 = vrot.slane %v3924_v21, %v4036_v5 }
 0x31f   : > { %v4249_v33 = vpop.permute.xlu1 %1176 }
 0x320   : > { %1141 = vbcast.lane.b32.xlu0 %v1139_v23, 256 }
 0x321   : > { %v1079_v62 = vpop.permute.xlu0 %1078 }
 0x323   : > { %v4253_v8 = vpop.permute.xlu1 %1386 }
 0x324   : > { %1351 = vbcast.lane.b32.xlu0 %v1349_v15, 256  ;;  %v1671_v15 = vrot.slane %v4182_v59, %v3895_v1 }
 0x325   : > { %v1289_v42 = vpop.permute.xlu0 %1288 }
 0x327   : > { %v1597_v29 = vpop.permute.xlu1 %1596 }
 0x328   : > { %1561 = vbcast.lane.b32.xlu0 %v1559_v13, 256  ;;  %v1802_v45 = vsel %vm1801_vm14, %v1793_v20, %v1597_v29  ;;  %v1741_v29 = vsel %vm1739_vm11, %v1732_v3, %v4103_v24  ;;  %v1412_v20 = vrot.slane %v3944_v35, %v4036_v5  ;;  %v1678_v3 = vrot.slane %v4182_v59, %v3927_v22 }
 0x329   : > { %v1750_v4 = vsel %vm1748_vm12, %v1741_v29, %v4111_v31  ;;  %v4835_v31 = vld [vmem:[#allocation22_spill] sm:$0xff]  ;;  %v1524_v29 = vrot.slane %v4023_v25, %v4036_v5 }
 0x32b   : > { %v1023_v12 = vpop.permute.xlu1 %1022 }
 0x32c   : > { %1197 = vbcast.lane.b32.xlu0 %v1195_v14, 256  ;;  %v1759_v14 = vsel %vm1757_vm13, %v1750_v4, %v4115_v41  ;;  %v4840_v4 = vld [vmem:[#allocation14_spill] sm:$0xff] }
 0x32d   : > { %v1767_v57 = vsel %vm292_vm2, %v1759_v14, %v4127_v56  ;;  %v1566_v56 = vrot.slane %v4033_v30, %v3927_v22 }
 0x32f   : > { %v4270_v2 = vpop.permute.xlu1 %1232 }
 0x330   : > { %1407 = vbcast.lane.b32.xlu0 %v1405_v49, 256  ;;  %v4834_v49 = vld [vmem:[#allocation20_spill] sm:$0xff] }
 0x333   : > { %v4282_v48 = vpop.permute.xlu1 %1442 }
 0x334   : > { %1617 = vbcast.lane.b32.xlu0 %v1615_v32, 256 }
 0x337   : > { %v1653_v61 = vpop.permute.xlu1 %1652 }
 0x338   : > { %v1811_v34 = vsel %vm1810_vm5, %v1802_v45, %v1653_v61  ;;  %1253 = vbcast.lane.b32.xlu0 %v1251_v26, 256  ;;  %v1622_v61 = vrot.slane %v4048_v39, %v3927_v22 }
 0x339   : > { %3466 = vmatprep.mubr.msk.f32.mxu1 %vm1821_vm7, %v1811_v34 }
 0x33b   : > { %v4302_v23 = vpop.permute.xlu1 %1029 }
 0x33c   : > { %1463 = vbcast.lane.b32.xlu0 %v1461_v51, 256  ;;  %v4838_v51 = vld [vmem:[#allocation13_spill] sm:$0xff] }
 0x33f   : > { %v1240_v13 = vpop.permute.xlu1 %1239 }
 0x340   : > { %v4312_v36 = vsel %vm1739_vm11, %v4146_v38, %v1240_v13  ;;  %1673 = vbcast.lane.b32.xlu0 %v1671_v15, 256  ;;  %v1776_v38 = vsel %vm1774_vm15, %v1767_v57, %v4834_v49  ;;  %v4841_v57 = vld [vmem:[#allocation16_spill] sm:$0xff] }
 0x341   : > { %v1785_v41 = vsel %vm1783_vm0, %v1776_v38, %v4835_v31  ;;  %v1531_v38 = vrot.slane %v4023_v25, %v4055_v43  ;;  %v731_v31 = vld [vmem:[%s4805_s6 + $0xc0] sm:$0xff]  ;;  %v729_v25 = vld [vmem:[%s4805_s6 + $0xb0] sm:$0xff] }
 0x342   : > { %v1794_v21 = vsel %vm1792_vm1, %v1785_v41, %v4135_v46  ;;  %v1726_v46 = vsel %vm1721_vm9, %v1717_v18, %v4236_v17  ;;  %v730_v41 = vld [vmem:[%s4805_s6 + $0xb8] sm:$0xff]  ;;  %3452 = vmatpush3.msra.mxu0 %v731_v31 }
 0x343   : > { %v1450_v24 = vpop.permute.xlu1 %1449  ;;  %v1803_v32 = vsel %vm1801_vm14, %v1794_v21, %v1604_v9  ;;  %v1735_v26 = vsel %vm1730_vm10, %v1726_v46, %v4249_v33  ;;  %v1468_v33 = vrot.slane %v4006_v16, %v4036_v5  ;;  %3453 = vmatprep.subr.mxu0 %v4833_v50  ;;  %v4843_v21 = vld [vmem:[#allocation19_spill] sm:$0xff] }
 0x344   : > { %v4328_v54 = vsel %vm1774_vm15, %v4150_v27, %v1450_v24  ;;  %1358 = vbcast.lane.b32.xlu0 %v1356_v19, 256  ;;  %v1710_v27 = vsel %vm1703_vm4, %v4141_v28, %v1023_v12  ;;  %v1744_v12 = vsel %vm1739_vm11, %v1735_v26, %v4270_v2  ;;  %v4839_v2 = vld [vmem:[#allocation15_spill] sm:$0xff]  ;;  %3454 = vmatpush3.msra.mxu0 %v730_v41 }
 0x345   : > { %v1719_v6 = vsel %vm1712_vm8, %v1710_v27, %v1079_v62  ;;  %v1753_v17 = vsel %vm1748_vm12, %v1744_v12, %v1289_v42  ;;  %v1706_v9 = vsel %vm1703_vm4, %v4839_v2, %v4838_v51  ;;  %3455 = vmatprep.subr.mxu0 %v4833_v50  ;;  %v1636_v41 = vrot.slane %v4048_v39, %v4036_v5 }
 0x346   : > { %v1715_v14 = vsel %vm1712_vm8, %v1706_v9, %v4840_v4  ;;  %3456 = vmatpush3.msra.mxu0 %v729_v25 }
 0x347   : > { %v1660_v55 = vpop.permute.xlu1 %1659  ;;  %v1724_v24 = vsel %vm1721_vm9, %v1715_v14, %v4841_v57  ;;  %3457 = vmatprep.subr.mxu0 %v4833_v50  ;;  %v2457_v57 = vld [vmem:[%s4805_s6 + $0x120] sm:$0xff] }
 0x348   : > { %v1812_v60 = vsel %vm1810_vm5, %v1803_v32, %v1660_v55  ;;  %1568 = vbcast.lane.b32.xlu0 %v1566_v56, 256  ;;  %v1733_v63 = vsel %vm1730_vm10, %v1724_v24, %v4842_v40  ;;  %v1587_v32 = vrot.slane %v4033_v30, %v4055_v43  ;;  %v728_v55 = vld [vmem:[%s4805_s6 + $0xa8] sm:$0xff] }
 0x349   : > { %3467 = vmatmul.mubr.msk.f32.vlgmr.msra.gmra.mxu1 %vm1821_vm7, %v1812_v60  ;;  %v1742_v56 = vsel %vm1739_vm11, %v1733_v63, %v4843_v21  ;;  %3458 = vmatpush3.msra.mxu0 %v728_v55 }
 0x34a   : > { %v1751_v62 = vsel %vm1748_vm12, %v1742_v56, %v4230_v37  ;;  %v1643_v37 = vrot.slane %v4048_v39, %v4055_v43 }
 0x34b   : > { %v1135_v28 = vpop.permute.xlu1 %1134  ;;  %v1760_v60 = vsel %vm1757_vm13, %v1751_v62, %v4240_v53 }
 0x34c   : > { %v1728_v45 = vsel %vm1721_vm9, %v1719_v6, %v1135_v28  ;;  %1414 = vbcast.lane.b32.xlu0 %v1412_v20, 256  ;;  %v1768_v46 = vsel %vm292_vm2, %v1760_v60, %v4253_v8  ;;  %v1499_v6 = vpop.permute.xlu0 %1498  ;;  %v1699_v8 = vrot.slane %v4182_v59, %v4055_v43 }
 0x34d   : > { %v1777_v20 = vsel %vm1774_vm15, %v1768_v46, %v4282_v48 }
 0x34e   : > { %v1786_v53 = vsel %vm1783_vm0, %v1777_v20, %v1499_v6 }
 0x34f   : > { %v1345_v34 = vpop.permute.xlu1 %1344 }
 0x350   : > { %v1762_v35 = vsel %vm1757_vm13, %v1753_v17, %v1345_v34  ;;  %1624 = vbcast.lane.b32.xlu0 %v1622_v61, 256  ;;  %v1086_v34 = vpop.permute.xlu0 %1085 }
 0x353   : > { %v1555_v52 = vpop.permute.xlu1 %1554 }
 0x354   : > { %1470 = vbcast.lane.b32.xlu0 %v1468_v33, 256  ;;  %v1795_v12 = vsel %vm1792_vm1, %v1786_v53, %v1555_v52  ;;  %v712_v33 = vsub.f32 1.0, %v4152_v0  ;;  %v4844_v52 = vld [vmem:[#allocation12_spill] sm:$0xff] }
 0x355   : > { %v721_v2 = vmul.f32 %v4152_v0, %v4844_v52 }
 0x357   : > { %v1191_v15 = vpop.permute.xlu1 %1190 }
 0x358   : > { %v1737_v13 = vsel %vm1730_vm10, %v1728_v45, %v1191_v15  ;;  %1680 = vbcast.lane.b32.xlu0 %v1678_v3, 256 }
 0x35b   : > { %v1401_v19 = vpop.permute.xlu1 %1400 }
 0x35c   : > { %v1770_v49 = vsel %vm292_vm2, %v1762_v35, %v1401_v19  ;;  %1526 = vbcast.lane.b32.xlu0 %v1524_v29, 256  ;;  %v1296_v35 = vpop.permute.xlu0 %1295  ;;  %v1475_v29 = vrot.slane %v4006_v16, %v4055_v43  ;;  %v2458_v19 = vld [vmem:[%s4805_s6 + $0x128] sm:$0xff] }
 0x35d   : > { %3499 = vmatpush3.msra.mxu1 %v2458_v19  ;;  %v1754_v16 = vsel %vm1748_vm12, %v4312_v36, %v1296_v35  ;;  %v1580_v36 = vrot.slane %v4033_v30, %v4036_v5 }
 0x35e   : > { %3500 = vmatprep.subr.mxu1 %v4833_v50 }
 0x35f   : > { %v1611_v47 = vpop.permute.xlu1 %1610  ;;  %3501 = vmatpush3.msra.mxu1 %v2457_v57 }
 0x360   : > { %1533 = vbcast.lane.b32.xlu0 %v1531_v38, 256  ;;  %v1804_v45 = vsel %vm1801_vm14, %v1795_v12, %v1611_v47  ;;  %3502 = vmatprep.subr.mxu1 %v4833_v50  ;;  %v2455_v38 = vld [vmem:[%s4805_s6 + $0x110] sm:$0xff]  ;;  %v1692_v47 = vrot.slane %v4182_v59, %v4036_v5 }
 0x363   : > { %v1247_v27 = vpop.permute.xlu1 %1246 }
 0x364   : > { %v1746_v18 = vsel %vm1739_vm11, %v1737_v13, %v1247_v27  ;;  %1589 = vbcast.lane.b32.xlu0 %v1587_v32, 256  ;;  %v1711_v13 = vsel %vm1703_vm4, %v4318_v7, %v4302_v23  ;;  %v1685_v23 = vrot.slane %v4182_v59, %v3967_v44  ;;  %vm2278_vm4 = vcmask 1042434  }
 0x365   : > { %v1720_v14 = vsel %vm1712_vm8, %v1711_v13, %v1086_v34  ;;  %vm2280_vm8 = vcmask 1043459  }
 0x367   : > { %v1457_v26 = vpop.permute.xlu1 %1456 }
 0x368   : > { %v4410_v28 = vsel %vm1774_vm15, %v1770_v49, %v1457_v26  ;;  %1645 = vbcast.lane.b32.xlu0 %v1643_v37, 256  ;;  %v2456_v49 = vld [vmem:[%s4805_s6 + $0x118] sm:$0xff] }
 0x369   : > { %3503 = vmatpush3.msra.mxu1 %v2456_v49 }
 0x36a   : > { %3504 = vmatprep.subr.mxu1 %v4833_v50 }
 0x36b   : > { %v1667_v42 = vpop.permute.xlu1 %1666  ;;  %3505 = vmatpush3.msra.mxu1 %v2455_v38 }
 0x36c   : > { %v1813_v48 = vsel %vm1810_vm5, %v1804_v45, %v1667_v42  ;;  %1701 = vbcast.lane.b32.xlu0 %v1699_v8, 256  ;;  %3509 = vmatprep.subr.mxu1 %v4833_v50 }
 0x36d   : > { %3469 = vmatprep.mubr.msk.f32.mxu1 %vm1821_vm7, %v1813_v48 }
 0x36f   : > { %v1303_v61 = vpop.permute.xlu1 %1302 }
 0x370   : > { %v1755_v17 = vsel %vm1748_vm12, %v1746_v18, %v1303_v61 }
 0x373   : > { %v1513_v12 = vpop.permute.xlu1 %1512 }
 0x374   : > { %v1788_v45 = vsel %vm1783_vm0, %v4410_v28, %v1513_v12 }
 0x38a   : > { %v715_v51 = vpop.permute.xlu0 %714 }
 0x38b   : > { %v717_v9 = vmul.f32 %v715_v51, %v712_v33 }
 0x38d   : > { %v722_v3 = vadd.f32 %v721_v2, %v717_v9 }
 0x38e   : > { %v1506_v15 = vpop.permute.xlu0 %1505 }
 0x38f   : > { %724 = vrot.lane.b32.xlu1 %v722_v3, %s3673_s24  ;;  %v1787_v39 = vsel %vm1783_vm0, %v4328_v54, %v1506_v15 }
 0x392   : > { %v1142_v4 = vpop.permute.xlu0 %1141 }
 0x393   : > { %v1729_v0 = vsel %vm1721_vm9, %v1720_v14, %v1142_v4  ;;  %1477 = vbcast.lane.b32.xlu1 %v1475_v29, 256  ;;  %vm2282_vm9 = vcmask 1044484  }
 0x396   : > { %v1352_v7 = vpop.permute.xlu0 %1351 }
 0x397   : > { %v1763_v24 = vsel %vm1757_vm13, %v1754_v16, %v1352_v7  ;;  %1687 = vbcast.lane.b32.xlu1 %v1685_v23, 256 }
 0x39a   : > { %v1562_v31 = vpop.permute.xlu0 %1561 }
 0x39b   : > { %1582 = vbcast.lane.b32.xlu1 %v1580_v36, 256  ;;  %v1796_v27 = vsel %vm1792_vm1, %v1787_v39, %v1562_v31  ;;  %v2077_v39 = vld [vmem:[%s4805_s6 + $0xd0] sm:$0xff] }
 0x39e   : > { %v1198_v40 = vpop.permute.xlu0 %1197 }
 0x39f   : > { %v1738_v63 = vsel %vm1730_vm10, %v1729_v0, %v1198_v40  ;;  %1638 = vbcast.lane.b32.xlu1 %v1636_v41, 256  ;;  %vm2284_vm10 = vcmask 1045509  }
 0x3a2   : > { %v1408_v25 = vpop.permute.xlu0 %1407 }
 0x3a3   : > { %v1771_v30 = vsel %vm292_vm2, %v1763_v24, %v1408_v25  ;;  %1694 = vbcast.lane.b32.xlu1 %v1692_v47, 256 }
 0x3a6   : > { %v1618_v21 = vpop.permute.xlu0 %1617 }
 0x3a7   : > { %v1805_v60 = vsel %vm1801_vm14, %v1796_v27, %v1618_v21  ;;  %v3674_v27 = vmov 0  }
 0x3a8   : > { %3608 = vset.pattern.permute.xlu0 %v3674_v27  ;;  %3609 = vset.pattern.permute.xlu1 %v3674_v27 }
 0x3aa   : > { %v1254_v56 = vpop.permute.xlu0 %1253 }
 0x3ab   : > { %v1747_v32 = vsel %vm1739_vm11, %v1738_v63, %v1254_v56  ;;  %vm2286_vm11 = vcmask 1046534  }
 0x3ae   : > { %v1464_v55 = vpop.permute.xlu0 %1463 }
 0x3af   : > { %v1780_v62 = vsel %vm1774_vm15, %v1771_v30, %v1464_v55  ;;  %v2079_v55 = vld [vmem:[%s4805_s6 + $0xe0] sm:$0xff] }
 0x3b2   : > { %v1674_v18 = vpop.permute.xlu0 %1673 }
 0x3b3   : > { %v1814_v59 = vsel %vm1810_vm5, %v1805_v60, %v1674_v18  ;;  %v3675_v60 = vmov 1966171168  }
 0x3b4   : > { %3470 = vmatmul.mubr.msk.f32.gmra.mxu1 %vm1821_vm7, %v1814_v59  ;;  %v1958_v18 = vunpack.c.l.s4 %v3675_v60  ;;  %v2011_v60 = vld [vmem:[%s4801_s2 + $0x30] sm:$0xff] }
 0x3b6   : > { %v1359_v46 = vpop.permute.xlu0 %1358  ;;  %v1959_v59 = vunpack.c.0.s8 %v1958_v18 }
 0x3b7   : > { %v1764_v20 = vsel %vm1757_vm13, %v1755_v17, %v1359_v46  ;;  %v1310_v17 = vpop.permute.xlu1 %1309 }
 0x3b8   : > { %v1756_v15 = vsel %vm1748_vm12, %v1747_v32, %v1310_v17  ;;  %v2080_v32 = vld [vmem:[%s4805_s6 + $0xe8] sm:$0xff]  ;;  %v2005_v17 = vld [vmem:[%s4801_s2] sm:$0xff]  ;;  %vm2288_vm12 = vcmask 1047559  }
 0x3b9   : > { %3478 = vmatprep.subr.mxu0 %v2080_v32 }
 0x3ba   : > { %v1569_v37 = vpop.permute.xlu0 %1568 }
 0x3bb   : > { %v1797_v42 = vsel %vm1792_vm1, %v1788_v45, %v1569_v37  ;;  %v1520_v35 = vpop.permute.xlu1 %1519  ;;  %v4845_v37 = vld [vmem:[#allocation11_spill] sm:$0xff] }
 0x3bc   : > { %v1789_v28 = vsel %vm1783_vm0, %v1780_v62, %v1520_v35  ;;  %v2078_v62 = vld [vmem:[%s4805_s6 + $0xd8] sm:$0xff] }
 0x3be   : > { %v1415_v26 = vpop.permute.xlu0 %1414 }
 0x3bf   : > { %v1772_v6 = vsel %vm292_vm2, %v1764_v20, %v1415_v26  ;;  %v1366_v33 = vpop.permute.xlu1 %1365  ;;  %v3285_v20 = vld [vmem:[%s4805_s6 + $0xc8] ss:$0 sm:$0xff]  ;;  %v1962_v26 = vsub.s32 %v1959_v59, %v4845_v37 }
 0x3c0   : > { %v1765_v14 = vsel %vm1757_vm13, %v1756_v15, %v1366_v33 }
 0x3c2   : > { %v1625_v53 = vpop.permute.xlu0 %1624 }
 0x3c3   : > { %v1806_v48 = vsel %vm1801_vm14, %v1797_v42, %v1625_v53  ;;  %v1576_v51 = vpop.permute.xlu1 %1575 }
 0x3c4   : > { %v1798_v4 = vsel %vm1792_vm1, %v1789_v28, %v1576_v51 }
 0x3c6   : > { %v1471_v8 = vpop.permute.xlu0 %1470 }
 0x3c7   : > { %v1781_v54 = vsel %vm1774_vm15, %v1772_v6, %v1471_v8  ;;  %v1422_v52 = vpop.permute.xlu1 %1421 }
 0x3c8   : > { %v1773_v7 = vsel %vm292_vm2, %v1765_v14, %v1422_v52 }
 0x3ca   : > { %v1681_v61 = vpop.permute.xlu0 %1680 }
 0x3cb   : > { %v1815_v34 = vsel %vm1810_vm5, %v1806_v48, %v1681_v61  ;;  %v1632_v2 = vpop.permute.xlu1 %1631 }
 0x3cc   : > { %3472 = vmatprep.mubr.msk.f32.mxu1 %vm1821_vm7, %v1815_v34  ;;  %v1807_v19 = vsel %vm1801_vm14, %v1798_v4, %v1632_v2 }
 0x3ce   : > { %v1527_v9 = vpop.permute.xlu0 %1526 }
 0x3cf   : > { %v1790_v41 = vsel %vm1783_vm0, %v1781_v54, %v1527_v9  ;;  %v2006_v9 = vld [vmem:[%s4801_s2 + $0x8] sm:$0xff] }
 0x3d2   : > { %v1534_v13 = vpop.permute.xlu0 %1533 }
 0x3d6   : > { %v1590_v23 = vpop.permute.xlu0 %1589 }
 0x3da   : > { %v1646_v38 = vpop.permute.xlu0 %1645 }
 0x3de   : > { %v1702_v30 = vpop.permute.xlu0 %1701 }
 0x401   : > { %v725_v3 = vpop.permute.xlu1 %724 }
 0x402   : > { %727 = vst.msk [vmem:[#allocation2] sm:$0xff] %vm376_vm6, %v725_v3  ;;  %3460 = vmatmul.mubr.msk.f32.vlgmr.msra.gmra.mxu0 %vm376_vm6, %v725_v3 }
 0x403   : > { %3479 = vmatpush3.msra.mxu0 %v2080_v32 }
 0x404   : > { %3480 = vmatprep.subr.mxu0 %v2079_v55 }
 0x405   : > { %v1478_v29 = vpop.permute.xlu1 %1477  ;;  %3481 = vmatpush3.msra.mxu0 %v2079_v55 }
 0x406   : > { %v1782_v57 = vsel %vm1774_vm15, %v1773_v7, %v1478_v29  ;;  %3482 = vmatprep.subr.mxu0 %v2078_v62 }
 0x407   : > { %v1791_v49 = vsel %vm1783_vm0, %v1782_v57, %v1534_v13  ;;  %3483 = vmatpush3.msra.mxu0 %v2078_v62 }
 0x408   : > { %v1800_v36 = vsel %vm1792_vm1, %v1791_v49, %v1590_v23  ;;  %3484 = vmatprep.subr.mxu0 %v2077_v39 }
 0x409   : > { %v1688_v0 = vpop.permute.xlu1 %1687  ;;  %v1809_v63 = vsel %vm1801_vm14, %v1800_v36, %v1646_v38  ;;  %3485 = vmatpush3.msra.mxu0 %v2077_v39  ;;  %v3468_v46 = vpop.f32.mrf.mxu1  ;;  %v2010_v38 = vld [vmem:[%s4801_s2 + $0x28] sm:$0xff]  ;;  %v2012_v39 = vld [vmem:[%s4801_s2 + $0x38] sm:$0xff] }
 0x40a   : > { %v1816_v16 = vsel %vm1810_vm5, %v1807_v19, %v1688_v0  ;;  %v1818_v56 = vsel %vm1810_vm5, %v1809_v63, %v1702_v30  ;;  %3520 = vmatprep.subr.mxu0 %v4833_v50  ;;  %v2009_v19 = vld [vmem:[%s4801_s2 + $0x20] sm:$0xff]  ;;  %v2008_v0 = vld [vmem:[%s4801_s2 + $0x18] sm:$0xff] }
 0x40b   : > { %3473 = vmatmul.mubr.msk.f32.gmra.mxu1 %vm1821_vm7, %v1816_v16  ;;  %v1916_v53 = vpop.f32.mrf.mxu1 }
 0x40d   : > { %v1583_v24 = vpop.permute.xlu1 %1582 }
 0x40e   : > { %v1799_v40 = vsel %vm1792_vm1, %v1790_v41, %v1583_v24 }
 0x411   : > { %v1639_v31 = vpop.permute.xlu1 %1638 }
 0x412   : > { %v1808_v47 = vsel %vm1801_vm14, %v1799_v40, %v1639_v31 }
 0x415   : > { %v1695_v25 = vpop.permute.xlu1 %1694 }
 0x416   : > { %v1817_v21 = vsel %vm1810_vm5, %v1808_v47, %v1695_v25 }
 0x417   : > { %3475 = vmatprep.mubr.msk.f32.mxu1 %vm1821_vm7, %v1817_v21 }
 0x418   : > { %3476 = vmatmul.mubr.msk.f32.gmra.mxu1 %vm1821_vm7, %v1818_v56  ;;  %vm2276_vm7 = vcmask 1041409  }
 0x419   : > { %3506 = vmatprep.mubr.msk.f32.mxu1 %vm3664_vm3, %v4833_v50 }
 0x41c   : > { %3507 = vmatmul.mubr.msk.f32.vlgmr.msra.gmra.mxu1 %vm376_vm6, %v725_v3  ;;  %v2007_v3 = vld [vmem:[%s4801_s2 + $0x10] sm:$0xff] }
 0x41d   : > { %3517 = vmatprep.mubr.msk.f32.mxu1 %vm3664_vm3, %v4833_v50 }
 0x474   : > { %v3471_v54 = vpop.f32.mrf.mxu1 }
 0x476   : > { %v1926_v35 = vpop.f32.mrf.mxu1 }
 0x4c2   : > { %v805_v6 = vpop.f32.mrf.mxu0 }
 0x4c3   : > { %v806_v12 = vadd.f32 %v3285_v20, %v805_v6 }
 0x4c4   : > { %v3461_v8 = vpop.f32.mrf.mxu0 }
 0x4c5   : > { %v1956_v45 = vcombine.high %v806_v12, %v806_v12  ;;  %v1963_v42 = vrot.slane %v806_v12, %v1962_v26 }
 0x4c7   : > { %v1970_v48 = vrot.slane %v1956_v45, %v1962_v26  ;;  %v1971_v61 = vcombine.high %v1963_v42, %v1963_v42  ;;  %v1979_v34 = vrot.slane %v1963_v42, %v1962_v26 }
 0x4c9   : > { %v1972_v33 = vcombine.high %v1970_v48, %v1970_v48  ;;  %v1993_v51 = vrot.slane %v1971_v61, %v1962_v26  ;;  %v2001_v52 = vcombine.high %v1979_v34, %v1979_v34  ;;  %v2016_v2 = vrot.slane %v1979_v34, %v3759_v10 }
 0x4ca   : > { %v1986_v28 = vrot.slane %v1970_v48, %v1962_v26 }
 0x4cb   : > { %v2003_v15 = vcombine.high %v1993_v51, %v1993_v51  ;;  %v2020_v13 = vrot.slane %v1993_v51, %v3759_v10  ;;  %v2024_v29 = vrot.slane %v2001_v52, %v3759_v10  ;;  %v2053_v4 = vadd.f32 %v2016_v2, %v2005_v17  ;;  %v3474_v14 = vpop.f32.mrf.mxu1 }
 0x4cc   : > { %v2000_v23 = vrot.slane %v1972_v33, %v1962_v26  ;;  %v2032_v7 = vrot.slane %v1986_v28, %v3759_v10  ;;  %v2002_v56 = vcombine.high %v1986_v28, %v1986_v28 }
 0x4cd   : > { %v2028_v16 = vrot.slane %v2003_v15, %v3759_v10  ;;  %v2054_v57 = vadd.f32 %v2020_v13, %v2006_v9  ;;  %v2055_v24 = vadd.f32 %v2024_v29, %v2007_v3  ;;  %v2061_v49 = vadd.f32 %v2053_v4, %v1916_v53  ;;  %v1936_v47 = vpop.f32.mrf.mxu1  ;;  %v4846_v13 = vld [vmem:[#allocation10_spill] sm:$0xff] }
 0x4ce   : > { %v2036_v36 = vrot.slane %v2000_v23, %v3759_v10  ;;  %v2057_v31 = vadd.f32 %v2032_v7, %v2009_v19  ;;  %v2004_v25 = vcombine.high %v2000_v23, %v2000_v23  ;;  %v2040_v27 = vrot.slane %v2002_v56, %v3759_v10 }
 0x4cf   : > { %v2056_v41 = vadd.f32 %v2028_v16, %v2008_v0  ;;  %v2062_v40 = vadd.f32 %v3468_v46, %v2054_v57  ;;  %v2063_v63 = vadd.f32 %v2055_v24, %v1926_v35  ;;  %3616 = vtanh.f32 %v2061_v49 }
 0x4d0   : > { %v2058_v21 = vadd.f32 %v2036_v36, %v2010_v38  ;;  %v2065_v32 = vadd.f32 %v2057_v31, %v1936_v47  ;;  %v2044_v55 = vrot.slane %v2004_v25, %v3759_v10  ;;  %v2059_v46 = vadd.f32 %v2040_v27, %v2011_v60  ;;  %v2210_v47 = vld [vmem:[%s4802_s3] sm:$0xff] }
 0x4d1   : > { %v2064_v30 = vadd.f32 %v3471_v54, %v2056_v41  ;;  %3618 = vtanh.f32 %v2062_v40  ;;  %v2246_v29 = vsub.s32 %v4846_v13, %v4845_v37  ;;  %vm2211_vm13 = vcmp.gt.f32.partialorder %v2210_v47, 0.5 }
 0x4d2   : > { %3620 = vtanh.f32 %v2063_v63  ;;  %v2066_v62 = vadd.f32 %v3474_v14, %v2058_v21  ;;  %v2060_v59 = vadd.f32 %v2044_v55, %v2012_v39 }
 0x4d3   : > { %3622 = vtanh.f32 %v2064_v30 }
 0x4d4   : > { %3624 = vtanh.f32 %v2065_v32 }
 0x4d5   : > { %3626 = vtanh.f32 %v2066_v62 }
 0x4d8   : > { %v3477_v18 = vpop.f32.mrf.mxu1 }
 0x4d9   : > { %v2068_v20 = vadd.f32 %v3477_v18, %v2060_v59 }
 0x4da   : > { %v1946_v26 = vpop.f32.mrf.mxu1 }
 0x4db   : > { %v2067_v6 = vadd.f32 %v2059_v46, %v1946_v26 }
 0x4dc   : > { %v3617_v53 = vpop.eup %3616  ;;  %v4552_v12 = vpop.f32.mrf.mxu1 }
 0x4dd   : > { %3628 = vtanh.f32 %v2067_v6  ;;  %3486 = vmatprep.mubr.msk.f32.mxu0 %vm376_vm6, %v3617_v53  ;;  %v3652_v6 = vld [vmem:[#allocation8] sm:$0xff] }
 0x4de   : > { %v3619_v8 = vpop.eup %3618  ;;  %3630 = vtanh.f32 %v2068_v20  ;;  %v3508_v54 = vpop.f32.mrf.mxu1 }
 0x4df   : > { %v3621_v45 = vpop.eup %3620  ;;  %3487 = vmatmul.mubr.msk.f32.vlgmr.msra.gmra.mxu0 %vm376_vm6, %v3619_v8 }
 0x4e0   : > { %3489 = vmatprep.mubr.msk.f32.mxu0 %vm376_vm6, %v3621_v45  ;;  %v3623_v42 = vpop.eup %3622 }
 0x4e1   : > { %v3625_v48 = vpop.eup %3624 }
 0x4e2   : > { %v3627_v61 = vpop.eup %3626 }
 0x4e3   : > { %3490 = vmatmul.mubr.msk.f32.gmra.mxu0 %vm376_vm6, %v3623_v42 }
 0x4e4   : > { %3492 = vmatprep.mubr.msk.f32.mxu0 %vm376_vm6, %v3625_v48 }
 0x4e7   : > { %3493 = vmatmul.mubr.msk.f32.gmra.mxu0 %vm376_vm6, %v3627_v61 }
 0x4ea   : > { %v3629_v34 = vpop.eup %3628 }
 0x4eb   : > { %v3631_v17 = vpop.eup %3630  ;;  %3495 = vmatprep.mubr.msk.f32.mxu0 %vm376_vm6, %v3629_v34  ;;  %v2360_v34 = vld [vmem:[%s4800_s1 + $0x8] sm:$0xff] }
 0x4ec   : > { %3496 = vmatmul.mubr.msk.f32.gmra.mxu0 %vm376_vm6, %v3631_v17  ;;  %v2359_v17 = vld [vmem:[%s4800_s1] sm:$0xff] }
 0x4ed   : > { %3522 = vmatprep.mubr.msk.f32.mxu0 %vm3664_vm3, %v4833_v50 }
 0x59f   : > { %v3488_v35 = vpop.f32.mrf.mxu0 }
 0x5a0   : > { %2224 = vperm.xlu0 %3608, %v3488_v35  }
 0x5a1   : > { %v2171_v33 = vpop.f32.mrf.mxu0 }
 0x5a2   : > { %2221 = vperm.xlu1 %3609, %v2171_v33  }
 0x5a3   : > { %v3491_v51 = vpop.f32.mrf.mxu0 }
 0x5a5   : > { %v2181_v52 = vpop.f32.mrf.mxu0 }
 0x5a6   : > { %2230 = vperm.xlu1 %3609, %v3491_v51  }
 0x5a7   : > { %v3494_v2 = vpop.f32.mrf.mxu0 }
 0x5a9   : > { %v2191_v9 = vpop.f32.mrf.mxu0 }
 0x5aa   : > { %2227 = vperm.xlu1 %3609, %v2181_v52   ;;  %2233 = vperm.xlu0 %3608, %v2191_v9   ;;  %v2361_v9 = vld [vmem:[%s4800_s1 + $0x10] sm:$0xff] }
 0x5ac   : > { %v3497_v3 = vpop.f32.mrf.mxu0 }
 0x5ae   : > { %2236 = vperm.xlu1 %3609, %v3494_v2   ;;  %v2201_v28 = vpop.f32.mrf.mxu0  ;;  %v2362_v2 = vld [vmem:[%s4800_s1 + $0x18] sm:$0xff] }
 0x5af   : > { %2239 = vperm.xlu0 %3608, %v2201_v28  }
 0x5b2   : > { %2242 = vperm.xlu1 %3609, %v3497_v3  }
 0x61b   : > { %v2225_v4 = vpop.permute.xlu0 %2224 }
 0x61c   : > { %v2251_v0 = vrot.slane %v2225_v4, %v2246_v29 }
 0x61d   : > { %v2222_v15 = vpop.permute.xlu1 %2221 }
 0x61e   : > { %v2247_v19 = vrot.slane %v2222_v15, %v2246_v29 }
 0x620   : > { %v2277_v57 = vsel %vm2276_vm7, %v2251_v0, %v2247_v19 }
 0x621   : > { %v2231_v14 = vpop.permute.xlu1 %2230 }
 0x622   : > { %v2259_v24 = vrot.slane %v2231_v14, %v2246_v29 }
 0x625   : > { %v2228_v23 = vpop.permute.xlu1 %2227  ;;  %v2234_v7 = vpop.permute.xlu0 %2233 }
 0x626   : > { %v2255_v16 = vrot.slane %v2228_v23, %v2246_v29  ;;  %v2263_v38 = vrot.slane %v2234_v7, %v2246_v29  ;;  %v2364_v7 = vld [vmem:[%s4800_s1 + $0x28] sm:$0xff] }
 0x628   : > { %v2279_v49 = vsel %vm2278_vm4, %v2255_v16, %v2277_v57  ;;  %v2363_v16 = vld [vmem:[%s4800_s1 + $0x20] sm:$0xff] }
 0x629   : > { %v2281_v36 = vsel %vm2280_vm8, %v2259_v24, %v2279_v49  ;;  %v2237_v37 = vpop.permute.xlu1 %2236 }
 0x62a   : > { %v2283_v31 = vsel %vm2282_vm9, %v2263_v38, %v2281_v36  ;;  %v2267_v41 = vrot.slane %v2237_v37, %v2246_v29  ;;  %v2240_v40 = vpop.permute.xlu0 %2239 }
 0x62b   : > { %v2271_v63 = vrot.slane %v2240_v40, %v2246_v29 }
 0x62c   : > { %v2285_v25 = vsel %vm2284_vm10, %v2267_v41, %v2283_v31 }
 0x62d   : > { %v2243_v30 = vpop.permute.xlu1 %2242  ;;  %v2287_v56 = vsel %vm2286_vm11, %v2271_v63, %v2285_v25 }
 0x62e   : > { %v2275_v21 = vrot.slane %v2243_v30, %v2246_v29 }
 0x630   : > { %v2289_v32 = vsel %vm2288_vm12, %v2275_v21, %v2287_v56  ;;  %v2366_v56 = vld [vmem:[%s4800_s1 + $0x38] sm:$0xff] }
 0x631   : > { %v2291_v55 = vsel %vm2211_vm13, %v2289_v32, -1e+30  ;;  %v2365_v32 = vld [vmem:[%s4800_s1 + $0x30] sm:$0xff] }
 0x632   : > { %v2292_v62 = vsel %vm292_vm2, %v2291_v55, -inf }
 0x633   : > { %2293 = vmax.xlane.f32.xlu0 %v2292_v62 }
 0x6bc   : > { %v2294_v39 = vpop.xlane.xlu0 %2293 }
 0x6bd   : > { %v2295_v27 = vsub.f32 %v2291_v55, %v2294_v39 }
 0x6bf   : > { %v2296_v60 = vmul.f32 1.442695, %v2295_v27 }
 0x6c1   : > { %3632 = vpow2.f32 %v2296_v60 }
 0x6ce   : > { %v3633_v18 = vpop.eup %3632 }
 0x6cf   : > { %v2298_v59 = vsel %vm292_vm2, %v3633_v18, 0.0 }
 0x6d0   : > { %2299 = vadd.xlane.f32.xlu1 %v2298_v59 }
 0x759   : > { %v2300_v46 = vpop.xlane.xlu1 %2299 }
 0x75a   : > { %3634 = vrcp.f32 %v2300_v46 }
 0x767   : > { %v3635_v20 = vpop.eup %3634 }
 0x768   : > { %v2302_v26 = vmul.f32 %v3635_v20, %v3633_v18 }
 0x76a   : > { %2431 = vst.msk [vmem:[#allocation9] sm:$0xff] %vm292_vm2, %v2302_v26  ;;  %v2432_v53 = vadd.f32 %v3652_v6, %v2302_v26  ;;  %3241 = vst.msk [vmem:[%s3240_s19] sm:$0xff] %vm292_vm2, %v2302_v26  ;;  %v2313_v8 = vrot.slane %v2302_v26, %v3762_v11  ;;  %v2306_v54 = vrot.slane %v2302_v26, %v3759_v10 }
 0x76b   : > { %v2327_v45 = vrot.slane %v2302_v26, %v3895_v1  ;;  %v2320_v42 = vrot.slane %v2302_v26, %v3878_v58  ;;  %v2341_v48 = vrot.slane %v2302_v26, %v3967_v44  ;;  %v2334_v61 = vrot.slane %v2302_v26, %v3927_v22  ;;  %v2454_v1 = vld [vmem:[%s4805_s6 + $0x108] sm:$0xff]  ;;  %v2459_v58 = vld [vmem:[%s4805_s6 + $0x130] sm:$0xff]  ;;  %v2453_v22 = vld [vmem:[%s4805_s6 + $0x100] sm:$0xff] }
 0x76c   : > { %2433 = vst.msk [vmem:[#allocation8] sm:$0xff] %vm292_vm2, %v2432_v53  ;;  %2315 = vbcast.lane.b32.xlu1 %v2313_v8, 256  ;;  %2308 = vbcast.lane.b32.xlu0 %v2306_v54, 256  ;;  %v2355_v11 = vrot.slane %v2302_v26, %v4055_v43  ;;  %v2348_v10 = vrot.slane %v2302_v26, %v4036_v5  ;;  %v2452_v44 = vld [vmem:[%s4805_s6 + $0xf8] sm:$0xff]  ;;  %v2451_v5 = vld [vmem:[%s4805_s6 + $0xf0] sm:$0xff]  ;;  %v2603_v43 = vld [vmem:[%s4803_s4] sm:$0xff] }
 0x76d   : > { %3510 = vmatpush3.msra.mxu1 %v2454_v1  ;;  %3521 = vmatpush3.msra.mxu0 %v2459_v58 }
 0x76e   : > { %3511 = vmatprep.subr.mxu1 %v4833_v50  ;;  %3530 = vmatprep.subr.mxu0 %v4833_v50 }
 0x76f   : > { %3512 = vmatpush3.msra.mxu1 %v2453_v22  ;;  %3523 = vmatmul.mubr.msk.f32.vlgmr.msra.gmra.mxu0 %vm292_vm2, %v2603_v43 }
 0x770   : > { %2329 = vbcast.lane.b32.xlu1 %v2327_v45, 256  ;;  %2322 = vbcast.lane.b32.xlu0 %v2320_v42, 256 }
 0x771   : > { %3513 = vmatprep.subr.mxu1 %v4833_v50  ;;  %3538 = vmatprep.mubr.msk.f32.mxu0 %vm3664_vm3, %v4833_v50 }
 0x772   : > { %3514 = vmatpush3.msra.mxu1 %v2452_v44 }
 0x773   : > { %3515 = vmatprep.subr.mxu1 %v4833_v50 }
 0x774   : > { %2343 = vbcast.lane.b32.xlu1 %v2341_v48, 256  ;;  %2336 = vbcast.lane.b32.xlu0 %v2334_v61, 256 }
 0x775   : > { %3516 = vmatpush3.msra.mxu1 %v2451_v5 }
 0x776   : > { %3525 = vmatprep.subr.mxu1 %v4833_v50 }
 0x778   : > { %2357 = vbcast.lane.b32.xlu1 %v2355_v11, 256  ;;  %2350 = vbcast.lane.b32.xlu0 %v2348_v10, 256 }
 0x7de   : > { %v2316_v35 = vpop.permute.xlu1 %2315  ;;  %v2309_v33 = vpop.permute.xlu0 %2308 }
 0x7df   : > { %v2368_v51 = vmul.f32 %v2360_v34, %v2316_v35  ;;  %v2367_v52 = vmul.f32 %v2359_v17, %v2309_v33 }
 0x7e1   : > { %v2382_v3 = vsel %vm376_vm6, %v2368_v51, 0.0  ;;  %v2375_v28 = vsel %vm376_vm6, %v2367_v52, 0.0 }
 0x7e2   : > { %v2383_v15 = vrot.slane %v2382_v3, 4  ;;  %v2376_v13 = vrot.slane %v2375_v28, 4  ;;  %v2330_v29 = vpop.permute.xlu1 %2329  ;;  %v2323_v4 = vpop.permute.xlu0 %2322 }
 0x7e3   : > { %v2370_v14 = vmul.f32 %v2362_v2, %v2330_v29  ;;  %v2369_v19 = vmul.f32 %v2361_v9, %v2323_v4 }
 0x7e4   : > { %v2384_v0 = vadd.f32 %v2383_v15, %v2382_v3  ;;  %v2377_v23 = vadd.f32 %v2376_v13, %v2375_v28 }
 0x7e5   : > { %v2396_v57 = vsel %vm376_vm6, %v2370_v14, 0.0  ;;  %v2389_v24 = vsel %vm376_vm6, %v2369_v19, 0.0 }
 0x7e6   : > { %v2385_v49 = vrot.slane %v2384_v0, 2  ;;  %v2378_v38 = vrot.slane %v2377_v23, 2  ;;  %v2397_v36 = vrot.slane %v2396_v57, 4  ;;  %v2390_v37 = vrot.slane %v2389_v24, 4  ;;  %v2344_v31 = vpop.permute.xlu1 %2343  ;;  %v2337_v41 = vpop.permute.xlu0 %2336 }
 0x7e7   : > { %v2372_v40 = vmul.f32 %v2364_v7, %v2344_v31  ;;  %v2371_v63 = vmul.f32 %v2363_v16, %v2337_v41  ;;  %v2678_v31 = vld [vmem:[%s4804_s5] sm:$0xff] }
 0x7e8   : > { %v2386_v47 = vadd.f32 %v2385_v49, %v2384_v0  ;;  %v2379_v25 = vadd.f32 %v2378_v38, %v2377_v23  ;;  %v2398_v30 = vadd.f32 %v2397_v36, %v2396_v57  ;;  %v2391_v21 = vadd.f32 %v2390_v37, %v2389_v24  ;;  %v2460_v36 = vld [vmem:[%s4805_s6 + $0x138] sm:$0xff] }
 0x7e9   : > { %v2410_v55 = vsel %vm376_vm6, %v2372_v40, 0.0  ;;  %v2403_v62 = vsel %vm376_vm6, %v2371_v63, 0.0  ;;  %v2768_v40 = vld [vmem:[%s4805_s6 + $0x180] sm:$0xff] }
 0x7ea   : > { %v2387_v39 = vrot.slane %v2386_v47, 1  ;;  %v2380_v27 = vrot.slane %v2379_v25, 1  ;;  %v2399_v60 = vrot.slane %v2398_v30, 2  ;;  %v2392_v18 = vrot.slane %v2391_v21, 2  ;;  %v2358_v59 = vpop.permute.xlu1 %2357  ;;  %v2351_v46 = vpop.permute.xlu0 %2350  ;;  %3531 = vmatpush3.msra.mxu0 %v2768_v40 }
 0x7eb   : > { %v2411_v20 = vrot.slane %v2410_v55, 4  ;;  %v2404_v26 = vrot.slane %v2403_v62, 4  ;;  %v2374_v6 = vmul.f32 %v2366_v56, %v2358_v59  ;;  %v2373_v53 = vmul.f32 %v2365_v32, %v2351_v46  ;;  %3532 = vmatprep.subr.mxu0 %v4833_v50  ;;  %v2765_v56 = vld [vmem:[%s4805_s6 + $0x168] sm:$0xff]  ;;  %v2762_v32 = vld [vmem:[%s4805_s6 + $0x150] sm:$0xff] }
 0x7ec   : > { %v2388_v8 = vadd.f32 %v2387_v39, %v2386_v47  ;;  %v2400_v54 = vadd.f32 %v2399_v60, %v2398_v30  ;;  %v2393_v45 = vadd.f32 %v2392_v18, %v2391_v21  ;;  %v2381_v10 = vadd.f32 %v2380_v27, %v2379_v25  ;;  %v2767_v47 = vld [vmem:[%s4805_s6 + $0x178] sm:$0xff]  ;;  %v2764_v25 = vld [vmem:[%s4805_s6 + $0x160] sm:$0xff]  ;;  %v2766_v30 = vld [vmem:[%s4805_s6 + $0x170] sm:$0xff] }
 0x7ed   : > { %v2412_v42 = vadd.f32 %v2411_v20, %v2410_v55  ;;  %v2405_v48 = vadd.f32 %v2404_v26, %v2403_v62  ;;  %v2424_v61 = vsel %vm376_vm6, %v2374_v6, 0.0  ;;  %v2417_v11 = vsel %vm376_vm6, %v2373_v53, 0.0  ;;  %3533 = vmatpush3.msra.mxu0 %v2767_v47  ;;  %v2763_v21 = vld [vmem:[%s4805_s6 + $0x158] sm:$0xff]  ;;  %v2759_v55 = vld [vmem:[#allocation3] sm:$0xff]  ;;  %v2760_v39 = vld [vmem:[#allocation4] sm:$0xff] }
 0x7ee   : > { %v2401_v1 = vrot.slane %v2400_v54, 1  ;;  %v2394_v58 = vrot.slane %v2393_v45, 1  ;;  %v2425_v22 = vrot.slane %v2424_v61, 4  ;;  %v2418_v43 = vrot.slane %v2417_v11, 4  ;;  %3534 = vmatprep.subr.mxu0 %v4833_v50  ;;  %v2761_v62 = vld [vmem:[%s4805_s6 + $0x148] sm:$0xff]  ;;  %2929 = vrot.lane.b32.xlu1 %v2760_v39, %s3665_s18  ;;  %v3162_v39 = vld [vmem:[%s4805_s6 + $0x1e0] sm:$0xff] }
 0x7ef   : > { %v2413_v44 = vrot.slane %v2412_v42, 2  ;;  %v2406_v5 = vrot.slane %v2405_v48, 2  ;;  %v2442_v52 = vsel %vm2276_vm7, %v2388_v8, %v2381_v10  ;;  %3535 = vmatpush3.msra.mxu0 %v2766_v30  ;;  %v3308_v20 = vld [vmem:[%s4805_s6 + $0x140] ss:$0 sm:$0xff] }
 0x7f0   : > { %v2395_v34 = vadd.f32 %v2394_v58, %v2393_v45  ;;  %v2426_v17 = vadd.f32 %v2425_v22, %v2424_v61  ;;  %v2419_v51 = vadd.f32 %v2418_v43, %v2417_v11  ;;  %v2402_v2 = vadd.f32 %v2401_v1, %v2400_v54  ;;  %3536 = vmatprep.subr.mxu0 %v4833_v50 }
 0x7f1   : > { %v2414_v35 = vadd.f32 %v2413_v44, %v2412_v42  ;;  %v2407_v33 = vadd.f32 %v2406_v5, %v2405_v48  ;;  %3537 = vmatpush3.msra.mxu0 %v2765_v56 }
 0x7f2   : > { %v2427_v9 = vrot.slane %v2426_v17, 2  ;;  %v2443_v3 = vsel %vm2278_vm4, %v2395_v34, %v2442_v52  ;;  %v2420_v13 = vrot.slane %v2419_v51, 2  ;;  %3539 = vmatmul.mubr.msk.f32.vlgmr.msra.gmra.mxu0 %vm376_vm6, %v2759_v55  ;;  %3552 = vmatprep.subr.mxu0 %v4833_v50  ;;  %v2965_v52 = vld [vmem:[%s4805_s6 + $0x1a8] sm:$0xff]  ;;  %v3164_v55 = vld [vmem:[%s4805_s6 + $0x1f0] sm:$0xff] }
 0x7f3   : > { %v2415_v28 = vrot.slane %v2414_v35, 1  ;;  %v2408_v15 = vrot.slane %v2407_v33, 1  ;;  %v2444_v0 = vsel %vm2280_vm8, %v2402_v2, %v2443_v3  ;;  %3560 = vmatprep.mubr.msk.f32.mxu0 %vm3664_vm3, %v4833_v50  ;;  %v2964_v2 = vld [vmem:[%s4805_s6 + $0x1a0] sm:$0xff]  ;;  %v2963_v3 = vld [vmem:[%s4805_s6 + $0x198] sm:$0xff] }
 0x7f4   : > { %v2428_v29 = vadd.f32 %v2427_v9, %v2426_v17  ;;  %v2421_v14 = vadd.f32 %v2420_v13, %v2419_v51  ;;  %v2968_v51 = vld [vmem:[%s4805_s6 + $0x1c0] sm:$0xff]  ;;  %v2967_v9 = vld [vmem:[%s4805_s6 + $0x1b8] sm:$0xff] }
 0x7f5   : > { %v2409_v4 = vadd.f32 %v2408_v15, %v2407_v33  ;;  %v2416_v19 = vadd.f32 %v2415_v28, %v2414_v35  ;;  %v2969_v33 = vld [vmem:[%s4805_s6 + $0x1c8] sm:$0xff]  ;;  %v2966_v28 = vld [vmem:[%s4805_s6 + $0x1b0] sm:$0xff]  ;;  %v2960_v13 = vld [vmem:[#allocation5] sm:$0xff] }
 0x7f6   : > { %v2429_v23 = vrot.slane %v2428_v29, 1  ;;  %v2422_v16 = vrot.slane %v2421_v14, 1  ;;  %3553 = vmatpush3.msra.mxu0 %v2969_v33 }
 0x7f7   : > { %v2445_v7 = vsel %vm2282_vm9, %v2409_v4, %v2444_v0  ;;  %3554 = vmatprep.subr.mxu0 %v4833_v50 }
 0x7f8   : > { %v2430_v57 = vadd.f32 %v2429_v23, %v2428_v29  ;;  %v2423_v24 = vadd.f32 %v2422_v16, %v2421_v14  ;;  %v2446_v49 = vsel %vm2284_vm10, %v2416_v19, %v2445_v7  ;;  %3555 = vmatpush3.msra.mxu0 %v2968_v51  ;;  %v2962_v29 = vld [vmem:[%s4805_s6 + $0x190] sm:$0xff]  ;;  %v2961_v19 = vld [vmem:[#allocation6] sm:$0xff] }
 0x7f9   : > { %3556 = vmatprep.subr.mxu0 %v4833_v50 }
 0x7fa   : > { %v2447_v38 = vsel %vm2286_vm11, %v2423_v24, %v2446_v49  ;;  %3557 = vmatpush3.msra.mxu0 %v2967_v9  ;;  %v3315_v24 = vld [vmem:[%s4805_s6 + $0x1d0] ss:$0 sm:$0xff] }
 0x7fb   : > { %v2448_v37 = vsel %vm2288_vm12, %v2430_v57, %v2447_v38  ;;  %3558 = vmatprep.subr.mxu0 %v4833_v50 }
 0x7fc   : > { %2450 = vst.msk [vmem:[#allocation7] sm:$0xff] %vm376_vm6, %v2448_v37  ;;  %3518 = vmatmul.mubr.msk.f32.vlgmr.msra.gmra.mxu1 %vm376_vm6, %v2448_v37  ;;  %3559 = vmatpush3.msra.mxu0 %v2966_v28 }
 0x7fd   : > { %3526 = vmatpush3.msra.mxu1 %v2460_v36  ;;  %3527 = vmatprep.mubr.msk.f32.mxu1 %vm3664_vm3, %v4833_v50 }
 0x7fe   : > { %3541 = vmatprep.subr.mxu1 %v4833_v50  ;;  %3574 = vmatprep.subr.mxu0 %v4833_v50 }
 0x7ff   : > { %3561 = vmatmul.mubr.msk.f32.vlgmr.msra.gmra.mxu0 %vm376_vm6, %v2960_v13 }
 0x800   : > { %3528 = vmatmul.mubr.msk.f32.vlgmr.msra.gmra.mxu1 %vm292_vm2, %v2678_v31  ;;  %3582 = vmatprep.mubr.msk.f32.mxu0 %vm3664_vm3, %v4833_v50  ;;  %vm4847_vm2 = vcmask 130048  }
 0x801   : > { %3549 = vmatprep.mubr.msk.f32.mxu1 %vm3664_vm3, %v4833_v50  ;;  %3542 = vmatpush3.msra.mxu1 %v2764_v25 }
 0x802   : > { %3543 = vmatprep.subr.mxu1 %v4833_v50  ;;  %3575 = vmatpush3.msra.mxu0 %v3164_v55 }
 0x803   : > { %3544 = vmatpush3.msra.mxu1 %v2763_v21  ;;  %3576 = vmatprep.subr.mxu0 %v4833_v50 }
 0x804   : > { %3545 = vmatprep.subr.mxu1 %v4833_v50 }
 0x805   : > { %3546 = vmatpush3.msra.mxu1 %v2762_v32 }
 0x806   : > { %3547 = vmatprep.subr.mxu1 %v4833_v50 }
 0x807   : > { %3548 = vmatpush3.msra.mxu1 %v2761_v62  ;;  %v3163_v62 = vld [vmem:[%s4805_s6 + $0x1e8] sm:$0xff] }
 0x808   : > { %3563 = vmatprep.subr.mxu1 %v4833_v50  ;;  %3577 = vmatpush3.msra.mxu0 %v3163_v62 }
 0x809   : > { %3578 = vmatprep.subr.mxu0 %v4833_v50 }
 0x80a   : > { %3579 = vmatpush3.msra.mxu0 %v3162_v39 }
 0x80b   : > { %3580 = vmatprep.subr.mxu0 %v4833_v50 }
 0x82f   : > { %v2673_v41 = vpop.f32.mrf.mxu0 }
 0x831   : > { %v3524_v63 = vpop.f32.mrf.mxu0 }
 0x860   : > { %v2930_v43 = vpop.permute.xlu1 %2929 }
 0x8b2   : > { %v2838_v8 = vpop.f32.mrf.mxu0 }
 0x8b4   : > { %v3540_v54 = vpop.f32.mrf.mxu0 }
 0x8bc   : > { %v2599_v27 = vpop.f32.mrf.mxu1 }
 0x8bd   : > { %v2600_v60 = vadd.f32 %v2599_v27, %v4552_v12  ;;  %v3311_v12 = vld [vmem:[%s4805_s6 + $0x188] ss:$0 sm:$0xff] }
 0x8be   : > { %v3519_v18 = vpop.f32.mrf.mxu1 }
 0x8bf   : > { %v2677_v59 = vadd.f32 %v2673_v41, %v2600_v60  ;;  %v3039_v7 = vpop.f32.mrf.mxu0  ;;  %v3161_v60 = vld [vmem:[%s4805_s6 + $0x1d8] sm:$0xff] }
 0x8c0   : > { %v2748_v46 = vpop.f32.mrf.mxu1  ;;  %3581 = vmatpush3.msra.mxu0 %v3161_v60 }
 0x8c1   : > { %v2752_v26 = vadd.f32 %v2748_v46, %v2677_v59  ;;  %v3562_v16 = vpop.f32.mrf.mxu0 }
 0x8c2   : > { %v3529_v6 = vpop.f32.mrf.mxu1 }
 0x8c3   : > { %v2758_v53 = vadd.f32 %v3308_v20, %v2752_v26 }
 0x8c5   : > { %3550 = vmatmul.mubr.msk.f32.vlgmr.msra.gmra.mxu1 %vm376_vm6, %v2758_v53 }
 0x8c6   : > { %3571 = vmatprep.mubr.msk.f32.mxu1 %vm3664_vm3, %v4833_v50  ;;  %3564 = vmatpush3.msra.mxu1 %v2965_v52 }
 0x8c7   : > { %3565 = vmatprep.subr.mxu1 %v4833_v50 }
 0x8c8   : > { %3566 = vmatpush3.msra.mxu1 %v2964_v2 }
 0x8c9   : > { %3567 = vmatprep.subr.mxu1 %v4833_v50 }
 0x8ca   : > { %3568 = vmatpush3.msra.mxu1 %v2963_v3 }
 0x8cb   : > { %3569 = vmatprep.subr.mxu1 %v4833_v50 }
 0x8cc   : > { %3570 = vmatpush3.msra.mxu1 %v2962_v29 }
 0x985   : > { %v2911_v45 = vpop.f32.mrf.mxu1 }
 0x986   : > { %v2912_v42 = vadd.f32 %v2911_v45, %v2838_v8 }
 0x987   : > { %v3551_v48 = vpop.f32.mrf.mxu1 }
 0x988   : > { %v2920_v61 = vadd.f32 %v3311_v12, %v2912_v42 }
 0x98a   : > { %3636 = vtanh.f32 %v2920_v61  ;;  %v3312_v10 = vmul.f32 -1.442695, %v2920_v61 }
 0x98c   : > { %3638 = vpow2.f32 %v3312_v10 }
 0x997   : > { %v3637_v11 = vpop.eup %3636 }
 0x998   : > { %2934 = vrot.lane.b32.xlu0 %v3637_v11, %s3672_s16 }
 0x999   : > { %v3639_v1 = vpop.eup %3638 }
 0x99a   : > { %v2924_v58 = vadd.f32 1.0, %v3639_v1 }
 0x99c   : > { %3640 = vrcp.f32 %v2924_v58 }
 0x9a9   : > { %v3641_v22 = vpop.eup %3640 }
 0x9aa   : > { %v2932_v34 = vmul.f32 %v3641_v22, %v2930_v43 }
 0xa0a   : > { %v2935_v44 = vpop.permute.xlu0 %2934 }
 0xa0b   : > { %v2937_v5 = vmul.f32 %v3641_v22, %v2935_v44 }
 0xa0d   : > { %2939 = vrot.lane.b32.xlu0 %v2937_v5, %s3665_s18 }
 0xa7f   : > { %v2940_v17 = vpop.permute.xlu0 %2939 }
 0xa80   : > { %v4720_v35 = vadd.f32 %v2940_v17, %v2932_v34 }
 0xa82   : > { %3642 = vtanh.f32 %v4720_v35 }
 0xa8f   : > { %v3643_v15 = vpop.eup %3642 }
 0xa90   : > { %2945 = vrot.lane.b32.xlu1 %v3643_v15, %s3672_s16 }
 0xb02   : > { %v2946_v4 = vpop.permute.xlu1 %2945 }
 0xb03   : > { %v2948_v14 = vmul.f32 %v3641_v22, %v2946_v4 }
 0xb05   : > { %2950 = vrot.lane.b32.xlu0 %v2948_v14, %s3665_s18 }
 0xb09   : > { %3130 = vrot.lane.b32.xlu0 %v2961_v19, %s3665_s18 }
 0xb77   : > { %v2951_v0 = vpop.permute.xlu0 %2950 }
 0xb78   : > { %2953 = vst.msk [vmem:[#allocation3] sm:$0xff] %vm376_vm6, %v2951_v0  ;;  %v2959_v23 = vadd.f32 %v2951_v0, %v2758_v53 }
 0xb7a   : > { %3572 = vmatmul.mubr.msk.f32.vlgmr.msra.gmra.mxu1 %vm376_vm6, %v2959_v23 }
 0xb7b   : > { %v3131_v30 = vpop.permute.xlu0 %3130 }
 0xc3a   : > { %v3112_v57 = vpop.f32.mrf.mxu1 }
 0xc3b   : > { %v3113_v49 = vadd.f32 %v3112_v57, %v3039_v7 }
 0xc3c   : > { %v3573_v38 = vpop.f32.mrf.mxu1 }
 0xc3d   : > { %v3121_v36 = vadd.f32 %v3315_v24, %v3113_v49 }
 0xc3f   : > { %3644 = vtanh.f32 %v3121_v36  ;;  %v3316_v31 = vmul.f32 -1.442695, %v3121_v36 }
 0xc41   : > { %3646 = vpow2.f32 %v3316_v31 }
 0xc4c   : > { %v3645_v37 = vpop.eup %3644 }
 0xc4d   : > { %3135 = vrot.lane.b32.xlu1 %v3645_v37, %s3672_s16 }
 0xc4e   : > { %v3647_v41 = vpop.eup %3646 }
 0xc4f   : > { %v3125_v40 = vadd.f32 1.0, %v3647_v41 }
 0xc51   : > { %3648 = vrcp.f32 %v3125_v40 }
 0xc5e   : > { %v3649_v63 = vpop.eup %3648 }
 0xc5f   : > { %v3133_v21 = vmul.f32 %v3649_v63, %v3131_v30 }
 0xcbf   : > { %v3136_v47 = vpop.permute.xlu1 %3135 }
 0xcc0   : > { %v3138_v25 = vmul.f32 %v3649_v63, %v3136_v47 }
 0xcc2   : > { %3140 = vrot.lane.b32.xlu1 %v3138_v25, %s3665_s18 }
 0xd34   : > { %v3141_v56 = vpop.permute.xlu1 %3140 }
 0xd35   : > { %v3143_v32 = vadd.f32 %v3141_v56, %v3133_v21 }
 0xd37   : > { %3650 = vtanh.f32 %v3143_v32 }
 0xd44   : > { %v3651_v27 = vpop.eup %3650 }
 0xd45   : > { %3146 = vrot.lane.b32.xlu0 %v3651_v27, %s3672_s16 }
 0xd49   : > { %2955 = vrot.lane.b32.xlu0 %v4720_v35, %s3673_s24 }
 0xdb7   : > { %v3147_v18 = vpop.permute.xlu0 %3146 }
 0xdb8   : > { %v3149_v59 = vmul.f32 %v3649_v63, %v3147_v18 }
 0xdba   : > { %3151 = vrot.lane.b32.xlu1 %v3149_v59, %s3665_s18 }
 0xdbb   : > { %v2956_v46 = vpop.permute.xlu0 %2955 }
 0xdbc   : > { %2958 = vst.msk [vmem:[#allocation4] sm:$0xff] %vm376_vm6, %v2956_v46 }
 0xdbe   : > { %3156 = vrot.lane.b32.xlu1 %v3143_v32, %s3673_s24 }
 0xe2c   : > { %v3152_v50 = vpop.permute.xlu1 %3151 }
 0xe2d   : > { %3154 = vst.msk [vmem:[#allocation5] sm:$0xff] %vm376_vm6, %v3152_v50  ;;  %v3160_v20 = vadd.f32 %v3152_v50, %v2959_v23 }
 0xe2f   : > { %3583 = vmatmul.mubr.msk.f32.vlgmr.msra.gmra.mxu0 %vm376_vm6, %v3160_v20 }
 0xe30   : > { %v3157_v26 = vpop.permute.xlu1 %3156 }
 0xe31   : > { %3159 = vst.msk [vmem:[#allocation6] sm:$0xff] %vm376_vm6, %v3157_v26 }
 0xeef   : > { %v3234_v6 = vpop.f32.mrf.mxu0 }
 0xef0   : > { %3239 = vst.msk [vmem:[%s3238_s12] sm:$0xff] %vm4847_vm2, %v3234_v6 }
 0xef1   : > { %v3584_v53 = vpop.f32.mrf.mxu0 }
 0xef2 PF: > { %s19_s27 = sadd.s32 1, %s3659_s27  }
 0xef3   : > { %p16_p4 = scmp.ge.s32.totalorder %s19_s27, 6  }
 0xef5   :  { %18 = sbr.rel (!%p16_p4) target bundleno = 1 (0x1), region = 86 }

</bundles_post_ra>
